<compile_context>
chip_gen: v7x
topology: tpu7x:2x2x1
jax: 0.10.0
libtpu: 0.0.40
codegen_flags: <defaults>
</compile_context>

<pallas_src>
import jax
import jax.numpy as jnp
from jax import lax
from jax.experimental import pallas as pl
from jax.experimental.pallas import tpu as pltpu


# Geometry of the original Net (input must be (N, 3, 32, 32)).
_H = 32
_W = 32
_FRAME = _H * _W          # 1024 rows per sample on the conv1 frame (row = h*32 + w)
_K = 5                    # conv kernel size
_LANES = 128              # TPU lane width; channel dims are zero-padded to this

_CW = 16                  # compact pool1 frame width (14 valid cols, padded to 16)
_P1_ROWS = 240            # pool1 compact scratch rows
_A2_ROWS = 160            # conv2 output rows computed (valid rows: 16*oi + oj, oi,oj<10)

# --- static row-budget checks (correctness concern from review: tie every in-kernel
# read offset to its scratch extent; change these together). ---
# conv2 tap (ki,kj) reads p1 rows [ki*16 + kj, ki*16 + kj + _A2_ROWS)
assert (_K - 1) * _CW + (_K - 1) + _A2_ROWS <= _P1_ROWS
# pool1 writes p1 rows i*16 + j for i,j < 14
assert 13 * _CW + 13 < _P1_ROWS
# last conv2 row read by pool2/flatten: 32*4 + 17 + 2*4
assert 32 * 4 + 17 + 2 * 4 < _A2_ROWS
# pool1 compaction reads a1 rows up to 64*13 + 33 + 2*13
assert 64 * 13 + 33 + 2 * 13 < _FRAME


# ----------------------------------------------------------------------------
# The fused per-sample kernel (grid = (batch,))
# ----------------------------------------------------------------------------
def _lenet_kernel(xc_ref, w1c_ref, b1_ref, w2c_ref, b2_ref,
                  w1f_ref, b1f_ref, w2f_ref, b2f_ref, w3f_ref, b3f_ref,
                  o_ref,
                  a1_ref, p1_ref, a2_ref, flat_ref):
    f32 = jnp.float32
    bf16 = jnp.bfloat16

    # ---- conv1: ONE matmul.  xc lanes [3t:3t+3] hold the 3 input channels shifted
    # by tap t (im2col pre-built in the wrapper); w1c row 3t+c -> output channel.
    # Bias + ReLU fused into the single accumulator write (no extra full-buffer pass).
    a1_ref[...] = jnp.maximum(
        jnp.dot(xc_ref[...], w1c_ref[...], preferred_element_type=f32)
        + b1_ref[...], 0.0)

    # ---- pool1 (2x2/2) + compaction to a dense 16-wide frame:
    # p1[i*16 + j, c] = pooled value at (i, j) for i,j < 14.
    # Stride-2 row reads pick the even columns of the 32-wide conv1 frame.
    for i in range(14):
        r0 = 64 * i                                   # frame row of position (2i, 0)
        v = jnp.maximum(
            jnp.maximum(a1_ref[pl.ds(r0,          14, stride=2), :],
                        a1_ref[pl.ds(r0 + 1,      14, stride=2), :]),
            jnp.maximum(a1_ref[pl.ds(r0 + _W,     14, stride=2), :],
                        a1_ref[pl.ds(r0 + _W + 1, 14, stride=2), :]))
        p1_ref[16 * i:16 * i + 14, :] = v.astype(bf16)
    # p1 rows with j in {14,15} or row >= 224 stay uninitialized; they only feed
    # conv2 output rows 16*oi+oj with oi>9 or oj>9, which pool2 never reads
    # (guaranteed by the asserts above).

    # ---- conv2 (5x5 valid on the 14x14 compact frame): 25-tap sum of dots over only
    # _A2_ROWS=160 rows, kept as ONE value expression so partials never round-trip
    # through VMEM; bias + ReLU fused into the single accumulator write.
    acc = None
    for t in range(_K * _K):
        ki, kj = divmod(t, _K)
        d = jnp.dot(p1_ref[pl.ds(ki * _CW + kj, _A2_ROWS), :], w2c_ref[t],
                    preferred_element_type=f32)
        acc = d if acc is None else acc + d
    a2_ref[...] = jnp.maximum(acc + b2_ref[...], 0.0)

    # ---- pool2 (2x2/2) + flatten: valid conv2 outputs sit at rows 16*oi + oj
    # (oi,oj < 10); pooled (pi,pj) = max over rows 32*pi + 16*di + 2*pj + dj.
    # Gather the 5 pj taps per pi with one stride-2 read per corner and scatter into
    # the lane-dense fc1 input: flat[0, (5*pi + pj)*128 + c].
    # NOTE: flat_ref is NOT zero-initialized - every lane of row 0 is written below,
    # and rows 1..7 only feed fc output rows 1..7, which are never read back.
    for pi in range(5):
        r0 = 32 * pi
        m = jnp.maximum(
            jnp.maximum(a2_ref[pl.ds(r0,      5, stride=2), :],
                        a2_ref[pl.ds(r0 + 1,  5, stride=2), :]),
            jnp.maximum(a2_ref[pl.ds(r0 + 16, 5, stride=2), :],
                        a2_ref[pl.ds(r0 + 17, 5, stride=2), :])).astype(bf16)
        for pj in range(5):
            s = pi * 5 + pj
            flat_ref[0:1, s * _LANES:(s + 1) * _LANES] = m[pj:pj + 1, :]

    # ---- fc1 -> fc2 -> fc3: lane-dense 128-wide matmuls (flatten order baked into
    # the pre-packed fc1 weight).  Only row 0 of the (8, *) matmuls is meaningful.
    hh = jnp.dot(flat_ref[...], w1f_ref[...], preferred_element_type=f32)
    hh = jnp.maximum(hh + b1f_ref[...], 0.0).astype(bf16)
    hh = jnp.dot(hh, w2f_ref[...], preferred_element_type=f32)
    hh = jnp.maximum(hh + b2f_ref[...], 0.0).astype(bf16)
    hh = jnp.dot(hh, w3f_ref[...], preferred_element_type=f32) + b3f_ref[...]
    o_ref[0] = hh


def _bcast_spec(shape):
    zeros = (0,) * len(shape)
    return pl.BlockSpec(shape, lambda b, _z=zeros: _z)


# ----------------------------------------------------------------------------
# One-time parameter packing (outside the jitted forward)
# ----------------------------------------------------------------------------
def pack_params(p):
    """Pre-transpose / zero-pad / cast the PyTorch-layout params for the kernel."""
    f32 = jnp.float32
    bf16 = jnp.bfloat16

    def bias_row(b):                                  # (C,) -> (1, 128) f32
        return jnp.zeros((1, _LANES), f32).at[0, :b.shape[0]].set(b)

    def fc_mat(w):                                    # (out, in) -> (128, 128) bf16
        o, i = w.shape
        return jnp.zeros((_LANES, _LANES), f32).at[:i, :o].set(w.T).astype(bf16)

    # conv1: single im2col weight; row 3t+c -> output channel o (t = ki*5 + kj).
    w1 = jnp.transpose(p["conv1_w"], (2, 3, 1, 0)).reshape(_K * _K * 3, 6)
    w1c = jnp.zeros((_LANES, _LANES), f32).at[:_K * _K * 3, :6].set(w1).astype(bf16)

    # conv2: per-tap (25, 128, 128) weights; contraction over input-channel lanes.
    w2 = jnp.transpose(p["conv2_w"], (2, 3, 1, 0)).reshape(_K * _K, 6, 16)  # [t,c,o]
    w2c = jnp.zeros((_K * _K, _LANES, _LANES), f32).at[:, :6, :16].set(w2).astype(bf16)

    # fc1 absorbs the (c, pi, pj) -> (spatial block s = 5*pi + pj, channel lane c)
    # flatten layout: row s*128 + c of w1f is torch feature index c*25 + s.
    wf = p["fc1_w"].reshape(120, 16, 25)              # [o, c, s]
    wf = jnp.transpose(wf, (2, 1, 0))                 # [s, c, o]
    w1f = (jnp.zeros((25, _LANES, _LANES), f32).at[:, :16, :120].set(wf)
           .reshape(25 * _LANES, _LANES).astype(bf16))

    return {
        "w1c": w1c, "b1": bias_row(p["conv1_b"]),
        "w2c": w2c, "b2": bias_row(p["conv2_b"]),
        "w1f": w1f, "b1f": bias_row(p["fc1_b"]),
        "w2f": fc_mat(p["fc2_w"]), "b2f": bias_row(p["fc2_b"]),
        "w3f": fc_mat(p["fc3_w"]), "b3f": bias_row(p["fc3_b"]),
    }


# ----------------------------------------------------------------------------
# Forward pass (single fused pallas_call, sample-parallel grid)
# ----------------------------------------------------------------------------
@jax.jit
def net_forward(packed, x):
    n, c, h, w = x.shape
    assert (c, h, w) == (3, _H, _W), "Net expects (N, 3, 32, 32) inputs"

    # conv1 im2col built ONCE here: for frame position (h, w), lanes [3t : 3t+3]
    # hold x[:, :, h+ki, w+kj] (zero past the image edge), t = ki*5 + kj.
    xhwc = jnp.transpose(x, (0, 2, 3, 1)).astype(jnp.bfloat16)          # (n,32,32,3)
    xpad = jnp.pad(xhwc, ((0, 0), (0, _K - 1), (0, _K - 1), (0, 0)))
    taps = [xpad[:, ki:ki + _H, kj:kj + _W, :]
            for ki in range(_K) for kj in range(_K)]
    xc = jnp.concatenate(taps, axis=-1)                                 # (n,32,32,75)
    xc = jnp.pad(xc, ((0, 0), (0, 0), (0, 0), (0, _LANES - 3 * _K * _K)))
    xc = xc.reshape(n * _FRAME, _LANES)

    inputs = (xc,
              packed["w1c"], packed["b1"], packed["w2c"], packed["b2"],
              packed["w1f"], packed["b1f"], packed["w2f"], packed["b2f"],
              packed["w3f"], packed["b3f"])

    in_specs = ([pl.BlockSpec((_FRAME, _LANES), lambda b: (b, 0))]
                + [_bcast_spec(a.shape) for a in inputs[1:]])

    out = pl.pallas_call(
        _lenet_kernel,
        out_shape=jax.ShapeDtypeStruct((n, 8, _LANES), jnp.float32),
        grid=(n,),
        in_specs=in_specs,
        out_specs=pl.BlockSpec((1, 8, _LANES), lambda b: (b, 0, 0)),
        scratch_shapes=[
            pltpu.VMEM((_FRAME, _LANES), jnp.float32),        # a1: conv1 output
            pltpu.VMEM((_P1_ROWS, _LANES), jnp.bfloat16),     # p1: compact pool1
            pltpu.VMEM((_A2_ROWS, _LANES), jnp.float32),      # a2: conv2 output
            pltpu.VMEM((8, 25 * _LANES), jnp.bfloat16),       # flat fc1 input
        ],
        compiler_params=pltpu.CompilerParams(
            dimension_semantics=("parallel",),                # v7x: both TCs share batch
            vmem_limit_bytes=32 * 1024 * 1024),
    )(*inputs)

    return out[:, 0, :10]


# ----------------------------------------------------------------------------
# Deterministic synthetic init (PyTorch-default-like uniform) and f32 reference
# ----------------------------------------------------------------------------
def init_params(key):
    def uniform(key, shape, fan_in):
        bound = 1.0 / jnp.sqrt(jnp.float32(fan_in))
        return jax.random.uniform(key, shape, jnp.float32, -bound, bound)

    ks = jax.random.split(key, 10)
    return {
        "conv1_w": uniform(ks[0], (6, 3, 5, 5), 3 * 5 * 5),
        "conv1_b": uniform(ks[1], (6,), 3 * 5 * 5),
        "conv2_w": uniform(ks[2], (16, 6, 5, 5), 6 * 5 * 5),
        "conv2_b": uniform(ks[3], (16,), 6 * 5 * 5),
        "fc1_w": uniform(ks[4], (120, 400), 400),
        "fc1_b": uniform(ks[5], (120,), 400),
        "fc2_w": uniform(ks[6], (84, 120), 120),
        "fc2_b": uniform(ks[7], (84,), 120),
        "fc3_w": uniform(ks[8], (10, 84), 84),
        "fc3_b": uniform(ks[9], (10,), 84),
    }


def net_forward_reference(params, x):
    dn = ("NCHW", "OIHW", "NCHW")
    y = lax.conv_general_dilated(x, params["conv1_w"], (1, 1), "VALID",
                                 dimension_numbers=dn)
    y = jnp.maximum(y + params["conv1_b"][None, :, None, None], 0.0)
    y = lax.reduce_window(y, -jnp.inf, lax.max, (1, 1, 2, 2), (1, 1, 2, 2), "VALID")
    y = lax.conv_general_dilated(y, params["conv2_w"], (1, 1), "VALID",
                                 dimension_numbers=dn)
    y = jnp.maximum(y + params["conv2_b"][None, :, None, None], 0.0)
    y = lax.reduce_window(y, -jnp.inf, lax.max, (1, 1, 2, 2), (1, 1, 2, 2), "VALID")
    y = y.reshape(y.shape[0], -1)
    y = jnp.maximum(y @ params["fc1_w"].T + params["fc1_b"], 0.0)
    y = jnp.maximum(y @ params["fc2_w"].T + params["fc2_b"], 0.0)
    return y @ params["fc3_w"].T + params["fc3_b"]


if __name__ == "__main__":
    key = jax.random.PRNGKey(0)
    k_param, k_x = jax.random.split(key)
    params = init_params(k_param)
    packed = pack_params(params)          # one-time weight prep, outside jit
    x = jax.random.normal(k_x, (2, 3, 32, 32), dtype=jnp.float32)  # NCHW like PyTorch

    out = jax.block_until_ready(net_forward(packed, x))
    assert out.shape == (2, 10), out.shape
    assert bool(jnp.all(jnp.isfinite(out)))

    ref = net_forward_reference(params, x)
    assert bool(jnp.allclose(out, ref, rtol=1e-1, atol=1e-1)), (
        float(jnp.max(jnp.abs(out - ref))))

    print("KERNEL_OK")
</pallas_src>

<mosaic_0001>
module attributes {stable_mosaic.version = 11 : i64} {
  func.func @_lenet_kernel(%arg0: i32, %arg1: memref<1024x128xbf16, #tpu.memory_space<vmem>>, %arg2: memref<128x128xbf16, #tpu.memory_space<vmem>>, %arg3: memref<1x128xf32, #tpu.memory_space<vmem>>, %arg4: memref<25x128x128xbf16, #tpu.memory_space<vmem>>, %arg5: memref<1x128xf32, #tpu.memory_space<vmem>>, %arg6: memref<3200x128xbf16, #tpu.memory_space<vmem>>, %arg7: memref<1x128xf32, #tpu.memory_space<vmem>>, %arg8: memref<128x128xbf16, #tpu.memory_space<vmem>>, %arg9: memref<1x128xf32, #tpu.memory_space<vmem>>, %arg10: memref<128x128xbf16, #tpu.memory_space<vmem>>, %arg11: memref<1x128xf32, #tpu.memory_space<vmem>>, %arg12: memref<1x8x128xf32, #tpu.memory_space<vmem>>, %arg13: memref<1024x128xf32, #tpu.memory_space<vmem>>, %arg14: memref<240x128xbf16, #tpu.memory_space<vmem>>, %arg15: memref<160x128xf32, #tpu.memory_space<vmem>>, %arg16: memref<8x3200xbf16, #tpu.memory_space<vmem>>) attributes {dimension_semantics = [#tpu.dimension_semantics<parallel>], iteration_bounds = array<i64: 2>, scalar_prefetch = 0 : i64, scratch_operands = 4 : i64, tpu.core_type = #tpu.core_type<tc>, window_params = [{transform_indices = @transform_0, window_bounds = array<i64: 1024, 128>}, {pipeline_mode = #tpu.pipeline_mode<synchronous>, transform_indices = @transform_1, window_bounds = array<i64: 128, 128>}, {pipeline_mode = #tpu.pipeline_mode<synchronous>, transform_indices = @transform_2, window_bounds = array<i64: 1, 128>}, {pipeline_mode = #tpu.pipeline_mode<synchronous>, transform_indices = @transform_3, window_bounds = array<i64: 25, 128, 128>}, {pipeline_mode = #tpu.pipeline_mode<synchronous>, transform_indices = @transform_4, window_bounds = array<i64: 1, 128>}, {pipeline_mode = #tpu.pipeline_mode<synchronous>, transform_indices = @transform_5, window_bounds = array<i64: 3200, 128>}, {pipeline_mode = #tpu.pipeline_mode<synchronous>, transform_indices = @transform_6, window_bounds = array<i64: 1, 128>}, {pipeline_mode = #tpu.pipeline_mode<synchronous>, transform_indices = @transform_7, window_bounds = array<i64: 128, 128>}, {pipeline_mode = #tpu.pipeline_mode<synchronous>, transform_indices = @transform_8, window_bounds = array<i64: 1, 128>}, {pipeline_mode = #tpu.pipeline_mode<synchronous>, transform_indices = @transform_9, window_bounds = array<i64: 128, 128>}, {pipeline_mode = #tpu.pipeline_mode<synchronous>, transform_indices = @transform_10, window_bounds = array<i64: 1, 128>}, {transform_indices = @transform_11, window_bounds = array<i64: 1, 8, 128>}]} {
    %c0 = arith.constant 0 : index
    %c0_0 = arith.constant 0 : index
    %0 = vector.load %arg1[%c0, %c0_0] : memref<1024x128xbf16, #tpu.memory_space<vmem>>, vector<1024x128xbf16>
    %c0_1 = arith.constant 0 : index
    %c0_2 = arith.constant 0 : index
    %1 = vector.load %arg2[%c0_1, %c0_2] : memref<128x128xbf16, #tpu.memory_space<vmem>>, vector<128x128xbf16>
    %cst = arith.constant dense<0.000000e+00> : vector<1024x128xf32>
    %2 = tpu.matmul %0, %1, %cst {dimension_numbers = #tpu.dot_dimension_numbers<[1], [0], [0], [1], [0, 0, 1, 1], [], []>} : vector<1024x128xbf16>, vector<128x128xbf16>, vector<1024x128xf32> -> vector<1024x128xf32>
    %c0_3 = arith.constant 0 : index
    %c0_4 = arith.constant 0 : index
    %3 = vector.load %arg3[%c0_3, %c0_4] : memref<1x128xf32, #tpu.memory_space<vmem>>, vector<1x128xf32>
    %4 = vector.broadcast %3 : vector<1x128xf32> to vector<1024x128xf32>
    %5 = arith.addf %2, %4 : vector<1024x128xf32>
    %cst_5 = arith.constant 0.000000e+00 : f32
    %6 = vector.broadcast %cst_5 : f32 to vector<1024x128xf32>
    %7 = arith.maximumf %5, %6 : vector<1024x128xf32>
    %c0_6 = arith.constant 0 : index
    %c0_7 = arith.constant 0 : index
    %8 = vector.load %arg13[%c0_6, %c0_7] : memref<1024x128xf32, #tpu.memory_space<vmem>>, vector<1024x128xf32>
    tpu.vector_store %arg13[%c0_6, %c0_7], %7 {strides = array<i32>} : memref<1024x128xf32, #tpu.memory_space<vmem>>, vector<1024x128xf32>,
    %c0_8 = arith.constant 0 : index
    %c0_9 = arith.constant 0 : index
    %9 = tpu.strided_load %arg13[%c0_8, %c0_9] {strides = array<i32: 2, 1>} : memref<1024x128xf32, #tpu.memory_space<vmem>>, vector<14x128xf32>
    %c1 = arith.constant 1 : index
    %c0_10 = arith.constant 0 : index
    %10 = tpu.strided_load %arg13[%c1, %c0_10] {strides = array<i32: 2, 1>} : memref<1024x128xf32, #tpu.memory_space<vmem>>, vector<14x128xf32>
    %11 = arith.maximumf %9, %10 : vector<14x128xf32>
    %c32 = arith.constant 32 : index
    %c0_11 = arith.constant 0 : index
    %12 = tpu.strided_load %arg13[%c32, %c0_11] {strides = array<i32: 2, 1>} : memref<1024x128xf32, #tpu.memory_space<vmem>>, vector<14x128xf32>
    %c33 = arith.constant 33 : index
    %c0_12 = arith.constant 0 : index
    %13 = tpu.strided_load %arg13[%c33, %c0_12] {strides = array<i32: 2, 1>} : memref<1024x128xf32, #tpu.memory_space<vmem>>, vector<14x128xf32>
    %14 = arith.maximumf %12, %13 : vector<14x128xf32>
    %15 = arith.maximumf %11, %14 : vector<14x128xf32>
    %16 = arith.truncf %15 : vector<14x128xf32> to vector<14x128xbf16>
    %c0_13 = arith.constant 0 : index
    %c0_14 = arith.constant 0 : index
    %17 = vector.load %arg14[%c0_13, %c0_14] : memref<240x128xbf16, #tpu.memory_space<vmem>>, vector<14x128xbf16>
    tpu.vector_store %arg14[%c0_13, %c0_14], %16 {strides = array<i32>} : memref<240x128xbf16, #tpu.memory_space<vmem>>, vector<14x128xbf16>,
    %c64 = arith.constant 64 : index
    %c0_15 = arith.constant 0 : index
    %18 = tpu.strided_load %arg13[%c64, %c0_15] {strides = array<i32: 2, 1>} : memref<1024x128xf32, #tpu.memory_space<vmem>>, vector<14x128xf32>
    %c65 = arith.constant 65 : index
    %c0_16 = arith.constant 0 : index
    %19 = tpu.strided_load %arg13[%c65, %c0_16] {strides = array<i32: 2, 1>} : memref<1024x128xf32, #tpu.memory_space<vmem>>, vector<14x128xf32>
    %20 = arith.maximumf %18, %19 : vector<14x128xf32>
    %c96 = arith.constant 96 : index
    %c0_17 = arith.constant 0 : index
    %21 = tpu.strided_load %arg13[%c96, %c0_17] {strides = array<i32: 2, 1>} : memref<1024x128xf32, #tpu.memory_space<vmem>>, vector<14x128xf32>
    %c97 = arith.constant 97 : index
    %c0_18 = arith.constant 0 : index
    %22 = tpu.strided_load %arg13[%c97, %c0_18] {strides = array<i32: 2, 1>} : memref<1024x128xf32, #tpu.memory_space<vmem>>, vector<14x128xf32>
    %23 = arith.maximumf %21, %22 : vector<14x128xf32>
    %24 = arith.maximumf %20, %23 : vector<14x128xf32>
    %25 = arith.truncf %24 : vector<14x128xf32> to vector<14x128xbf16>
    %c16 = arith.constant 16 : index
    %c0_19 = arith.constant 0 : index
    %26 = vector.load %arg14[%c16, %c0_19] : memref<240x128xbf16, #tpu.memory_space<vmem>>, vector<14x128xbf16>
    tpu.vector_store %arg14[%c16, %c0_19], %25 {strides = array<i32>} : memref<240x128xbf16, #tpu.memory_space<vmem>>, vector<14x128xbf16>,
    %c128 = arith.constant 128 : index
    %c0_20 = arith.constant 0 : index
    %27 = tpu.strided_load %arg13[%c128, %c0_20] {strides = array<i32: 2, 1>} : memref<1024x128xf32, #tpu.memory_space<vmem>>, vector<14x128xf32>
    %c129 = arith.constant 129 : index
    %c0_21 = arith.constant 0 : index
    %28 = tpu.strided_load %arg13[%c129, %c0_21] {strides = array<i32: 2, 1>} : memref<1024x128xf32, #tpu.memory_space<vmem>>, vector<14x128xf32>
    %29 = arith.maximumf %27, %28 : vector<14x128xf32>
    %c160 = arith.constant 160 : index
    %c0_22 = arith.constant 0 : index
    %30 = tpu.strided_load %arg13[%c160, %c0_22] {strides = array<i32: 2, 1>} : memref<1024x128xf32, #tpu.memory_space<vmem>>, vector<14x128xf32>
    %c161 = arith.constant 161 : index
    %c0_23 = arith.constant 0 : index
    %31 = tpu.strided_load %arg13[%c161, %c0_23] {strides = array<i32: 2, 1>} : memref<1024x128xf32, #tpu.memory_space<vmem>>, vector<14x128xf32>
    %32 = arith.maximumf %30, %31 : vector<14x128xf32>
    %33 = arith.maximumf %29, %32 : vector<14x128xf32>
    %34 = arith.truncf %33 : vector<14x128xf32> to vector<14x128xbf16>
    %c32_24 = arith.constant 32 : index
    %c0_25 = arith.constant 0 : index
    %35 = vector.load %arg14[%c32_24, %c0_25] : memref<240x128xbf16, #tpu.memory_space<vmem>>, vector<14x128xbf16>
    tpu.vector_store %arg14[%c32_24, %c0_25], %34 {strides = array<i32>} : memref<240x128xbf16, #tpu.memory_space<vmem>>, vector<14x128xbf16>,
    %c192 = arith.constant 192 : index
    %c0_26 = arith.constant 0 : index
    %36 = tpu.strided_load %arg13[%c192, %c0_26] {strides = array<i32: 2, 1>} : memref<1024x128xf32, #tpu.memory_space<vmem>>, vector<14x128xf32>
    %c193 = arith.constant 193 : index
    %c0_27 = arith.constant 0 : index
    %37 = tpu.strided_load %arg13[%c193, %c0_27] {strides = array<i32: 2, 1>} : memref<1024x128xf32, #tpu.memory_space<vmem>>, vector<14x128xf32>
    %38 = arith.maximumf %36, %37 : vector<14x128xf32>
    %c224 = arith.constant 224 : index
    %c0_28 = arith.constant 0 : index
    %39 = tpu.strided_load %arg13[%c224, %c0_28] {strides = array<i32: 2, 1>} : memref<1024x128xf32, #tpu.memory_space<vmem>>, vector<14x128xf32>
    %c225 = arith.constant 225 : index
    %c0_29 = arith.constant 0 : index
    %40 = tpu.strided_load %arg13[%c225, %c0_29] {strides = array<i32: 2, 1>} : memref<1024x128xf32, #tpu.memory_space<vmem>>, vector<14x128xf32>
    %41 = arith.maximumf %39, %40 : vector<14x128xf32>
    %42 = arith.maximumf %38, %41 : vector<14x128xf32>
    %43 = arith.truncf %42 : vector<14x128xf32> to vector<14x128xbf16>
    %c48 = arith.constant 48 : index
    %c0_30 = arith.constant 0 : index
    %44 = vector.load %arg14[%c48, %c0_30] : memref<240x128xbf16, #tpu.memory_space<vmem>>, vector<14x128xbf16>
    tpu.vector_store %arg14[%c48, %c0_30], %43 {strides = array<i32>} : memref<240x128xbf16, #tpu.memory_space<vmem>>, vector<14x128xbf16>,
    %c256 = arith.constant 256 : index
    %c0_31 = arith.constant 0 : index
    %45 = tpu.strided_load %arg13[%c256, %c0_31] {strides = array<i32: 2, 1>} : memref<1024x128xf32, #tpu.memory_space<vmem>>, vector<14x128xf32>
    %c257 = arith.constant 257 : index
    %c0_32 = arith.constant 0 : index
    %46 = tpu.strided_load %arg13[%c257, %c0_32] {strides = array<i32: 2, 1>} : memref<1024x128xf32, #tpu.memory_space<vmem>>, vector<14x128xf32>
    %47 = arith.maximumf %45, %46 : vector<14x128xf32>
    %c288 = arith.constant 288 : index
    %c0_33 = arith.constant 0 : index
    %48 = tpu.strided_load %arg13[%c288, %c0_33] {strides = array<i32: 2, 1>} : memref<1024x128xf32, #tpu.memory_space<vmem>>, vector<14x128xf32>
    %c289 = arith.constant 289 : index
    %c0_34 = arith.constant 0 : index
    %49 = tpu.strided_load %arg13[%c289, %c0_34] {strides = array<i32: 2, 1>} : memref<1024x128xf32, #tpu.memory_space<vmem>>, vector<14x128xf32>
    %50 = arith.maximumf %48, %49 : vector<14x128xf32>
    %51 = arith.maximumf %47, %50 : vector<14x128xf32>
    %52 = arith.truncf %51 : vector<14x128xf32> to vector<14x128xbf16>
    %c64_35 = arith.constant 64 : index
    %c0_36 = arith.constant 0 : index
    %53 = vector.load %arg14[%c64_35, %c0_36] : memref<240x128xbf16, #tpu.memory_space<vmem>>, vector<14x128xbf16>
    tpu.vector_store %arg14[%c64_35, %c0_36], %52 {strides = array<i32>} : memref<240x128xbf16, #tpu.memory_space<vmem>>, vector<14x128xbf16>,
    %c320 = arith.constant 320 : index
    %c0_37 = arith.constant 0 : index
    %54 = tpu.strided_load %arg13[%c320, %c0_37] {strides = array<i32: 2, 1>} : memref<1024x128xf32, #tpu.memory_space<vmem>>, vector<14x128xf32>
    %c321 = arith.constant 321 : index
    %c0_38 = arith.constant 0 : index
    %55 = tpu.strided_load %arg13[%c321, %c0_38] {strides = array<i32: 2, 1>} : memref<1024x128xf32, #tpu.memory_space<vmem>>, vector<14x128xf32>
    %56 = arith.maximumf %54, %55 : vector<14x128xf32>
    %c352 = arith.constant 352 : index
    %c0_39 = arith.constant 0 : index
    %57 = tpu.strided_load %arg13[%c352, %c0_39] {strides = array<i32: 2, 1>} : memref<1024x128xf32, #tpu.memory_space<vmem>>, vector<14x128xf32>
    %c353 = arith.constant 353 : index
    %c0_40 = arith.constant 0 : index
    %58 = tpu.strided_load %arg13[%c353, %c0_40] {strides = array<i32: 2, 1>} : memref<1024x128xf32, #tpu.memory_space<vmem>>, vector<14x128xf32>
    %59 = arith.maximumf %57, %58 : vector<14x128xf32>
    %60 = arith.maximumf %56, %59 : vector<14x128xf32>
    %61 = arith.truncf %60 : vector<14x128xf32> to vector<14x128xbf16>
    %c80 = arith.constant 80 : index
    %c0_41 = arith.constant 0 : index
    %62 = vector.load %arg14[%c80, %c0_41] : memref<240x128xbf16, #tpu.memory_space<vmem>>, vector<14x128xbf16>
    tpu.vector_store %arg14[%c80, %c0_41], %61 {strides = array<i32>} : memref<240x128xbf16, #tpu.memory_space<vmem>>, vector<14x128xbf16>,
    %c384 = arith.constant 384 : index
    %c0_42 = arith.constant 0 : index
    %63 = tpu.strided_load %arg13[%c384, %c0_42] {strides = array<i32: 2, 1>} : memref<1024x128xf32, #tpu.memory_space<vmem>>, vector<14x128xf32>
    %c385 = arith.constant 385 : index
    %c0_43 = arith.constant 0 : index
    %64 = tpu.strided_load %arg13[%c385, %c0_43] {strides = array<i32: 2, 1>} : memref<1024x128xf32, #tpu.memory_space<vmem>>, vector<14x128xf32>
    %65 = arith.maximumf %63, %64 : vector<14x128xf32>
    %c416 = arith.constant 416 : index
    %c0_44 = arith.constant 0 : index
    %66 = tpu.strided_load %arg13[%c416, %c0_44] {strides = array<i32: 2, 1>} : memref<1024x128xf32, #tpu.memory_space<vmem>>, vector<14x128xf32>
    %c417 = arith.constant 417 : index
    %c0_45 = arith.constant 0 : index
    %67 = tpu.strided_load %arg13[%c417, %c0_45] {strides = array<i32: 2, 1>} : memref<1024x128xf32, #tpu.memory_space<vmem>>, vector<14x128xf32>
    %68 = arith.maximumf %66, %67 : vector<14x128xf32>
    %69 = arith.maximumf %65, %68 : vector<14x128xf32>
    %70 = arith.truncf %69 : vector<14x128xf32> to vector<14x128xbf16>
    %c96_46 = arith.constant 96 : index
    %c0_47 = arith.constant 0 : index
    %71 = vector.load %arg14[%c96_46, %c0_47] : memref<240x128xbf16, #tpu.memory_space<vmem>>, vector<14x128xbf16>
    tpu.vector_store %arg14[%c96_46, %c0_47], %70 {strides = array<i32>} : memref<240x128xbf16, #tpu.memory_space<vmem>>, vector<14x128xbf16>,
    %c448 = arith.constant 448 : index
    %c0_48 = arith.constant 0 : index
    %72 = tpu.strided_load %arg13[%c448, %c0_48] {strides = array<i32: 2, 1>} : memref<1024x128xf32, #tpu.memory_space<vmem>>, vector<14x128xf32>
    %c449 = arith.constant 449 : index
    %c0_49 = arith.constant 0 : index
    %73 = tpu.strided_load %arg13[%c449, %c0_49] {strides = array<i32: 2, 1>} : memref<1024x128xf32, #tpu.memory_space<vmem>>, vector<14x128xf32>
    %74 = arith.maximumf %72, %73 : vector<14x128xf32>
    %c480 = arith.constant 480 : index
    %c0_50 = arith.constant 0 : index
    %75 = tpu.strided_load %arg13[%c480, %c0_50] {strides = array<i32: 2, 1>} : memref<1024x128xf32, #tpu.memory_space<vmem>>, vector<14x128xf32>
    %c481 = arith.constant 481 : index
    %c0_51 = arith.constant 0 : index
    %76 = tpu.strided_load %arg13[%c481, %c0_51] {strides = array<i32: 2, 1>} : memref<1024x128xf32, #tpu.memory_space<vmem>>, vector<14x128xf32>
    %77 = arith.maximumf %75, %76 : vector<14x128xf32>
    %78 = arith.maximumf %74, %77 : vector<14x128xf32>
    %79 = arith.truncf %78 : vector<14x128xf32> to vector<14x128xbf16>
    %c112 = arith.constant 112 : index
    %c0_52 = arith.constant 0 : index
    %80 = vector.load %arg14[%c112, %c0_52] : memref<240x128xbf16, #tpu.memory_space<vmem>>, vector<14x128xbf16>
    tpu.vector_store %arg14[%c112, %c0_52], %79 {strides = array<i32>} : memref<240x128xbf16, #tpu.memory_space<vmem>>, vector<14x128xbf16>,
    %c512 = arith.constant 512 : index
    %c0_53 = arith.constant 0 : index
    %81 = tpu.strided_load %arg13[%c512, %c0_53] {strides = array<i32: 2, 1>} : memref<1024x128xf32, #tpu.memory_space<vmem>>, vector<14x128xf32>
    %c513 = arith.constant 513 : index
    %c0_54 = arith.constant 0 : index
    %82 = tpu.strided_load %arg13[%c513, %c0_54] {strides = array<i32: 2, 1>} : memref<1024x128xf32, #tpu.memory_space<vmem>>, vector<14x128xf32>
    %83 = arith.maximumf %81, %82 : vector<14x128xf32>
    %c544 = arith.constant 544 : index
    %c0_55 = arith.constant 0 : index
    %84 = tpu.strided_load %arg13[%c544, %c0_55] {strides = array<i32: 2, 1>} : memref<1024x128xf32, #tpu.memory_space<vmem>>, vector<14x128xf32>
    %c545 = arith.constant 545 : index
    %c0_56 = arith.constant 0 : index
    %85 = tpu.strided_load %arg13[%c545, %c0_56] {strides = array<i32: 2, 1>} : memref<1024x128xf32, #tpu.memory_space<vmem>>, vector<14x128xf32>
    %86 = arith.maximumf %84, %85 : vector<14x128xf32>
    %87 = arith.maximumf %83, %86 : vector<14x128xf32>
    %88 = arith.truncf %87 : vector<14x128xf32> to vector<14x128xbf16>
    %c128_57 = arith.constant 128 : index
    %c0_58 = arith.constant 0 : index
    %89 = vector.load %arg14[%c128_57, %c0_58] : memref<240x128xbf16, #tpu.memory_space<vmem>>, vector<14x128xbf16>
    tpu.vector_store %arg14[%c128_57, %c0_58], %88 {strides = array<i32>} : memref<240x128xbf16, #tpu.memory_space<vmem>>, vector<14x128xbf16>,
    %c576 = arith.constant 576 : index
    %c0_59 = arith.constant 0 : index
    %90 = tpu.strided_load %arg13[%c576, %c0_59] {strides = array<i32: 2, 1>} : memref<1024x128xf32, #tpu.memory_space<vmem>>, vector<14x128xf32>
    %c577 = arith.constant 577 : index
    %c0_60 = arith.constant 0 : index
    %91 = tpu.strided_load %arg13[%c577, %c0_60] {strides = array<i32: 2, 1>} : memref<1024x128xf32, #tpu.memory_space<vmem>>, vector<14x128xf32>
    %92 = arith.maximumf %90, %91 : vector<14x128xf32>
    %c608 = arith.constant 608 : index
    %c0_61 = arith.constant 0 : index
    %93 = tpu.strided_load %arg13[%c608, %c0_61] {strides = array<i32: 2, 1>} : memref<1024x128xf32, #tpu.memory_space<vmem>>, vector<14x128xf32>
    %c609 = arith.constant 609 : index
    %c0_62 = arith.constant 0 : index
    %94 = tpu.strided_load %arg13[%c609, %c0_62] {strides = array<i32: 2, 1>} : memref<1024x128xf32, #tpu.memory_space<vmem>>, vector<14x128xf32>
    %95 = arith.maximumf %93, %94 : vector<14x128xf32>
    %96 = arith.maximumf %92, %95 : vector<14x128xf32>
    %97 = arith.truncf %96 : vector<14x128xf32> to vector<14x128xbf16>
    %c144 = arith.constant 144 : index
    %c0_63 = arith.constant 0 : index
    %98 = vector.load %arg14[%c144, %c0_63] : memref<240x128xbf16, #tpu.memory_space<vmem>>, vector<14x128xbf16>
    tpu.vector_store %arg14[%c144, %c0_63], %97 {strides = array<i32>} : memref<240x128xbf16, #tpu.memory_space<vmem>>, vector<14x128xbf16>,
    %c640 = arith.constant 640 : index
    %c0_64 = arith.constant 0 : index
    %99 = tpu.strided_load %arg13[%c640, %c0_64] {strides = array<i32: 2, 1>} : memref<1024x128xf32, #tpu.memory_space<vmem>>, vector<14x128xf32>
    %c641 = arith.constant 641 : index
    %c0_65 = arith.constant 0 : index
    %100 = tpu.strided_load %arg13[%c641, %c0_65] {strides = array<i32: 2, 1>} : memref<1024x128xf32, #tpu.memory_space<vmem>>, vector<14x128xf32>
    %101 = arith.maximumf %99, %100 : vector<14x128xf32>
    %c672 = arith.constant 672 : index
    %c0_66 = arith.constant 0 : index
    %102 = tpu.strided_load %arg13[%c672, %c0_66] {strides = array<i32: 2, 1>} : memref<1024x128xf32, #tpu.memory_space<vmem>>, vector<14x128xf32>
    %c673 = arith.constant 673 : index
    %c0_67 = arith.constant 0 : index
    %103 = tpu.strided_load %arg13[%c673, %c0_67] {strides = array<i32: 2, 1>} : memref<1024x128xf32, #tpu.memory_space<vmem>>, vector<14x128xf32>
    %104 = arith.maximumf %102, %103 : vector<14x128xf32>
    %105 = arith.maximumf %101, %104 : vector<14x128xf32>
    %106 = arith.truncf %105 : vector<14x128xf32> to vector<14x128xbf16>
    %c160_68 = arith.constant 160 : index
    %c0_69 = arith.constant 0 : index
    %107 = vector.load %arg14[%c160_68, %c0_69] : memref<240x128xbf16, #tpu.memory_space<vmem>>, vector<14x128xbf16>
    tpu.vector_store %arg14[%c160_68, %c0_69], %106 {strides = array<i32>} : memref<240x128xbf16, #tpu.memory_space<vmem>>, vector<14x128xbf16>,
    %c704 = arith.constant 704 : index
    %c0_70 = arith.constant 0 : index
    %108 = tpu.strided_load %arg13[%c704, %c0_70] {strides = array<i32: 2, 1>} : memref<1024x128xf32, #tpu.memory_space<vmem>>, vector<14x128xf32>
    %c705 = arith.constant 705 : index
    %c0_71 = arith.constant 0 : index
    %109 = tpu.strided_load %arg13[%c705, %c0_71] {strides = array<i32: 2, 1>} : memref<1024x128xf32, #tpu.memory_space<vmem>>, vector<14x128xf32>
    %110 = arith.maximumf %108, %109 : vector<14x128xf32>
    %c736 = arith.constant 736 : index
    %c0_72 = arith.constant 0 : index
    %111 = tpu.strided_load %arg13[%c736, %c0_72] {strides = array<i32: 2, 1>} : memref<1024x128xf32, #tpu.memory_space<vmem>>, vector<14x128xf32>
    %c737 = arith.constant 737 : index
    %c0_73 = arith.constant 0 : index
    %112 = tpu.strided_load %arg13[%c737, %c0_73] {strides = array<i32: 2, 1>} : memref<1024x128xf32, #tpu.memory_space<vmem>>, vector<14x128xf32>
    %113 = arith.maximumf %111, %112 : vector<14x128xf32>
    %114 = arith.maximumf %110, %113 : vector<14x128xf32>
    %115 = arith.truncf %114 : vector<14x128xf32> to vector<14x128xbf16>
    %c176 = arith.constant 176 : index
    %c0_74 = arith.constant 0 : index
    %116 = vector.load %arg14[%c176, %c0_74] : memref<240x128xbf16, #tpu.memory_space<vmem>>, vector<14x128xbf16>
    tpu.vector_store %arg14[%c176, %c0_74], %115 {strides = array<i32>} : memref<240x128xbf16, #tpu.memory_space<vmem>>, vector<14x128xbf16>,
    %c768 = arith.constant 768 : index
    %c0_75 = arith.constant 0 : index
    %117 = tpu.strided_load %arg13[%c768, %c0_75] {strides = array<i32: 2, 1>} : memref<1024x128xf32, #tpu.memory_space<vmem>>, vector<14x128xf32>
    %c769 = arith.constant 769 : index
    %c0_76 = arith.constant 0 : index
    %118 = tpu.strided_load %arg13[%c769, %c0_76] {strides = array<i32: 2, 1>} : memref<1024x128xf32, #tpu.memory_space<vmem>>, vector<14x128xf32>
    %119 = arith.maximumf %117, %118 : vector<14x128xf32>
    %c800 = arith.constant 800 : index
    %c0_77 = arith.constant 0 : index
    %120 = tpu.strided_load %arg13[%c800, %c0_77] {strides = array<i32: 2, 1>} : memref<1024x128xf32, #tpu.memory_space<vmem>>, vector<14x128xf32>
    %c801 = arith.constant 801 : index
    %c0_78 = arith.constant 0 : index
    %121 = tpu.strided_load %arg13[%c801, %c0_78] {strides = array<i32: 2, 1>} : memref<1024x128xf32, #tpu.memory_space<vmem>>, vector<14x128xf32>
    %122 = arith.maximumf %120, %121 : vector<14x128xf32>
    %123 = arith.maximumf %119, %122 : vector<14x128xf32>
    %124 = arith.truncf %123 : vector<14x128xf32> to vector<14x128xbf16>
    %c192_79 = arith.constant 192 : index
    %c0_80 = arith.constant 0 : index
    %125 = vector.load %arg14[%c192_79, %c0_80] : memref<240x128xbf16, #tpu.memory_space<vmem>>, vector<14x128xbf16>
    tpu.vector_store %arg14[%c192_79, %c0_80], %124 {strides = array<i32>} : memref<240x128xbf16, #tpu.memory_space<vmem>>, vector<14x128xbf16>,
    %c832 = arith.constant 832 : index
    %c0_81 = arith.constant 0 : index
    %126 = tpu.strided_load %arg13[%c832, %c0_81] {strides = array<i32: 2, 1>} : memref<1024x128xf32, #tpu.memory_space<vmem>>, vector<14x128xf32>
    %c833 = arith.constant 833 : index
    %c0_82 = arith.constant 0 : index
    %127 = tpu.strided_load %arg13[%c833, %c0_82] {strides = array<i32: 2, 1>} : memref<1024x128xf32, #tpu.memory_space<vmem>>, vector<14x128xf32>
    %128 = arith.maximumf %126, %127 : vector<14x128xf32>
    %c864 = arith.constant 864 : index
    %c0_83 = arith.constant 0 : index
    %129 = tpu.strided_load %arg13[%c864, %c0_83] {strides = array<i32: 2, 1>} : memref<1024x128xf32, #tpu.memory_space<vmem>>, vector<14x128xf32>
    %c865 = arith.constant 865 : index
    %c0_84 = arith.constant 0 : index
    %130 = tpu.strided_load %arg13[%c865, %c0_84] {strides = array<i32: 2, 1>} : memref<1024x128xf32, #tpu.memory_space<vmem>>, vector<14x128xf32>
    %131 = arith.maximumf %129, %130 : vector<14x128xf32>
    %132 = arith.maximumf %128, %131 : vector<14x128xf32>
    %133 = arith.truncf %132 : vector<14x128xf32> to vector<14x128xbf16>
    %c208 = arith.constant 208 : index
    %c0_85 = arith.constant 0 : index
    %134 = vector.load %arg14[%c208, %c0_85] : memref<240x128xbf16, #tpu.memory_space<vmem>>, vector<14x128xbf16>
    tpu.vector_store %arg14[%c208, %c0_85], %133 {strides = array<i32>} : memref<240x128xbf16, #tpu.memory_space<vmem>>, vector<14x128xbf16>,
    %c0_86 = arith.constant 0 : index
    %c0_87 = arith.constant 0 : index
    %135 = vector.load %arg14[%c0_86, %c0_87] : memref<240x128xbf16, #tpu.memory_space<vmem>>, vector<160x128xbf16>
    %c0_88 = arith.constant 0 : index
    %c0_89 = arith.constant 0 : index
    %c0_90 = arith.constant 0 : index
    %136 = vector.load %arg4[%c0_88, %c0_89, %c0_90] : memref<25x128x128xbf16, #tpu.memory_space<vmem>>, vector<1x128x128xbf16>
    %137 = vector.shape_cast %136 : vector<1x128x128xbf16> to vector<128x128xbf16>
    %cst_91 = arith.constant dense<0.000000e+00> : vector<160x128xf32>
    %138 = tpu.matmul %135, %137, %cst_91 {dimension_numbers = #tpu.dot_dimension_numbers<[1], [0], [0], [1], [0, 0, 1, 1], [], []>} : vector<160x128xbf16>, vector<128x128xbf16>, vector<160x128xf32> -> vector<160x128xf32>
    %c1_92 = arith.constant 1 : index
    %c0_93 = arith.constant 0 : index
    %139 = vector.load %arg14[%c1_92, %c0_93] : memref<240x128xbf16, #tpu.memory_space<vmem>>, vector<160x128xbf16>
    %c1_94 = arith.constant 1 : index
    %c0_95 = arith.constant 0 : index
    %c0_96 = arith.constant 0 : index
    %140 = vector.load %arg4[%c1_94, %c0_95, %c0_96] : memref<25x128x128xbf16, #tpu.memory_space<vmem>>, vector<1x128x128xbf16>
    %141 = vector.shape_cast %140 : vector<1x128x128xbf16> to vector<128x128xbf16>
    %cst_97 = arith.constant dense<0.000000e+00> : vector<160x128xf32>
    %142 = tpu.matmul %139, %141, %cst_97 {dimension_numbers = #tpu.dot_dimension_numbers<[1], [0], [0], [1], [0, 0, 1, 1], [], []>} : vector<160x128xbf16>, vector<128x128xbf16>, vector<160x128xf32> -> vector<160x128xf32>
    %143 = arith.addf %138, %142 : vector<160x128xf32>
    %c2 = arith.constant 2 : index
    %c0_98 = arith.constant 0 : index
    %144 = vector.load %arg14[%c2, %c0_98] : memref<240x128xbf16, #tpu.memory_space<vmem>>, vector<160x128xbf16>
    %c2_99 = arith.constant 2 : index
    %c0_100 = arith.constant 0 : index
    %c0_101 = arith.constant 0 : index
    %145 = vector.load %arg4[%c2_99, %c0_100, %c0_101] : memref<25x128x128xbf16, #tpu.memory_space<vmem>>, vector<1x128x128xbf16>
    %146 = vector.shape_cast %145 : vector<1x128x128xbf16> to vector<128x128xbf16>
    %cst_102 = arith.constant dense<0.000000e+00> : vector<160x128xf32>
    %147 = tpu.matmul %144, %146, %cst_102 {dimension_numbers = #tpu.dot_dimension_numbers<[1], [0], [0], [1], [0, 0, 1, 1], [], []>} : vector<160x128xbf16>, vector<128x128xbf16>, vector<160x128xf32> -> vector<160x128xf32>
    %148 = arith.addf %143, %147 : vector<160x128xf32>
    %c3 = arith.constant 3 : index
    %c0_103 = arith.constant 0 : index
    %149 = vector.load %arg14[%c3, %c0_103] : memref<240x128xbf16, #tpu.memory_space<vmem>>, vector<160x128xbf16>
    %c3_104 = arith.constant 3 : index
    %c0_105 = arith.constant 0 : index
    %c0_106 = arith.constant 0 : index
    %150 = vector.load %arg4[%c3_104, %c0_105, %c0_106] : memref<25x128x128xbf16, #tpu.memory_space<vmem>>, vector<1x128x128xbf16>
    %151 = vector.shape_cast %150 : vector<1x128x128xbf16> to vector<128x128xbf16>
    %cst_107 = arith.constant dense<0.000000e+00> : vector<160x128xf32>
    %152 = tpu.matmul %149, %151, %cst_107 {dimension_numbers = #tpu.dot_dimension_numbers<[1], [0], [0], [1], [0, 0, 1, 1], [], []>} : vector<160x128xbf16>, vector<128x128xbf16>, vector<160x128xf32> -> vector<160x128xf32>
    %153 = arith.addf %148, %152 : vector<160x128xf32>
    %c4 = arith.constant 4 : index
    %c0_108 = arith.constant 0 : index
    %154 = vector.load %arg14[%c4, %c0_108] : memref<240x128xbf16, #tpu.memory_space<vmem>>, vector<160x128xbf16>
    %c4_109 = arith.constant 4 : index
    %c0_110 = arith.constant 0 : index
    %c0_111 = arith.constant 0 : index
    %155 = vector.load %arg4[%c4_109, %c0_110, %c0_111] : memref<25x128x128xbf16, #tpu.memory_space<vmem>>, vector<1x128x128xbf16>
    %156 = vector.shape_cast %155 : vector<1x128x128xbf16> to vector<128x128xbf16>
    %cst_112 = arith.constant dense<0.000000e+00> : vector<160x128xf32>
    %157 = tpu.matmul %154, %156, %cst_112 {dimension_numbers = #tpu.dot_dimension_numbers<[1], [0], [0], [1], [0, 0, 1, 1], [], []>} : vector<160x128xbf16>, vector<128x128xbf16>, vector<160x128xf32> -> vector<160x128xf32>
    %158 = arith.addf %153, %157 : vector<160x128xf32>
    %c16_113 = arith.constant 16 : index
    %c0_114 = arith.constant 0 : index
    %159 = vector.load %arg14[%c16_113, %c0_114] : memref<240x128xbf16, #tpu.memory_space<vmem>>, vector<160x128xbf16>
    %c5 = arith.constant 5 : index
    %c0_115 = arith.constant 0 : index
    %c0_116 = arith.constant 0 : index
    %160 = vector.load %arg4[%c5, %c0_115, %c0_116] : memref<25x128x128xbf16, #tpu.memory_space<vmem>>, vector<1x128x128xbf16>
    %161 = vector.shape_cast %160 : vector<1x128x128xbf16> to vector<128x128xbf16>
    %cst_117 = arith.constant dense<0.000000e+00> : vector<160x128xf32>
    %162 = tpu.matmul %159, %161, %cst_117 {dimension_numbers = #tpu.dot_dimension_numbers<[1], [0], [0], [1], [0, 0, 1, 1], [], []>} : vector<160x128xbf16>, vector<128x128xbf16>, vector<160x128xf32> -> vector<160x128xf32>
    %163 = arith.addf %158, %162 : vector<160x128xf32>
    %c17 = arith.constant 17 : index
    %c0_118 = arith.constant 0 : index
    %164 = vector.load %arg14[%c17, %c0_118] : memref<240x128xbf16, #tpu.memory_space<vmem>>, vector<160x128xbf16>
    %c6 = arith.constant 6 : index
    %c0_119 = arith.constant 0 : index
    %c0_120 = arith.constant 0 : index
    %165 = vector.load %arg4[%c6, %c0_119, %c0_120] : memref<25x128x128xbf16, #tpu.memory_space<vmem>>, vector<1x128x128xbf16>
    %166 = vector.shape_cast %165 : vector<1x128x128xbf16> to vector<128x128xbf16>
    %cst_121 = arith.constant dense<0.000000e+00> : vector<160x128xf32>
    %167 = tpu.matmul %164, %166, %cst_121 {dimension_numbers = #tpu.dot_dimension_numbers<[1], [0], [0], [1], [0, 0, 1, 1], [], []>} : vector<160x128xbf16>, vector<128x128xbf16>, vector<160x128xf32> -> vector<160x128xf32>
    %168 = arith.addf %163, %167 : vector<160x128xf32>
    %c18 = arith.constant 18 : index
    %c0_122 = arith.constant 0 : index
    %169 = vector.load %arg14[%c18, %c0_122] : memref<240x128xbf16, #tpu.memory_space<vmem>>, vector<160x128xbf16>
    %c7 = arith.constant 7 : index
    %c0_123 = arith.constant 0 : index
    %c0_124 = arith.constant 0 : index
    %170 = vector.load %arg4[%c7, %c0_123, %c0_124] : memref<25x128x128xbf16, #tpu.memory_space<vmem>>, vector<1x128x128xbf16>
    %171 = vector.shape_cast %170 : vector<1x128x128xbf16> to vector<128x128xbf16>
    %cst_125 = arith.constant dense<0.000000e+00> : vector<160x128xf32>
    %172 = tpu.matmul %169, %171, %cst_125 {dimension_numbers = #tpu.dot_dimension_numbers<[1], [0], [0], [1], [0, 0, 1, 1], [], []>} : vector<160x128xbf16>, vector<128x128xbf16>, vector<160x128xf32> -> vector<160x128xf32>
    %173 = arith.addf %168, %172 : vector<160x128xf32>
    %c19 = arith.constant 19 : index
    %c0_126 = arith.constant 0 : index
    %174 = vector.load %arg14[%c19, %c0_126] : memref<240x128xbf16, #tpu.memory_space<vmem>>, vector<160x128xbf16>
    %c8 = arith.constant 8 : index
    %c0_127 = arith.constant 0 : index
    %c0_128 = arith.constant 0 : index
    %175 = vector.load %arg4[%c8, %c0_127, %c0_128] : memref<25x128x128xbf16, #tpu.memory_space<vmem>>, vector<1x128x128xbf16>
    %176 = vector.shape_cast %175 : vector<1x128x128xbf16> to vector<128x128xbf16>
    %cst_129 = arith.constant dense<0.000000e+00> : vector<160x128xf32>
    %177 = tpu.matmul %174, %176, %cst_129 {dimension_numbers = #tpu.dot_dimension_numbers<[1], [0], [0], [1], [0, 0, 1, 1], [], []>} : vector<160x128xbf16>, vector<128x128xbf16>, vector<160x128xf32> -> vector<160x128xf32>
    %178 = arith.addf %173, %177 : vector<160x128xf32>
    %c20 = arith.constant 20 : index
    %c0_130 = arith.constant 0 : index
    %179 = vector.load %arg14[%c20, %c0_130] : memref<240x128xbf16, #tpu.memory_space<vmem>>, vector<160x128xbf16>
    %c9 = arith.constant 9 : index
    %c0_131 = arith.constant 0 : index
    %c0_132 = arith.constant 0 : index
    %180 = vector.load %arg4[%c9, %c0_131, %c0_132] : memref<25x128x128xbf16, #tpu.memory_space<vmem>>, vector<1x128x128xbf16>
    %181 = vector.shape_cast %180 : vector<1x128x128xbf16> to vector<128x128xbf16>
    %cst_133 = arith.constant dense<0.000000e+00> : vector<160x128xf32>
    %182 = tpu.matmul %179, %181, %cst_133 {dimension_numbers = #tpu.dot_dimension_numbers<[1], [0], [0], [1], [0, 0, 1, 1], [], []>} : vector<160x128xbf16>, vector<128x128xbf16>, vector<160x128xf32> -> vector<160x128xf32>
    %183 = arith.addf %178, %182 : vector<160x128xf32>
    %c32_134 = arith.constant 32 : index
    %c0_135 = arith.constant 0 : index
    %184 = vector.load %arg14[%c32_134, %c0_135] : memref<240x128xbf16, #tpu.memory_space<vmem>>, vector<160x128xbf16>
    %c10 = arith.constant 10 : index
    %c0_136 = arith.constant 0 : index
    %c0_137 = arith.constant 0 : index
    %185 = vector.load %arg4[%c10, %c0_136, %c0_137] : memref<25x128x128xbf16, #tpu.memory_space<vmem>>, vector<1x128x128xbf16>
    %186 = vector.shape_cast %185 : vector<1x128x128xbf16> to vector<128x128xbf16>
    %cst_138 = arith.constant dense<0.000000e+00> : vector<160x128xf32>
    %187 = tpu.matmul %184, %186, %cst_138 {dimension_numbers = #tpu.dot_dimension_numbers<[1], [0], [0], [1], [0, 0, 1, 1], [], []>} : vector<160x128xbf16>, vector<128x128xbf16>, vector<160x128xf32> -> vector<160x128xf32>
    %188 = arith.addf %183, %187 : vector<160x128xf32>
    %c33_139 = arith.constant 33 : index
    %c0_140 = arith.constant 0 : index
    %189 = vector.load %arg14[%c33_139, %c0_140] : memref<240x128xbf16, #tpu.memory_space<vmem>>, vector<160x128xbf16>
    %c11 = arith.constant 11 : index
    %c0_141 = arith.constant 0 : index
    %c0_142 = arith.constant 0 : index
    %190 = vector.load %arg4[%c11, %c0_141, %c0_142] : memref<25x128x128xbf16, #tpu.memory_space<vmem>>, vector<1x128x128xbf16>
    %191 = vector.shape_cast %190 : vector<1x128x128xbf16> to vector<128x128xbf16>
    %cst_143 = arith.constant dense<0.000000e+00> : vector<160x128xf32>
    %192 = tpu.matmul %189, %191, %cst_143 {dimension_numbers = #tpu.dot_dimension_numbers<[1], [0], [0], [1], [0, 0, 1, 1], [], []>} : vector<160x128xbf16>, vector<128x128xbf16>, vector<160x128xf32> -> vector<160x128xf32>
    %193 = arith.addf %188, %192 : vector<160x128xf32>
    %c34 = arith.constant 34 : index
    %c0_144 = arith.constant 0 : index
    %194 = vector.load %arg14[%c34, %c0_144] : memref<240x128xbf16, #tpu.memory_space<vmem>>, vector<160x128xbf16>
    %c12 = arith.constant 12 : index
    %c0_145 = arith.constant 0 : index
    %c0_146 = arith.constant 0 : index
    %195 = vector.load %arg4[%c12, %c0_145, %c0_146] : memref<25x128x128xbf16, #tpu.memory_space<vmem>>, vector<1x128x128xbf16>
    %196 = vector.shape_cast %195 : vector<1x128x128xbf16> to vector<128x128xbf16>
    %cst_147 = arith.constant dense<0.000000e+00> : vector<160x128xf32>
    %197 = tpu.matmul %194, %196, %cst_147 {dimension_numbers = #tpu.dot_dimension_numbers<[1], [0], [0], [1], [0, 0, 1, 1], [], []>} : vector<160x128xbf16>, vector<128x128xbf16>, vector<160x128xf32> -> vector<160x128xf32>
    %198 = arith.addf %193, %197 : vector<160x128xf32>
    %c35 = arith.constant 35 : index
    %c0_148 = arith.constant 0 : index
    %199 = vector.load %arg14[%c35, %c0_148] : memref<240x128xbf16, #tpu.memory_space<vmem>>, vector<160x128xbf16>
    %c13 = arith.constant 13 : index
    %c0_149 = arith.constant 0 : index
    %c0_150 = arith.constant 0 : index
    %200 = vector.load %arg4[%c13, %c0_149, %c0_150] : memref<25x128x128xbf16, #tpu.memory_space<vmem>>, vector<1x128x128xbf16>
    %201 = vector.shape_cast %200 : vector<1x128x128xbf16> to vector<128x128xbf16>
    %cst_151 = arith.constant dense<0.000000e+00> : vector<160x128xf32>
    %202 = tpu.matmul %199, %201, %cst_151 {dimension_numbers = #tpu.dot_dimension_numbers<[1], [0], [0], [1], [0, 0, 1, 1], [], []>} : vector<160x128xbf16>, vector<128x128xbf16>, vector<160x128xf32> -> vector<160x128xf32>
    %203 = arith.addf %198, %202 : vector<160x128xf32>
    %c36 = arith.constant 36 : index
    %c0_152 = arith.constant 0 : index
    %204 = vector.load %arg14[%c36, %c0_152] : memref<240x128xbf16, #tpu.memory_space<vmem>>, vector<160x128xbf16>
    %c14 = arith.constant 14 : index
    %c0_153 = arith.constant 0 : index
    %c0_154 = arith.constant 0 : index
    %205 = vector.load %arg4[%c14, %c0_153, %c0_154] : memref<25x128x128xbf16, #tpu.memory_space<vmem>>, vector<1x128x128xbf16>
    %206 = vector.shape_cast %205 : vector<1x128x128xbf16> to vector<128x128xbf16>
    %cst_155 = arith.constant dense<0.000000e+00> : vector<160x128xf32>
    %207 = tpu.matmul %204, %206, %cst_155 {dimension_numbers = #tpu.dot_dimension_numbers<[1], [0], [0], [1], [0, 0, 1, 1], [], []>} : vector<160x128xbf16>, vector<128x128xbf16>, vector<160x128xf32> -> vector<160x128xf32>
    %208 = arith.addf %203, %207 : vector<160x128xf32>
    %c48_156 = arith.constant 48 : index
    %c0_157 = arith.constant 0 : index
    %209 = vector.load %arg14[%c48_156, %c0_157] : memref<240x128xbf16, #tpu.memory_space<vmem>>, vector<160x128xbf16>
    %c15 = arith.constant 15 : index
    %c0_158 = arith.constant 0 : index
    %c0_159 = arith.constant 0 : index
    %210 = vector.load %arg4[%c15, %c0_158, %c0_159] : memref<25x128x128xbf16, #tpu.memory_space<vmem>>, vector<1x128x128xbf16>
    %211 = vector.shape_cast %210 : vector<1x128x128xbf16> to vector<128x128xbf16>
    %cst_160 = arith.constant dense<0.000000e+00> : vector<160x128xf32>
    %212 = tpu.matmul %209, %211, %cst_160 {dimension_numbers = #tpu.dot_dimension_numbers<[1], [0], [0], [1], [0, 0, 1, 1], [], []>} : vector<160x128xbf16>, vector<128x128xbf16>, vector<160x128xf32> -> vector<160x128xf32>
    %213 = arith.addf %208, %212 : vector<160x128xf32>
    %c49 = arith.constant 49 : index
    %c0_161 = arith.constant 0 : index
    %214 = vector.load %arg14[%c49, %c0_161] : memref<240x128xbf16, #tpu.memory_space<vmem>>, vector<160x128xbf16>
    %c16_162 = arith.constant 16 : index
    %c0_163 = arith.constant 0 : index
    %c0_164 = arith.constant 0 : index
    %215 = vector.load %arg4[%c16_162, %c0_163, %c0_164] : memref<25x128x128xbf16, #tpu.memory_space<vmem>>, vector<1x128x128xbf16>
    %216 = vector.shape_cast %215 : vector<1x128x128xbf16> to vector<128x128xbf16>
    %cst_165 = arith.constant dense<0.000000e+00> : vector<160x128xf32>
    %217 = tpu.matmul %214, %216, %cst_165 {dimension_numbers = #tpu.dot_dimension_numbers<[1], [0], [0], [1], [0, 0, 1, 1], [], []>} : vector<160x128xbf16>, vector<128x128xbf16>, vector<160x128xf32> -> vector<160x128xf32>
    %218 = arith.addf %213, %217 : vector<160x128xf32>
    %c50 = arith.constant 50 : index
    %c0_166 = arith.constant 0 : index
    %219 = vector.load %arg14[%c50, %c0_166] : memref<240x128xbf16, #tpu.memory_space<vmem>>, vector<160x128xbf16>
    %c17_167 = arith.constant 17 : index
    %c0_168 = arith.constant 0 : index
    %c0_169 = arith.constant 0 : index
    %220 = vector.load %arg4[%c17_167, %c0_168, %c0_169] : memref<25x128x128xbf16, #tpu.memory_space<vmem>>, vector<1x128x128xbf16>
    %221 = vector.shape_cast %220 : vector<1x128x128xbf16> to vector<128x128xbf16>
    %cst_170 = arith.constant dense<0.000000e+00> : vector<160x128xf32>
    %222 = tpu.matmul %219, %221, %cst_170 {dimension_numbers = #tpu.dot_dimension_numbers<[1], [0], [0], [1], [0, 0, 1, 1], [], []>} : vector<160x128xbf16>, vector<128x128xbf16>, vector<160x128xf32> -> vector<160x128xf32>
    %223 = arith.addf %218, %222 : vector<160x128xf32>
    %c51 = arith.constant 51 : index
    %c0_171 = arith.constant 0 : index
    %224 = vector.load %arg14[%c51, %c0_171] : memref<240x128xbf16, #tpu.memory_space<vmem>>, vector<160x128xbf16>
    %c18_172 = arith.constant 18 : index
    %c0_173 = arith.constant 0 : index
    %c0_174 = arith.constant 0 : index
    %225 = vector.load %arg4[%c18_172, %c0_173, %c0_174] : memref<25x128x128xbf16, #tpu.memory_space<vmem>>, vector<1x128x128xbf16>
    %226 = vector.shape_cast %225 : vector<1x128x128xbf16> to vector<128x128xbf16>
    %cst_175 = arith.constant dense<0.000000e+00> : vector<160x128xf32>
    %227 = tpu.matmul %224, %226, %cst_175 {dimension_numbers = #tpu.dot_dimension_numbers<[1], [0], [0], [1], [0, 0, 1, 1], [], []>} : vector<160x128xbf16>, vector<128x128xbf16>, vector<160x128xf32> -> vector<160x128xf32>
    %228 = arith.addf %223, %227 : vector<160x128xf32>
    %c52 = arith.constant 52 : index
    %c0_176 = arith.constant 0 : index
    %229 = vector.load %arg14[%c52, %c0_176] : memref<240x128xbf16, #tpu.memory_space<vmem>>, vector<160x128xbf16>
    %c19_177 = arith.constant 19 : index
    %c0_178 = arith.constant 0 : index
    %c0_179 = arith.constant 0 : index
    %230 = vector.load %arg4[%c19_177, %c0_178, %c0_179] : memref<25x128x128xbf16, #tpu.memory_space<vmem>>, vector<1x128x128xbf16>
    %231 = vector.shape_cast %230 : vector<1x128x128xbf16> to vector<128x128xbf16>
    %cst_180 = arith.constant dense<0.000000e+00> : vector<160x128xf32>
    %232 = tpu.matmul %229, %231, %cst_180 {dimension_numbers = #tpu.dot_dimension_numbers<[1], [0], [0], [1], [0, 0, 1, 1], [], []>} : vector<160x128xbf16>, vector<128x128xbf16>, vector<160x128xf32> -> vector<160x128xf32>
    %233 = arith.addf %228, %232 : vector<160x128xf32>
    %c64_181 = arith.constant 64 : index
    %c0_182 = arith.constant 0 : index
    %234 = vector.load %arg14[%c64_181, %c0_182] : memref<240x128xbf16, #tpu.memory_space<vmem>>, vector<160x128xbf16>
    %c20_183 = arith.constant 20 : index
    %c0_184 = arith.constant 0 : index
    %c0_185 = arith.constant 0 : index
    %235 = vector.load %arg4[%c20_183, %c0_184, %c0_185] : memref<25x128x128xbf16, #tpu.memory_space<vmem>>, vector<1x128x128xbf16>
    %236 = vector.shape_cast %235 : vector<1x128x128xbf16> to vector<128x128xbf16>
    %cst_186 = arith.constant dense<0.000000e+00> : vector<160x128xf32>
    %237 = tpu.matmul %234, %236, %cst_186 {dimension_numbers = #tpu.dot_dimension_numbers<[1], [0], [0], [1], [0, 0, 1, 1], [], []>} : vector<160x128xbf16>, vector<128x128xbf16>, vector<160x128xf32> -> vector<160x128xf32>
    %238 = arith.addf %233, %237 : vector<160x128xf32>
    %c65_187 = arith.constant 65 : index
    %c0_188 = arith.constant 0 : index
    %239 = vector.load %arg14[%c65_187, %c0_188] : memref<240x128xbf16, #tpu.memory_space<vmem>>, vector<160x128xbf16>
    %c21 = arith.constant 21 : index
    %c0_189 = arith.constant 0 : index
    %c0_190 = arith.constant 0 : index
    %240 = vector.load %arg4[%c21, %c0_189, %c0_190] : memref<25x128x128xbf16, #tpu.memory_space<vmem>>, vector<1x128x128xbf16>
    %241 = vector.shape_cast %240 : vector<1x128x128xbf16> to vector<128x128xbf16>
    %cst_191 = arith.constant dense<0.000000e+00> : vector<160x128xf32>
    %242 = tpu.matmul %239, %241, %cst_191 {dimension_numbers = #tpu.dot_dimension_numbers<[1], [0], [0], [1], [0, 0, 1, 1], [], []>} : vector<160x128xbf16>, vector<128x128xbf16>, vector<160x128xf32> -> vector<160x128xf32>
    %243 = arith.addf %238, %242 : vector<160x128xf32>
    %c66 = arith.constant 66 : index
    %c0_192 = arith.constant 0 : index
    %244 = vector.load %arg14[%c66, %c0_192] : memref<240x128xbf16, #tpu.memory_space<vmem>>, vector<160x128xbf16>
    %c22 = arith.constant 22 : index
    %c0_193 = arith.constant 0 : index
    %c0_194 = arith.constant 0 : index
    %245 = vector.load %arg4[%c22, %c0_193, %c0_194] : memref<25x128x128xbf16, #tpu.memory_space<vmem>>, vector<1x128x128xbf16>
    %246 = vector.shape_cast %245 : vector<1x128x128xbf16> to vector<128x128xbf16>
    %cst_195 = arith.constant dense<0.000000e+00> : vector<160x128xf32>
    %247 = tpu.matmul %244, %246, %cst_195 {dimension_numbers = #tpu.dot_dimension_numbers<[1], [0], [0], [1], [0, 0, 1, 1], [], []>} : vector<160x128xbf16>, vector<128x128xbf16>, vector<160x128xf32> -> vector<160x128xf32>
    %248 = arith.addf %243, %247 : vector<160x128xf32>
    %c67 = arith.constant 67 : index
    %c0_196 = arith.constant 0 : index
    %249 = vector.load %arg14[%c67, %c0_196] : memref<240x128xbf16, #tpu.memory_space<vmem>>, vector<160x128xbf16>
    %c23 = arith.constant 23 : index
    %c0_197 = arith.constant 0 : index
    %c0_198 = arith.constant 0 : index
    %250 = vector.load %arg4[%c23, %c0_197, %c0_198] : memref<25x128x128xbf16, #tpu.memory_space<vmem>>, vector<1x128x128xbf16>
    %251 = vector.shape_cast %250 : vector<1x128x128xbf16> to vector<128x128xbf16>
    %cst_199 = arith.constant dense<0.000000e+00> : vector<160x128xf32>
    %252 = tpu.matmul %249, %251, %cst_199 {dimension_numbers = #tpu.dot_dimension_numbers<[1], [0], [0], [1], [0, 0, 1, 1], [], []>} : vector<160x128xbf16>, vector<128x128xbf16>, vector<160x128xf32> -> vector<160x128xf32>
    %253 = arith.addf %248, %252 : vector<160x128xf32>
    %c68 = arith.constant 68 : index
    %c0_200 = arith.constant 0 : index
    %254 = vector.load %arg14[%c68, %c0_200] : memref<240x128xbf16, #tpu.memory_space<vmem>>, vector<160x128xbf16>
    %c24 = arith.constant 24 : index
    %c0_201 = arith.constant 0 : index
    %c0_202 = arith.constant 0 : index
    %255 = vector.load %arg4[%c24, %c0_201, %c0_202] : memref<25x128x128xbf16, #tpu.memory_space<vmem>>, vector<1x128x128xbf16>
    %256 = vector.shape_cast %255 : vector<1x128x128xbf16> to vector<128x128xbf16>
    %cst_203 = arith.constant dense<0.000000e+00> : vector<160x128xf32>
    %257 = tpu.matmul %254, %256, %cst_203 {dimension_numbers = #tpu.dot_dimension_numbers<[1], [0], [0], [1], [0, 0, 1, 1], [], []>} : vector<160x128xbf16>, vector<128x128xbf16>, vector<160x128xf32> -> vector<160x128xf32>
    %258 = arith.addf %253, %257 : vector<160x128xf32>
    %c0_204 = arith.constant 0 : index
    %c0_205 = arith.constant 0 : index
    %259 = vector.load %arg5[%c0_204, %c0_205] : memref<1x128xf32, #tpu.memory_space<vmem>>, vector<1x128xf32>
    %260 = vector.broadcast %259 : vector<1x128xf32> to vector<160x128xf32>
    %261 = arith.addf %258, %260 : vector<160x128xf32>
    %cst_206 = arith.constant 0.000000e+00 : f32
    %262 = vector.broadcast %cst_206 : f32 to vector<160x128xf32>
    %263 = arith.maximumf %261, %262 : vector<160x128xf32>
    %c0_207 = arith.constant 0 : index
    %c0_208 = arith.constant 0 : index
    %264 = vector.load %arg15[%c0_207, %c0_208] : memref<160x128xf32, #tpu.memory_space<vmem>>, vector<160x128xf32>
    tpu.vector_store %arg15[%c0_207, %c0_208], %263 {strides = array<i32>} : memref<160x128xf32, #tpu.memory_space<vmem>>, vector<160x128xf32>,
    %c0_209 = arith.constant 0 : index
    %c0_210 = arith.constant 0 : index
    %265 = tpu.strided_load %arg15[%c0_209, %c0_210] {strides = array<i32: 2, 1>} : memref<160x128xf32, #tpu.memory_space<vmem>>, vector<5x128xf32>
    %c1_211 = arith.constant 1 : index
    %c0_212 = arith.constant 0 : index
    %266 = tpu.strided_load %arg15[%c1_211, %c0_212] {strides = array<i32: 2, 1>} : memref<160x128xf32, #tpu.memory_space<vmem>>, vector<5x128xf32>
    %267 = arith.maximumf %265, %266 : vector<5x128xf32>
    %c16_213 = arith.constant 16 : index
    %c0_214 = arith.constant 0 : index
    %268 = tpu.strided_load %arg15[%c16_213, %c0_214] {strides = array<i32: 2, 1>} : memref<160x128xf32, #tpu.memory_space<vmem>>, vector<5x128xf32>
    %c17_215 = arith.constant 17 : index
    %c0_216 = arith.constant 0 : index
    %269 = tpu.strided_load %arg15[%c17_215, %c0_216] {strides = array<i32: 2, 1>} : memref<160x128xf32, #tpu.memory_space<vmem>>, vector<5x128xf32>
    %270 = arith.maximumf %268, %269 : vector<5x128xf32>
    %271 = arith.maximumf %267, %270 : vector<5x128xf32>
    %272 = arith.truncf %271 : vector<5x128xf32> to vector<5x128xbf16>
    %273 = vector.extract_strided_slice %272 {offsets = [0, 0], sizes = [1, 128], strides = [1, 1]} : vector<5x128xbf16> to vector<1x128xbf16>
    %c0_217 = arith.constant 0 : index
    %c0_218 = arith.constant 0 : index
    %274 = vector.load %arg16[%c0_217, %c0_218] : memref<8x3200xbf16, #tpu.memory_space<vmem>>, vector<1x128xbf16>
    tpu.vector_store %arg16[%c0_217, %c0_218], %273 {strides = array<i32>} : memref<8x3200xbf16, #tpu.memory_space<vmem>>, vector<1x128xbf16>,
    %275 = vector.extract_strided_slice %272 {offsets = [1, 0], sizes = [1, 128], strides = [1, 1]} : vector<5x128xbf16> to vector<1x128xbf16>
    %c0_219 = arith.constant 0 : index
    %c128_220 = arith.constant 128 : index
    %276 = vector.load %arg16[%c0_219, %c128_220] : memref<8x3200xbf16, #tpu.memory_space<vmem>>, vector<1x128xbf16>
    tpu.vector_store %arg16[%c0_219, %c128_220], %275 {strides = array<i32>} : memref<8x3200xbf16, #tpu.memory_space<vmem>>, vector<1x128xbf16>,
    %277 = vector.extract_strided_slice %272 {offsets = [2, 0], sizes = [1, 128], strides = [1, 1]} : vector<5x128xbf16> to vector<1x128xbf16>
    %c0_221 = arith.constant 0 : index
    %c256_222 = arith.constant 256 : index
    %278 = vector.load %arg16[%c0_221, %c256_222] : memref<8x3200xbf16, #tpu.memory_space<vmem>>, vector<1x128xbf16>
    tpu.vector_store %arg16[%c0_221, %c256_222], %277 {strides = array<i32>} : memref<8x3200xbf16, #tpu.memory_space<vmem>>, vector<1x128xbf16>,
    %279 = vector.extract_strided_slice %272 {offsets = [3, 0], sizes = [1, 128], strides = [1, 1]} : vector<5x128xbf16> to vector<1x128xbf16>
    %c0_223 = arith.constant 0 : index
    %c384_224 = arith.constant 384 : index
    %280 = vector.load %arg16[%c0_223, %c384_224] : memref<8x3200xbf16, #tpu.memory_space<vmem>>, vector<1x128xbf16>
    tpu.vector_store %arg16[%c0_223, %c384_224], %279 {strides = array<i32>} : memref<8x3200xbf16, #tpu.memory_space<vmem>>, vector<1x128xbf16>,
    %281 = vector.extract_strided_slice %272 {offsets = [4, 0], sizes = [1, 128], strides = [1, 1]} : vector<5x128xbf16> to vector<1x128xbf16>
    %c0_225 = arith.constant 0 : index
    %c512_226 = arith.constant 512 : index
    %282 = vector.load %arg16[%c0_225, %c512_226] : memref<8x3200xbf16, #tpu.memory_space<vmem>>, vector<1x128xbf16>
    tpu.vector_store %arg16[%c0_225, %c512_226], %281 {strides = array<i32>} : memref<8x3200xbf16, #tpu.memory_space<vmem>>, vector<1x128xbf16>,
    %c32_227 = arith.constant 32 : index
    %c0_228 = arith.constant 0 : index
    %283 = tpu.strided_load %arg15[%c32_227, %c0_228] {strides = array<i32: 2, 1>} : memref<160x128xf32, #tpu.memory_space<vmem>>, vector<5x128xf32>
    %c33_229 = arith.constant 33 : index
    %c0_230 = arith.constant 0 : index
    %284 = tpu.strided_load %arg15[%c33_229, %c0_230] {strides = array<i32: 2, 1>} : memref<160x128xf32, #tpu.memory_space<vmem>>, vector<5x128xf32>
    %285 = arith.maximumf %283, %284 : vector<5x128xf32>
    %c48_231 = arith.constant 48 : index
    %c0_232 = arith.constant 0 : index
    %286 = tpu.strided_load %arg15[%c48_231, %c0_232] {strides = array<i32: 2, 1>} : memref<160x128xf32, #tpu.memory_space<vmem>>, vector<5x128xf32>
    %c49_233 = arith.constant 49 : index
    %c0_234 = arith.constant 0 : index
    %287 = tpu.strided_load %arg15[%c49_233, %c0_234] {strides = array<i32: 2, 1>} : memref<160x128xf32, #tpu.memory_space<vmem>>, vector<5x128xf32>
    %288 = arith.maximumf %286, %287 : vector<5x128xf32>
    %289 = arith.maximumf %285, %288 : vector<5x128xf32>
    %290 = arith.truncf %289 : vector<5x128xf32> to vector<5x128xbf16>
    %291 = vector.extract_strided_slice %290 {offsets = [0, 0], sizes = [1, 128], strides = [1, 1]} : vector<5x128xbf16> to vector<1x128xbf16>
    %c0_235 = arith.constant 0 : index
    %c640_236 = arith.constant 640 : index
    %292 = vector.load %arg16[%c0_235, %c640_236] : memref<8x3200xbf16, #tpu.memory_space<vmem>>, vector<1x128xbf16>
    tpu.vector_store %arg16[%c0_235, %c640_236], %291 {strides = array<i32>} : memref<8x3200xbf16, #tpu.memory_space<vmem>>, vector<1x128xbf16>,
    %293 = vector.extract_strided_slice %290 {offsets = [1, 0], sizes = [1, 128], strides = [1, 1]} : vector<5x128xbf16> to vector<1x128xbf16>
    %c0_237 = arith.constant 0 : index
    %c768_238 = arith.constant 768 : index
    %294 = vector.load %arg16[%c0_237, %c768_238] : memref<8x3200xbf16, #tpu.memory_space<vmem>>, vector<1x128xbf16>
    tpu.vector_store %arg16[%c0_237, %c768_238], %293 {strides = array<i32>} : memref<8x3200xbf16, #tpu.memory_space<vmem>>, vector<1x128xbf16>,
    %295 = vector.extract_strided_slice %290 {offsets = [2, 0], sizes = [1, 128], strides = [1, 1]} : vector<5x128xbf16> to vector<1x128xbf16>
    %c0_239 = arith.constant 0 : index
    %c896 = arith.constant 896 : index
    %296 = vector.load %arg16[%c0_239, %c896] : memref<8x3200xbf16, #tpu.memory_space<vmem>>, vector<1x128xbf16>
    tpu.vector_store %arg16[%c0_239, %c896], %295 {strides = array<i32>} : memref<8x3200xbf16, #tpu.memory_space<vmem>>, vector<1x128xbf16>,
    %297 = vector.extract_strided_slice %290 {offsets = [3, 0], sizes = [1, 128], strides = [1, 1]} : vector<5x128xbf16> to vector<1x128xbf16>
    %c0_240 = arith.constant 0 : index
    %c1024 = arith.constant 1024 : index
    %298 = vector.load %arg16[%c0_240, %c1024] : memref<8x3200xbf16, #tpu.memory_space<vmem>>, vector<1x128xbf16>
    tpu.vector_store %arg16[%c0_240, %c1024], %297 {strides = array<i32>} : memref<8x3200xbf16, #tpu.memory_space<vmem>>, vector<1x128xbf16>,
    %299 = vector.extract_strided_slice %290 {offsets = [4, 0], sizes = [1, 128], strides = [1, 1]} : vector<5x128xbf16> to vector<1x128xbf16>
    %c0_241 = arith.constant 0 : index
    %c1152 = arith.constant 1152 : index
    %300 = vector.load %arg16[%c0_241, %c1152] : memref<8x3200xbf16, #tpu.memory_space<vmem>>, vector<1x128xbf16>
    tpu.vector_store %arg16[%c0_241, %c1152], %299 {strides = array<i32>} : memref<8x3200xbf16, #tpu.memory_space<vmem>>, vector<1x128xbf16>,
    %c64_242 = arith.constant 64 : index
    %c0_243 = arith.constant 0 : index
    %301 = tpu.strided_load %arg15[%c64_242, %c0_243] {strides = array<i32: 2, 1>} : memref<160x128xf32, #tpu.memory_space<vmem>>, vector<5x128xf32>
    %c65_244 = arith.constant 65 : index
    %c0_245 = arith.constant 0 : index
    %302 = tpu.strided_load %arg15[%c65_244, %c0_245] {strides = array<i32: 2, 1>} : memref<160x128xf32, #tpu.memory_space<vmem>>, vector<5x128xf32>
    %303 = arith.maximumf %301, %302 : vector<5x128xf32>
    %c80_246 = arith.constant 80 : index
    %c0_247 = arith.constant 0 : index
    %304 = tpu.strided_load %arg15[%c80_246, %c0_247] {strides = array<i32: 2, 1>} : memref<160x128xf32, #tpu.memory_space<vmem>>, vector<5x128xf32>
    %c81 = arith.constant 81 : index
    %c0_248 = arith.constant 0 : index
    %305 = tpu.strided_load %arg15[%c81, %c0_248] {strides = array<i32: 2, 1>} : memref<160x128xf32, #tpu.memory_space<vmem>>, vector<5x128xf32>
    %306 = arith.maximumf %304, %305 : vector<5x128xf32>
    %307 = arith.maximumf %303, %306 : vector<5x128xf32>
    %308 = arith.truncf %307 : vector<5x128xf32> to vector<5x128xbf16>
    %309 = vector.extract_strided_slice %308 {offsets = [0, 0], sizes = [1, 128], strides = [1, 1]} : vector<5x128xbf16> to vector<1x128xbf16>
    %c0_249 = arith.constant 0 : index
    %c1280 = arith.constant 1280 : index
    %310 = vector.load %arg16[%c0_249, %c1280] : memref<8x3200xbf16, #tpu.memory_space<vmem>>, vector<1x128xbf16>
    tpu.vector_store %arg16[%c0_249, %c1280], %309 {strides = array<i32>} : memref<8x3200xbf16, #tpu.memory_space<vmem>>, vector<1x128xbf16>,
    %311 = vector.extract_strided_slice %308 {offsets = [1, 0], sizes = [1, 128], strides = [1, 1]} : vector<5x128xbf16> to vector<1x128xbf16>
    %c0_250 = arith.constant 0 : index
    %c1408 = arith.constant 1408 : index
    %312 = vector.load %arg16[%c0_250, %c1408] : memref<8x3200xbf16, #tpu.memory_space<vmem>>, vector<1x128xbf16>
    tpu.vector_store %arg16[%c0_250, %c1408], %311 {strides = array<i32>} : memref<8x3200xbf16, #tpu.memory_space<vmem>>, vector<1x128xbf16>,
    %313 = vector.extract_strided_slice %308 {offsets = [2, 0], sizes = [1, 128], strides = [1, 1]} : vector<5x128xbf16> to vector<1x128xbf16>
    %c0_251 = arith.constant 0 : index
    %c1536 = arith.constant 1536 : index
    %314 = vector.load %arg16[%c0_251, %c1536] : memref<8x3200xbf16, #tpu.memory_space<vmem>>, vector<1x128xbf16>
    tpu.vector_store %arg16[%c0_251, %c1536], %313 {strides = array<i32>} : memref<8x3200xbf16, #tpu.memory_space<vmem>>, vector<1x128xbf16>,
    %315 = vector.extract_strided_slice %308 {offsets = [3, 0], sizes = [1, 128], strides = [1, 1]} : vector<5x128xbf16> to vector<1x128xbf16>
    %c0_252 = arith.constant 0 : index
    %c1664 = arith.constant 1664 : index
    %316 = vector.load %arg16[%c0_252, %c1664] : memref<8x3200xbf16, #tpu.memory_space<vmem>>, vector<1x128xbf16>
    tpu.vector_store %arg16[%c0_252, %c1664], %315 {strides = array<i32>} : memref<8x3200xbf16, #tpu.memory_space<vmem>>, vector<1x128xbf16>,
    %317 = vector.extract_strided_slice %308 {offsets = [4, 0], sizes = [1, 128], strides = [1, 1]} : vector<5x128xbf16> to vector<1x128xbf16>
    %c0_253 = arith.constant 0 : index
    %c1792 = arith.constant 1792 : index
    %318 = vector.load %arg16[%c0_253, %c1792] : memref<8x3200xbf16, #tpu.memory_space<vmem>>, vector<1x128xbf16>
    tpu.vector_store %arg16[%c0_253, %c1792], %317 {strides = array<i32>} : memref<8x3200xbf16, #tpu.memory_space<vmem>>, vector<1x128xbf16>,
    %c96_254 = arith.constant 96 : index
    %c0_255 = arith.constant 0 : index
    %319 = tpu.strided_load %arg15[%c96_254, %c0_255] {strides = array<i32: 2, 1>} : memref<160x128xf32, #tpu.memory_space<vmem>>, vector<5x128xf32>
    %c97_256 = arith.constant 97 : index
    %c0_257 = arith.constant 0 : index
    %320 = tpu.strided_load %arg15[%c97_256, %c0_257] {strides = array<i32: 2, 1>} : memref<160x128xf32, #tpu.memory_space<vmem>>, vector<5x128xf32>
    %321 = arith.maximumf %319, %320 : vector<5x128xf32>
    %c112_258 = arith.constant 112 : index
    %c0_259 = arith.constant 0 : index
    %322 = tpu.strided_load %arg15[%c112_258, %c0_259] {strides = array<i32: 2, 1>} : memref<160x128xf32, #tpu.memory_space<vmem>>, vector<5x128xf32>
    %c113 = arith.constant 113 : index
    %c0_260 = arith.constant 0 : index
    %323 = tpu.strided_load %arg15[%c113, %c0_260] {strides = array<i32: 2, 1>} : memref<160x128xf32, #tpu.memory_space<vmem>>, vector<5x128xf32>
    %324 = arith.maximumf %322, %323 : vector<5x128xf32>
    %325 = arith.maximumf %321, %324 : vector<5x128xf32>
    %326 = arith.truncf %325 : vector<5x128xf32> to vector<5x128xbf16>
    %327 = vector.extract_strided_slice %326 {offsets = [0, 0], sizes = [1, 128], strides = [1, 1]} : vector<5x128xbf16> to vector<1x128xbf16>
    %c0_261 = arith.constant 0 : index
    %c1920 = arith.constant 1920 : index
    %328 = vector.load %arg16[%c0_261, %c1920] : memref<8x3200xbf16, #tpu.memory_space<vmem>>, vector<1x128xbf16>
    tpu.vector_store %arg16[%c0_261, %c1920], %327 {strides = array<i32>} : memref<8x3200xbf16, #tpu.memory_space<vmem>>, vector<1x128xbf16>,
    %329 = vector.extract_strided_slice %326 {offsets = [1, 0], sizes = [1, 128], strides = [1, 1]} : vector<5x128xbf16> to vector<1x128xbf16>
    %c0_262 = arith.constant 0 : index
    %c2048 = arith.constant 2048 : index
    %330 = vector.load %arg16[%c0_262, %c2048] : memref<8x3200xbf16, #tpu.memory_space<vmem>>, vector<1x128xbf16>
    tpu.vector_store %arg16[%c0_262, %c2048], %329 {strides = array<i32>} : memref<8x3200xbf16, #tpu.memory_space<vmem>>, vector<1x128xbf16>,
    %331 = vector.extract_strided_slice %326 {offsets = [2, 0], sizes = [1, 128], strides = [1, 1]} : vector<5x128xbf16> to vector<1x128xbf16>
    %c0_263 = arith.constant 0 : index
    %c2176 = arith.constant 2176 : index
    %332 = vector.load %arg16[%c0_263, %c2176] : memref<8x3200xbf16, #tpu.memory_space<vmem>>, vector<1x128xbf16>
    tpu.vector_store %arg16[%c0_263, %c2176], %331 {strides = array<i32>} : memref<8x3200xbf16, #tpu.memory_space<vmem>>, vector<1x128xbf16>,
    %333 = vector.extract_strided_slice %326 {offsets = [3, 0], sizes = [1, 128], strides = [1, 1]} : vector<5x128xbf16> to vector<1x128xbf16>
    %c0_264 = arith.constant 0 : index
    %c2304 = arith.constant 2304 : index
    %334 = vector.load %arg16[%c0_264, %c2304] : memref<8x3200xbf16, #tpu.memory_space<vmem>>, vector<1x128xbf16>
    tpu.vector_store %arg16[%c0_264, %c2304], %333 {strides = array<i32>} : memref<8x3200xbf16, #tpu.memory_space<vmem>>, vector<1x128xbf16>,
    %335 = vector.extract_strided_slice %326 {offsets = [4, 0], sizes = [1, 128], strides = [1, 1]} : vector<5x128xbf16> to vector<1x128xbf16>
    %c0_265 = arith.constant 0 : index
    %c2432 = arith.constant 2432 : index
    %336 = vector.load %arg16[%c0_265, %c2432] : memref<8x3200xbf16, #tpu.memory_space<vmem>>, vector<1x128xbf16>
    tpu.vector_store %arg16[%c0_265, %c2432], %335 {strides = array<i32>} : memref<8x3200xbf16, #tpu.memory_space<vmem>>, vector<1x128xbf16>,
    %c128_266 = arith.constant 128 : index
    %c0_267 = arith.constant 0 : index
    %337 = tpu.strided_load %arg15[%c128_266, %c0_267] {strides = array<i32: 2, 1>} : memref<160x128xf32, #tpu.memory_space<vmem>>, vector<5x128xf32>
    %c129_268 = arith.constant 129 : index
    %c0_269 = arith.constant 0 : index
    %338 = tpu.strided_load %arg15[%c129_268, %c0_269] {strides = array<i32: 2, 1>} : memref<160x128xf32, #tpu.memory_space<vmem>>, vector<5x128xf32>
    %339 = arith.maximumf %337, %338 : vector<5x128xf32>
    %c144_270 = arith.constant 144 : index
    %c0_271 = arith.constant 0 : index
    %340 = tpu.strided_load %arg15[%c144_270, %c0_271] {strides = array<i32: 2, 1>} : memref<160x128xf32, #tpu.memory_space<vmem>>, vector<5x128xf32>
    %c145 = arith.constant 145 : index
    %c0_272 = arith.constant 0 : index
    %341 = tpu.strided_load %arg15[%c145, %c0_272] {strides = array<i32: 2, 1>} : memref<160x128xf32, #tpu.memory_space<vmem>>, vector<5x128xf32>
    %342 = arith.maximumf %340, %341 : vector<5x128xf32>
    %343 = arith.maximumf %339, %342 : vector<5x128xf32>
    %344 = arith.truncf %343 : vector<5x128xf32> to vector<5x128xbf16>
    %345 = vector.extract_strided_slice %344 {offsets = [0, 0], sizes = [1, 128], strides = [1, 1]} : vector<5x128xbf16> to vector<1x128xbf16>
    %c0_273 = arith.constant 0 : index
    %c2560 = arith.constant 2560 : index
    %346 = vector.load %arg16[%c0_273, %c2560] : memref<8x3200xbf16, #tpu.memory_space<vmem>>, vector<1x128xbf16>
    tpu.vector_store %arg16[%c0_273, %c2560], %345 {strides = array<i32>} : memref<8x3200xbf16, #tpu.memory_space<vmem>>, vector<1x128xbf16>,
    %347 = vector.extract_strided_slice %344 {offsets = [1, 0], sizes = [1, 128], strides = [1, 1]} : vector<5x128xbf16> to vector<1x128xbf16>
    %c0_274 = arith.constant 0 : index
    %c2688 = arith.constant 2688 : index
    %348 = vector.load %arg16[%c0_274, %c2688] : memref<8x3200xbf16, #tpu.memory_space<vmem>>, vector<1x128xbf16>
    tpu.vector_store %arg16[%c0_274, %c2688], %347 {strides = array<i32>} : memref<8x3200xbf16, #tpu.memory_space<vmem>>, vector<1x128xbf16>,
    %349 = vector.extract_strided_slice %344 {offsets = [2, 0], sizes = [1, 128], strides = [1, 1]} : vector<5x128xbf16> to vector<1x128xbf16>
    %c0_275 = arith.constant 0 : index
    %c2816 = arith.constant 2816 : index
    %350 = vector.load %arg16[%c0_275, %c2816] : memref<8x3200xbf16, #tpu.memory_space<vmem>>, vector<1x128xbf16>
    tpu.vector_store %arg16[%c0_275, %c2816], %349 {strides = array<i32>} : memref<8x3200xbf16, #tpu.memory_space<vmem>>, vector<1x128xbf16>,
    %351 = vector.extract_strided_slice %344 {offsets = [3, 0], sizes = [1, 128], strides = [1, 1]} : vector<5x128xbf16> to vector<1x128xbf16>
    %c0_276 = arith.constant 0 : index
    %c2944 = arith.constant 2944 : index
    %352 = vector.load %arg16[%c0_276, %c2944] : memref<8x3200xbf16, #tpu.memory_space<vmem>>, vector<1x128xbf16>
    tpu.vector_store %arg16[%c0_276, %c2944], %351 {strides = array<i32>} : memref<8x3200xbf16, #tpu.memory_space<vmem>>, vector<1x128xbf16>,
    %353 = vector.extract_strided_slice %344 {offsets = [4, 0], sizes = [1, 128], strides = [1, 1]} : vector<5x128xbf16> to vector<1x128xbf16>
    %c0_277 = arith.constant 0 : index
    %c3072 = arith.constant 3072 : index
    %354 = vector.load %arg16[%c0_277, %c3072] : memref<8x3200xbf16, #tpu.memory_space<vmem>>, vector<1x128xbf16>
    tpu.vector_store %arg16[%c0_277, %c3072], %353 {strides = array<i32>} : memref<8x3200xbf16, #tpu.memory_space<vmem>>, vector<1x128xbf16>,
    %c0_278 = arith.constant 0 : index
    %c0_279 = arith.constant 0 : index
    %355 = vector.load %arg16[%c0_278, %c0_279] : memref<8x3200xbf16, #tpu.memory_space<vmem>>, vector<8x3200xbf16>
    %c0_280 = arith.constant 0 : index
    %c0_281 = arith.constant 0 : index
    %356 = vector.load %arg6[%c0_280, %c0_281] : memref<3200x128xbf16, #tpu.memory_space<vmem>>, vector<3200x128xbf16>
    %cst_282 = arith.constant dense<0.000000e+00> : vector<8x128xf32>
    %357 = tpu.matmul %355, %356, %cst_282 {dimension_numbers = #tpu.dot_dimension_numbers<[1], [0], [0], [1], [0, 0, 1, 1], [], []>} : vector<8x3200xbf16>, vector<3200x128xbf16>, vector<8x128xf32> -> vector<8x128xf32>
    %c0_283 = arith.constant 0 : index
    %c0_284 = arith.constant 0 : index
    %358 = vector.load %arg7[%c0_283, %c0_284] : memref<1x128xf32, #tpu.memory_space<vmem>>, vector<1x128xf32>
    %359 = vector.broadcast %358 : vector<1x128xf32> to vector<8x128xf32>
    %360 = arith.addf %357, %359 : vector<8x128xf32>
    %cst_285 = arith.constant 0.000000e+00 : f32
    %361 = vector.broadcast %cst_285 : f32 to vector<8x128xf32>
    %362 = arith.maximumf %360, %361 : vector<8x128xf32>
    %363 = arith.truncf %362 : vector<8x128xf32> to vector<8x128xbf16>
    %c0_286 = arith.constant 0 : index
    %c0_287 = arith.constant 0 : index
    %364 = vector.load %arg8[%c0_286, %c0_287] : memref<128x128xbf16, #tpu.memory_space<vmem>>, vector<128x128xbf16>
    %cst_288 = arith.constant dense<0.000000e+00> : vector<8x128xf32>
    %365 = tpu.matmul %363, %364, %cst_288 {dimension_numbers = #tpu.dot_dimension_numbers<[1], [0], [0], [1], [0, 0, 1, 1], [], []>} : vector<8x128xbf16>, vector<128x128xbf16>, vector<8x128xf32> -> vector<8x128xf32>
    %c0_289 = arith.constant 0 : index
    %c0_290 = arith.constant 0 : index
    %366 = vector.load %arg9[%c0_289, %c0_290] : memref<1x128xf32, #tpu.memory_space<vmem>>, vector<1x128xf32>
    %367 = vector.broadcast %366 : vector<1x128xf32> to vector<8x128xf32>
    %368 = arith.addf %365, %367 : vector<8x128xf32>
    %cst_291 = arith.constant 0.000000e+00 : f32
    %369 = vector.broadcast %cst_291 : f32 to vector<8x128xf32>
    %370 = arith.maximumf %368, %369 : vector<8x128xf32>
    %371 = arith.truncf %370 : vector<8x128xf32> to vector<8x128xbf16>
    %c0_292 = arith.constant 0 : index
    %c0_293 = arith.constant 0 : index
    %372 = vector.load %arg10[%c0_292, %c0_293] : memref<128x128xbf16, #tpu.memory_space<vmem>>, vector<128x128xbf16>
    %cst_294 = arith.constant dense<0.000000e+00> : vector<8x128xf32>
    %373 = tpu.matmul %371, %372, %cst_294 {dimension_numbers = #tpu.dot_dimension_numbers<[1], [0], [0], [1], [0, 0, 1, 1], [], []>} : vector<8x128xbf16>, vector<128x128xbf16>, vector<8x128xf32> -> vector<8x128xf32>
    %c0_295 = arith.constant 0 : index
    %c0_296 = arith.constant 0 : index
    %374 = vector.load %arg11[%c0_295, %c0_296] : memref<1x128xf32, #tpu.memory_space<vmem>>, vector<1x128xf32>
    %375 = vector.broadcast %374 : vector<1x128xf32> to vector<8x128xf32>
    %376 = arith.addf %373, %375 : vector<8x128xf32>
    %c0_297 = arith.constant 0 : index
    %c0_298 = arith.constant 0 : index
    %c0_299 = arith.constant 0 : index
    %377 = vector.load %arg12[%c0_297, %c0_298, %c0_299] : memref<1x8x128xf32, #tpu.memory_space<vmem>>, vector<1x8x128xf32>
    %378 = vector.shape_cast %377 : vector<1x8x128xf32> to vector<8x128xf32>
    %379 = vector.shape_cast %376 : vector<8x128xf32> to vector<1x8x128xf32>
    tpu.vector_store %arg12[%c0_297, %c0_298, %c0_299], %379 {strides = array<i32>} : memref<1x8x128xf32, #tpu.memory_space<vmem>>, vector<1x8x128xf32>,
    return
  }
  func.func @transform_0(%arg0: i32) -> (i32, i32) {
    %c0_i32 = arith.constant 0 : i32
    %c0_i32_0 = arith.constant 0 : i32
    return %arg0, %c0_i32 : i32, i32
  }
  func.func @transform_1(%arg0: i32) -> (i32, i32) {
    %c0_i32 = arith.constant 0 : i32
    %c0_i32_0 = arith.constant 0 : i32
    %c0_i32_1 = arith.constant 0 : i32
    return %c0_i32, %c0_i32_0 : i32, i32
  }
  func.func @transform_2(%arg0: i32) -> (i32, i32) {
    %c0_i32 = arith.constant 0 : i32
    %c0_i32_0 = arith.constant 0 : i32
    %c0_i32_1 = arith.constant 0 : i32
    return %c0_i32, %c0_i32_0 : i32, i32
  }
  func.func @transform_3(%arg0: i32) -> (i32, i32, i32) {
    %c0_i32 = arith.constant 0 : i32
    %c0_i32_0 = arith.constant 0 : i32
    %c0_i32_1 = arith.constant 0 : i32
    %c0_i32_2 = arith.constant 0 : i32
    return %c0_i32, %c0_i32_0, %c0_i32_1 : i32, i32, i32
  }
  func.func @transform_4(%arg0: i32) -> (i32, i32) {
    %c0_i32 = arith.constant 0 : i32
    %c0_i32_0 = arith.constant 0 : i32
    %c0_i32_1 = arith.constant 0 : i32
    return %c0_i32, %c0_i32_0 : i32, i32
  }
  func.func @transform_5(%arg0: i32) -> (i32, i32) {
    %c0_i32 = arith.constant 0 : i32
    %c0_i32_0 = arith.constant 0 : i32
    %c0_i32_1 = arith.constant 0 : i32
    return %c0_i32, %c0_i32_0 : i32, i32
  }
  func.func @transform_6(%arg0: i32) -> (i32, i32) {
    %c0_i32 = arith.constant 0 : i32
    %c0_i32_0 = arith.constant 0 : i32
    %c0_i32_1 = arith.constant 0 : i32
    return %c0_i32, %c0_i32_0 : i32, i32
  }
  func.func @transform_7(%arg0: i32) -> (i32, i32) {
    %c0_i32 = arith.constant 0 : i32
    %c0_i32_0 = arith.constant 0 : i32
    %c0_i32_1 = arith.constant 0 : i32
    return %c0_i32, %c0_i32_0 : i32, i32
  }
  func.func @transform_8(%arg0: i32) -> (i32, i32) {
    %c0_i32 = arith.constant 0 : i32
    %c0_i32_0 = arith.constant 0 : i32
    %c0_i32_1 = arith.constant 0 : i32
    return %c0_i32, %c0_i32_0 : i32, i32
  }
  func.func @transform_9(%arg0: i32) -> (i32, i32) {
    %c0_i32 = arith.constant 0 : i32
    %c0_i32_0 = arith.constant 0 : i32
    %c0_i32_1 = arith.constant 0 : i32
    return %c0_i32, %c0_i32_0 : i32, i32
  }
  func.func @transform_10(%arg0: i32) -> (i32, i32) {
    %c0_i32 = arith.constant 0 : i32
    %c0_i32_0 = arith.constant 0 : i32
    %c0_i32_1 = arith.constant 0 : i32
    return %c0_i32, %c0_i32_0 : i32, i32
  }
  func.func @transform_11(%arg0: i32) -> (i32, i32, i32) {
    %c0_i32 = arith.constant 0 : i32
    %c0_i32_0 = arith.constant 0 : i32
    %c0_i32_1 = arith.constant 0 : i32
    return %arg0, %c0_i32, %c0_i32_0 : i32, i32, i32
  }
}

</mosaic_0001>

<bundles_post_ra>
// kernel: net_forward.1
= control target key start
LH: loop header
LB: loop body
LE: loop exit
PB: predicated region body
PF: predicated region fallthrough
CT: control target
= control target key end

     0   :  { %s15058_s17 = smov 0   ;;  %s17946_s0 = inlined_call_operand.vmem [shape: bf16[2048,128], index: 0, kind: input, shape index: {}]   ;;  %s17947_s1 = inlined_call_operand.vmem [shape: bf16[128,128], index: 1, kind: input, shape index: {}]   ;;  %s17948_s2 = inlined_call_operand.vmem [shape: f32[1,128], index: 2, kind: input, shape index: {}]   ;;  %s17949_s3 = inlined_call_operand.vmem [shape: bf16[25,128,128], index: 3, kind: input, shape index: {}]   ;;  %s17950_s4 = inlined_call_operand.vmem [shape: f32[1,128], index: 4, kind: input, shape index: {}]   ;;  %s17951_s5 = inlined_call_operand.vmem [shape: bf16[3200,128], index: 5, kind: input, shape index: {}]   ;;  %s17952_s6 = inlined_call_operand.vmem [shape: f32[1,128], index: 6, kind: input, shape index: {}]   ;;  %s17953_s7 = inlined_call_operand.vmem [shape: bf16[128,128], index: 7, kind: input, shape index: {}]   ;;  %s17954_s8 = inlined_call_operand.vmem [shape: f32[1,128], index: 8, kind: input, shape index: {}]   ;;  %s17955_s9 = inlined_call_operand.vmem [shape: bf16[128,128], index: 9, kind: input, shape index: {}]   ;;  %s17956_s10 = inlined_call_operand.vmem [shape: f32[1,128], index: 10, kind: input, shape index: {}]   ;;  %s17957_s11 = inlined_call_operand.vmem [shape: f32[2,8,128], index: 11, kind: output, shape index: {}]  }
   0x1 LB: > { %s15064_s18 = sadd.s32 4294967295, %s14994_s17   ;;  %p11060_p0 = scmp.ge.s32.totalorder %s14994_s17, 1  ;;  %s14994_s17 = sphi %s15058_s17, %s21_s17  }
   0x2   : > { %p338_p1 = scmp.lt.s32.totalorder %s14994_s17, 3 }
   0x4   : > { %p339_p2 = pnand %p11060_p0, %p338_p1 }
   0x6   : > { %342 = sbr.rel (%p339_p2) target bundleno = 2523 (0x9db), region = 64 }
   0xd   : > { %v14421_v0 = vld [vmem:[%s17947_s1] sm:$0xff]   ;;  %s11061_s21 = sshll.u32 %s15064_s18, 7  ;;  %v14422_v1 = vld [vmem:[%s17947_s1 + $0x8] sm:$0xff]   ;;  %v14423_v2 = vld [vmem:[%s17947_s1 + $0x10] sm:$0xff]   ;;  %vm2151_vm0 = vsmask.f32 7424 }
   0xe   : > { %p378_p3 = scmp.lt.s32.totalorder %s11061_s21, 255  ;;  %12811 = vmatprep.subr.bf16.mxu0 %v14421_v0  ;;  %v14424_v3 = vld [vmem:[%s17947_s1 + $0x18] sm:$0xff]   ;;  %v14425_v5 = vld [vmem:[%s17947_s1 + $0x20] sm:$0xff]   ;;  %v14426_v6 = vld [vmem:[%s17947_s1 + $0x28] sm:$0xff]   ;;  %vm2828_vm1 = vsmask.f32 6400 }
   0xf   : > { %12812 = vmatpush3.bf16.msra.mxu0 %v14421_v0  ;;  %v14427_v7 = vld [vmem:[%s17947_s1 + $0x30] sm:$0xff]   ;;  %v14428_v8 = vld [vmem:[%s17947_s1 + $0x38] sm:$0xff]   ;;  %v14489_v43 = vld [vmem:[%s17949_s3 + $0x40] sm:$0xff]   ;;  %vm3093_vm2 = vcmask 1045504   ;;  %vm2597_vm3 = vcmask 1046528   ;;  %vm8332_vm4 = vcmask 1040384  }
  0x10   : > { %s18185_s21 = smov (!%p378_p3, %s11061_s21), 255  ;;  %12813 = vmatprep.subr.bf16.mxu0 %v14422_v1  ;;  %v14490_v44 = vld [vmem:[%s17949_s3 + $0xc0] sm:$0xff]   ;;  %v14491_v45 = vld [vmem:[%s17949_s3 + $0x48] sm:$0xff]   ;;  %v14495_v49 = vld [vmem:[%s17949_s3 + $0x50] sm:$0xff]   ;;  %vm8333_vm5 = vsmask.f32 256 }
  0x11   : > { %s11062_s26 = sshll.u32 %s18185_s21, 2  ;;  %13063 = vmatprep.subr.bf16.mxu1 %v14490_v44  ;;  %v14493_v47 = vld [vmem:[%s17949_s3 + $0xc8] sm:$0xff]   ;;  %v14496_v50 = vld [vmem:[%s17949_s3 + $0xd0] sm:$0xff]   ;;  %v14497_v51 = vld [vmem:[%s17949_s3 + $0x58] sm:$0xff]   ;;  %vm14997_vm7 = vmmov 0   ;;  %p383_p4 = scmp.lt.s32.totalorder %s15064_s18, 1 }
  0x12   : > { %s15081_s29 = scalar_lea.vmem %s17946_s0, %s11062_s26  ;;  %13064 = vmatpush3.bf16.msra.mxu1 %v14490_v44  ;;  %v14499_v53 = vld [vmem:[%s17949_s3 + $0xd8] sm:$0xff]   ;;  %v14501_v55 = vld [vmem:[%s17949_s3 + $0x60] sm:$0xff]   ;;  %v14503_v59 = vld [vmem:[%s17949_s3 + $0x68] sm:$0xff]  }
  0x13   : > { %12814 = vmatpush3.bf16.msra.mxu0 %v14422_v1  ;;  %v14429_v4 = vld [vmem:[%s15081_s29] sm:$0xff]   ;;  %v14430_v9 = vld [vmem:[%s15081_s29 + $0x8] sm:$0xff]   ;;  %v14431_v10 = vld [vmem:[%s15081_s29 + $0x10] sm:$0xff]   ;;  %13065 = vmatprep.subr.bf16.mxu1 %v14493_v47  ;;  %s18187_s18 = smov (!%p383_p4, %s15064_s18), 1 }
  0x14   : > { %12815 = vmatprep.subr.bf16.mxu0 %v14423_v2  ;;  %12827 = vmatprep.mubr.bf16.mxu0 %v14429_v4  ;;  %v14432_v11 = vld [vmem:[%s15081_s29 + $0x18] sm:$0xff]   ;;  %v14433_v12 = vld [vmem:[%s15081_s29 + $0x20] sm:$0xff]   ;;  %v14434_v13 = vld [vmem:[%s15081_s29 + $0x28] sm:$0xff]   ;;  %s11063_s24 = sshll.u32 %s18187_s18, 3 }
  0x15   : > { %v14435_v14 = vld [vmem:[%s15081_s29 + $0x30] sm:$0xff]   ;;  %v14436_v15 = vld [vmem:[%s15081_s29 + $0x38] sm:$0xff]   ;;  %v14437_v16 = vld [vmem:[%s15081_s29 + $0x40] sm:$0xff]   ;;  %s386_s28 = scalar_lea.vmem %s17957_s11, %s11063_s24 }
  0x16   : > { %v14438_v17 = vld [vmem:[%s15081_s29 + $0x48] sm:$0xff]   ;;  %v14439_v18 = vld [vmem:[%s15081_s29 + $0x50] sm:$0xff]   ;;  %v14440_v19 = vld [vmem:[%s15081_s29 + $0x58] sm:$0xff]   ;;  %13066 = vmatpush3.bf16.msra.mxu1 %v14493_v47 }
  0x17   : > { %12816 = vmatpush3.bf16.msra.mxu0 %v14423_v2  ;;  %v14441_v20 = vld [vmem:[%s15081_s29 + $0x60] sm:$0xff]   ;;  %v14442_v21 = vld [vmem:[%s15081_s29 + $0x68] sm:$0xff]   ;;  %v14443_v22 = vld [vmem:[%s15081_s29 + $0x70] sm:$0xff]   ;;  %13067 = vmatprep.subr.bf16.mxu1 %v14496_v50 }
  0x18   : > { %12817 = vmatprep.subr.bf16.mxu0 %v14424_v3  ;;  %v14444_v23 = vld [vmem:[%s15081_s29 + $0x78] sm:$0xff]   ;;  %v14445_v24 = vld [vmem:[%s15081_s29 + $0x80] sm:$0xff]   ;;  %v14446_v25 = vld [vmem:[%s15081_s29 + $0x88] sm:$0xff]  }
  0x19   : > { %v14447_v26 = vld [vmem:[%s15081_s29 + $0x90] sm:$0xff]   ;;  %v14448_v27 = vld [vmem:[%s15081_s29 + $0x98] sm:$0xff]   ;;  %v14449_v28 = vld [vmem:[%s15081_s29 + $0xa0] sm:$0xff]  }
  0x1a   : > { %v14450_v29 = vld [vmem:[%s15081_s29 + $0xa8] sm:$0xff]   ;;  %v14451_v30 = vld [vmem:[%s15081_s29 + $0xb0] sm:$0xff]   ;;  %v14452_v31 = vld [vmem:[%s15081_s29 + $0xb8] sm:$0xff]   ;;  %13068 = vmatpush3.bf16.msra.mxu1 %v14496_v50 }
  0x1b   : > { %12818 = vmatpush3.bf16.msra.mxu0 %v14424_v3  ;;  %v14453_v32 = vld [vmem:[%s15081_s29 + $0xc0] sm:$0xff]   ;;  %v14454_v33 = vld [vmem:[%s15081_s29 + $0xc8] sm:$0xff]   ;;  %v14455_v34 = vld [vmem:[%s15081_s29 + $0xd0] sm:$0xff]   ;;  %13069 = vmatprep.subr.bf16.mxu1 %v14499_v53 }
  0x1c   : > { %12819 = vmatprep.subr.bf16.mxu0 %v14425_v5  ;;  %v14456_v35 = vld [vmem:[%s15081_s29 + $0xd8] sm:$0xff]   ;;  %v14457_v36 = vld [vmem:[%s15081_s29 + $0xe0] sm:$0xff]   ;;  %v14458_v37 = vld [vmem:[%s15081_s29 + $0xe8] sm:$0xff]  }
  0x1d   : > { %v14459_v38 = vld [vmem:[%s15081_s29 + $0xf0] sm:$0xff]   ;;  %v14460_v39 = vld [vmem:[%s15081_s29 + $0xf8] sm:$0xff]   ;;  %v14461_v40 = vld [vmem:[%s15081_s29 + $0x100] sm:$0xff]  }
  0x1e   : > { %v14462_v41 = vld [vmem:[%s15081_s29 + $0x108] sm:$0xff]   ;;  %v14463_v42 = vld [vmem:[%s15081_s29 + $0x110] sm:$0xff]   ;;  %v14464_v46 = vld [vmem:[%s15081_s29 + $0x118] sm:$0xff]   ;;  %13070 = vmatpush3.bf16.msra.mxu1 %v14499_v53 }
  0x1f   : > { %12820 = vmatpush3.bf16.msra.mxu0 %v14425_v5  ;;  %v14465_v48 = vld [vmem:[%s15081_s29 + $0x120] sm:$0xff]   ;;  %v14466_v52 = vld [vmem:[%s15081_s29 + $0x128] sm:$0xff]   ;;  %v14467_v54 = vld [vmem:[%s15081_s29 + $0x130] sm:$0xff]  }
  0x20   : > { %12821 = vmatprep.subr.bf16.mxu0 %v14426_v6  ;;  %v14502_v56 = vld [vmem:[%s17949_s3 + $0xe0] sm:$0xff]   ;;  %v14468_v57 = vld [vmem:[%s15081_s29 + $0x138] sm:$0xff]   ;;  %v14504_v60 = vld [vmem:[%s17949_s3 + $0xe8] sm:$0xff]  }
  0x21   : > { %v14469_v58 = vld [vmem:[%s15081_s29 + $0x140] sm:$0xff]   ;;  %13071 = vmatprep.subr.bf16.mxu1 %v14502_v56  ;;  %v14505_v61 = vld [vmem:[%s17949_s3 + $0x70] sm:$0xff]   ;;  %v14470_v62 = vld [vmem:[%s15081_s29 + $0x148] sm:$0xff]  }
  0x22   : > { %13072 = vmatpush3.bf16.msra.mxu1 %v14502_v56  ;;  %v14506_v63 = vld [vmem:[%s17949_s3 + $0xf0] sm:$0xff]   ;;  %v14507_v1 = vld [vmem:[%s17949_s3 + $0x78] sm:$0xff]   ;;  %v14473_v4 = vld [vmem:[%s15081_s29 + $0x160] sm:$0xff]  }
  0x23   : > { %12822 = vmatpush3.bf16.msra.mxu0 %v14426_v6  ;;  %13073 = vmatprep.subr.bf16.mxu1 %v14504_v60  ;;  %v14471_v0 = vld [vmem:[%s15081_s29 + $0x150] sm:$0xff]   ;;  %v14508_v2 = vld [vmem:[%s17949_s3 + $0xf8] sm:$0xff]   ;;  %v14474_v5 = vld [vmem:[%s15081_s29 + $0x168] sm:$0xff]  }
  0x24   : > { %12823 = vmatprep.subr.bf16.mxu0 %v14427_v7  ;;  %v14472_v3 = vld [vmem:[%s15081_s29 + $0x158] sm:$0xff]   ;;  %v14475_v6 = vld [vmem:[%s15081_s29 + $0x170] sm:$0xff]   ;;  %vm17197_vm6 = vmand %vm8332_vm4, %vm8333_vm5 }
  0x25   : > { %v14488_v47 = vld [vmem:[%s15081_s29 + $0x1d8] sm:$0xff]  }
  0x26   : > { %13074 = vmatpush3.bf16.msra.mxu1 %v14504_v60 }
  0x27   : > { %12824 = vmatpush3.bf16.msra.mxu0 %v14427_v7  ;;  %13075 = vmatprep.subr.bf16.mxu1 %v14506_v63  ;;  %v14476_v7 = vld [vmem:[%s15081_s29 + $0x178] sm:$0xff]  }
  0x28   : > { %12825 = vmatprep.subr.bf16.mxu0 %v14428_v8 }
  0x2a   : > { %13076 = vmatpush3.bf16.msra.mxu1 %v14506_v63 }
  0x2b   : > { %12826 = vmatpush3.bf16.msra.mxu0 %v14428_v8  ;;  %13077 = vmatprep.subr.bf16.mxu1 %v14508_v2  ;;  %v14477_v8 = vld [vmem:[%s15081_s29 + $0x180] sm:$0xff]  }
  0x2c   : > { %12955 = vmatprep.subr.bf16.mxu0 %v14489_v43 }
  0x2e   : > { %12828 = vmatmul.mubr.bf16.vlgmr.msra.gmra.mrb[0].mxu0 %v14430_v9  ;;  %13078 = vmatpush3.bf16.msra.mxu1 %v14508_v2  ;;  %v14478_v9 = vld [vmem:[%s15081_s29 + $0x188] sm:$0xff]  }
  0x2f   : > { %12831 = vmatprep.mubr.bf16.mxu0 %v14431_v10  ;;  %12956 = vmatpush3.bf16.msra.mxu0 %v14489_v43  ;;  %v14479_v10 = vld [vmem:[%s15081_s29 + $0x190] sm:$0xff]  }
  0x30   : > { %12957 = vmatprep.subr.bf16.mxu0 %v14491_v45 }
  0x33   : > { %12958 = vmatpush3.bf16.msra.mxu0 %v14491_v45 }
  0x34   : > { %12959 = vmatprep.subr.bf16.mxu0 %v14495_v49 }
  0x36   : > { %12832 = vmatmul.mubr.bf16.gmra.mrb[4].mxu0 %v14432_v11  ;;  %v14480_v11 = vld [vmem:[%s15081_s29 + $0x198] sm:$0xff]  }
  0x37   : > { %12835 = vmatprep.mubr.bf16.mxu0 %v14433_v12  ;;  %12960 = vmatpush3.bf16.msra.mxu0 %v14495_v49  ;;  %v14481_v12 = vld [vmem:[%s15081_s29 + $0x1a0] sm:$0xff]  }
  0x38   : > { %12961 = vmatprep.subr.bf16.mxu0 %v14497_v51 }
  0x3b   : > { %12962 = vmatpush3.bf16.msra.mxu0 %v14497_v51 }
  0x3c   : > { %12963 = vmatprep.subr.bf16.mxu0 %v14501_v55 }
  0x3e   : > { %12836 = vmatmul.mubr.bf16.gmra.mrb[8].mxu0 %v14434_v13  ;;  %v14482_v13 = vld [vmem:[%s15081_s29 + $0x1a8] sm:$0xff]  }
  0x3f   : > { %12839 = vmatprep.mubr.bf16.mxu0 %v14435_v14  ;;  %12964 = vmatpush3.bf16.msra.mxu0 %v14501_v55  ;;  %v14483_v14 = vld [vmem:[%s15081_s29 + $0x1b0] sm:$0xff]  }
  0x40   : > { %12965 = vmatprep.subr.bf16.mxu0 %v14503_v59 }
  0x43   : > { %12966 = vmatpush3.bf16.msra.mxu0 %v14503_v59 }
  0x44   : > { %12967 = vmatprep.subr.bf16.mxu0 %v14505_v61 }
  0x46   : > { %12840 = vmatmul.mubr.bf16.gmra.mrb[12].mxu0 %v14436_v15  ;;  %v15204_v15 = vld [vmem:[%s17948_s2] ss:$0 sm:$0xff] }
  0x47   : > { %12843 = vmatprep.mubr.bf16.mxu0 %v14437_v16  ;;  %12968 = vmatpush3.bf16.msra.mxu0 %v14505_v61 }
  0x48   : > { %12969 = vmatprep.subr.bf16.mxu0 %v14507_v1 }
  0x4b   : > { %12970 = vmatpush3.bf16.msra.mxu0 %v14507_v1 }
  0x4e   : > { %12844 = vmatmul.mubr.bf16.gmra.mrb[16].mxu0 %v14438_v17 }
  0x4f   : > { %12847 = vmatprep.mubr.bf16.mxu0 %v14439_v18 }
  0x56   : > { %12848 = vmatmul.mubr.bf16.gmra.mrb[20].mxu0 %v14440_v19  ;;  %v14484_v19 = vld [vmem:[%s15081_s29 + $0x1b8] sm:$0xff]  }
  0x57   : > { %12851 = vmatprep.mubr.bf16.mxu0 %v14441_v20 }
  0x5e   : > { %12852 = vmatmul.mubr.bf16.gmra.mrb[24].mxu0 %v14442_v21 }
  0x5f   : > { %12855 = vmatprep.mubr.bf16.mxu0 %v14443_v22  ;;  %v14485_v22 = vld [vmem:[%s15081_s29 + $0x1c0] sm:$0xff]  }
  0x66   : > { %12856 = vmatmul.mubr.bf16.gmra.mrb[28].mxu0 %v14444_v23 }
  0x67   : > { %12859 = vmatprep.mubr.bf16.mxu0 %v14445_v24 }
  0x6e   : > { %12860 = vmatmul.mubr.bf16.gmra.mrb[32].mxu0 %v14446_v25 }
  0x6f   : > { %12863 = vmatprep.mubr.bf16.mxu0 %v14447_v26 }
  0x76   : > { %12864 = vmatmul.mubr.bf16.gmra.mrb[36].mxu0 %v14448_v27 }
  0x77   : > { %12867 = vmatprep.mubr.bf16.mxu0 %v14449_v28 }
  0x7e   : > { %12868 = vmatmul.mubr.bf16.gmra.mrb[40].mxu0 %v14450_v29 }
  0x7f   : > { %12871 = vmatprep.mubr.bf16.mxu0 %v14451_v30 }
  0x86   : > { %12872 = vmatmul.mubr.bf16.gmra.mrb[44].mxu0 %v14452_v31 }
  0x87   : > { %12875 = vmatprep.mubr.bf16.mxu0 %v14453_v32 }
  0x8e   : > { %12876 = vmatmul.mubr.bf16.gmra.mrb[48].mxu0 %v14454_v33  ;;  %v14486_v33 = vld [vmem:[%s15081_s29 + $0x1c8] sm:$0xff]  }
  0x8f   : > { %12879 = vmatprep.mubr.bf16.mxu0 %v14455_v34 }
  0x96   : > { %12880 = vmatmul.mubr.bf16.gmra.mrb[52].mxu0 %v14456_v35 }
  0x97   : > { %12883 = vmatprep.mubr.bf16.mxu0 %v14457_v36  ;;  %v14487_v36 = vld [vmem:[%s15081_s29 + $0x1d0] sm:$0xff]  }
  0x9e   : > { %12884 = vmatmul.mubr.bf16.gmra.mrb[56].mxu0 %v14458_v37 }
  0x9f   : > { %12887 = vmatprep.mubr.bf16.mxu0 %v14459_v38 }
  0xa6   : > { %12888 = vmatmul.mubr.bf16.gmra.mrb[60].mxu0 %v14460_v39 }
  0xa7   : > { %12891 = vmatprep.mubr.bf16.mxu0 %v14461_v40 }
  0xae   : > { %12892 = vmatmul.mubr.bf16.gmra.mrb[64].mxu0 %v14462_v41 }
  0xaf   : > { %12895 = vmatprep.mubr.bf16.mxu0 %v14463_v42 }
  0xb6   : > { %12896 = vmatmul.mubr.bf16.gmra.mrb[68].mxu0 %v14464_v46 }
  0xb7   : > { %12899 = vmatprep.mubr.bf16.mxu0 %v14465_v48 }
  0xbe   : > { %12900 = vmatmul.mubr.bf16.gmra.mrb[72].mxu0 %v14466_v52  ;;  %v14492_v52 = vld [vmem:[%s15081_s29 + $0x1e0] sm:$0xff]  }
  0xbf   : > { %12903 = vmatprep.mubr.bf16.mxu0 %v14467_v54 }
  0xc6   : > { %12904 = vmatmul.mubr.bf16.gmra.mrb[76].mxu0 %v14468_v57 }
  0xc7   : > { %12907 = vmatprep.mubr.bf16.mxu0 %v14469_v58 }
  0xce   : > { %12908 = vmatmul.mubr.bf16.gmra.mrb[80].mxu0 %v14470_v62 }
  0xcf   : > { %12911 = vmatprep.mubr.bf16.mxu0 %v14471_v0 }
  0xd6   : > { %12912 = vmatmul.mubr.bf16.gmra.mrb[84].mxu0 %v14472_v3 }
  0xd7   : > { %12915 = vmatprep.mubr.bf16.mxu0 %v14473_v4 }
  0xde   : > { %12916 = vmatmul.mubr.bf16.gmra.mrb[88].mxu0 %v14474_v5 }
  0xdf   : > { %12919 = vmatprep.mubr.bf16.mxu0 %v14475_v6 }
  0xe6   : > { %12920 = vmatmul.mubr.bf16.gmra.mrb[92].mxu0 %v14476_v7 }
  0xe7   : > { %12923 = vmatprep.mubr.bf16.mxu0 %v14477_v8 }
  0xee   : > { %12924 = vmatmul.mubr.bf16.gmra.mrb[96].mxu0 %v14478_v9 }
  0xef   : > { %12927 = vmatprep.mubr.bf16.mxu0 %v14479_v10  ;;  %v14494_v10 = vld [vmem:[%s15081_s29 + $0x1e8] sm:$0xff]  }
  0xf6   : > { %12928 = vmatmul.mubr.bf16.gmra.mrb[100].mxu0 %v14480_v11 }
  0xf7   : > { %12931 = vmatprep.mubr.bf16.mxu0 %v14481_v12 }
  0xfe   : > { %12932 = vmatmul.mubr.bf16.gmra.mrb[104].mxu0 %v14482_v13  ;;  %v14498_v13 = vld [vmem:[%s15081_s29 + $0x1f0] sm:$0xff]  }
  0xff   : > { %12935 = vmatprep.mubr.bf16.mxu0 %v14483_v14 }
 0x101   : > { %v12829_v16 = vpop.f32.mrb[0].mxu0 }
 0x102   : > { %v1014_v17 = vadd.f32 %v12829_v16, %v15204_v15  ;;  %v1005_v18 = vpop.f32.mrb[1].mxu0 }
 0x103   : > { %v1006_v20 = vadd.f32 %v15204_v15, %v1005_v18  ;;  %v12830_v21 = vpop.f32.mrb[2].mxu0 }
 0x104   : > { %v1518_v23 = vmax.f32 %v1014_v17, 0.0  ;;  %v1017_v24 = vadd.f32 %v12830_v21, %v15204_v15  ;;  %v1008_v25 = vpop.f32.mrb[3].mxu0 }
 0x105   : > { %v1516_v26 = vmax.f32 %v1006_v20, 0.0  ;;  %v1009_v27 = vadd.f32 %v15204_v15, %v1008_v25 }
 0x106   : > { %1646 = vst [vmem:[#allocation2 + $0x10] sm:$0xff] %v1518_v23  ;;  %v1519_v28 = vmax.f32 %v1017_v24, 0.0  ;;  %12936 = vmatmul.mubr.bf16.gmra.mrb[108].mxu0 %v14484_v19 }
 0x107   : > { %1644 = vst [vmem:[#allocation2] sm:$0xff] %v1516_v26  ;;  %v1517_v29 = vmax.f32 %v1009_v27, 0.0  ;;  %12939 = vmatprep.mubr.bf16.mxu0 %v14485_v22  ;;  %v14500_v27 = vld [vmem:[%s15081_s29 + $0x1f8] sm:$0xff]  }
 0x108   : > { %1647 = vst [vmem:[#allocation2 + $0x18] sm:$0xff] %v1519_v28 }
 0x109   : > { %1645 = vst [vmem:[#allocation2 + $0x8] sm:$0xff] %v1517_v29  ;;  %v12833_v30 = vpop.f32.mrb[4].mxu0 }
 0x10a   : > { %v1030_v31 = vadd.f32 %v12833_v30, %v15204_v15  ;;  %v1021_v32 = vpop.f32.mrb[5].mxu0 }
 0x10b   : > { %v1022_v34 = vadd.f32 %v15204_v15, %v1021_v32  ;;  %v12834_v35 = vpop.f32.mrb[6].mxu0 }
 0x10c   : > { %v1522_v37 = vmax.f32 %v1030_v31, 0.0  ;;  %v1033_v38 = vadd.f32 %v12834_v35, %v15204_v15  ;;  %v1024_v39 = vpop.f32.mrb[7].mxu0 }
 0x10d   : > { %v1520_v40 = vmax.f32 %v1022_v34, 0.0  ;;  %v1025_v41 = vadd.f32 %v15204_v15, %v1024_v39 }
 0x10e   : > { %1650 = vst [vmem:[#allocation2 + $0x30] sm:$0xff] %v1522_v37  ;;  %v1523_v42 = vmax.f32 %v1033_v38, 0.0  ;;  %12940 = vmatmul.mubr.bf16.gmra.mrb[112].mxu0 %v14486_v33 }
 0x10f   : > { %1648 = vst [vmem:[#allocation2 + $0x20] sm:$0xff] %v1520_v40  ;;  %12943 = vmatprep.mubr.bf16.mxu0 %v14487_v36  ;;  %v1521_v43 = vmax.f32 %v1025_v41, 0.0  ;;  %v1774_v48 = vld [vmem:[#allocation2 + $0x10] ss:$2 sm:$0x3f] }
 0x110   : > { %1651 = vst [vmem:[#allocation2 + $0x38] sm:$0xff] %v1523_v42  ;;  %v1778_v49 = vld [vmem:[#allocation2 + $0x11] ss:$2 sm:$0x3f]  ;;  %v1772_v56 = vld [vmem:[#allocation2] ss:$2 sm:$0xff] }
 0x111   : > { %v12837_v44 = vpop.f32.mrb[8].mxu0  ;;  %1649 = vst [vmem:[#allocation2 + $0x28] sm:$0xff] %v1521_v43  ;;  %v1776_v57 = vld [vmem:[#allocation2 + $0x1] ss:$2 sm:$0xff]  ;;  %v1780_v63 = vmax.f32 %v1774_v48, %v1778_v49 }
 0x112   : > { %v1046_v45 = vadd.f32 %v12837_v44, %v15204_v15  ;;  %v1037_v46 = vpop.f32.mrb[9].mxu0  ;;  %v1779_v5 = vmax.f32 %v1772_v56, %v1776_v57 }
 0x113   : > { %v1038_v50 = vadd.f32 %v15204_v15, %v1037_v46  ;;  %v12838_v51 = vpop.f32.mrb[10].mxu0 }
 0x114   : > { %v1526_v53 = vmax.f32 %v1046_v45, 0.0  ;;  %v1049_v54 = vadd.f32 %v12838_v51, %v15204_v15  ;;  %v1040_v55 = vpop.f32.mrb[11].mxu0 }
 0x115   : > { %v1524_v58 = vmax.f32 %v1038_v50, 0.0  ;;  %v1041_v59 = vadd.f32 %v15204_v15, %v1040_v55 }
 0x116   : > { %1654 = vst [vmem:[#allocation2 + $0x50] sm:$0xff] %v1526_v53  ;;  %v1527_v60 = vmax.f32 %v1049_v54, 0.0  ;;  %12944 = vmatmul.mubr.bf16.gmra.mrb[116].mxu0 %v14488_v47 }
 0x117   : > { %v1784_v61 = vld [vmem:[#allocation2 + $0x30] ss:$2 sm:$0x3f]  ;;  %v1788_v62 = vld [vmem:[#allocation2 + $0x31] ss:$2 sm:$0x3f]  ;;  %12947 = vmatprep.mubr.bf16.mxu0 %v14492_v52 }
 0x118   : > { %1652 = vst [vmem:[#allocation2 + $0x40] sm:$0xff] %v1524_v58  ;;  %v1790_v0 = vmax.f32 %v1784_v61, %v1788_v62  ;;  %1655 = vst [vmem:[#allocation2 + $0x58] sm:$0xff] %v1527_v60  ;;  %v1525_v1 = vmax.f32 %v1041_v59, 0.0  ;;  %v1782_v2 = vld [vmem:[#allocation2 + $0x20] ss:$2 sm:$0xff] }
 0x119   : > { %v1786_v3 = vld [vmem:[#allocation2 + $0x21] ss:$2 sm:$0xff]  ;;  %v12841_v4 = vpop.f32.mrb[12].mxu0 }
 0x11a   : > { %v1792_v6 = vmax.f32 %v1780_v63, %v1790_v0  ;;  %v1789_v7 = vmax.f32 %v1782_v2, %v1786_v3  ;;  %1653 = vst [vmem:[#allocation2 + $0x48] sm:$0xff] %v1525_v1  ;;  %v1062_v8 = vadd.f32 %v12841_v4, %v15204_v15  ;;  %v1053_v9 = vpop.f32.mrb[13].mxu0 }
 0x11b   : > { %v1054_v11 = vadd.f32 %v15204_v15, %v1053_v9  ;;  %v12842_v12 = vpop.f32.mrb[14].mxu0 }
 0x11c   : > { %v1791_v14 = vmax.f32 %v1779_v5, %v1789_v7  ;;  %v1530_v16 = vmax.f32 %v1062_v8, 0.0  ;;  %v1065_v17 = vadd.f32 %v12842_v12, %v15204_v15  ;;  %v1056_v18 = vpop.f32.mrb[15].mxu0 }
 0x11d   : > { %v1528_v19 = vmax.f32 %v1054_v11, 0.0  ;;  %v1057_v20 = vadd.f32 %v15204_v15, %v1056_v18 }
 0x11e   : > { %v1793_v21 = vpack.c.bf16 %v1792_v6, %v1791_v14  ;;  %1658 = vst [vmem:[#allocation2 + $0x70] sm:$0xff] %v1530_v16  ;;  %v1531_v22 = vmax.f32 %v1065_v17, 0.0  ;;  %12948 = vmatmul.mubr.bf16.gmra.mrb[120].mxu0 %v14494_v10 }
 0x11f   : > { %1656 = vst [vmem:[#allocation2 + $0x60] sm:$0xff] %v1528_v19  ;;  %12951 = vmatprep.mubr.bf16.mxu0 %v14498_v13  ;;  %v1529_v23 = vmax.f32 %v1057_v20, 0.0  ;;  %v1798_v28 = vld [vmem:[#allocation2 + $0x50] ss:$2 sm:$0x3f] }
 0x120   : > { %1794 = vst [vmem:[#allocation3] sm:$0x7f] %v1793_v21  ;;  %1659 = vst [vmem:[#allocation2 + $0x78] sm:$0xff] %v1531_v22  ;;  %v1802_v29 = vld [vmem:[#allocation2 + $0x51] ss:$2 sm:$0x3f] }
 0x121   : > { %v12845_v24 = vpop.f32.mrb[16].mxu0  ;;  %1657 = vst [vmem:[#allocation2 + $0x68] sm:$0xff] %v1529_v23  ;;  %v1796_v35 = vld [vmem:[#allocation2 + $0x40] ss:$2 sm:$0xff]  ;;  %v1800_v36 = vld [vmem:[#allocation2 + $0x41] ss:$2 sm:$0xff]  ;;  %v1804_v42 = vmax.f32 %v1798_v28, %v1802_v29 }
 0x122   : > { %v1078_v25 = vadd.f32 %v12845_v24, %v15204_v15  ;;  %v1069_v26 = vpop.f32.mrb[17].mxu0  ;;  %v1803_v48 = vmax.f32 %v1796_v35, %v1800_v36  ;;  %v15250_v24 = vld [vmem:[%s17949_s3] sm:$0xff]  }
 0x123   : > { %v1070_v30 = vadd.f32 %v15204_v15, %v1069_v26  ;;  %v12846_v31 = vpop.f32.mrb[18].mxu0  ;;  %12991 = vmatprep.subr.bf16.mxu0 %v15250_v24 }
 0x124   : > { %v1534_v32 = vmax.f32 %v1078_v25, 0.0  ;;  %v1081_v33 = vadd.f32 %v12846_v31, %v15204_v15  ;;  %v1072_v34 = vpop.f32.mrb[19].mxu0 }
 0x125   : > { %v1532_v37 = vmax.f32 %v1070_v30, 0.0  ;;  %v1073_v38 = vadd.f32 %v15204_v15, %v1072_v34 }
 0x126   : > { %1662 = vst [vmem:[#allocation2 + $0x90] sm:$0xff] %v1534_v32  ;;  %v1535_v39 = vmax.f32 %v1081_v33, 0.0  ;;  %12952 = vmatmul.mubr.bf16.gmra.mrb[124].mxu0 %v14500_v27  ;;  %v15257_v32 = vld [vmem:[%s17949_s3 + $0x100] sm:$0xff]  }
 0x127   : > { %v1808_v40 = vld [vmem:[#allocation2 + $0x70] ss:$2 sm:$0x3f]  ;;  %v1812_v41 = vld [vmem:[#allocation2 + $0x71] ss:$2 sm:$0x3f]  ;;  %13099 = vmatprep.subr.bf16.mxu1 %v15257_v32 }
 0x128   : > { %1660 = vst [vmem:[#allocation2 + $0x80] sm:$0xff] %v1532_v37  ;;  %v1814_v43 = vmax.f32 %v1808_v40, %v1812_v41  ;;  %1663 = vst [vmem:[#allocation2 + $0x98] sm:$0xff] %v1535_v39  ;;  %v1533_v44 = vmax.f32 %v1073_v38, 0.0  ;;  %v1806_v45 = vld [vmem:[#allocation2 + $0x60] ss:$2 sm:$0xff] }
 0x129   : > { %v1810_v46 = vld [vmem:[#allocation2 + $0x61] ss:$2 sm:$0xff]  ;;  %v12849_v47 = vpop.f32.mrb[20].mxu0 }
 0x12a   : > { %v1816_v49 = vmax.f32 %v1804_v42, %v1814_v43  ;;  %v1813_v50 = vmax.f32 %v1806_v45, %v1810_v46  ;;  %1661 = vst [vmem:[#allocation2 + $0x88] sm:$0xff] %v1533_v44  ;;  %v1094_v51 = vadd.f32 %v12849_v47, %v15204_v15  ;;  %v1085_v52 = vpop.f32.mrb[21].mxu0  ;;  %v15238_v59 = vld [vmem:[#allocation3] sm:$0xff] }
 0x12b   : > { %v1086_v53 = vadd.f32 %v15204_v15, %v1085_v52  ;;  %v12850_v54 = vpop.f32.mrb[22].mxu0  ;;  %v2568_v62 = vld [vmem:[#allocation3] sm:$0xfe]  ;;  %v2155_v1 = vshll.u32 %v15238_v59, 16  ;;  %v2153_v4 = vshrl.u32 %v15238_v59, 16 }
 0x12c   : > { %v1815_v55 = vmax.f32 %v1803_v48, %v1813_v50  ;;  %v1538_v56 = vmax.f32 %v1094_v51, 0.0  ;;  %v1097_v57 = vadd.f32 %v12850_v54, %v15204_v15  ;;  %v1088_v58 = vpop.f32.mrb[23].mxu0  ;;  %v2830_v5 = vshrl.u32 %v2568_v62, 16 }
 0x12d   : > { %v1536_v60 = vmax.f32 %v1086_v53, 0.0  ;;  %v1089_v61 = vadd.f32 %v15204_v15, %v1088_v58  ;;  %v2833_v8 = vshll.u32 %v2568_v62, 16  ;;  %v2157_v13 = vrot.slane %v2155_v1, 1 }
 0x12e   : > { %v1817_v63 = vpack.c.bf16 %v1816_v49, %v1815_v55  ;;  %1666 = vst [vmem:[#allocation2 + $0xb0] sm:$0xff] %v1538_v56  ;;  %v1539_v0 = vmax.f32 %v1097_v57, 0.0  ;;  %v2832_v22 = vrot.slane %v2830_v5, 1 }
 0x12f   : > { %1664 = vst [vmem:[#allocation2 + $0xa0] sm:$0xff] %v1536_v60  ;;  %v1537_v2 = vmax.f32 %v1089_v61, 0.0  ;;  %v1822_v9 = vld [vmem:[#allocation2 + $0x90] ss:$2 sm:$0x3f]  ;;  %v2835_v31 = vrot.slane %v2833_v8, 2  ;;  %v2158_v45 = vor.u32 %v2157_v13, %v2153_v4 }
 0x130   : > { %1818 = vst [vmem:[#allocation3 + $0x8] sm:$0x7f] %v1817_v63  ;;  %1667 = vst [vmem:[#allocation2 + $0xb8] sm:$0xff] %v1539_v0  ;;  %v1826_v10 = vld [vmem:[#allocation2 + $0x91] ss:$2 sm:$0x3f] }
 0x131   : > { %v12853_v3 = vpop.f32.mrb[24].mxu0  ;;  %1665 = vst [vmem:[#allocation2 + $0xa8] sm:$0xff] %v1537_v2  ;;  %v1820_v14 = vld [vmem:[#allocation2 + $0x80] ss:$2 sm:$0xff]  ;;  %v1824_v16 = vld [vmem:[#allocation2 + $0x81] ss:$2 sm:$0xff]  ;;  %v1828_v27 = vmax.f32 %v1822_v9, %v1826_v10  ;;  %v2836_v58 = vor.u32 %v2835_v31, %v2832_v22 }
 0x132   : > { %v1110_v6 = vadd.f32 %v12853_v3, %v15204_v15  ;;  %v1101_v7 = vpop.f32.mrb[25].mxu0  ;;  %v1827_v33 = vmax.f32 %v1820_v14, %v1824_v16 }
 0x133   : > { %v1102_v11 = vadd.f32 %v15204_v15, %v1101_v7  ;;  %v12854_v12 = vpop.f32.mrb[26].mxu0 }
 0x134   : > { %v1542_v17 = vmax.f32 %v1110_v6, 0.0  ;;  %v1113_v18 = vadd.f32 %v12854_v12, %v15204_v15  ;;  %v1104_v19 = vpop.f32.mrb[27].mxu0 }
 0x135   : > { %v1540_v20 = vmax.f32 %v1102_v11, 0.0  ;;  %v1105_v21 = vadd.f32 %v15204_v15, %v1104_v19 }
 0x136   : > { %1670 = vst [vmem:[#allocation2 + $0xd0] sm:$0xff] %v1542_v17  ;;  %v1543_v23 = vmax.f32 %v1113_v18, 0.0 }
 0x137   : > { %v1832_v25 = vld [vmem:[#allocation2 + $0xb0] ss:$2 sm:$0x3f]  ;;  %v1836_v26 = vld [vmem:[#allocation2 + $0xb1] ss:$2 sm:$0x3f] }
 0x138   : > { %1668 = vst [vmem:[#allocation2 + $0xc0] sm:$0xff] %v1540_v20  ;;  %v1838_v28 = vmax.f32 %v1832_v25, %v1836_v26  ;;  %1671 = vst [vmem:[#allocation2 + $0xd8] sm:$0xff] %v1543_v23  ;;  %v1541_v29 = vmax.f32 %v1105_v21, 0.0  ;;  %v15252_v30 = vld [vmem:[#allocation3 + $0x8] sm:$0xff] }
 0x139   : > { %v1830_v34 = vld [vmem:[#allocation2 + $0xa0] ss:$2 sm:$0xff]  ;;  %v1834_v35 = vld [vmem:[#allocation2 + $0xa1] ss:$2 sm:$0xff]  ;;  %v12857_v36 = vpop.f32.mrb[28].mxu0  ;;  %v2160_v37 = vshll.u32 %v15252_v30, 16 }
 0x13a   : > { %v1840_v38 = vmax.f32 %v1828_v27, %v1838_v28  ;;  %v1837_v39 = vmax.f32 %v1830_v34, %v1834_v35  ;;  %1669 = vst [vmem:[#allocation2 + $0xc8] sm:$0xff] %v1541_v29  ;;  %v1126_v40 = vadd.f32 %v12857_v36, %v15204_v15  ;;  %v1117_v41 = vpop.f32.mrb[29].mxu0  ;;  %v2164_v42 = vshrl.u32 %v15252_v30, 16 }
 0x13b   : > { %v1118_v43 = vadd.f32 %v15204_v15, %v1117_v41  ;;  %v12858_v44 = vpop.f32.mrb[30].mxu0  ;;  %v2162_v46 = vrot.slane %v2160_v37, 1  ;;  %v2838_v47 = vrot.slane %v2160_v37, 2 }
 0x13c   : > { %v1839_v48 = vmax.f32 %v1827_v33, %v1837_v39  ;;  %v1546_v49 = vmax.f32 %v1126_v40, 0.0  ;;  %v1129_v50 = vadd.f32 %v12858_v44, %v15204_v15  ;;  %v1120_v51 = vpop.f32.mrb[31].mxu0  ;;  %v2837_v52 = vrot.slane %v2164_v42, 1  ;;  %v14513_v44 = vld [vmem:[%s17949_s3 + $0x8] sm:$0xff]  }
 0x13d   : > { %v1544_v53 = vmax.f32 %v1118_v43, 0.0  ;;  %v1121_v54 = vadd.f32 %v15204_v15, %v1120_v51  ;;  %v2163_v55 = vsel %vm2151_vm0, %v2158_v45, %v2162_v46  ;;  %v2166_v33 = vor.u32 %v2164_v42, %v2162_v46 }
 0x13e   : > { %v1841_v56 = vpack.c.bf16 %v1840_v38, %v1839_v48  ;;  %1674 = vst [vmem:[#allocation2 + $0xf0] sm:$0xff] %v1546_v49  ;;  %v1547_v57 = vmax.f32 %v1129_v50, 0.0  ;;  %12971 = vmatprep.mubr.bf16.mxu0 %v2163_v55  ;;  %v15270_v59 = vor.u32 %v2838_v47, %v2837_v52  ;;  %v14510_v50 = vld [vmem:[%s17949_s3 + $0x108] sm:$0xff]  }
 0x13f   : > { %1672 = vst [vmem:[#allocation2 + $0xe0] sm:$0xff] %v1544_v53  ;;  %v1545_v60 = vmax.f32 %v1121_v54, 0.0  ;;  %v1846_v1 = vld [vmem:[#allocation2 + $0xd0] ss:$2 sm:$0x3f] }
 0x140   : > { %1842 = vst [vmem:[#allocation3 + $0x10] sm:$0x7f] %v1841_v56  ;;  %1675 = vst [vmem:[#allocation2 + $0xf8] sm:$0xff] %v1547_v57  ;;  %v2840_v61 = vsel %vm2828_vm1, %v2836_v58, %v15270_v59  ;;  %v1850_v2 = vld [vmem:[#allocation2 + $0xd1] ss:$2 sm:$0x3f] }
 0x141   : > { %13079 = vmatprep.mubr.bf16.mxu1 %v2840_v61  ;;  %v12861_v62 = vpop.f32.mrb[32].mxu0  ;;  %1673 = vst [vmem:[#allocation2 + $0xe8] sm:$0xff] %v1545_v60  ;;  %v1844_v5 = vld [vmem:[#allocation2 + $0xc0] ss:$2 sm:$0xff]  ;;  %v1848_v9 = vld [vmem:[#allocation2 + $0xc1] ss:$2 sm:$0xff]  ;;  %v1852_v16 = vmax.f32 %v1846_v1, %v1850_v2 }
 0x142   : > { %v1142_v63 = vadd.f32 %v12861_v62, %v15204_v15  ;;  %v1133_v0 = vpop.f32.mrb[33].mxu0  ;;  %v1851_v20 = vmax.f32 %v1844_v5, %v1848_v9  ;;  %v14514_v53 = vld [vmem:[%s17949_s3 + $0x10] sm:$0xff]   ;;  %v14515_v9 = vld [vmem:[%s17949_s3 + $0x118] sm:$0xff]  }
 0x143   : > { %v1134_v3 = vadd.f32 %v15204_v15, %v1133_v0  ;;  %v12862_v4 = vpop.f32.mrb[34].mxu0  ;;  %v14512_v62 = vld [vmem:[%s17949_s3 + $0x110] sm:$0xff]  }
 0x144   : > { %v1550_v6 = vmax.f32 %v1142_v63, 0.0  ;;  %v1145_v7 = vadd.f32 %v12862_v4, %v15204_v15  ;;  %v1136_v8 = vpop.f32.mrb[35].mxu0  ;;  %v14516_v4 = vld [vmem:[%s17949_s3 + $0x18] sm:$0xff]  }
 0x145   : > { %v1548_v10 = vmax.f32 %v1134_v3, 0.0  ;;  %v1137_v11 = vadd.f32 %v15204_v15, %v1136_v8 }
 0x146   : > { %1678 = vst [vmem:[#allocation2 + $0x110] sm:$0xff] %v1550_v6  ;;  %v1551_v12 = vmax.f32 %v1145_v7, 0.0 }
 0x147   : > { %v1856_v13 = vld [vmem:[#allocation2 + $0xf0] ss:$2 sm:$0x3f]  ;;  %v1860_v14 = vld [vmem:[#allocation2 + $0xf1] ss:$2 sm:$0x3f] }
 0x148   : > { %1676 = vst [vmem:[#allocation2 + $0x100] sm:$0xff] %v1548_v10  ;;  %v1862_v17 = vmax.f32 %v1856_v13, %v1860_v14  ;;  %1679 = vst [vmem:[#allocation2 + $0x118] sm:$0xff] %v1551_v12  ;;  %v1549_v18 = vmax.f32 %v1137_v11, 0.0  ;;  %v15278_v19 = vld [vmem:[#allocation3 + $0x10] sm:$0xff]  ;;  %v1854_v21 = vld [vmem:[#allocation2 + $0xe0] ss:$2 sm:$0xff] }
 0x149   : > { %v1858_v22 = vld [vmem:[#allocation2 + $0xe1] ss:$2 sm:$0xff]  ;;  %v12865_v23 = vpop.f32.mrb[36].mxu0  ;;  %v2168_v25 = vshll.u32 %v15278_v19, 16  ;;  %v2172_v31 = vshrl.u32 %v15278_v19, 16  ;;  %v15299_v49 = vld [vmem:[#allocation3 + $0x10] sm:$0xff] }
 0x14a   : > { %v1864_v26 = vmax.f32 %v1852_v16, %v1862_v17  ;;  %v1861_v27 = vmax.f32 %v1854_v21, %v1858_v22  ;;  %1677 = vst [vmem:[#allocation2 + $0x108] sm:$0xff] %v1549_v18  ;;  %v1158_v28 = vadd.f32 %v12865_v23, %v15204_v15  ;;  %v1149_v29 = vpop.f32.mrb[37].mxu0  ;;  %v17975_v55 = vshll.u32 %v15299_v49, 16  ;;  %v14518_v18 = vld [vmem:[%s17949_s3 + $0x20] sm:$0xff]   ;;  %v14520_v19 = vld [vmem:[%s17949_s3 + $0x28] sm:$0xff]  }
 0x14b   : > { %v1150_v34 = vadd.f32 %v15204_v15, %v1149_v29  ;;  %v12866_v35 = vpop.f32.mrb[38].mxu0  ;;  %v15286_v36 = vrot.slane %v2168_v25, 1  ;;  %v2842_v37 = vrot.slane %v2168_v25, 2  ;;  %v2841_v43 = vrot.slane %v2172_v31, 1 }
 0x14c   : > { %v1863_v38 = vmax.f32 %v1851_v20, %v1861_v27  ;;  %v1554_v39 = vmax.f32 %v1158_v28, 0.0  ;;  %v1161_v40 = vadd.f32 %v12866_v35, %v15204_v15  ;;  %v1152_v41 = vpop.f32.mrb[39].mxu0  ;;  %v17970_v57 = vshrl.u32 %v15299_v49, 16 }
 0x14d   : > { %v1552_v30 = vmax.f32 %v1150_v34, 0.0  ;;  %v1153_v42 = vadd.f32 %v15204_v15, %v1152_v41  ;;  %v2171_v45 = vsel %vm2151_vm0, %v2166_v33, %v15286_v36  ;;  %v15297_v48 = vor.u32 %v2842_v37, %v2841_v43 }
 0x14e   : > { %v1865_v46 = vpack.c.bf16 %v1864_v26, %v1863_v38  ;;  %1682 = vst [vmem:[#allocation2 + $0x130] sm:$0xff] %v1554_v39  ;;  %v1555_v47 = vmax.f32 %v1161_v40, 0.0  ;;  %12972 = vmatmul.mubr.bf16.vlgmr.msra.gmra.mrb[128].mxu0 %v2171_v45  ;;  %v4076_v63 = vrot.slane %v17975_v55, 2  ;;  %v4075_v5 = vrot.slane %v17970_v57, 1  ;;  %v14517_v40 = vld [vmem:[%s17949_s3 + $0x120] sm:$0xff]  }
 0x14f   : > { %1680 = vst [vmem:[#allocation2 + $0x120] sm:$0xff] %v1552_v30  ;;  %12992 = vmatpush3.bf16.msra.mxu0 %v15250_v24  ;;  %v1553_v51 = vmax.f32 %v1153_v42, 0.0  ;;  %v2844_v52 = vsel %vm2828_vm1, %v15270_v59, %v15297_v48  ;;  %v1870_v58 = vld [vmem:[#allocation2 + $0x110] ss:$2 sm:$0x3f]  ;;  %v2174_v37 = vor.u32 %v2172_v31, %v15286_v36 }
 0x150   : > { %1866 = vst [vmem:[#allocation3 + $0x18] sm:$0x7f] %v1865_v46  ;;  %1683 = vst [vmem:[#allocation2 + $0x138] sm:$0xff] %v1555_v47  ;;  %12993 = vmatprep.subr.bf16.mxu0 %v14513_v44  ;;  %13080 = vmatmul.mubr.bf16.vlgmr.msra.gmra.mrb[0].mxu1 %v2844_v52  ;;  %v1874_v60 = vld [vmem:[#allocation2 + $0x111] ss:$2 sm:$0x3f]  ;;  %v15331_v10 = vor.u32 %v4076_v63, %v4075_v5 }
 0x151   : > { %v12869_v54 = vpop.f32.mrb[40].mxu0  ;;  %1681 = vst [vmem:[#allocation2 + $0x128] sm:$0xff] %v1553_v51  ;;  %13100 = vmatpush3.bf16.msra.mxu1 %v15257_v32  ;;  %v1868_v0 = vld [vmem:[#allocation2 + $0x100] ss:$2 sm:$0xff]  ;;  %v1872_v1 = vld [vmem:[#allocation2 + $0x101] ss:$2 sm:$0xff]  ;;  %v1876_v13 = vmax.f32 %v1870_v58, %v1874_v60 }
 0x152   : > { %v1174_v56 = vadd.f32 %v12869_v54, %v15204_v15  ;;  %v1165_v24 = vpop.f32.mrb[41].mxu0  ;;  %13101 = vmatprep.subr.bf16.mxu1 %v14510_v50  ;;  %v1875_v20 = vmax.f32 %v1868_v0, %v1872_v1  ;;  %v14519_v52 = vld [vmem:[%s17949_s3 + $0x128] sm:$0xff]   ;;  %v14522_v54 = vld [vmem:[%s17949_s3 + $0x30] sm:$0xff]   ;;  %v15376_v58 = vld [vmem:[%s17948_s2] ss:$0 sm:$0xff] }
 0x153   : > { %v1166_v59 = vadd.f32 %v15204_v15, %v1165_v24  ;;  %v12870_v61 = vpop.f32.mrb[42].mxu0  ;;  %12994 = vmatpush3.bf16.msra.mxu0 %v14513_v44  ;;  %v14521_v1 = vld [vmem:[%s17949_s3 + $0x130] sm:$0xff]  }
 0x154   : > { %v1558_v2 = vmax.f32 %v1174_v56, 0.0  ;;  %v1177_v32 = vadd.f32 %v12870_v61, %v15204_v15  ;;  %v1168_v3 = vpop.f32.mrb[43].mxu0  ;;  %12995 = vmatprep.subr.bf16.mxu0 %v14514_v53 }
 0x155   : > { %v1556_v6 = vmax.f32 %v1166_v59, 0.0  ;;  %v1169_v7 = vadd.f32 %v15204_v15, %v1168_v3  ;;  %13102 = vmatpush3.bf16.msra.mxu1 %v14510_v50 }
 0x156   : > { %1686 = vst [vmem:[#allocation2 + $0x150] sm:$0xff] %v1558_v2  ;;  %v1559_v8 = vmax.f32 %v1177_v32, 0.0  ;;  %13103 = vmatprep.subr.bf16.mxu1 %v14512_v62 }
 0x157   : > { %v1880_v11 = vld [vmem:[#allocation2 + $0x130] ss:$2 sm:$0x3f]  ;;  %v1884_v12 = vld [vmem:[#allocation2 + $0x131] ss:$2 sm:$0x3f]  ;;  %12996 = vmatpush3.bf16.msra.mxu0 %v14514_v53 }
 0x158   : > { %1684 = vst [vmem:[#allocation2 + $0x140] sm:$0xff] %v1556_v6  ;;  %v1886_v14 = vmax.f32 %v1880_v11, %v1884_v12  ;;  %1687 = vst [vmem:[#allocation2 + $0x158] sm:$0xff] %v1559_v8  ;;  %v1557_v16 = vmax.f32 %v1169_v7, 0.0  ;;  %v15333_v17 = vld [vmem:[#allocation3 + $0x18] sm:$0xff]  ;;  %12997 = vmatprep.subr.bf16.mxu0 %v14516_v4  ;;  %v1878_v21 = vld [vmem:[#allocation2 + $0x120] ss:$2 sm:$0xff] }
 0x159   : > { %v1882_v22 = vld [vmem:[#allocation2 + $0x121] ss:$2 sm:$0xff]  ;;  %v12873_v23 = vpop.f32.mrb[44].mxu0  ;;  %v2176_v25 = vshll.u32 %v15333_v17, 16  ;;  %v2180_v33 = vshrl.u32 %v15333_v17, 16  ;;  %13104 = vmatpush3.bf16.msra.mxu1 %v14512_v62  ;;  %v15361_v51 = vld [vmem:[#allocation3 + $0x18] sm:$0xff] }
 0x15a   : > { %v1888_v26 = vmax.f32 %v1876_v13, %v1886_v14  ;;  %v1885_v27 = vmax.f32 %v1878_v21, %v1882_v22  ;;  %1685 = vst [vmem:[#allocation2 + $0x148] sm:$0xff] %v1557_v16  ;;  %v1190_v28 = vadd.f32 %v12873_v23, %v15204_v15  ;;  %v1181_v29 = vpop.f32.mrb[45].mxu0  ;;  %13105 = vmatprep.subr.bf16.mxu1 %v14515_v9  ;;  %v17974_v24 = vshll.u32 %v15361_v51, 16  ;;  %v14523_v6 = vld [vmem:[%s17949_s3 + $0x38] sm:$0xff]  }
 0x15b   : > { %v1182_v34 = vadd.f32 %v15204_v15, %v1181_v29  ;;  %v12874_v35 = vpop.f32.mrb[46].mxu0  ;;  %v15345_v38 = vrot.slane %v2176_v25, 1  ;;  %v2846_v39 = vrot.slane %v2176_v25, 2  ;;  %12998 = vmatpush3.bf16.msra.mxu0 %v14516_v4  ;;  %v2845_v42 = vrot.slane %v2180_v33, 1  ;;  %v14524_v13 = vld [vmem:[%s17949_s3 + $0x138] sm:$0xff]   ;;  %v14527_v25 = vld [vmem:[%s17949_s3 + $0x80] sm:$0xff]  }
 0x15c   : > { %v1887_v41 = vmax.f32 %v1875_v20, %v1885_v27  ;;  %v1562_v43 = vmax.f32 %v1190_v28, 0.0  ;;  %v1193_v44 = vadd.f32 %v12874_v35, %v15204_v15  ;;  %v1184_v30 = vpop.f32.mrb[47].mxu0  ;;  %12999 = vmatprep.subr.bf16.mxu0 %v14518_v18  ;;  %v4080_v2 = vrot.slane %v17974_v24, 2 }
 0x15d   : > { %v1560_v31 = vmax.f32 %v1182_v34, 0.0  ;;  %v1185_v36 = vadd.f32 %v15204_v15, %v1184_v30  ;;  %v2179_v45 = vsel %vm2151_vm0, %v2174_v37, %v15345_v38  ;;  %v15359_v50 = vor.u32 %v2846_v39, %v2845_v42  ;;  %13106 = vmatpush3.bf16.msra.mxu1 %v14515_v9 }
 0x15e   : > { %v1889_v46 = vpack.c.bf16 %v1888_v26, %v1887_v41  ;;  %1690 = vst [vmem:[#allocation2 + $0x170] sm:$0xff] %v1562_v43  ;;  %v1563_v47 = vmax.f32 %v1193_v44, 0.0  ;;  %12975 = vmatprep.mubr.bf16.mxu0 %v2179_v45  ;;  %13107 = vmatprep.subr.bf16.mxu1 %v14517_v40  ;;  %v2182_v42 = vor.u32 %v2180_v33, %v15345_v38 }
 0x15f   : > { %1688 = vst [vmem:[#allocation2 + $0x160] sm:$0xff] %v1560_v31  ;;  %13000 = vmatpush3.bf16.msra.mxu0 %v14518_v18  ;;  %v1561_v15 = vmax.f32 %v1185_v36, 0.0  ;;  %v2848_v53 = vsel %vm2828_vm1, %v15297_v48, %v15359_v50  ;;  %v17969_v48 = vshrl.u32 %v15361_v51, 16  ;;  %v1894_v61 = vld [vmem:[#allocation2 + $0x150] ss:$2 sm:$0x3f] }
 0x160   : > { %1890 = vst [vmem:[#allocation3 + $0x20] sm:$0x7f] %v1889_v46  ;;  %1691 = vst [vmem:[#allocation2 + $0x178] sm:$0xff] %v1563_v47  ;;  %13001 = vmatprep.subr.bf16.mxu0 %v14520_v19  ;;  %13083 = vmatprep.mubr.bf16.mxu1 %v2848_v53  ;;  %v1898_v62 = vld [vmem:[#allocation2 + $0x151] ss:$2 sm:$0x3f] }
 0x161   : > { %v12877_v56 = vpop.f32.mrb[48].mxu0  ;;  %1689 = vst [vmem:[#allocation2 + $0x168] sm:$0xff] %v1561_v15  ;;  %13108 = vmatpush3.bf16.msra.mxu1 %v14517_v40  ;;  %v1892_v32 = vld [vmem:[#allocation2 + $0x140] ss:$2 sm:$0xff]  ;;  %v4079_v7 = vrot.slane %v17969_v48, 1  ;;  %v1900_v20 = vmax.f32 %v1894_v61, %v1898_v62 }
 0x162   : > { %v1206_v60 = vadd.f32 %v15376_v58, %v12877_v56  ;;  %v1197_v59 = vpop.f32.mrb[49].mxu0  ;;  %13109 = vmatprep.subr.bf16.mxu1 %v14519_v52  ;;  %v1896_v11 = vld [vmem:[#allocation2 + $0x141] ss:$2 sm:$0xff] }
 0x163   : > { %v1198_v63 = vadd.f32 %v15376_v58, %v1197_v59  ;;  %v12878_v0 = vpop.f32.mrb[50].mxu0  ;;  %13002 = vmatpush3.bf16.msra.mxu0 %v14520_v19  ;;  %v15396_v14 = vor.u32 %v4080_v2, %v4079_v7  ;;  %v1899_v27 = vmax.f32 %v1892_v32, %v1896_v11  ;;  %v14525_v36 = vld [vmem:[%s17949_s3 + $0x140] sm:$0xff]  }
 0x164   : > { %v1566_v3 = vmax.f32 %v1206_v60, 0.0  ;;  %v1209_v4 = vadd.f32 %v15376_v58, %v12878_v0  ;;  %v1200_v5 = vpop.f32.mrb[51].mxu0  ;;  %13003 = vmatprep.subr.bf16.mxu0 %v14522_v54 }
 0x165   : > { %v1564_v8 = vmax.f32 %v1198_v63, 0.0  ;;  %v1201_v9 = vadd.f32 %v15376_v58, %v1200_v5  ;;  %13110 = vmatpush3.bf16.msra.mxu1 %v14519_v52  ;;  %v15406_v26 = vsel %vm2828_vm1, %v15331_v10, %v15396_v14 }
 0x166   : > { %1694 = vst [vmem:[#allocation2 + $0x190] sm:$0xff] %v1566_v3  ;;  %v1567_v12 = vmax.f32 %v1209_v4, 0.0  ;;  %13111 = vmatprep.subr.bf16.mxu1 %v14521_v1 }
 0x167   : > { %v1904_v16 = vld [vmem:[#allocation2 + $0x170] ss:$2 sm:$0x3f]  ;;  %v1908_v18 = vld [vmem:[#allocation2 + $0x171] ss:$2 sm:$0x3f]  ;;  %13004 = vmatpush3.bf16.msra.mxu0 %v14522_v54 }
 0x168   : > { %1692 = vst [vmem:[#allocation2 + $0x180] sm:$0xff] %v1564_v8  ;;  %v1910_v21 = vmax.f32 %v1904_v16, %v1908_v18  ;;  %1695 = vst [vmem:[#allocation2 + $0x198] sm:$0xff] %v1567_v12  ;;  %v1565_v22 = vmax.f32 %v1201_v9, 0.0  ;;  %v15398_v23 = vld [vmem:[#allocation3 + $0x20] sm:$0xff]  ;;  %13005 = vmatprep.subr.bf16.mxu0 %v14523_v6 }
 0x169   : > { %v1902_v28 = vld [vmem:[#allocation2 + $0x160] ss:$2 sm:$0xff]  ;;  %v1906_v29 = vld [vmem:[#allocation2 + $0x161] ss:$2 sm:$0xff]  ;;  %v12881_v34 = vpop.f32.mrb[52].mxu0  ;;  %v2184_v35 = vshll.u32 %v15398_v23, 16  ;;  %13112 = vmatpush3.bf16.msra.mxu1 %v14521_v1 }
 0x16a   : > { %v1912_v37 = vmax.f32 %v1900_v20, %v1910_v21  ;;  %v1909_v39 = vmax.f32 %v1902_v28, %v1906_v29  ;;  %1693 = vst [vmem:[#allocation2 + $0x188] sm:$0xff] %v1565_v22  ;;  %v1222_v40 = vadd.f32 %v15376_v58, %v12881_v34  ;;  %v1213_v41 = vpop.f32.mrb[53].mxu0  ;;  %v2188_v43 = vshrl.u32 %v15398_v23, 16  ;;  %13113 = vmatprep.subr.bf16.mxu1 %v14524_v13  ;;  %v15431_v61 = vld [vmem:[#allocation3 + $0x20] sm:$0xff] }
 0x16b   : > { %v1214_v44 = vadd.f32 %v15376_v58, %v1213_v41  ;;  %v12882_v30 = vpop.f32.mrb[54].mxu0  ;;  %v15415_v19 = vrot.slane %v2184_v35, 1  ;;  %v2850_v31 = vrot.slane %v2184_v35, 2  ;;  %13006 = vmatpush3.bf16.msra.mxu0 %v14523_v6  ;;  %v17971_v4 = vshll.u32 %v15431_v61, 16 }
 0x16c   : > { %v1911_v45 = vmax.f32 %v1899_v27, %v1909_v39  ;;  %v1570_v46 = vmax.f32 %v1222_v40, 0.0  ;;  %v1225_v47 = vadd.f32 %v15376_v58, %v12882_v30  ;;  %v1216_v52 = vpop.f32.mrb[55].mxu0  ;;  %v2849_v15 = vrot.slane %v2188_v43, 1  ;;  %13027 = vmatprep.subr.bf16.mxu0 %v14527_v25 }
 0x16d   : > { %v1568_v17 = vmax.f32 %v1214_v44, 0.0  ;;  %v1217_v33 = vadd.f32 %v15376_v58, %v1216_v52  ;;  %v2187_v38 = vsel %vm2151_vm0, %v2182_v42, %v15415_v19  ;;  %13114 = vmatpush3.bf16.msra.mxu1 %v14524_v13  ;;  %v17966_v5 = vshrl.u32 %v15431_v61, 16 }
 0x16e   : > { %v1913_v53 = vpack.c.bf16 %v1912_v37, %v1911_v45  ;;  %1698 = vst [vmem:[#allocation2 + $0x1b0] sm:$0xff] %v1570_v46  ;;  %v1571_v54 = vmax.f32 %v1225_v47, 0.0  ;;  %12976 = vmatmul.mubr.bf16.gmra.mrb[132].mxu0 %v2187_v38  ;;  %v15426_v56 = vor.u32 %v2850_v31, %v2849_v15  ;;  %13135 = vmatprep.subr.bf16.mxu1 %v14525_v36  ;;  %v4084_v18 = vrot.slane %v17971_v4, 2 }
 0x16f   : > { %1696 = vst [vmem:[#allocation2 + $0x1a0] sm:$0xff] %v1568_v17  ;;  %v1569_v60 = vmax.f32 %v1217_v33, 0.0  ;;  %v1918_v1 = vld [vmem:[#allocation2 + $0x190] ss:$2 sm:$0x3f]  ;;  %v4083_v16 = vrot.slane %v17966_v5, 1  ;;  %v2190_v46 = vor.u32 %v2188_v43, %v15415_v19 }
 0x170   : > { %1914 = vst [vmem:[#allocation3 + $0x28] sm:$0x7f] %v1913_v53  ;;  %1699 = vst [vmem:[#allocation2 + $0x1b8] sm:$0xff] %v1571_v54  ;;  %v2852_v59 = vsel %vm2828_vm1, %v15359_v50, %v15426_v56  ;;  %v1922_v2 = vld [vmem:[#allocation2 + $0x191] ss:$2 sm:$0x3f] }
 0x171   : > { %13084 = vmatmul.mubr.bf16.gmra.mrb[4].mxu1 %v2852_v59  ;;  %v12885_v62 = vpop.f32.mrb[56].mxu0  ;;  %1697 = vst [vmem:[#allocation2 + $0x1a8] sm:$0xff] %v1569_v60  ;;  %v1916_v6 = vld [vmem:[#allocation2 + $0x180] ss:$2 sm:$0xff]  ;;  %v1920_v7 = vld [vmem:[#allocation2 + $0x181] ss:$2 sm:$0xff]  ;;  %v1924_v22 = vmax.f32 %v1918_v1, %v1922_v2  ;;  %v15445_v29 = vor.u32 %v4084_v18, %v4083_v16 }
 0x172   : > { %v1238_v63 = vadd.f32 %v15376_v58, %v12885_v62  ;;  %v1229_v0 = vpop.f32.mrb[57].mxu0  ;;  %v1923_v34 = vmax.f32 %v1916_v6, %v1920_v7 }
 0x173   : > { %v1230_v32 = vadd.f32 %v15376_v58, %v1229_v0  ;;  %v12886_v3 = vpop.f32.mrb[58].mxu0 }
 0x174   : > { %v1574_v50 = vmax.f32 %v1238_v63, 0.0  ;;  %v1241_v8 = vadd.f32 %v15376_v58, %v12886_v3  ;;  %v1232_v9 = vpop.f32.mrb[59].mxu0  ;;  %v15469_v63 = vsel %vm2828_vm1, %v15396_v14, %v15445_v29 }
 0x175   : > { %v1572_v11 = vmax.f32 %v1230_v32, 0.0  ;;  %v1233_v12 = vadd.f32 %v15376_v58, %v1232_v9 }
 0x176   : > { %1702 = vst [vmem:[#allocation2 + $0x1d0] sm:$0xff] %v1574_v50  ;;  %v1575_v13 = vmax.f32 %v1241_v8, 0.0 }
 0x177   : > { %v1928_v20 = vld [vmem:[#allocation2 + $0x1b0] ss:$2 sm:$0x3f]  ;;  %v1932_v21 = vld [vmem:[#allocation2 + $0x1b1] ss:$2 sm:$0x3f] }
 0x178   : > { %1700 = vst [vmem:[#allocation2 + $0x1c0] sm:$0xff] %v1572_v11  ;;  %v1934_v25 = vmax.f32 %v1928_v20, %v1932_v21  ;;  %1703 = vst [vmem:[#allocation2 + $0x1d8] sm:$0xff] %v1575_v13  ;;  %v1573_v27 = vmax.f32 %v1233_v12, 0.0  ;;  %v15443_v28 = vld [vmem:[#allocation3 + $0x28] sm:$0xff] }
 0x179   : > { %v1926_v35 = vld [vmem:[#allocation2 + $0x1a0] ss:$2 sm:$0xff]  ;;  %v1930_v37 = vld [vmem:[#allocation2 + $0x1a1] ss:$2 sm:$0xff]  ;;  %v12889_v39 = vpop.f32.mrb[60].mxu0  ;;  %v2192_v40 = vshll.u32 %v15443_v28, 16 }
 0x17a   : > { %v1936_v41 = vmax.f32 %v1924_v22, %v1934_v25  ;;  %v1933_v44 = vmax.f32 %v1926_v35, %v1930_v37  ;;  %1701 = vst [vmem:[#allocation2 + $0x1c8] sm:$0xff] %v1573_v27  ;;  %v1254_v30 = vadd.f32 %v15376_v58, %v12889_v39  ;;  %v1245_v42 = vpop.f32.mrb[61].mxu0  ;;  %v2196_v31 = vshrl.u32 %v15443_v28, 16  ;;  %v15464_v19 = vld [vmem:[#allocation3 + $0x28] sm:$0xff] }
 0x17b   : > { %v1246_v36 = vadd.f32 %v15376_v58, %v1245_v42  ;;  %v12890_v45 = vpop.f32.mrb[62].mxu0  ;;  %v15454_v47 = vrot.slane %v2192_v40, 1  ;;  %v2854_v52 = vrot.slane %v2192_v40, 2  ;;  %v17968_v6 = vshll.u32 %v15464_v19, 16 }
 0x17c   : > { %v1935_v15 = vmax.f32 %v1923_v34, %v1933_v44  ;;  %v1578_v17 = vmax.f32 %v1254_v30, 0.0  ;;  %v1257_v33 = vadd.f32 %v15376_v58, %v12890_v45  ;;  %v1248_v38 = vpop.f32.mrb[63].mxu0  ;;  %v2853_v53 = vrot.slane %v2196_v31, 1 }
 0x17d   : > { %v1576_v54 = vmax.f32 %v1246_v36, 0.0  ;;  %v1249_v60 = vadd.f32 %v15376_v58, %v1248_v38  ;;  %v2195_v59 = vsel %vm2151_vm0, %v2190_v46, %v15454_v47  ;;  %v17965_v9 = vshrl.u32 %v15464_v19, 16 }
 0x17e   : > { %v1937_v62 = vpack.c.bf16 %v1936_v41, %v1935_v15  ;;  %1706 = vst [vmem:[#allocation2 + $0x1f0] sm:$0xff] %v1578_v17  ;;  %v1579_v23 = vmax.f32 %v1257_v33, 0.0  ;;  %12979 = vmatprep.mubr.bf16.mxu0 %v2195_v59  ;;  %v15462_v43 = vor.u32 %v2854_v52, %v2853_v53  ;;  %v4088_v18 = vrot.slane %v17968_v6, 2 }
 0x17f   : > { %1704 = vst [vmem:[#allocation2 + $0x1e0] sm:$0xff] %v1576_v54  ;;  %v1577_v0 = vmax.f32 %v1249_v60, 0.0  ;;  %v1942_v7 = vld [vmem:[#allocation2 + $0x1d0] ss:$2 sm:$0x3f]  ;;  %v4087_v22 = vrot.slane %v17965_v9, 1  ;;  %v2198_v60 = vor.u32 %v2196_v31, %v15454_v47 }
 0x180   : > { %1938 = vst [vmem:[#allocation3 + $0x30] sm:$0x7f] %v1937_v62  ;;  %1707 = vst [vmem:[#allocation2 + $0x1f8] sm:$0xff] %v1579_v23  ;;  %v2856_v1 = vsel %vm2828_vm1, %v15426_v56, %v15462_v43  ;;  %v1946_v50 = vld [vmem:[#allocation2 + $0x1d1] ss:$2 sm:$0x3f] }
 0x181   : > { %13087 = vmatprep.mubr.bf16.mxu1 %v2856_v1  ;;  %v12893_v2 = vpop.f32.mrb[64].mxu0  ;;  %1705 = vst [vmem:[#allocation2 + $0x1e8] sm:$0xff] %v1577_v0  ;;  %v1940_v11 = vld [vmem:[#allocation2 + $0x1c0] ss:$2 sm:$0xff]  ;;  %v1944_v12 = vld [vmem:[#allocation2 + $0x1c1] ss:$2 sm:$0xff]  ;;  %v15484_v35 = vor.u32 %v4088_v18, %v4087_v22  ;;  %v1948_v37 = vmax.f32 %v1942_v7, %v1946_v50 }
 0x182   : > { %v1270_v32 = vadd.f32 %v15376_v58, %v12893_v2  ;;  %v1261_v3 = vpop.f32.mrb[65].mxu0  ;;  %v1947_v44 = vmax.f32 %v1940_v11, %v1944_v12  ;;  %v15505_v50 = vld [vmem:[#allocation3 + $0x18] sm:$0xff] }
 0x183   : > { %v1262_v14 = vadd.f32 %v15376_v58, %v1261_v3  ;;  %v12894_v8 = vpop.f32.mrb[66].mxu0  ;;  %v15492_v46 = vsel %vm2828_vm1, %v15445_v29, %v15484_v35  ;;  %18010 = vst [vmem:[#allocation6_spill] sm:$0xff] %v15505_v50  ;;  %v17958_v12 = vshll.u32 %v15505_v50, 16 }
 0x184   : > { %v1582_v13 = vmax.f32 %v1270_v32, 0.0  ;;  %v1273_v56 = vadd.f32 %v15376_v58, %v12894_v8  ;;  %v1264_v16 = vpop.f32.mrb[67].mxu0 }
 0x185   : > { %v1580_v20 = vmax.f32 %v1262_v14, 0.0  ;;  %v1265_v21 = vadd.f32 %v15376_v58, %v1264_v16 }
 0x186   : > { %1710 = vst [vmem:[#allocation2 + $0x210] sm:$0xff] %v1582_v13  ;;  %v1583_v25 = vmax.f32 %v1273_v56, 0.0 }
 0x187   : > { %v1952_v27 = vld [vmem:[#allocation2 + $0x1f0] ss:$2 sm:$0x3f]  ;;  %v1956_v34 = vld [vmem:[#allocation2 + $0x1f1] ss:$2 sm:$0x3f] }
 0x188   : > { %1708 = vst [vmem:[#allocation2 + $0x200] sm:$0xff] %v1580_v20  ;;  %v1958_v39 = vmax.f32 %v1952_v27, %v1956_v34  ;;  %1711 = vst [vmem:[#allocation2 + $0x218] sm:$0xff] %v1583_v25  ;;  %v1581_v40 = vmax.f32 %v1265_v21, 0.0  ;;  %v15486_v41 = vld [vmem:[#allocation3 + $0x30] sm:$0xff]  ;;  %v1950_v30 = vld [vmem:[#allocation2 + $0x1e0] ss:$2 sm:$0xff] }
 0x189   : > { %v1954_v42 = vld [vmem:[#allocation2 + $0x1e1] ss:$2 sm:$0xff]  ;;  %v12897_v36 = vpop.f32.mrb[68].mxu0  ;;  %v2200_v45 = vshll.u32 %v15486_v41, 16  ;;  %v2204_v38 = vshrl.u32 %v15486_v41, 16  ;;  %v15509_v47 = vld [vmem:[#allocation3 + $0x30] sm:$0xff] }
 0x18a   : > { %v1960_v52 = vmax.f32 %v1948_v37, %v1958_v39  ;;  %v1957_v15 = vmax.f32 %v1950_v30, %v1954_v42  ;;  %1709 = vst [vmem:[#allocation2 + $0x208] sm:$0xff] %v1581_v40  ;;  %v1286_v17 = vadd.f32 %v15376_v58, %v12897_v36  ;;  %v1277_v33 = vpop.f32.mrb[69].mxu0  ;;  %v17967_v18 = vshll.u32 %v15509_v47, 16  ;;  %v15519_v34 = vld [vmem:[#allocation3 + $0x20] sm:$0xff] }
 0x18b   : > { %v1278_v53 = vadd.f32 %v15376_v58, %v1277_v33  ;;  %v12898_v54 = vpop.f32.mrb[70].mxu0  ;;  %v2202_v59 = vrot.slane %v2200_v45, 1  ;;  %v2858_v62 = vrot.slane %v2200_v45, 2  ;;  %v2857_v2 = vrot.slane %v2204_v38, 1 }
 0x18c   : > { %v1959_v23 = vmax.f32 %v1947_v44, %v1957_v15  ;;  %v1586_v29 = vmax.f32 %v1286_v17, 0.0  ;;  %v1289_v0 = vadd.f32 %v15376_v58, %v12898_v54  ;;  %v1280_v1 = vpop.f32.mrb[71].mxu0  ;;  %v17962_v27 = vshrl.u32 %v15509_v47, 16 }
 0x18d   : > { %v1584_v32 = vmax.f32 %v1278_v53, 0.0  ;;  %v1281_v3 = vadd.f32 %v15376_v58, %v1280_v1  ;;  %v2203_v7 = vsel %vm2151_vm0, %v2198_v60, %v2202_v59  ;;  %v15507_v31 = vor.u32 %v2858_v62, %v2857_v2 }
 0x18e   : > { %v1961_v14 = vpack.c.bf16 %v1960_v52, %v1959_v23  ;;  %1714 = vst [vmem:[#allocation2 + $0x230] sm:$0xff] %v1586_v29  ;;  %v1587_v28 = vmax.f32 %v1289_v0, 0.0  ;;  %12980 = vmatmul.mubr.bf16.gmra.mrb[136].mxu0 %v2203_v7  ;;  %v4092_v44 = vrot.slane %v17967_v18, 2  ;;  %v15526_v30 = vrot.slane %v17958_v12, 1 }
 0x18f   : > { %1712 = vst [vmem:[#allocation2 + $0x220] sm:$0xff] %v1584_v32  ;;  %v1585_v8 = vmax.f32 %v1281_v3, 0.0  ;;  %v2860_v11 = vsel %vm2828_vm1, %v15462_v43, %v15507_v31  ;;  %v1966_v20 = vld [vmem:[#allocation2 + $0x210] ss:$2 sm:$0x3f]  ;;  %v4091_v45 = vrot.slane %v17962_v27, 1  ;;  %v2206_v7 = vor.u32 %v2204_v38, %v2202_v59 }
 0x190   : > { %1962 = vst [vmem:[#allocation3 + $0x38] sm:$0x7f] %v1961_v14  ;;  %1715 = vst [vmem:[#allocation2 + $0x238] sm:$0xff] %v1587_v28  ;;  %13088 = vmatmul.mubr.bf16.gmra.mrb[8].mxu1 %v2860_v11  ;;  %v1970_v21 = vld [vmem:[#allocation2 + $0x211] ss:$2 sm:$0x3f] }
 0x191   : > { %v12901_v13 = vpop.f32.mrb[72].mxu0  ;;  %1713 = vst [vmem:[#allocation2 + $0x228] sm:$0xff] %v1585_v8  ;;  %v1964_v43 = vld [vmem:[#allocation2 + $0x200] ss:$2 sm:$0xff]  ;;  %v1968_v52 = vld [vmem:[#allocation2 + $0x201] ss:$2 sm:$0xff]  ;;  %v15532_v54 = vor.u32 %v4092_v44, %v4091_v45  ;;  %v1972_v60 = vmax.f32 %v1966_v20, %v1970_v21 }
 0x192   : > { %v1302_v56 = vadd.f32 %v15376_v58, %v12901_v13  ;;  %v1293_v16 = vpop.f32.mrb[73].mxu0  ;;  %v17976_v17 = vshll.u32 %v15519_v34, 16  ;;  %v17959_v0 = vshrl.u32 %v15505_v50, 16  ;;  %v1971_v1 = vmax.f32 %v1964_v43, %v1968_v52 }
 0x193   : > { %v1294_v22 = vadd.f32 %v15376_v58, %v1293_v16  ;;  %v12902_v25 = vpop.f32.mrb[74].mxu0  ;;  %v15543_v28 = vsel %vm2828_vm1, %v15484_v35, %v15532_v54 }
 0x194   : > { %v1590_v37 = vmax.f32 %v1302_v56, 0.0  ;;  %v1305_v39 = vadd.f32 %v15376_v58, %v12902_v25  ;;  %v1296_v40 = vpop.f32.mrb[75].mxu0  ;;  %v15552_v59 = vrot.slane %v17976_v17, 1 }
 0x195   : > { %v1588_v42 = vmax.f32 %v1294_v22, 0.0  ;;  %v1297_v36 = vadd.f32 %v15376_v58, %v1296_v40 }
 0x196   : > { %1718 = vst [vmem:[#allocation2 + $0x250] sm:$0xff] %v1590_v37  ;;  %v1591_v15 = vmax.f32 %v1305_v39, 0.0 }
 0x197   : > { %v1976_v33 = vld [vmem:[#allocation2 + $0x230] ss:$2 sm:$0x3f]  ;;  %v1980_v53 = vld [vmem:[#allocation2 + $0x231] ss:$2 sm:$0x3f] }
 0x198   : > { %1716 = vst [vmem:[#allocation2 + $0x240] sm:$0xff] %v1588_v42  ;;  %v1982_v62 = vmax.f32 %v1976_v33, %v1980_v53  ;;  %1719 = vst [vmem:[#allocation2 + $0x258] sm:$0xff] %v1591_v15  ;;  %v1589_v23 = vmax.f32 %v1297_v36, 0.0  ;;  %v15534_v29 = vld [vmem:[#allocation3 + $0x38] sm:$0xff]  ;;  %v1974_v2 = vld [vmem:[#allocation2 + $0x220] ss:$2 sm:$0xff]  ;;  %v6013_v36 = vor.u32 %v17959_v0, %v15526_v30 }
 0x199   : > { %v1978_v32 = vld [vmem:[#allocation2 + $0x221] ss:$2 sm:$0xff]  ;;  %v12905_v3 = vpop.f32.mrb[76].mxu0  ;;  %v2208_v14 = vshll.u32 %v15534_v29, 16  ;;  %v2212_v16 = vshrl.u32 %v15534_v29, 16  ;;  %v15565_v33 = vld [vmem:[#allocation3 + $0x38] sm:$0xff] }
 0x19a   : > { %v1984_v8 = vmax.f32 %v1972_v60, %v1982_v62  ;;  %v1981_v11 = vmax.f32 %v1974_v2, %v1978_v32  ;;  %1717 = vst [vmem:[#allocation2 + $0x248] sm:$0xff] %v1589_v23  ;;  %v1318_v13 = vadd.f32 %v15376_v58, %v12905_v3  ;;  %v1309_v56 = vpop.f32.mrb[77].mxu0  ;;  %v15569_v53 = vsel %vm2151_vm0, %v6013_v36, %v15552_v59 }
 0x19b   : > { %v1310_v20 = vadd.f32 %v15376_v58, %v1309_v56  ;;  %v12906_v21 = vpop.f32.mrb[78].mxu0  ;;  %v15548_v22 = vrot.slane %v2208_v14, 1  ;;  %v2862_v38 = vrot.slane %v2208_v14, 2  ;;  %v2861_v39 = vrot.slane %v2212_v16, 1 }
 0x19c   : > { %v1983_v35 = vmax.f32 %v1971_v1, %v1981_v11  ;;  %v1594_v25 = vmax.f32 %v1318_v13, 0.0  ;;  %v1321_v43 = vadd.f32 %v15376_v58, %v12906_v21  ;;  %v1312_v37 = vpop.f32.mrb[79].mxu0  ;;  %v17964_v32 = vshll.u32 %v15565_v33, 16 }
 0x19d   : > { %v1592_v40 = vmax.f32 %v1310_v20, 0.0  ;;  %v1313_v44 = vadd.f32 %v15376_v58, %v1312_v37  ;;  %v2211_v42 = vsel %vm2151_vm0, %v2206_v7, %v15548_v22  ;;  %v15563_v15 = vor.u32 %v2862_v38, %v2861_v39 }
 0x19e   : > { %v1985_v45 = vpack.c.bf16 %v1984_v8, %v1983_v35  ;;  %1722 = vst [vmem:[#allocation2 + $0x270] sm:$0xff] %v1594_v25  ;;  %v1595_v52 = vmax.f32 %v1321_v43, 0.0  ;;  %12983 = vmatprep.mubr.bf16.mxu0 %v2211_v42  ;;  %v17961_v11 = vshrl.u32 %v15565_v33, 16  ;;  %v4096_v21 = vrot.slane %v17964_v32, 2 }
 0x19f   : > { %1720 = vst [vmem:[#allocation2 + $0x260] sm:$0xff] %v1592_v40  ;;  %v1593_v60 = vmax.f32 %v1313_v44, 0.0  ;;  %v2864_v62 = vsel %vm2828_vm1, %v15507_v31, %v15563_v15  ;;  %v1990_v3 = vld [vmem:[#allocation2 + $0x250] ss:$2 sm:$0x3f] }
 0x1a0   : > { %1986 = vst [vmem:[#allocation3 + $0x40] sm:$0x7f] %v1985_v45  ;;  %1723 = vst [vmem:[#allocation2 + $0x278] sm:$0xff] %v1595_v52  ;;  %13091 = vmatprep.mubr.bf16.mxu1 %v2864_v62  ;;  %v1994_v7 = vld [vmem:[#allocation2 + $0x251] ss:$2 sm:$0x3f] }
 0x1a1   : > { %v12909_v23 = vpop.f32.mrb[80].mxu0  ;;  %1721 = vst [vmem:[#allocation2 + $0x268] sm:$0xff] %v1593_v60  ;;  %v1988_v13 = vld [vmem:[#allocation2 + $0x240] ss:$2 sm:$0xff]  ;;  %v4095_v25 = vrot.slane %v17961_v11, 1  ;;  %v1996_v42 = vmax.f32 %v1990_v3, %v1994_v7 }
 0x1a2   : > { %v1334_v1 = vadd.f32 %v15376_v58, %v12909_v23  ;;  %v1325_v2 = vpop.f32.mrb[81].mxu0  ;;  %v1992_v43 = vld [vmem:[#allocation2 + $0x241] ss:$2 sm:$0xff] }
 0x1a3   : > { %v1326_v14 = vadd.f32 %v15376_v58, %v1325_v2  ;;  %v12910_v8 = vpop.f32.mrb[82].mxu0  ;;  %v15584_v44 = vor.u32 %v4096_v21, %v4095_v25  ;;  %v1995_v60 = vmax.f32 %v1988_v13, %v1992_v43  ;;  %v2214_v21 = vor.u32 %v2212_v16, %v15548_v22 }
 0x1a4   : > { %v1598_v56 = vmax.f32 %v1334_v1, 0.0  ;;  %v1337_v20 = vadd.f32 %v15376_v58, %v12910_v8  ;;  %v1328_v31 = vpop.f32.mrb[83].mxu0 }
 0x1a5   : > { %v1596_v38 = vmax.f32 %v1326_v14, 0.0  ;;  %v1329_v35 = vadd.f32 %v15376_v58, %v1328_v31  ;;  %v15592_v14 = vsel %vm2828_vm1, %v15532_v54, %v15584_v44 }
 0x1a6   : > { %1726 = vst [vmem:[#allocation2 + $0x290] sm:$0xff] %v1598_v56  ;;  %v1599_v37 = vmax.f32 %v1337_v20, 0.0 }
 0x1a7   : > { %v2000_v39 = vld [vmem:[#allocation2 + $0x270] ss:$2 sm:$0x3f]  ;;  %v2004_v40 = vld [vmem:[#allocation2 + $0x271] ss:$2 sm:$0x3f] }
 0x1a8   : > { %1724 = vst [vmem:[#allocation2 + $0x280] sm:$0xff] %v1596_v38  ;;  %v2006_v36 = vmax.f32 %v2000_v39, %v2004_v40  ;;  %1727 = vst [vmem:[#allocation2 + $0x298] sm:$0xff] %v1599_v37  ;;  %v1597_v45 = vmax.f32 %v1329_v35, 0.0  ;;  %v15586_v52 = vld [vmem:[#allocation3 + $0x40] sm:$0xff] }
 0x1a9   : > { %v1998_v62 = vld [vmem:[#allocation2 + $0x260] ss:$2 sm:$0xff]  ;;  %v2002_v23 = vld [vmem:[#allocation2 + $0x261] ss:$2 sm:$0xff]  ;;  %v12913_v1 = vpop.f32.mrb[84].mxu0  ;;  %v2216_v2 = vshll.u32 %v15586_v52, 16 }
 0x1aa   : > { %v2008_v8 = vmax.f32 %v1996_v42, %v2006_v36  ;;  %v2005_v56 = vmax.f32 %v1998_v62, %v2002_v23  ;;  %1725 = vst [vmem:[#allocation2 + $0x288] sm:$0xff] %v1597_v45  ;;  %v1350_v3 = vadd.f32 %v15376_v58, %v12913_v1  ;;  %v1341_v7 = vpop.f32.mrb[85].mxu0  ;;  %v2220_v20 = vshrl.u32 %v15586_v52, 16 }
 0x1ab   : > { %v1342_v13 = vadd.f32 %v15376_v58, %v1341_v7  ;;  %v12914_v31 = vpop.f32.mrb[86].mxu0  ;;  %v15600_v38 = vrot.slane %v2216_v2, 1  ;;  %v2866_v35 = vrot.slane %v2216_v2, 2 }
 0x1ac   : > { %v2007_v54 = vmax.f32 %v1995_v60, %v2005_v56  ;;  %v1602_v25 = vmax.f32 %v1350_v3, 0.0  ;;  %v1353_v43 = vadd.f32 %v15376_v58, %v12914_v31  ;;  %v1344_v37 = vpop.f32.mrb[87].mxu0  ;;  %v2865_v39 = vrot.slane %v2220_v20, 1  ;;  %v15610_v60 = vld [vmem:[#allocation3 + $0x40] sm:$0xff] }
 0x1ad   : > { %18011 = vst [vmem:[#allocation7_spill] sm:$0xff] %v15600_v38  ;;  %v1600_v40 = vmax.f32 %v1342_v13, 0.0  ;;  %v1345_v42 = vadd.f32 %v15376_v58, %v1344_v37  ;;  %v2219_v36 = vsel %vm2151_vm0, %v2214_v21, %v15600_v38  ;;  %v17963_v2 = vshll.u32 %v15610_v60, 16 }
 0x1ae   : > { %v2009_v45 = vpack.c.bf16 %v2008_v8, %v2007_v54  ;;  %1730 = vst [vmem:[#allocation2 + $0x2b0] sm:$0xff] %v1602_v25  ;;  %v1603_v16 = vmax.f32 %v1353_v43, 0.0  ;;  %12984 = vmatmul.mubr.bf16.gmra.mrb[140].mxu0 %v2219_v36  ;;  %v15608_v22 = vor.u32 %v2866_v35, %v2865_v39  ;;  %v17960_v3 = vshrl.u32 %v15610_v60, 16 }
 0x1af   : > { %1728 = vst [vmem:[#allocation2 + $0x2a0] sm:$0xff] %v1600_v40  ;;  %v1601_v62 = vmax.f32 %v1345_v42, 0.0  ;;  %v2014_v7 = vld [vmem:[#allocation2 + $0x290] ss:$2 sm:$0x3f]  ;;  %v4100_v35 = vrot.slane %v17963_v2, 2 }
 0x1b0   : > { %2010 = vst [vmem:[#allocation3 + $0x48] sm:$0x7f] %v2009_v45  ;;  %1731 = vst [vmem:[#allocation2 + $0x2b8] sm:$0xff] %v1603_v16  ;;  %v2868_v23 = vsel %vm2828_vm1, %v15563_v15, %v15608_v22  ;;  %v2018_v13 = vld [vmem:[#allocation2 + $0x291] ss:$2 sm:$0x3f] }
 0x1b1   : > { %13092 = vmatmul.mubr.bf16.gmra.mrb[12].mxu1 %v2868_v23  ;;  %v12917_v1 = vpop.f32.mrb[88].mxu0  ;;  %1729 = vst [vmem:[#allocation2 + $0x2a8] sm:$0xff] %v1601_v62  ;;  %v2012_v54 = vld [vmem:[#allocation2 + $0x280] ss:$2 sm:$0xff]  ;;  %v2016_v15 = vld [vmem:[#allocation2 + $0x281] ss:$2 sm:$0xff]  ;;  %v2020_v23 = vmax.f32 %v2014_v7, %v2018_v13 }
 0x1b2   : > { %v1366_v8 = vadd.f32 %v15376_v58, %v12917_v1  ;;  %v1357_v56 = vpop.f32.mrb[89].mxu0  ;;  %v4099_v39 = vrot.slane %v17960_v3, 1 }
 0x1b3   : > { %v1358_v31 = vadd.f32 %v15376_v58, %v1357_v56  ;;  %v12918_v21 = vpop.f32.mrb[90].mxu0 }
 0x1b4   : > { %v1606_v25 = vmax.f32 %v1366_v8, 0.0  ;;  %v1369_v43 = vadd.f32 %v15376_v58, %v12918_v21  ;;  %v1360_v37 = vpop.f32.mrb[91].mxu0  ;;  %v15625_v45 = vor.u32 %v4100_v35, %v4099_v39 }
 0x1b5   : > { %v1604_v40 = vmax.f32 %v1358_v31, 0.0  ;;  %v1361_v42 = vadd.f32 %v15376_v58, %v1360_v37  ;;  %v2019_v31 = vmax.f32 %v2012_v54, %v2016_v15 }
 0x1b6   : > { %1734 = vst [vmem:[#allocation2 + $0x2d0] sm:$0xff] %v1606_v25  ;;  %v1607_v36 = vmax.f32 %v1369_v43, 0.0  ;;  %v15632_v21 = vsel %vm2828_vm1, %v15584_v44, %v15625_v45  ;;  %v2222_v44 = vor.u32 %v2220_v20, %v15600_v38 }
 0x1b7   : > { %v2024_v16 = vld [vmem:[#allocation2 + $0x2b0] ss:$2 sm:$0x3f]  ;;  %v2028_v62 = vld [vmem:[#allocation2 + $0x2b1] ss:$2 sm:$0x3f] }
 0x1b8   : > { %1732 = vst [vmem:[#allocation2 + $0x2c0] sm:$0xff] %v1604_v40  ;;  %v2030_v1 = vmax.f32 %v2024_v16, %v2028_v62  ;;  %1735 = vst [vmem:[#allocation2 + $0x2d8] sm:$0xff] %v1607_v36  ;;  %v1605_v8 = vmax.f32 %v1361_v42, 0.0  ;;  %v15627_v56 = vld [vmem:[#allocation3 + $0x48] sm:$0xff] }
 0x1b9   : > { %v2022_v37 = vld [vmem:[#allocation2 + $0x2a0] ss:$2 sm:$0xff]  ;;  %v2026_v25 = vld [vmem:[#allocation2 + $0x2a1] ss:$2 sm:$0xff]  ;;  %v12921_v43 = vpop.f32.mrb[92].mxu0  ;;  %v2224_v35 = vshll.u32 %v15627_v56, 16 }
 0x1ba   : > { %v2032_v39 = vmax.f32 %v2020_v23, %v2030_v1  ;;  %v2029_v12 = vmax.f32 %v2022_v37, %v2026_v25  ;;  %1733 = vst [vmem:[#allocation2 + $0x2c8] sm:$0xff] %v1605_v8  ;;  %v1382_v7 = vadd.f32 %v15376_v58, %v12921_v43  ;;  %v1373_v13 = vpop.f32.mrb[93].mxu0  ;;  %v2228_v40 = vshrl.u32 %v15627_v56, 16 }
 0x1bb   : > { %v1374_v42 = vadd.f32 %v15376_v58, %v1373_v13  ;;  %v12922_v36 = vpop.f32.mrb[94].mxu0  ;;  %v15641_v54 = vrot.slane %v2224_v35, 1  ;;  %v2870_v15 = vrot.slane %v2224_v35, 2 }
 0x1bc   : > { %v2031_v16 = vmax.f32 %v2019_v31, %v2029_v12  ;;  %v1610_v62 = vmax.f32 %v1382_v7, 0.0  ;;  %v1385_v23 = vadd.f32 %v15376_v58, %v12922_v36  ;;  %v1376_v1 = vpop.f32.mrb[95].mxu0  ;;  %v2869_v8 = vrot.slane %v2228_v40, 1 }
 0x1bd   : > { %v1608_v37 = vmax.f32 %v1374_v42, 0.0  ;;  %v1377_v25 = vadd.f32 %v15376_v58, %v1376_v1  ;;  %v15649_v43 = vsel %vm2151_vm0, %v2222_v44, %v15641_v54  ;;  %v14935_v42 = vld [vmem:[%s17948_s2] ss:$0 sm:$0xff] }
 0x1be   : > { %18012 = vst [vmem:[#allocation8_spill] sm:$0xff] %v15649_v43  ;;  %v2033_v13 = vpack.c.bf16 %v2032_v39, %v2031_v16  ;;  %1738 = vst [vmem:[#allocation2 + $0x2f0] sm:$0xff] %v1610_v62  ;;  %v1611_v20 = vmax.f32 %v1385_v23, 0.0  ;;  %12987 = vmatprep.mubr.bf16.mxu0 %v15649_v43  ;;  %v15652_v12 = vor.u32 %v2870_v15, %v2869_v8 }
 0x1bf   : > { %1736 = vst [vmem:[#allocation2 + $0x2e0] sm:$0xff] %v1608_v37  ;;  %v1609_v31 = vmax.f32 %v1377_v25, 0.0  ;;  %v2038_v58 = vld [vmem:[#allocation2 + $0x2d0] ss:$2 sm:$0x3f] }
 0x1c0   : > { %2034 = vst [vmem:[#allocation3 + $0x50] sm:$0x7f] %v2033_v13  ;;  %1739 = vst [vmem:[#allocation2 + $0x2f8] sm:$0xff] %v1611_v20  ;;  %v15657_v35 = vsel %vm2828_vm1, %v15608_v22, %v15652_v12  ;;  %v2042_v7 = vld [vmem:[#allocation2 + $0x2d1] ss:$2 sm:$0x3f] }
 0x1c1   : > { %18013 = vst [vmem:[#allocation9_spill] sm:$0xff] %v15657_v35  ;;  %13095 = vmatprep.mubr.bf16.mxu1 %v15657_v35  ;;  %v12925_v39 = vpop.f32.mrb[96].mxu0  ;;  %1737 = vst [vmem:[#allocation2 + $0x2e8] sm:$0xff] %v1609_v31  ;;  %v2036_v15 = vld [vmem:[#allocation2 + $0x2c0] ss:$2 sm:$0xff]  ;;  %v2044_v20 = vmax.f32 %v2038_v58, %v2042_v7 }
 0x1c2   : > { %v1398_v36 = vadd.f32 %v14935_v42, %v12925_v39  ;;  %v1389_v44 = vpop.f32.mrb[97].mxu0  ;;  %v2040_v23 = vld [vmem:[#allocation2 + $0x2c1] ss:$2 sm:$0xff]  ;;  %v15666_v39 = vsel %vm2828_vm1, %v15625_v45, %v15652_v12 }
 0x1c3   : > { %v1390_v16 = vadd.f32 %v14935_v42, %v1389_v44  ;;  %v12926_v62 = vpop.f32.mrb[98].mxu0  ;;  %v2043_v11 = vmax.f32 %v2036_v15, %v2040_v23  ;;  %v15675_v15 = vld [vmem:[#allocation3 + $0x8] sm:$0xff] }
 0x1c4   : > { %v1614_v1 = vmax.f32 %v1398_v36, 0.0  ;;  %v1401_v8 = vadd.f32 %v14935_v42, %v12926_v62  ;;  %v1392_v37 = vpop.f32.mrb[99].mxu0 }
 0x1c5   : > { %v1612_v25 = vmax.f32 %v1390_v16, 0.0  ;;  %v1393_v13 = vadd.f32 %v14935_v42, %v1392_v37 }
 0x1c6   : > { %1742 = vst [vmem:[#allocation2 + $0x310] sm:$0xff] %v1614_v1  ;;  %v1615_v0 = vmax.f32 %v1401_v8, 0.0 }
 0x1c7   : > { %v2048_v3 = vld [vmem:[#allocation2 + $0x2f0] ss:$2 sm:$0x3f]  ;;  %v2052_v31 = vld [vmem:[#allocation2 + $0x2f1] ss:$2 sm:$0x3f] }
 0x1c8   : > { %1740 = vst [vmem:[#allocation2 + $0x300] sm:$0xff] %v1612_v25  ;;  %v2054_v44 = vmax.f32 %v2048_v3, %v2052_v31  ;;  %v15668_v27 = vld [vmem:[#allocation3 + $0x50] sm:$0x1]  ;;  %1743 = vst [vmem:[#allocation2 + $0x318] sm:$0xff] %v1615_v0  ;;  %v1613_v16 = vmax.f32 %v1393_v13, 0.0  ;;  %v3095_v3 = vrot.slane %v15675_v15, 2  ;;  %v15681_v0 = vor.u32 %v2228_v40, %v15641_v54 }
 0x1c9   : > { %v15670_v36 = vld [vmem:[#allocation3 + $0x50] sm:$0x3]  ;;  %v2046_v58 = vld [vmem:[#allocation2 + $0x2e0] ss:$2 sm:$0xff]  ;;  %v2050_v7 = vld [vmem:[#allocation2 + $0x2e1] ss:$2 sm:$0xff] }
 0x1ca   : > { %v2232_v62 = vshll.u32 %v15668_v27, 16  ;;  %v2874_v1 = vshrl.u32 %v15670_v36, 16  ;;  %v2056_v8 = vmax.f32 %v2044_v20, %v2054_v44  ;;  %v2053_v37 = vmax.f32 %v2046_v58, %v2050_v7  ;;  %v3073_v25 = vld [vmem:[#allocation3] sm:$0xfc]  ;;  %1741 = vst [vmem:[#allocation2 + $0x308] sm:$0xff] %v1613_v16  ;;  %v12929_v23 = vpop.f32.mrb[100].mxu0 }
 0x1cb   : > { %v2877_v45 = vshll.u32 %v15670_v36, 16  ;;  %v1414_v2 = vadd.f32 %v14935_v42, %v12929_v23  ;;  %v1405_v32 = vpop.f32.mrb[101].mxu0  ;;  %v15685_v4 = vld [vmem:[#allocation3 + $0x50] sm:$0xff] }
 0x1cc   : > { %v2234_v13 = vrot.slane %v2232_v62, 1  ;;  %v2876_v31 = vrot.slane %v2874_v1, 1  ;;  %v2055_v20 = vmax.f32 %v2043_v11, %v2053_v37  ;;  %v1406_v58 = vadd.f32 %v14935_v42, %v1405_v32  ;;  %v12930_v7 = vpop.f32.mrb[102].mxu0  ;;  %v14937_v62 = vld [vmem:[#allocation3] sm:$0xff]  ;;  %v15692_v37 = vld [vmem:[#allocation3 + $0x10] sm:$0xff] }
 0x1cd   : > { %v2879_v44 = vrot.slane %v2877_v45, 2  ;;  %v1618_v5 = vmax.f32 %v1414_v2, 0.0  ;;  %v1417_v18 = vadd.f32 %v14935_v42, %v12930_v7  ;;  %v1408_v16 = vpop.f32.mrb[103].mxu0  ;;  %v3094_v1 = vrot.slane %v3073_v25, 2  ;;  %v15702_v25 = vld [vmem:[#allocation3 + $0x18] sm:$0xff]  ;;  %v15778_v55 = vld [vmem:[#allocation3 + $0x50] sm:$0xff] }
 0x1ce   : > { %v2235_v9 = vsel %vm2151_vm0, %v15681_v0, %v2234_v13  ;;  %v2057_v6 = vpack.c.bf16 %v2056_v8, %v2055_v20  ;;  %v1616_v57 = vmax.f32 %v1406_v58, 0.0  ;;  %v1409_v40 = vadd.f32 %v14935_v42, %v1408_v16  ;;  %v14940_v58 = vld [vmem:[%s17949_s3 + $0x80] sm:$0xff]   ;;  %v14530_v16 = vld [vmem:[%s17949_s3 + $0x90] sm:$0xff]  }
 0x1cf   : > { %12988 = vmatmul.mubr.bf16.gmra.mrb[144].mxu0 %v2235_v9  ;;  %v2880_v48 = vor.u32 %v2879_v44, %v2876_v31  ;;  %1746 = vst [vmem:[#allocation2 + $0x330] sm:$0xff] %v1618_v5  ;;  %v1619_v11 = vmax.f32 %v1417_v18, 0.0  ;;  %v3096_v8 = vsel %vm3093_vm2, %v3094_v1, %v3095_v3  ;;  %v17973_v9 = vshll.u32 %v15685_v4, 16  ;;  %v2066_v45 = vld [vmem:[#allocation2 + $0x311] ss:$2 sm:$0x3f] }
 0x1d0   : > { %13007 = vmatprep.mubr.bf16.mxu0 %v14937_v62  ;;  %2058 = vst [vmem:[#allocation3 + $0x58] sm:$0x7f] %v2057_v6  ;;  %1744 = vst [vmem:[#allocation2 + $0x320] sm:$0xff] %v1616_v57  ;;  %v1617_v2 = vmax.f32 %v1409_v40, 0.0  ;;  %v17972_v42 = vshrl.u32 %v15685_v4, 16  ;;  %v3097_v5 = vrot.slane %v15692_v37, 2 }
 0x1d1   : > { %v2881_v32 = vsel %vm2828_vm1, %v15652_v12, %v2880_v48  ;;  %1747 = vst [vmem:[#allocation2 + $0x338] sm:$0xff] %v1619_v11  ;;  %v2062_v6 = vld [vmem:[#allocation2 + $0x310] ss:$2 sm:$0x3f]  ;;  %v4108_v57 = vrot.slane %v17973_v9, 2  ;;  %v14529_v48 = vld [vmem:[%s17949_s3 + $0x88] sm:$0xff]  }
 0x1d2   : > { %13096 = vmatmul.mubr.bf16.gmra.mrb[16].mxu1 %v2881_v32  ;;  %1745 = vst [vmem:[#allocation2 + $0x328] sm:$0xff] %v1617_v2  ;;  %v4107_v18 = vrot.slane %v17972_v42, 1  ;;  %v3099_v23 = vrot.slane %v15702_v25, 2  ;;  %v2060_v13 = vld [vmem:[#allocation2 + $0x300] ss:$2 sm:$0xff]  ;;  %v3098_v7 = vsel %vm3093_vm2, %v3095_v3, %v3097_v5  ;;  %v2068_v40 = vmax.f32 %v2062_v6, %v2066_v45 }
 0x1d3   : > { %13115 = vmatprep.mubr.bf16.mxu1 %v3096_v8  ;;  %v2064_v31 = vld [vmem:[#allocation2 + $0x301] ss:$2 sm:$0xff] }
 0x1d4   : > { %v15706_v20 = vor.u32 %v4108_v57, %v4107_v18  ;;  %v14526_v44 = vld [vmem:[%s17949_s3 + $0x148] sm:$0xff]   ;;  %v3100_v1 = vsel %vm3093_vm2, %v3097_v5, %v3099_v23  ;;  %v2067_v32 = vmax.f32 %v2060_v13, %v2064_v31  ;;  %v14941_v3 = vld [vmem:[%s17949_s3 + $0x140] sm:$0xff]  }
 0x1d5   : > { %v15731_v5 = vld [vmem:[#allocation3 + $0x20] sm:$0xff]  ;;  %v15734_v31 = vld [vmem:[#allocation3 + $0x28] sm:$0xff] }
 0x1d6   : > { %v15722_v62 = vsel %vm2828_vm1, %v15652_v12, %v15706_v20  ;;  %v14528_v12 = vld [vmem:[%s17949_s3 + $0x150] sm:$0xff]   ;;  %v3101_v18 = vrot.slane %v15731_v5, 2 }
 0x1d7   : > { %13008 = vmatmul.mubr.bf16.vlgmr.msra.gmra.mrb[128].mxu0 %v15675_v15 }
 0x1d8   : > { %13011 = vmatprep.mubr.bf16.mxu0 %v15692_v37  ;;  %13028 = vmatpush3.bf16.msra.mxu0 %v14940_v58  ;;  %v2072_v11 = vld [vmem:[#allocation2 + $0x330] ss:$2 sm:$0x3f]  ;;  %v2076_v2 = vld [vmem:[#allocation2 + $0x331] ss:$2 sm:$0x3f] }
 0x1d9   : > { %13029 = vmatprep.subr.bf16.mxu0 %v14529_v48  ;;  %v2078_v8 = vmax.f32 %v2072_v11, %v2076_v2  ;;  %v2070_v57 = vld [vmem:[#allocation2 + $0x320] ss:$2 sm:$0xff]  ;;  %v2074_v6 = vld [vmem:[#allocation2 + $0x321] ss:$2 sm:$0xff]  ;;  %v3103_v58 = vrot.slane %v15734_v31, 2  ;;  %v3102_v2 = vsel %vm3093_vm2, %v3099_v23, %v3101_v18  ;;  %v15759_v23 = vld [vmem:[#allocation3 + $0x38] sm:$0xff] }
 0x1da   : > { %13116 = vmatmul.mubr.bf16.vlgmr.msra.gmra.mrb[0].mxu1 %v3098_v7  ;;  %v2077_v45 = vmax.f32 %v2070_v57, %v2074_v6  ;;  %v14532_v7 = vld [vmem:[%s17949_s3 + $0x98] sm:$0xff]   ;;  %v15745_v11 = vld [vmem:[#allocation3 + $0x28] sm:$0xff]  ;;  %v14533_v57 = vld [vmem:[%s17949_s3 + $0x160] sm:$0xff]   ;;  %v17982_v42 = vshrl.u32 %v15759_v23, 16 }
 0x1db   : > { %13136 = vmatpush3.bf16.msra.mxu1 %v14941_v3  ;;  %13119 = vmatprep.mubr.bf16.mxu1 %v3100_v1  ;;  %v2080_v13 = vmax.f32 %v2068_v40, %v2078_v8  ;;  %v15748_v3 = vld [vmem:[#allocation3 + $0x30] sm:$0xff]  ;;  %v17978_v8 = vrot.slane %v15534_v29, 2  ;;  %v14534_v6 = vld [vmem:[%s17949_s3 + $0xa0] sm:$0xff]  }
 0x1dc   : > { %13137 = vmatprep.subr.bf16.mxu1 %v14526_v44  ;;  %13030 = vmatpush3.bf16.msra.mxu0 %v14529_v48  ;;  %v2079_v1 = vmax.f32 %v2067_v32, %v2077_v45  ;;  %v14531_v48 = vld [vmem:[%s17949_s3 + $0x158] sm:$0xff]   ;;  %v3105_v32 = vrot.slane %v15486_v41, 2  ;;  %v17977_v45 = vshrl.u32 %v15745_v11, 16 }
 0x1dd   : > { %13031 = vmatprep.subr.bf16.mxu0 %v14530_v16 }
 0x1de   : > { %v2081_v40 = vpack.c.bf16 %v2080_v13, %v2079_v1  ;;  %v15765_v13 = vld [vmem:[#allocation3 + $0x48] sm:$0xff]  ;;  %v17981_v1 = vshll.u32 %v15748_v3, 16  ;;  %v3106_v9 = vsel %vm3093_vm2, %v3103_v58, %v3105_v32  ;;  %v3108_v17 = vsel %vm3093_vm2, %v3105_v32, %v17978_v8 }
 0x1df   : > { %13138 = vmatpush3.bf16.msra.mxu1 %v14526_v44  ;;  %13012 = vmatmul.mubr.bf16.gmra.mrb[132].mxu0 %v15702_v25  ;;  %v3104_v44 = vsel %vm3093_vm2, %v3101_v18, %v3103_v58  ;;  %v15763_v18 = vld [vmem:[#allocation3 + $0x40] sm:$0xff]  ;;  %v5328_v32 = vrot.slane %v17982_v42, 1 }
 0x1e0   : > { %13015 = vmatprep.mubr.bf16.mxu0 %v15731_v5  ;;  %13139 = vmatprep.subr.bf16.mxu1 %v14528_v12  ;;  %2082 = vst [vmem:[#allocation3 + $0x60] sm:$0x7f] %v2081_v40  ;;  %v17983_v40 = vshll.u32 %v15759_v23, 16  ;;  %v18015_v35 = vshll.u32 %v15763_v18, 16 }
 0x1e1   : > { %13032 = vmatpush3.bf16.msra.mxu0 %v14530_v16  ;;  %v17979_v16 = vshll.u32 %v15745_v11, 16 }
 0x1e2   : > { %13120 = vmatmul.mubr.bf16.gmra.mrb[4].mxu1 %v3102_v2  ;;  %13033 = vmatprep.subr.bf16.mxu0 %v14532_v7  ;;  %v17980_v2 = vshrl.u32 %v15748_v3, 16  ;;  %v5329_v8 = vrot.slane %v17983_v40, 2  ;;  %v5333_v43 = vrot.slane %v18015_v35, 2  ;;  %v15830_v35 = vrot.slane %v15627_v56, 2 }
 0x1e3   : > { %13123 = vmatprep.mubr.bf16.mxu1 %v3104_v44  ;;  %13140 = vmatpush3.bf16.msra.mxu1 %v14528_v12  ;;  %v14536_v12 = vld [vmem:[%s17949_s3 + $0xa8] sm:$0xff]   ;;  %v5321_v24 = vrot.slane %v17979_v16, 2  ;;  %v14538_v16 = vld [vmem:[%s17949_s3 + $0xb0] sm:$0xff]  }
 0x1e4   : > { %13141 = vmatprep.subr.bf16.mxu1 %v14531_v48  ;;  %v5324_v44 = vrot.slane %v17980_v2, 1  ;;  %v5330_v40 = vor.u32 %v5329_v8, %v5328_v32  ;;  %v15816_v2 = vrot.slane %v15586_v52, 2  ;;  %v18019_v8 = vshll.u32 %v15765_v13, 16 }
 0x1e5   : > { %13034 = vmatpush3.bf16.msra.mxu0 %v14532_v7  ;;  %v5320_v7 = vrot.slane %v17977_v45, 1  ;;  %v5325_v45 = vrot.slane %v17981_v1, 2  ;;  %v18014_v1 = vshrl.u32 %v15763_v18, 16  ;;  %v18020_v32 = vshll.u32 %v15778_v55, 16 }
 0x1e6   : > { %13035 = vmatprep.subr.bf16.mxu0 %v14534_v6 }
 0x1e7   : > { %13016 = vmatmul.mubr.bf16.gmra.mrb[136].mxu0 %v15734_v31  ;;  %13142 = vmatpush3.bf16.msra.mxu1 %v14531_v48  ;;  %v14535_v48 = vld [vmem:[%s17949_s3 + $0x168] sm:$0xff]   ;;  %v5332_v58 = vrot.slane %v18014_v1, 1  ;;  %v5326_v42 = vor.u32 %v5325_v45, %v5324_v44  ;;  %v5337_v1 = vrot.slane %v18019_v8, 2  ;;  %v14539_v44 = vld [vmem:[%s17949_s3 + $0xb8] sm:$0xff]   ;;  %v17990_v8 = vshrl.u32 %v15519_v34, 16 }
 0x1e8   : > { %13019 = vmatprep.mubr.bf16.mxu0 %v15486_v41  ;;  %13143 = vmatprep.subr.bf16.mxu1 %v14533_v57  ;;  %v15806_v41 = vor.u32 %v5321_v24, %v5320_v7  ;;  %v18016_v24 = vshrl.u32 %v15765_v13, 16 }
 0x1e9   : > { %13036 = vmatpush3.bf16.msra.mxu0 %v14534_v6  ;;  %v17986_v6 = vshrl.u32 %v15778_v55, 16  ;;  %v5334_v45 = vor.u32 %v5333_v43, %v5332_v58  ;;  %v14540_v58 = vld [vmem:[%s17949_s3 + $0x178] sm:$0xff]  }
 0x1ea   : > { %13124 = vmatmul.mubr.bf16.gmra.mrb[8].mxu1 %v3106_v9  ;;  %13037 = vmatprep.subr.bf16.mxu0 %v14536_v12  ;;  %v14537_v9 = vld [vmem:[%s17949_s3 + $0x170] sm:$0xff]   ;;  %v5336_v7 = vrot.slane %v18016_v24, 1  ;;  %v5341_v24 = vrot.slane %v18020_v32, 2  ;;  %v18023_v32 = vrot.slane %v15534_v29, 2 }
 0x1eb   : > { %13127 = vmatprep.mubr.bf16.mxu1 %v3108_v17  ;;  %13144 = vmatpush3.bf16.msra.mxu1 %v14533_v57  ;;  %v15822_v17 = vsel %vm2828_vm1, %v15806_v41, %v5326_v42  ;;  %v15825_v57 = vsel %vm2828_vm1, %v5326_v42, %v5330_v40  ;;  %v15841_v43 = vsel %vm2828_vm1, %v5330_v40, %v5334_v45  ;;  %v15854_v40 = vld [vmem:[#allocation3 + $0x58] sm:$0xff] }
 0x1ec   : > { %13145 = vmatprep.subr.bf16.mxu1 %v14535_v48  ;;  %18017 = vst [vmem:[#allocation10_spill] sm:$0xff] %v15822_v17  ;;  %18018 = vst [vmem:[#allocation11_spill] sm:$0xff] %v15825_v57  ;;  %v5338_v42 = vor.u32 %v5337_v1, %v5336_v7  ;;  %v14543_v1 = vld [vmem:[%s17949_s3 + $0x600] sm:$0xff]  }
 0x1ed   : > { %13038 = vmatpush3.bf16.msra.mxu0 %v14536_v12  ;;  %v5340_v12 = vrot.slane %v17986_v6, 1  ;;  %18021 = vst [vmem:[#allocation12_spill] sm:$0xff] %v15841_v43  ;;  %18024 = vst [vmem:[#allocation14_spill] sm:$0xff] %v15854_v40 }
 0x1ee   : > { %13039 = vmatprep.subr.bf16.mxu0 %v14538_v16  ;;  %v15857_v7 = vsel %vm2828_vm1, %v5334_v45, %v5338_v42  ;;  %v2599_v45 = vrot.slane %v15675_v15, 1 }
 0x1ef   : > { %13020 = vmatmul.mubr.bf16.gmra.mrb[140].mxu0 %v15534_v29  ;;  %13146 = vmatpush3.bf16.msra.mxu1 %v14535_v48  ;;  %v15848_v6 = vor.u32 %v5341_v24, %v5340_v12  ;;  %v3110_v48 = vsel %vm3093_vm2, %v18023_v32, %v15816_v2  ;;  %18025 = vst [vmem:[#allocation15_spill] sm:$0xff] %v15857_v7  ;;  %v18026_v29 = vshll.u32 %v15519_v34, 16  ;;  %v14541_v24 = vld [vmem:[%s17949_s3 + $0x180] sm:$0xff]  }
 0x1f0   : > { %13023 = vmatprep.mubr.bf16.mxu0 %v15586_v52  ;;  %13147 = vmatprep.subr.bf16.mxu1 %v14537_v9  ;;  %v15862_v52 = vsel %vm3093_vm2, %v15816_v2, %v15830_v35 }
 0x1f1   : > { %18022 = vst [vmem:[#allocation13_spill] sm:$0xff] %v15848_v6  ;;  %13040 = vmatpush3.bf16.msra.mxu0 %v14538_v16  ;;  %v5317_v12 = vrot.slane %v18026_v29, 2  ;;  %v15871_v16 = vsel %vm2828_vm1, %v5338_v42, %v15848_v6  ;;  %v6549_v29 = vrot.slane %v17990_v8, 1  ;;  %v14944_v42 = vld [vmem:[#allocation3] sm:$0xfe]  ;;  %v3113_v6 = vrot.slane %v15670_v36, 2 }
 0x1f2   : > { %13128 = vmatmul.mubr.bf16.gmra.mrb[12].mxu1 %v3110_v48  ;;  %13041 = vmatprep.subr.bf16.mxu0 %v14539_v44  ;;  %18027 = vst [vmem:[#allocation16_spill] sm:$0xff] %v15871_v16  ;;  %v17992_v48 = vshrl.u32 %v15854_v40, 16  ;;  %v2598_v38 = vrot.slane %v14944_v42, 1  ;;  %v18029_v8 = vshll.u32 %v15854_v40, 16  ;;  %v14544_v42 = vld [vmem:[%s17949_s3 + $0x190] sm:$0xff]  }
 0x1f3   : > { %13131 = vmatprep.mubr.bf16.mxu1 %v15862_v52  ;;  %13148 = vmatpush3.bf16.msra.mxu1 %v14537_v9  ;;  %v15883_v9 = vor.u32 %v6549_v29, %v5317_v12  ;;  %v2603_v12 = vrot.slane %v15702_v25, 1  ;;  %v2607_v29 = vrot.slane %v15734_v31, 1 }
 0x1f4   : > { %13149 = vmatprep.subr.bf16.mxu1 %v14540_v58  ;;  %v2600_v16 = vsel %vm2597_vm3, %v2598_v38, %v2599_v45  ;;  %v5344_v32 = vrot.slane %v17992_v48, 1  ;;  %v5345_v7 = vrot.slane %v18029_v8, 2  ;;  %v2601_v38 = vrot.slane %v15692_v37, 1  ;;  %v14545_v8 = vld [vmem:[%s17949_s3 + $0x608] sm:$0xff]   ;;  %v14548_v48 = vld [vmem:[%s17949_s3 + $0x618] sm:$0xff]  }
 0x1f5   : > { %13042 = vmatpush3.bf16.msra.mxu0 %v14539_v44  ;;  %18028 = vst [vmem:[#allocation17_spill] sm:$0xff] %v15883_v9  ;;  %v15894_v36 = vsel %vm2828_vm1, %v15883_v9, %v15806_v41  ;;  %v3114_v44 = vsel %vm3093_vm2, %v15830_v35, %v3113_v6  ;;  %v14542_v6 = vld [vmem:[%s17949_s3 + $0x188] sm:$0xff]  }
 0x1f6   : > { %13819 = vmatprep.subr.bf16.mxu0 %v14543_v1  ;;  %18030 = vst [vmem:[#allocation18_spill] sm:$0xff] %v15894_v36  ;;  %v2604_v41 = vsel %vm2597_vm3, %v2601_v38, %v2603_v12 }
 0x1f7   : > { %13024 = vmatmul.mubr.bf16.gmra.mrb[144].mxu0 %v15627_v56  ;;  %13150 = vmatpush3.bf16.msra.mxu1 %v14540_v58  ;;  %v15899_v58 = vor.u32 %v5345_v7, %v5344_v32  ;;  %v15914_v7 = vld [vmem:[#allocation3 + $0x30] sm:$0xff]  ;;  %v15932_v32 = vld [vmem:[#allocation3 + $0x58] sm:$0xff] }
 0x1f8   : > { %13043 = vmatprep.mubr.bf16.mxu0 %v2600_v16  ;;  %13171 = vmatprep.subr.bf16.mxu1 %v14541_v24  ;;  %v2602_v16 = vsel %vm2597_vm3, %v2599_v45, %v2601_v38  ;;  %v2605_v45 = vrot.slane %v15731_v5, 1  ;;  %v15924_v38 = vld [vmem:[#allocation3 + $0x28] sm:$0xff]  ;;  %v18035_v36 = vshll.u32 %v15914_v7, 16 }
 0x1f9   : > { %18031 = vst [vmem:[#allocation19_spill] sm:$0xff] %v15899_v58  ;;  %v15948_v58 = vld [vmem:[#allocation3 + $0x8] sm:$0xff] }
 0x1fa   : > { %13132 = vmatmul.mubr.bf16.gmra.mrb[16].mxu1 %v3114_v44  ;;  %v2608_v43 = vsel %vm2597_vm3, %v2605_v45, %v2607_v29 }
 0x1fb   : > { %13151 = vmatprep.mubr.bf16.mxu1 %v15675_v15  ;;  %v14547_v15 = vld [vmem:[%s17949_s3 + $0x610] sm:$0xff]  }
 0x1ff   : > { %13044 = vmatmul.mubr.bf16.vlgmr.msra.gmra.mrb[128].mxu0 %v2602_v16  ;;  %v18032_v16 = vshrl.u32 %v15914_v7, 16 }
 0x200   : > { %13047 = vmatprep.mubr.bf16.mxu0 %v2604_v41  ;;  %13820 = vmatpush3.bf16.msra.mxu0 %v14543_v1  ;;  %v14946_v1 = vld [vmem:[#allocation3 + $0x30] sm:$0xff] }
 0x201   : > { %13821 = vmatprep.subr.bf16.mxu0 %v14545_v8  ;;  %v2609_v44 = vrot.slane %v14946_v1, 1  ;;  %v7790_v41 = vrot.slane %v18032_v16, 1  ;;  %v18033_v16 = vshrl.u32 %v15924_v38, 16 }
 0x202   : > { %13152 = vmatmul.mubr.bf16.vlgmr.msra.gmra.mrb[0].mxu1 %v15692_v37  ;;  %v2606_v37 = vsel %vm2597_vm3, %v2603_v12, %v2605_v45  ;;  %v18034_v12 = vshll.u32 %v15924_v38, 16  ;;  %v14549_v45 = vld [vmem:[%s17949_s3 + $0x1a0] sm:$0xff]  }
 0x203   : > { %13172 = vmatpush3.bf16.msra.mxu1 %v14541_v24  ;;  %13155 = vmatprep.mubr.bf16.mxu1 %v15702_v25  ;;  %v15934_v24 = vld [vmem:[#allocation3 + $0x38] sm:$0xff]  ;;  %v14550_v25 = vld [vmem:[%s17949_s3 + $0x620] sm:$0xff]   ;;  %v7786_v57 = vrot.slane %v18033_v16, 1 }
 0x204   : > { %13173 = vmatprep.subr.bf16.mxu1 %v14542_v6  ;;  %13822 = vmatpush3.bf16.msra.mxu0 %v14545_v8  ;;  %v14546_v8 = vld [vmem:[%s17949_s3 + $0x198] sm:$0xff]   ;;  %v7787_v17 = vrot.slane %v18034_v12, 2  ;;  %v18037_v50 = vshll.u32 %v15934_v24, 16 }
 0x205   : > { %13823 = vmatprep.subr.bf16.mxu0 %v14547_v15 }
 0x206   : > { %v7795_v40 = vrot.slane %v18037_v50, 2  ;;  %v15963_v16 = vor.u32 %v7787_v17, %v7786_v57 }
 0x207   : > { %13174 = vmatpush3.bf16.msra.mxu1 %v14542_v6  ;;  %13048 = vmatmul.mubr.bf16.gmra.mrb[132].mxu0 %v2606_v37  ;;  %v7791_v6 = vrot.slane %v18035_v36, 2  ;;  %v18036_v37 = vshrl.u32 %v15934_v24, 16  ;;  %v14949_v36 = vld [vmem:[#allocation3 + $0x38] sm:$0xff] }
 0x208   : > { %13051 = vmatprep.mubr.bf16.mxu0 %v2608_v43  ;;  %13175 = vmatprep.subr.bf16.mxu1 %v14544_v42 }
 0x209   : > { %13824 = vmatpush3.bf16.msra.mxu0 %v14547_v15  ;;  %v7794_v9 = vrot.slane %v18036_v37, 1  ;;  %v7792_v12 = vor.u32 %v7791_v6, %v7790_v41  ;;  %v2611_v15 = vrot.slane %v14949_v36, 1  ;;  %v18040_v41 = vshll.u32 %v15932_v32, 16 }
 0x20a   : > { %13156 = vmatmul.mubr.bf16.gmra.mrb[4].mxu1 %v15731_v5  ;;  %13825 = vmatprep.subr.bf16.mxu0 %v14548_v48  ;;  %v3536_v5 = vshll.u32 %v15948_v58, 16 }
 0x20b   : > { %13159 = vmatprep.mubr.bf16.mxu1 %v15734_v31  ;;  %13176 = vmatpush3.bf16.msra.mxu1 %v14544_v42  ;;  %v7796_v43 = vor.u32 %v7795_v40, %v7794_v9  ;;  %v15971_v50 = vsel %vm2828_vm1, %v15963_v16, %v7792_v12  ;;  %v18038_v31 = vshrl.u32 %v15932_v32, 16  ;;  %v2610_v42 = vsel %vm2597_vm3, %v2607_v29, %v2609_v44  ;;  %v14551_v40 = vld [vmem:[%s17949_s3 + $0x1a8] sm:$0xff]  }
 0x20c   : > { %13177 = vmatprep.subr.bf16.mxu1 %v14546_v8  ;;  %v14552_v9 = vld [vmem:[%s17949_s3 + $0x628] sm:$0xff]   ;;  %v7811_v6 = vrot.slane %v18040_v41, 2  ;;  %v2612_v37 = vsel %vm2597_vm3, %v2609_v44, %v2611_v15  ;;  %v16004_v44 = vrot.slane %v15627_v56, 1 }
 0x20d   : > { %13826 = vmatpush3.bf16.msra.mxu0 %v14548_v48  ;;  %v15975_v17 = vsel %vm2828_vm1, %v7792_v12, %v7796_v43  ;;  %v7810_v57 = vrot.slane %v18038_v31, 1  ;;  %v15988_v48 = vsel %vm2828_vm1, %v7796_v43, %v15608_v22  ;;  %v14950_v12 = vld [vmem:[#allocation3 + $0x40] sm:$0xff]  ;;  %v14554_v22 = vld [vmem:[%s17949_s3 + $0x630] sm:$0xff]  }
 0x20e   : > { %13827 = vmatprep.subr.bf16.mxu0 %v14550_v25  ;;  %18039 = vst [vmem:[#allocation20_spill] sm:$0xff] %v15988_v48  ;;  %v2613_v31 = vrot.slane %v14950_v12, 1 }
 0x20f   : > { %13052 = vmatmul.mubr.bf16.gmra.mrb[136].mxu0 %v2610_v42  ;;  %13178 = vmatpush3.bf16.msra.mxu1 %v14546_v8  ;;  %v15993_v29 = vor.u32 %v7811_v6, %v7810_v57  ;;  %v8022_v57 = vld [vmem:[#allocation3 + $0x20] sm:$0xfc]  ;;  %v16019_v42 = vld [vmem:[#allocation3 + $0x48] sm:$0xff]  ;;  %v3534_v6 = vshrl.u32 %v15948_v58, 16  ;;  %v16039_v58 = vrot.slane %v15934_v24, 2 }
 0x210   : > { %13055 = vmatprep.mubr.bf16.mxu0 %v2612_v37  ;;  %13179 = vmatprep.subr.bf16.mxu1 %v14549_v45  ;;  %v2614_v8 = vsel %vm2597_vm3, %v2611_v15, %v2613_v31  ;;  %v2616_v56 = vsel %vm2597_vm3, %v2613_v31, %v16004_v44  ;;  %v16023_v15 = vrot.slane %v15924_v38, 2  ;;  %v8042_v41 = vrot.slane %v8022_v57, 2 }
 0x211   : > { %13828 = vmatpush3.bf16.msra.mxu0 %v14550_v25  ;;  %v16001_v43 = vsel %vm2828_vm1, %v15706_v20, %v15993_v29  ;;  %v14556_v25 = vld [vmem:[%s17949_s3 + $0x638] sm:$0xff]   ;;  %v18042_v37 = vshll.u32 %v15299_v49, 16  ;;  %v18045_v57 = vshrl.u32 %v15299_v49, 16 }
 0x212   : > { %13160 = vmatmul.mubr.bf16.gmra.mrb[8].mxu1 %v14946_v1  ;;  %13829 = vmatprep.subr.bf16.mxu0 %v14552_v9  ;;  %18041 = vst [vmem:[#allocation21_spill] sm:$0xff] %v16001_v43  ;;  %v14553_v1 = vld [vmem:[%s17949_s3 + $0x1b0] sm:$0xff]   ;;  %v8044_v31 = vsel %vm3093_vm2, %v8042_v41, %v16023_v15  ;;  %v16157_v43 = vld [vmem:[#allocation3 + $0x20] sm:$0xff] }
 0x213   : > { %13163 = vmatprep.mubr.bf16.mxu1 %v14949_v36  ;;  %13180 = vmatpush3.bf16.msra.mxu1 %v14549_v45  ;;  %v14555_v45 = vld [vmem:[%s17949_s3 + $0x1b8] sm:$0xff]   ;;  %v2617_v36 = vrot.slane %v15668_v27, 1 }
 0x214   : > { %13181 = vmatprep.subr.bf16.mxu1 %v14551_v40 }
 0x215   : > { %13830 = vmatpush3.bf16.msra.mxu0 %v14552_v9  ;;  %v3538_v9 = vrot.slane %v3536_v5, 1  ;;  %v2618_v27 = vsel %vm2597_vm3, %v16004_v44, %v2617_v36 }
 0x216   : > { %13831 = vmatprep.subr.bf16.mxu0 %v14554_v22 }
 0x217   : > { %13056 = vmatmul.mubr.bf16.gmra.mrb[140].mxu0 %v2614_v8  ;;  %13182 = vmatpush3.bf16.msra.mxu1 %v14551_v40  ;;  %v14557_v40 = vld [vmem:[%s17949_s3 + $0x1c0] sm:$0xff]   ;;  %v3539_v5 = vor.u32 %v3538_v9, %v3534_v6 }
 0x218   : > { %13059 = vmatprep.mubr.bf16.mxu0 %v2616_v56  ;;  %13183 = vmatprep.subr.bf16.mxu1 %v14553_v1 }
 0x219   : > { %13832 = vmatpush3.bf16.msra.mxu0 %v14554_v22 }
 0x21a   : > { %13164 = vmatmul.mubr.bf16.gmra.mrb[12].mxu1 %v14950_v12  ;;  %13833 = vmatprep.subr.bf16.mxu0 %v14556_v25  ;;  %v3543_v12 = vrot.slane %v18042_v37, 1  ;;  %v14558_v37 = vld [vmem:[%s17949_s3 + $0x1c8] sm:$0xff]  }
 0x21b   : > { %13167 = vmatprep.mubr.bf16.mxu1 %v16019_v42  ;;  %13184 = vmatpush3.bf16.msra.mxu1 %v14553_v1  ;;  %v8045_v1 = vrot.slane %v15914_v7, 2 }
 0x21c   : > { %13185 = vmatprep.subr.bf16.mxu1 %v14555_v45  ;;  %v3544_v22 = vsel %vm2151_vm0, %v3539_v5, %v3543_v12  ;;  %v3547_v9 = vor.u32 %v18045_v57, %v3543_v12  ;;  %v18047_v12 = vshll.u32 %v15464_v19, 16 }
 0x21d   : > { %13834 = vmatpush3.bf16.msra.mxu0 %v14556_v25  ;;  %v18043_v25 = vshll.u32 %v15361_v51, 16  ;;  %v16045_v56 = vsel %vm3093_vm2, %v16023_v15, %v8045_v1  ;;  %v16054_v41 = vsel %vm3093_vm2, %v8045_v1, %v16039_v58  ;;  %v18048_v1 = vshll.u32 %v15509_v47, 16 }
 0x21e   : > { %v3567_v5 = vrot.slane %v18047_v12, 1 }
 0x21f   : > { %13060 = vmatmul.mubr.bf16.gmra.mrb[144].mxu0 %v2618_v27  ;;  %13186 = vmatpush3.bf16.msra.mxu1 %v14555_v45  ;;  %v3551_v8 = vrot.slane %v18043_v25, 1  ;;  %v18044_v45 = vshll.u32 %v15431_v61, 16  ;;  %v18046_v27 = vshrl.u32 %v15361_v51, 16  ;;  %v14559_v51 = vld [vmem:[%s17949_s3 + $0x1d0] sm:$0xff]   ;;  %v3575_v25 = vrot.slane %v18048_v1, 1 }
 0x220   : > { %13835 = vmatprep.mubr.bf16.mxu0 %v8044_v31  ;;  %13207 = vmatprep.subr.bf16.mxu1 %v14557_v40  ;;  %v18054_v1 = vshrl.u32 %v15565_v33, 16 }
 0x221   : > { %v3559_v36 = vrot.slane %v18044_v45, 1  ;;  %v3555_v6 = vor.u32 %v18046_v27, %v3551_v8  ;;  %v3552_v31 = vsel %vm2151_vm0, %v3547_v9, %v3551_v8  ;;  %v18050_v45 = vshrl.u32 %v15464_v19, 16  ;;  %v14560_v9 = vld [vmem:[%s17949_s3 + $0x1d8] sm:$0xff]  }
 0x222   : > { %13168 = vmatmul.mubr.bf16.gmra.mrb[16].mxu1 %v15685_v4  ;;  %v18051_v19 = vshll.u32 %v15565_v33, 16  ;;  %v14952_v33 = vld [vmem:[%s17948_s2] ss:$0 sm:$0xff] }
 0x223   : > { %13187 = vmatprep.mubr.bf16.mxu1 %v3544_v22  ;;  %v3560_v49 = vsel %vm2151_vm0, %v3555_v6, %v3559_v36  ;;  %v8050_v22 = vsel %vm3093_vm2, %v16039_v58, %v15816_v2  ;;  %v3571_v57 = vor.u32 %v18050_v45, %v3567_v5  ;;  %v16085_v6 = vrot.slane %v15685_v4, 2 }
 0x225   : > { %v3576_v27 = vsel %vm2151_vm0, %v3571_v57, %v3575_v25 }
 0x227   : > { %13836 = vmatmul.mubr.bf16.vlgmr.msra.gmra.mrb[148].mxu0 %v16045_v56 }
 0x228   : > { %13839 = vmatprep.mubr.bf16.mxu0 %v16054_v41 }
 0x22a   : > { %13188 = vmatmul.mubr.bf16.vlgmr.msra.gmra.mrb[0].mxu1 %v3552_v31  ;;  %v18052_v31 = vshll.u32 %v15610_v60, 16 }
 0x22b   : > { %13208 = vmatpush3.bf16.msra.mxu1 %v14557_v40  ;;  %13191 = vmatprep.mubr.bf16.mxu1 %v3560_v49  ;;  %v18049_v40 = vshrl.u32 %v15431_v61, 16  ;;  %v8055_v61 = vrot.slane %v15932_v32, 2 }
 0x22c   : > { %13209 = vmatprep.subr.bf16.mxu1 %v14558_v37  ;;  %v3591_v49 = vrot.slane %v18052_v31, 1 }
 0x22d   : > { %v3563_v8 = vor.u32 %v18049_v40, %v3559_v36  ;;  %v14561_v36 = vld [vmem:[%s17949_s3 + $0x1e0] sm:$0xff]   ;;  %v8056_v12 = vsel %vm3093_vm2, %v16085_v6, %v8055_v61 }
 0x22f   : > { %13210 = vmatpush3.bf16.msra.mxu1 %v14558_v37  ;;  %13840 = vmatmul.mubr.bf16.gmra.mrb[152].mxu0 %v8050_v22  ;;  %v3568_v2 = vsel %vm2151_vm0, %v3563_v8, %v3567_v5  ;;  %v8054_v37 = vsel %vm3093_vm2, %v15830_v35, %v16085_v6  ;;  %v18053_v5 = vshrl.u32 %v15509_v47, 16  ;;  %v16102_v22 = vld [vmem:[#allocation3 + $0x60] sm:$0xff]  ;;  %v14562_v35 = vld [vmem:[%s17949_s3 + $0x1e8] sm:$0xff]   ;;  %v12933_v47 = vpop.f32.mrb[104].mxu0 }
 0x230   : > { %13843 = vmatprep.mubr.bf16.mxu0 %v15862_v52  ;;  %13211 = vmatprep.subr.bf16.mxu1 %v14559_v51  ;;  %v3583_v52 = vrot.slane %v18051_v19, 1  ;;  %v18004_v57 = vrot.slane %v16102_v22, 2 }
 0x232   : > { %13192 = vmatmul.mubr.bf16.gmra.mrb[4].mxu1 %v3568_v2  ;;  %v3587_v40 = vor.u32 %v18054_v1, %v3583_v52  ;;  %v14563_v2 = vld [vmem:[%s17949_s3 + $0x1f0] sm:$0xff]  }
 0x233   : > { %13195 = vmatprep.mubr.bf16.mxu1 %v3576_v27  ;;  %13212 = vmatpush3.bf16.msra.mxu1 %v14559_v51  ;;  %v3579_v51 = vor.u32 %v18053_v5, %v3575_v25  ;;  %v1430_v25 = vadd.f32 %v14952_v33, %v12933_v47 }
 0x234   : > { %13213 = vmatprep.subr.bf16.mxu1 %v14560_v9  ;;  %v3592_v45 = vsel %vm2151_vm0, %v3587_v40, %v3591_v49 }
 0x235   : > { %v3584_v8 = vsel %vm2151_vm0, %v3579_v51, %v3583_v52  ;;  %v1622_v52 = vmax.f32 %v1430_v25, 0.0  ;;  %v16123_v51 = vld [vmem:[#allocation3 + $0x58] sm:$0x1] }
 0x237   : > { %13844 = vmatmul.mubr.bf16.gmra.mrb[156].mxu0 %v8054_v37  ;;  %13214 = vmatpush3.bf16.msra.mxu1 %v14560_v9  ;;  %v1421_v9 = vpop.f32.mrb[105].mxu0  ;;  %1750 = vst [vmem:[#allocation2 + $0x350] sm:$0xff] %v1622_v52 }
 0x238   : > { %13847 = vmatprep.mubr.bf16.mxu0 %v8056_v12  ;;  %13215 = vmatprep.subr.bf16.mxu1 %v14561_v36  ;;  %v1422_v27 = vadd.f32 %v14952_v33, %v1421_v9  ;;  %v12934_v19 = vpop.f32.mrb[106].mxu0  ;;  %v18055_v12 = vshll.u32 %v15685_v4, 16 }
 0x239   : > { %v1433_v37 = vadd.f32 %v14952_v33, %v12934_v19  ;;  %v1424_v31 = vpop.f32.mrb[107].mxu0 }
 0x23a   : > { %13196 = vmatmul.mubr.bf16.gmra.mrb[8].mxu1 %v3584_v8  ;;  %v3607_v5 = vrot.slane %v18055_v12, 1  ;;  %v1620_v1 = vmax.f32 %v1422_v27, 0.0  ;;  %v1425_v40 = vadd.f32 %v14952_v33, %v1424_v31  ;;  %v12937_v8 = vpop.f32.mrb[108].mxu0 }
 0x23b   : > { %13199 = vmatprep.mubr.bf16.mxu1 %v3592_v45  ;;  %13216 = vmatpush3.bf16.msra.mxu1 %v14561_v36  ;;  %v8058_v36 = vsel %vm3093_vm2, %v8055_v61, %v18004_v57  ;;  %v18056_v45 = vshrl.u32 %v15610_v60, 16  ;;  %v1623_v25 = vmax.f32 %v1433_v37, 0.0  ;;  %v1446_v9 = vadd.f32 %v14952_v33, %v12937_v8  ;;  %v1437_v19 = vpop.f32.mrb[109].mxu0  ;;  %v14564_v61 = vld [vmem:[%s17949_s3 + $0x1f8] sm:$0xff]  }
 0x23c   : > { %13217 = vmatprep.subr.bf16.mxu1 %v14562_v35  ;;  %1748 = vst [vmem:[#allocation2 + $0x340] sm:$0xff] %v1620_v1  ;;  %v1621_v12 = vmax.f32 %v1425_v40, 0.0  ;;  %v1438_v57 = vadd.f32 %v14952_v33, %v1437_v19  ;;  %v12938_v27 = vpop.f32.mrb[110].mxu0  ;;  %v3613_v60 = vshll.u32 %v16123_v51, 16  ;;  %v16135_v37 = vsel %vm2151_vm0, %v15681_v0, %v3607_v5 }
 0x23d   : > { %v3595_v47 = vor.u32 %v18056_v45, %v3591_v49  ;;  %1751 = vst [vmem:[#allocation2 + $0x358] sm:$0xff] %v1623_v25  ;;  %v1626_v49 = vmax.f32 %v1446_v9, 0.0  ;;  %v1440_v52 = vpop.f32.mrb[111].mxu0  ;;  %v16138_v45 = vld [vmem:[#allocation3 + $0x8] sm:$0xfe] }
 0x23e   : > { %1749 = vst [vmem:[#allocation2 + $0x348] sm:$0xff] %v1621_v12  ;;  %v1441_v1 = vadd.f32 %v14952_v33, %v1440_v52  ;;  %v12941_v40 = vpop.f32.mrb[112].mxu0  ;;  %v3615_v9 = vrot.slane %v3613_v60, 1  ;;  %v18057_v12 = vshrl.u32 %v15685_v4, 16  ;;  %v16154_v4 = vld [vmem:[#allocation3 + $0x18] sm:$0xff] }
 0x23f   : > { %13848 = vmatmul.mubr.bf16.gmra.mrb[160].mxu0 %v8058_v36  ;;  %13218 = vmatpush3.bf16.msra.mxu1 %v14562_v35  ;;  %v3600_v31 = vsel %vm2151_vm0, %v3595_v47, %v15641_v54  ;;  %v1449_v35 = vadd.f32 %v14952_v33, %v12938_v27  ;;  %v1624_v36 = vmax.f32 %v1438_v57, 0.0  ;;  %1754 = vst [vmem:[#allocation2 + $0x370] sm:$0xff] %v1626_v49  ;;  %v1453_v8 = vpop.f32.mrb[113].mxu0  ;;  %v14565_v47 = vld [vmem:[%s17949_s3 + $0x200] sm:$0xff]   ;;  %v16143_v33 = vld [vmem:[#allocation3 + $0x10] sm:$0xff] }
 0x240   : > { %13219 = vmatprep.subr.bf16.mxu1 %v14563_v2  ;;  %v1625_v0 = vmax.f32 %v1441_v1, 0.0  ;;  %v12942_v25 = vpop.f32.mrb[114].mxu0  ;;  %v16148_v27 = vor.u32 %v18057_v12, %v3607_v5  ;;  %v3840_v5 = vrot.slane %v16154_v4, 1 }
 0x241   : > { %v1627_v54 = vmax.f32 %v1449_v35, 0.0  ;;  %1752 = vst [vmem:[#allocation2 + $0x360] sm:$0xff] %v1624_v36  ;;  %v1456_v57 = vpop.f32.mrb[115].mxu0 }
 0x242   : > { %13200 = vmatmul.mubr.bf16.gmra.mrb[12].mxu1 %v3600_v31  ;;  %1753 = vst [vmem:[#allocation2 + $0x368] sm:$0xff] %v1625_v0  ;;  %v12945_v19 = vpop.f32.mrb[116].mxu0  ;;  %v3837_v31 = vrot.slane %v16138_v45, 1  ;;  %v3616_v60 = vsel %vm2151_vm0, %v16148_v27, %v3615_v9 }
 0x243   : > { %13203 = vmatprep.mubr.bf16.mxu1 %v16135_v37  ;;  %13220 = vmatpush3.bf16.msra.mxu1 %v14563_v2  ;;  %1755 = vst [vmem:[#allocation2 + $0x378] sm:$0xff] %v1627_v54  ;;  %v3838_v2 = vrot.slane %v16143_v33, 1  ;;  %v1469_v49 = vpop.f32.mrb[117].mxu0 }
 0x244   : > { %13221 = vmatprep.subr.bf16.mxu1 %v14564_v61  ;;  %v2086_v35 = vld [vmem:[#allocation2 + $0x350] ss:$2 sm:$0x3f]  ;;  %v2090_v52 = vld [vmem:[#allocation2 + $0x351] ss:$2 sm:$0x3f] }
 0x245   : > { %v2084_v36 = vld [vmem:[#allocation2 + $0x340] ss:$2 sm:$0xff]  ;;  %v2088_v1 = vld [vmem:[#allocation2 + $0x341] ss:$2 sm:$0xff]  ;;  %v3839_v40 = vsel %vm2597_vm3, %v3837_v31, %v3838_v2  ;;  %v12946_v54 = vpop.f32.mrb[118].mxu0  ;;  %v2092_v8 = vmax.f32 %v2086_v35, %v2090_v52 }
 0x246   : > { %v2091_v0 = vmax.f32 %v2084_v36, %v2088_v1  ;;  %v14566_v35 = vld [vmem:[%s17949_s3 + $0x208] sm:$0xff]   ;;  %v3841_v1 = vsel %vm2597_vm3, %v3838_v2, %v3840_v5  ;;  %v3846_v2 = vrot.slane %v15914_v7, 1 }
 0x247   : > { %13222 = vmatpush3.bf16.msra.mxu1 %v14564_v61  ;;  %v1472_v61 = vpop.f32.mrb[119].mxu0 }
 0x248   : > { %13243 = vmatprep.subr.bf16.mxu1 %v14565_v47  ;;  %v12949_v9 = vpop.f32.mrb[120].mxu0 }
 0x249   : > { %v2094_v12 = vld [vmem:[#allocation2 + $0x360] ss:$2 sm:$0xff]  ;;  %v2098_v49 = vld [vmem:[#allocation2 + $0x361] ss:$2 sm:$0xff]  ;;  %v1485_v54 = vpop.f32.mrb[121].mxu0 }
 0x24a   : > { %13204 = vmatmul.mubr.bf16.gmra.mrb[16].mxu1 %v3616_v60  ;;  %v2096_v25 = vld [vmem:[#allocation2 + $0x370] ss:$2 sm:$0x3f]  ;;  %v2100_v57 = vld [vmem:[#allocation2 + $0x371] ss:$2 sm:$0x3f]  ;;  %v2101_v31 = vmax.f32 %v2094_v12, %v2098_v49 }
 0x24b   : > { %13223 = vmatprep.mubr.bf16.mxu1 %v3839_v40  ;;  %v2102_v19 = vmax.f32 %v2096_v25, %v2100_v57  ;;  %v3842_v60 = vrot.slane %v16157_v43, 1  ;;  %v12950_v48 = vpop.f32.mrb[122].mxu0  ;;  %v14569_v49 = vld [vmem:[%s17949_s3 + $0x220] sm:$0xff]  }
 0x24c   : > { %v2103_v52 = vmax.f32 %v2091_v0, %v2101_v31  ;;  %v1488_v36 = vpop.f32.mrb[123].mxu0  ;;  %v14567_v48 = vld [vmem:[%s17949_s3 + $0x210] sm:$0xff]   ;;  %v3844_v0 = vrot.slane %v15924_v38, 1  ;;  %v3848_v31 = vrot.slane %v15934_v24, 1  ;;  %v16179_v54 = vld [vmem:[#allocation3 + $0x40] sm:$0xff] }
 0x24d   : > { %v2104_v40 = vmax.f32 %v2092_v8, %v2102_v19  ;;  %v12953_v61 = vpop.f32.mrb[124].mxu0  ;;  %v3843_v25 = vsel %vm2597_vm3, %v3840_v5, %v3842_v60  ;;  %v14568_v5 = vld [vmem:[%s17949_s3 + $0x218] sm:$0xff]  }
 0x24e   : > { %v1501_v9 = vpop.f32.mrb[125].mxu0  ;;  %v3847_v19 = vsel %vm2597_vm3, %v3844_v0, %v3846_v2  ;;  %v3849_v36 = vsel %vm2597_vm3, %v3846_v2, %v3848_v31  ;;  %v4071_v2 = vshll.u32 %v16138_v45, 16 }
 0x24f   : > { %v2105_v57 = vpack.c.bf16 %v2104_v40, %v2103_v52  ;;  %v12954_v12 = vpop.f32.mrb[126].mxu0  ;;  %v3850_v40 = vrot.slane %v16179_v54, 1  ;;  %v14570_v52 = vld [vmem:[%s17949_s3 + $0x228] sm:$0xff]   ;;  %v14571_v9 = vld [vmem:[%s17949_s3 + $0x230] sm:$0xff]  }
 0x250   : > { %v1504_v8 = vpop.f32.mrb[127].mxu0 }
 0x251   : > { %2106 = vst [vmem:[#allocation3 + $0x68] sm:$0x7f] %v2105_v57 }
 0x252   : > { %13224 = vmatmul.mubr.bf16.vlgmr.msra.gmra.mrb[0].mxu1 %v3841_v1 }
 0x253   : > { %13244 = vmatpush3.bf16.msra.mxu1 %v14565_v47  ;;  %13227 = vmatprep.mubr.bf16.mxu1 %v3843_v25  ;;  %v3845_v47 = vsel %vm2597_vm3, %v3842_v60, %v3844_v0  ;;  %v18005_v60 = vshrl.u32 %v16102_v22, 16  ;;  %v3851_v25 = vsel %vm2597_vm3, %v3848_v31, %v3850_v40  ;;  %v4068_v0 = vshrl.u32 %v16138_v45, 16  ;;  %v14573_v45 = vld [vmem:[%s17949_s3 + $0x240] sm:$0xff]  }
 0x254   : > { %13245 = vmatprep.subr.bf16.mxu1 %v14566_v35  ;;  %v3856_v31 = vrot.slane %v16123_v51, 1  ;;  %v14575_v51 = vld [vmem:[%s17949_s3 + $0x250] sm:$0xff]  }
 0x255   : > { %v7814_v1 = vrot.slane %v18005_v60, 1 }
 0x257   : > { %13246 = vmatpush3.bf16.msra.mxu1 %v14566_v35  ;;  %v18006_v35 = vshll.u32 %v16102_v22, 16 }
 0x258   : > { %13247 = vmatprep.subr.bf16.mxu1 %v14567_v48 }
 0x259   : > { %v7815_v61 = vrot.slane %v18006_v35, 2 }
 0x25a   : > { %13228 = vmatmul.mubr.bf16.gmra.mrb[4].mxu1 %v3845_v47  ;;  %v3853_v47 = vsel %vm2597_vm3, %v3850_v40, %v16004_v44 }
 0x25b   : > { %13231 = vmatprep.mubr.bf16.mxu1 %v3847_v19  ;;  %13248 = vmatpush3.bf16.msra.mxu1 %v14567_v48  ;;  %v16193_v57 = vor.u32 %v7815_v61, %v7814_v1  ;;  %v16203_v48 = vld [vmem:[#allocation3 + $0x50] sm:$0xff]  ;;  %v4070_v19 = vrot.slane %v4068_v0, 1  ;;  %v16242_v1 = vld [vmem:[#allocation3 + $0x58] sm:$0x3]  ;;  %v4311_v0 = vld [vmem:[#allocation3 + $0x8] sm:$0xfc] }
 0x25c   : > { %13249 = vmatprep.subr.bf16.mxu1 %v14568_v5  ;;  %v3854_v8 = vrot.slane %v16203_v48, 1  ;;  %v4115_v61 = vshll.u32 %v16242_v1, 16 }
 0x25d   : > { %v16201_v12 = vsel %vm2828_vm1, %v15993_v29, %v16193_v57 }
 0x25e   : > { %18058 = vst [vmem:[#allocation22_spill] sm:$0xff] %v16201_v12  ;;  %v3855_v29 = vsel %vm2597_vm3, %v16004_v44, %v3854_v8  ;;  %v3857_v40 = vsel %vm2597_vm3, %v3854_v8, %v3856_v31 }
 0x25f   : > { %13250 = vmatpush3.bf16.msra.mxu1 %v14568_v5  ;;  %v14572_v5 = vld [vmem:[%s17949_s3 + $0x238] sm:$0xff]  }
 0x260   : > { %13251 = vmatprep.subr.bf16.mxu1 %v14569_v49 }
 0x262   : > { %13232 = vmatmul.mubr.bf16.gmra.mrb[8].mxu1 %v3849_v36  ;;  %v14574_v36 = vld [vmem:[%s17949_s3 + $0x248] sm:$0xff]  }
 0x263   : > { %13235 = vmatprep.mubr.bf16.mxu1 %v3851_v25  ;;  %13252 = vmatpush3.bf16.msra.mxu1 %v14569_v49  ;;  %v4073_v49 = vrot.slane %v4071_v2, 2  ;;  %v4332_v2 = vrot.slane %v16143_v33, 2 }
 0x264   : > { %13253 = vmatprep.subr.bf16.mxu1 %v14570_v52 }
 0x267   : > { %13254 = vmatpush3.bf16.msra.mxu1 %v14570_v52  ;;  %v4074_v52 = vor.u32 %v4073_v49, %v4070_v19  ;;  %v4336_v19 = vrot.slane %v16157_v43, 2  ;;  %v14582_v49 = vld [vmem:[%s17949_s3 + $0x288] sm:$0xff]  }
 0x268   : > { %13255 = vmatprep.subr.bf16.mxu1 %v14571_v9 }
 0x269   : > { %v4078_v44 = vsel %vm2828_vm1, %v4074_v52, %v15331_v10  ;;  %v14576_v10 = vld [vmem:[%s17949_s3 + $0x258] sm:$0xff]  }
 0x26a   : > { %13236 = vmatmul.mubr.bf16.gmra.mrb[12].mxu1 %v3853_v47  ;;  %v14584_v52 = vld [vmem:[%s17949_s3 + $0x298] sm:$0xff]  }
 0x26b   : > { %13239 = vmatprep.mubr.bf16.mxu1 %v3855_v29  ;;  %13256 = vmatpush3.bf16.msra.mxu1 %v14571_v9  ;;  %v4117_v9 = vrot.slane %v4115_v61, 2  ;;  %v4334_v29 = vrot.slane %v16154_v4, 2  ;;  %v14590_v61 = vld [vmem:[%s17949_s3 + $0x2c8] sm:$0xff]  }
 0x26c   : > { %13257 = vmatprep.subr.bf16.mxu1 %v14572_v5 }
 0x26d   : > { %v4337_v31 = vsel %vm3093_vm2, %v4334_v29, %v4336_v19 }
 0x26f   : > { %13258 = vmatpush3.bf16.msra.mxu1 %v14572_v5  ;;  %v4331_v5 = vrot.slane %v4311_v0, 2  ;;  %v14960_v0 = vld [vmem:[#allocation3 + $0x38] sm:$0xff] }
 0x270   : > { %13279 = vmatprep.subr.bf16.mxu1 %v14573_v45 }
 0x272   : > { %13240 = vmatmul.mubr.bf16.gmra.mrb[16].mxu1 %v3857_v40  ;;  %v4339_v40 = vsel %vm3093_vm2, %v4336_v19, %v16023_v15  ;;  %v4742_v19 = vld [vmem:[#allocation3 + $0x10] sm:$0xff] }
 0x273   : > { %13259 = vmatprep.mubr.bf16.mxu1 %v4078_v44  ;;  %v14585_v44 = vld [vmem:[%s17949_s3 + $0x2a0] sm:$0xff]  }
 0x27a   : > { %13260 = vmatmul.mubr.bf16.vlgmr.msra.gmra.mrb[0].mxu1 %v15406_v26  ;;  %v14577_v26 = vld [vmem:[%s17949_s3 + $0x260] sm:$0xff]  }
 0x27b   : > { %13280 = vmatpush3.bf16.msra.mxu1 %v14573_v45  ;;  %13263 = vmatprep.mubr.bf16.mxu1 %v15469_v63  ;;  %v14578_v63 = vld [vmem:[%s17949_s3 + $0x268] sm:$0xff]   ;;  %v4335_v45 = vsel %vm3093_vm2, %v4332_v2, %v4334_v29 }
 0x27c   : > { %13281 = vmatprep.subr.bf16.mxu1 %v14574_v36 }
 0x27f   : > { %13282 = vmatpush3.bf16.msra.mxu1 %v14574_v36  ;;  %v4344_v36 = vrot.slane %v16179_v54, 2 }
 0x280   : > { %13283 = vmatprep.subr.bf16.mxu1 %v14575_v51 }
 0x281   : > { %v4345_v15 = vsel %vm3093_vm2, %v16039_v58, %v4344_v36 }
 0x282   : > { %13264 = vmatmul.mubr.bf16.gmra.mrb[4].mxu1 %v15492_v46  ;;  %v14579_v46 = vld [vmem:[%s17949_s3 + $0x270] sm:$0xff]  }
 0x283   : > { %13267 = vmatprep.mubr.bf16.mxu1 %v15543_v28  ;;  %13284 = vmatpush3.bf16.msra.mxu1 %v14575_v51  ;;  %v4112_v28 = vshrl.u32 %v16242_v1, 16  ;;  %v14586_v51 = vld [vmem:[%s17949_s3 + $0x2a8] sm:$0xff]  }
 0x284   : > { %13285 = vmatprep.subr.bf16.mxu1 %v14576_v10 }
 0x285   : > { %v4114_v25 = vrot.slane %v4112_v28, 1 }
 0x287   : > { %13286 = vmatpush3.bf16.msra.mxu1 %v14576_v10  ;;  %v4118_v8 = vor.u32 %v4117_v9, %v4114_v25  ;;  %v4346_v10 = vrot.slane %v16019_v42, 2  ;;  %v14959_v25 = vld [vmem:[#allocation3 + $0x30] sm:$0xff]  ;;  %v14593_v9 = vld [vmem:[%s17949_s3 + $0x2e0] sm:$0xff]  }
 0x288   : > { %13287 = vmatprep.subr.bf16.mxu1 %v14577_v26 }
 0x289   : > { %v4119_v47 = vsel %vm2828_vm1, %v15706_v20, %v4118_v8  ;;  %v14583_v20 = vld [vmem:[%s17949_s3 + $0x290] sm:$0xff]   ;;  %v4349_v58 = vsel %vm3093_vm2, %v4346_v10, %v16085_v6  ;;  %v14594_v8 = vld [vmem:[%s17949_s3 + $0x2e8] sm:$0xff]  }
 0x28a   : > { %13268 = vmatmul.mubr.bf16.gmra.mrb[8].mxu1 %v15592_v14  ;;  %v14580_v14 = vld [vmem:[%s17949_s3 + $0x278] sm:$0xff]  }
 0x28b   : > { %13271 = vmatprep.mubr.bf16.mxu1 %v15632_v21  ;;  %13288 = vmatpush3.bf16.msra.mxu1 %v14577_v26  ;;  %v14581_v21 = vld [vmem:[%s17949_s3 + $0x280] sm:$0xff]   ;;  %v14588_v26 = vld [vmem:[%s17949_s3 + $0x2b8] sm:$0xff]  }
 0x28c   : > { %13289 = vmatprep.subr.bf16.mxu1 %v14578_v63 }
 0x28f   : > { %13290 = vmatpush3.bf16.msra.mxu1 %v14578_v63  ;;  %v14589_v63 = vld [vmem:[%s17949_s3 + $0x2c0] sm:$0xff]  }
 0x290   : > { %13291 = vmatprep.subr.bf16.mxu1 %v14579_v46 }
 0x292   : > { %13272 = vmatmul.mubr.bf16.gmra.mrb[12].mxu1 %v15666_v39  ;;  %v4333_v39 = vsel %vm3093_vm2, %v4331_v5, %v4332_v2 }
 0x293   : > { %13275 = vmatprep.mubr.bf16.mxu1 %v15722_v62  ;;  %13292 = vmatpush3.bf16.msra.mxu1 %v14579_v46  ;;  %v4350_v46 = vrot.slane %v16242_v1, 2  ;;  %v14591_v1 = vld [vmem:[%s17949_s3 + $0x2d0] sm:$0xff]  }
 0x294   : > { %13293 = vmatprep.subr.bf16.mxu1 %v14580_v14 }
 0x295   : > { %v4351_v28 = vsel %vm3093_vm2, %v16085_v6, %v4350_v46  ;;  %v14592_v6 = vld [vmem:[%s17949_s3 + $0x2d8] sm:$0xff]  }
 0x297   : > { %13294 = vmatpush3.bf16.msra.mxu1 %v14580_v14 }
 0x298   : > { %13315 = vmatprep.subr.bf16.mxu1 %v14581_v21 }
 0x29a   : > { %13276 = vmatmul.mubr.bf16.gmra.mrb[16].mxu1 %v4119_v47 }
 0x29b   : > { %13295 = vmatprep.mubr.bf16.mxu1 %v4333_v39  ;;  %v14595_v39 = vld [vmem:[%s17949_s3 + $0x2f0] sm:$0xff]  }
 0x2a2   : > { %13296 = vmatmul.mubr.bf16.vlgmr.msra.gmra.mrb[0].mxu1 %v4335_v45 }
 0x2a3   : > { %13316 = vmatpush3.bf16.msra.mxu1 %v14581_v21  ;;  %13299 = vmatprep.mubr.bf16.mxu1 %v4337_v31 }
 0x2a4   : > { %13317 = vmatprep.subr.bf16.mxu1 %v14582_v49 }
 0x2a7   : > { %13318 = vmatpush3.bf16.msra.mxu1 %v14582_v49  ;;  %v4773_v49 = vshll.u32 %v4742_v19, 16 }
 0x2a8   : > { %13319 = vmatprep.subr.bf16.mxu1 %v14583_v20 }
 0x2aa   : > { %13300 = vmatmul.mubr.bf16.gmra.mrb[4].mxu1 %v4339_v40  ;;  %v14597_v40 = vld [vmem:[%s17949_s3 + $0x300] sm:$0xff]  }
 0x2ab   : > { %13303 = vmatprep.mubr.bf16.mxu1 %v16045_v56  ;;  %13320 = vmatpush3.bf16.msra.mxu1 %v14583_v20  ;;  %v14587_v56 = vld [vmem:[%s17949_s3 + $0x2b0] sm:$0xff]  }
 0x2ac   : > { %13321 = vmatprep.subr.bf16.mxu1 %v14584_v52 }
 0x2af   : > { %13322 = vmatpush3.bf16.msra.mxu1 %v14584_v52  ;;  %v4775_v52 = vrot.slane %v4773_v49, 1 }
 0x2b0   : > { %13323 = vmatprep.subr.bf16.mxu1 %v14585_v44 }
 0x2b2   : > { %13304 = vmatmul.mubr.bf16.gmra.mrb[8].mxu1 %v16054_v41  ;;  %v4347_v41 = vsel %vm3093_vm2, %v4344_v36, %v4346_v10  ;;  %v4771_v36 = vshrl.u32 %v4742_v19, 16  ;;  %v18084_v19 = vshrl.u32 %v15748_v3, 16 }
 0x2b3   : > { %13307 = vmatprep.mubr.bf16.mxu1 %v4345_v15  ;;  %13324 = vmatpush3.bf16.msra.mxu1 %v14585_v44 }
 0x2b4   : > { %13325 = vmatprep.subr.bf16.mxu1 %v14586_v51 }
 0x2b7   : > { %13326 = vmatpush3.bf16.msra.mxu1 %v14586_v51  ;;  %v14961_v51 = vld [vmem:[#allocation3 + $0x58] sm:$0xff] }
 0x2b8   : > { %13327 = vmatprep.subr.bf16.mxu1 %v14587_v56 }
 0x2ba   : > { %13308 = vmatmul.mubr.bf16.gmra.mrb[12].mxu1 %v4347_v41  ;;  %v18075_v41 = vshll.u32 %v15745_v11, 16 }
 0x2bb   : > { %13311 = vmatprep.mubr.bf16.mxu1 %v4349_v58  ;;  %13328 = vmatpush3.bf16.msra.mxu1 %v14587_v56 }
 0x2bc   : > { %13329 = vmatprep.subr.bf16.mxu1 %v14588_v26  ;;  %v4796_v58 = vrot.slane %v18075_v41, 1 }
 0x2bf   : > { %13330 = vmatpush3.bf16.msra.mxu1 %v14588_v26 }
 0x2c0   : > { %13351 = vmatprep.subr.bf16.mxu1 %v14589_v63 }
 0x2c2   : > { %13312 = vmatmul.mubr.bf16.gmra.mrb[16].mxu1 %v4351_v28  ;;  %v14598_v28 = vld [vmem:[%s17949_s3 + $0x308] sm:$0xff]  }
 0x2c3   : > { %13331 = vmatprep.mubr.bf16.mxu1 %v16143_v33  ;;  %v14958_v33 = vld [vmem:[#allocation3 + $0x28] sm:$0xff] }
 0x2ca   : > { %13332 = vmatmul.mubr.bf16.vlgmr.msra.gmra.mrb[0].mxu1 %v16154_v4 }
 0x2cb   : > { %13352 = vmatpush3.bf16.msra.mxu1 %v14589_v63  ;;  %13335 = vmatprep.mubr.bf16.mxu1 %v16157_v43  ;;  %v18076_v63 = vshrl.u32 %v15519_v34, 16  ;;  %v18080_v34 = vshll.u32 %v15748_v3, 16 }
 0x2cc   : > { %13353 = vmatprep.subr.bf16.mxu1 %v14590_v61 }
 0x2cd   : > { %v4792_v46 = vor.u32 %v18076_v63, %v15552_v59  ;;  %v4804_v59 = vrot.slane %v18080_v34, 1  ;;  %v18092_v34 = vshrl.u32 %v15763_v18, 16 }
 0x2cf   : > { %13354 = vmatpush3.bf16.msra.mxu1 %v14590_v61  ;;  %v16380_v61 = vsel %vm2151_vm0, %v4792_v46, %v4796_v58  ;;  %v4808_v49 = vor.u32 %v18084_v19, %v4804_v59  ;;  %v18091_v46 = vshrl.u32 %v15759_v23, 16 }
 0x2d0   : > { %13355 = vmatprep.subr.bf16.mxu1 %v14591_v1 }
 0x2d2   : > { %13336 = vmatmul.mubr.bf16.gmra.mrb[4].mxu1 %v14958_v33  ;;  %v16316_v14 = vpop.f32.mrb[128].mxu0  ;;  %v14599_v33 = vld [vmem:[%s17949_s3 + $0x310] sm:$0xff]  }
 0x2d3   : > { %18059 = vst [vmem:[#allocation23_spill] sm:$0xff] %v16316_v14  ;;  %13339 = vmatprep.mubr.bf16.mxu1 %v14959_v25  ;;  %v16318_v4 = vpop.f32.mrb[129].mxu0  ;;  %13356 = vmatpush3.bf16.msra.mxu1 %v14591_v1 }
 0x2d4   : > { %18060 = vst [vmem:[#allocation24_spill] sm:$0xff] %v16318_v4  ;;  %v16320_v43 = vpop.f32.mrb[130].mxu0  ;;  %13357 = vmatprep.subr.bf16.mxu1 %v14592_v6 }
 0x2d5   : > { %18061 = vst [vmem:[#allocation25_spill] sm:$0xff] %v16320_v43  ;;  %v16325_v21 = vpop.f32.mrb[131].mxu0 }
 0x2d6   : > { %18062 = vst [vmem:[#allocation26_spill] sm:$0xff] %v16325_v21  ;;  %v18124_v21 = vld [vmem:[#allocation13_spill] sm:$0xff] }
 0x2d7   : > { %13358 = vmatpush3.bf16.msra.mxu1 %v14592_v6 }
 0x2d8   : > { %13359 = vmatprep.subr.bf16.mxu1 %v14593_v9 }
 0x2da   : > { %13340 = vmatmul.mubr.bf16.gmra.mrb[8].mxu1 %v14960_v0  ;;  %v16330_v2 = vpop.f32.mrb[132].mxu0  ;;  %v18083_v0 = vshrl.u32 %v15745_v11, 16 }
 0x2db   : > { %18063 = vst [vmem:[#allocation27_spill] sm:$0xff] %v16330_v2  ;;  %13343 = vmatprep.mubr.bf16.mxu1 %v16179_v54  ;;  %v16333_v5 = vpop.f32.mrb[133].mxu0  ;;  %13360 = vmatpush3.bf16.msra.mxu1 %v14593_v9  ;;  %v14596_v54 = vld [vmem:[%s17949_s3 + $0x2f8] sm:$0xff]   ;;  %v18082_v9 = vshll.u32 %v15759_v23, 16 }
 0x2dc   : > { %18064 = vst [vmem:[#allocation28_spill] sm:$0xff] %v16333_v5  ;;  %v16335_v47 = vpop.f32.mrb[134].mxu0  ;;  %13361 = vmatprep.subr.bf16.mxu1 %v14594_v8 }
 0x2dd   : > { %18065 = vst [vmem:[#allocation29_spill] sm:$0xff] %v16335_v47  ;;  %v16340_v29 = vpop.f32.mrb[135].mxu0 }
 0x2de   : > { %18066 = vst [vmem:[#allocation30_spill] sm:$0xff] %v16340_v29 }
 0x2df   : > { %13362 = vmatpush3.bf16.msra.mxu1 %v14594_v8  ;;  %v4812_v8 = vrot.slane %v18082_v9, 1 }
 0x2e0   : > { %13363 = vmatprep.subr.bf16.mxu1 %v14595_v39 }
 0x2e2   : > { %13344 = vmatmul.mubr.bf16.gmra.mrb[12].mxu1 %v16019_v42  ;;  %v16346_v45 = vpop.f32.mrb[136].mxu0  ;;  %v4776_v42 = vor.u32 %v4775_v52, %v4771_v36 }
 0x2e3   : > { %18067 = vst [vmem:[#allocation31_spill] sm:$0xff] %v16346_v45  ;;  %13347 = vmatprep.mubr.bf16.mxu1 %v16203_v48  ;;  %v16349_v31 = vpop.f32.mrb[137].mxu0  ;;  %13364 = vmatpush3.bf16.msra.mxu1 %v14595_v39  ;;  %v4800_v39 = vor.u32 %v18083_v0, %v4796_v58  ;;  %v18090_v58 = vshll.u32 %v15765_v13, 16 }
 0x2e4   : > { %18068 = vst [vmem:[#allocation32_spill] sm:$0xff] %v16349_v31  ;;  %v16351_v20 = vpop.f32.mrb[138].mxu0  ;;  %13365 = vmatprep.subr.bf16.mxu1 %v14596_v54  ;;  %v4781_v15 = vsel %vm2151_vm0, %v4776_v42, %v15526_v30  ;;  %v18088_v42 = vshll.u32 %v15763_v18, 16 }
 0x2e5   : > { %18069 = vst [vmem:[#allocation33_spill] sm:$0xff] %v16351_v20  ;;  %v16356_v44 = vpop.f32.mrb[139].mxu0  ;;  %v16404_v52 = vsel %vm2151_vm0, %v4800_v39, %v4804_v59  ;;  %v4828_v63 = vrot.slane %v18090_v58, 1 }
 0x2e6   : > { %18070 = vst [vmem:[#allocation34_spill] sm:$0xff] %v16356_v44 }
 0x2e7   : > { %13366 = vmatpush3.bf16.msra.mxu1 %v14596_v54  ;;  %v14600_v54 = vld [vmem:[%s17949_s3 + $0x318] sm:$0xff]  }
 0x2e8   : > { %13387 = vmatprep.subr.bf16.mxu1 %v14597_v40 }
 0x2ea   : > { %13348 = vmatmul.mubr.bf16.gmra.mrb[16].mxu1 %v14961_v51  ;;  %v16358_v48 = vpop.f32.mrb[140].mxu0  ;;  %v4820_v51 = vrot.slane %v18088_v42, 1  ;;  %v18098_v42 = vld [vmem:[#allocation14_spill] sm:$0xff] }
 0x2eb   : > { %18071 = vst [vmem:[#allocation35_spill] sm:$0xff] %v16358_v48  ;;  %13367 = vmatprep.mubr.bf16.mxu1 %v4781_v15  ;;  %v16362_v56 = vpop.f32.mrb[141].mxu0  ;;  %v14601_v15 = vld [vmem:[%s17949_s3 + $0x320] sm:$0xff]   ;;  %v16547_v48 = vld [vmem:[#allocation3 + $0x68] sm:$0xff] }
 0x2ec   : > { %18072 = vst [vmem:[#allocation36_spill] sm:$0xff] %v16362_v56  ;;  %v16364_v10 = vpop.f32.mrb[142].mxu0  ;;  %v4824_v59 = vor.u32 %v18092_v34, %v4820_v51  ;;  %v18101_v34 = vshrl.u32 %v15778_v55, 16  ;;  %v18007_v20 = vshrl.u32 %v16547_v48, 16 }
 0x2ed   : > { %18073 = vst [vmem:[#allocation37_spill] sm:$0xff] %v16364_v10  ;;  %v16366_v26 = vpop.f32.mrb[143].mxu0  ;;  %v16511_v10 = vld [vmem:[#allocation3 + $0x28] sm:$0xff] }
 0x2ee   : > { %18074 = vst [vmem:[#allocation38_spill] sm:$0xff] %v16366_v26  ;;  %v16438_v0 = vsel %vm2151_vm0, %v4824_v59, %v4828_v63  ;;  %v16506_v26 = vld [vmem:[#allocation3 + $0x20] sm:$0xff]  ;;  %v5573_v14 = vrot.slane %v16511_v10, 2 }
 0x2f2   : > { %13368 = vmatmul.mubr.bf16.vlgmr.msra.gmra.mrb[0].mxu1 %v15569_v53  ;;  %v16377_v30 = vpop.f32.mrb[144].mxu0 }
 0x2f3   : > { %18077 = vst [vmem:[#allocation39_spill] sm:$0xff] %v16377_v30  ;;  %13388 = vmatpush3.bf16.msra.mxu1 %v14597_v40  ;;  %13371 = vmatprep.mubr.bf16.mxu1 %v16380_v61  ;;  %v16383_v1 = vpop.f32.mrb[145].mxu0  ;;  %v16408_v40 = vsel %vm2151_vm0, %v4808_v49, %v4812_v8  ;;  %v14603_v49 = vld [vmem:[%s17949_s3 + $0x330] sm:$0xff]  }
 0x2f4   : > { %18078 = vst [vmem:[#allocation40_spill] sm:$0xff] %v16383_v1  ;;  %v16385_v6 = vpop.f32.mrb[146].mxu0  ;;  %13389 = vmatprep.subr.bf16.mxu1 %v14598_v28 }
 0x2f5   : > { %18079 = vst [vmem:[#allocation41_spill] sm:$0xff] %v16385_v6  ;;  %v16392_v25 = vpop.f32.mrb[147].mxu0 }
 0x2f6   : > { %18081 = vst [vmem:[#allocation42_spill] sm:$0xff] %v16392_v25  ;;  %v16491_v25 = vld [vmem:[#allocation3 + $0x18] sm:$0xff] }
 0x2f7   : > { %13390 = vmatpush3.bf16.msra.mxu1 %v14598_v28  ;;  %v4816_v28 = vor.u32 %v18091_v46, %v4812_v8  ;;  %v18096_v8 = vshll.u32 %v15778_v55, 16  ;;  %v16456_v46 = vld [vmem:[#allocation3 + $0x60] sm:$0x1] }
 0x2f8   : > { %13391 = vmatprep.subr.bf16.mxu1 %v14599_v33  ;;  %v4850_v35 = vshll.u32 %v16456_v46, 16 }
 0x2f9   : > { %v16434_v9 = vsel %vm2151_vm0, %v4816_v28, %v4820_v51  ;;  %v4836_v19 = vrot.slane %v18096_v8, 1  ;;  %v18099_v51 = vshll.u32 %v18098_v42, 16  ;;  %v18100_v28 = vshrl.u32 %v15765_v13, 16  ;;  %v14604_v8 = vld [vmem:[%s17949_s3 + $0x338] sm:$0xff]  }
 0x2fa   : > { %13372 = vmatmul.mubr.bf16.gmra.mrb[4].mxu1 %v16404_v52  ;;  %v16410_v36 = vpop.f32.mrb[148].mxu0 }
 0x2fb   : > { %18085 = vst [vmem:[#allocation43_spill] sm:$0xff] %v16410_v36  ;;  %13375 = vmatprep.mubr.bf16.mxu1 %v16408_v40  ;;  %13392 = vmatpush3.bf16.msra.mxu1 %v14599_v33  ;;  %v16413_v11 = vpop.f32.mrb[149].mxu0  ;;  %v14602_v33 = vld [vmem:[%s17949_s3 + $0x328] sm:$0xff]   ;;  %v4844_v58 = vrot.slane %v18099_v51, 1  ;;  %v4840_v59 = vor.u32 %v18101_v34, %v4836_v19  ;;  %v4852_v34 = vrot.slane %v4850_v35, 1 }
 0x2fc   : > { %18086 = vst [vmem:[#allocation44_spill] sm:$0xff] %v16413_v11  ;;  %v16415_v3 = vpop.f32.mrb[150].mxu0  ;;  %13393 = vmatprep.subr.bf16.mxu1 %v14600_v54  ;;  %v5548_v36 = vld [vmem:[#allocation3 + $0x10] sm:$0xfc] }
 0x2fd   : > { %18087 = vst [vmem:[#allocation45_spill] sm:$0xff] %v16415_v3  ;;  %v16422_v41 = vpop.f32.mrb[151].mxu0  ;;  %v16471_v51 = vsel %vm2151_vm0, %v4840_v59, %v4844_v58  ;;  %v16489_v59 = vld [vmem:[#allocation3 + $0x10] sm:$0xfe] }
 0x2fe   : > { %18089 = vst [vmem:[#allocation46_spill] sm:$0xff] %v16422_v41  ;;  %v5074_v6 = vrot.slane %v16489_v59, 1  ;;  %v5093_v41 = vrot.slane %v16456_v46, 1  ;;  %v14618_v46 = vld [vmem:[%s17949_s3 + $0x3a8] sm:$0xff]  }
 0x2ff   : > { %13394 = vmatpush3.bf16.msra.mxu1 %v14600_v54 }
 0x300   : > { %13395 = vmatprep.subr.bf16.mxu1 %v14601_v15 }
 0x302   : > { %13376 = vmatmul.mubr.bf16.gmra.mrb[8].mxu1 %v16434_v9  ;;  %v16440_v39 = vpop.f32.mrb[152].mxu0 }
 0x303   : > { %18093 = vst [vmem:[#allocation47_spill] sm:$0xff] %v16440_v39  ;;  %13379 = vmatprep.mubr.bf16.mxu1 %v16438_v0  ;;  %v16443_v23 = vpop.f32.mrb[153].mxu0  ;;  %13396 = vmatpush3.bf16.msra.mxu1 %v14601_v15  ;;  %v4832_v15 = vor.u32 %v18100_v28, %v4828_v63  ;;  %v18106_v28 = vshrl.u32 %v18098_v42, 16 }
 0x304   : > { %18094 = vst [vmem:[#allocation48_spill] sm:$0xff] %v16443_v23  ;;  %v16445_v18 = vpop.f32.mrb[154].mxu0  ;;  %13397 = vmatprep.subr.bf16.mxu1 %v14602_v33  ;;  %v18113_v23 = vld [vmem:[#allocation6_spill] sm:$0xff] }
 0x305   : > { %18095 = vst [vmem:[#allocation49_spill] sm:$0xff] %v16445_v18  ;;  %v16452_v54 = vpop.f32.mrb[155].mxu0  ;;  %v16466_v60 = vsel %vm2151_vm0, %v4832_v15, %v4836_v19  ;;  %v16487_v15 = vor.u32 %v18106_v28, %v4844_v58  ;;  %v14612_v18 = vld [vmem:[%s17949_s3 + $0x378] sm:$0xff]   ;;  %v18115_v39 = vshll.u32 %v18113_v23, 16 }
 0x306   : > { %18097 = vst [vmem:[#allocation50_spill] sm:$0xff] %v16452_v54  ;;  %v16577_v54 = vld [vmem:[#allocation3 + $0x50] sm:$0xff] }
 0x307   : > { %13398 = vmatpush3.bf16.msra.mxu1 %v14602_v33  ;;  %v14605_v33 = vld [vmem:[%s17949_s3 + $0x340] sm:$0xff]   ;;  %v4853_v1 = vsel %vm2151_vm0, %v16487_v15, %v4852_v34  ;;  %v5313_v5 = vrot.slane %v18115_v39, 2 }
 0x308   : > { %13399 = vmatprep.subr.bf16.mxu1 %v14603_v49 }
 0x30a   : > { %13380 = vmatmul.mubr.bf16.gmra.mrb[12].mxu1 %v16466_v60  ;;  %v16473_v13 = vpop.f32.mrb[156].mxu0 }
 0x30b   : > { %18102 = vst [vmem:[#allocation14_spill] sm:$0xff] %v16473_v13  ;;  %13383 = vmatprep.mubr.bf16.mxu1 %v16471_v51  ;;  %v16476_v55 = vpop.f32.mrb[157].mxu0  ;;  %13400 = vmatpush3.bf16.msra.mxu1 %v14603_v49  ;;  %v5075_v49 = vrot.slane %v16491_v25, 1  ;;  %v7818_v13 = vrot.slane %v18007_v20, 1  ;;  %v5089_v20 = vrot.slane %v16577_v54, 1 }
 0x30c   : > { %18103 = vst [vmem:[#allocation51_spill] sm:$0xff] %v16476_v55  ;;  %v16478_v63 = vpop.f32.mrb[158].mxu0  ;;  %13401 = vmatprep.subr.bf16.mxu1 %v14604_v8 }
 0x30d   : > { %18104 = vst [vmem:[#allocation52_spill] sm:$0xff] %v16478_v63  ;;  %v16483_v19 = vpop.f32.mrb[159].mxu0  ;;  %v5076_v30 = vsel %vm2597_vm3, %v5074_v6, %v5075_v49  ;;  %v14606_v6 = vld [vmem:[%s17949_s3 + $0x348] sm:$0xff]  }
 0x30e   : > { %18105 = vst [vmem:[#allocation53_spill] sm:$0xff] %v16483_v19  ;;  %v16549_v19 = vld [vmem:[#allocation3 + $0x40] sm:$0xff]  ;;  %v16552_v63 = vld [vmem:[#allocation3 + $0x48] sm:$0xff] }
 0x30f   : > { %13402 = vmatpush3.bf16.msra.mxu1 %v14604_v8  ;;  %v16509_v8 = vrot.slane %v16506_v26, 1  ;;  %v5087_v44 = vrot.slane %v16552_v63, 1 }
 0x310   : > { %13423 = vmatprep.subr.bf16.mxu1 %v14605_v33 }
 0x311   : > { %v16596_v29 = vsel %vm2597_vm3, %v5087_v44, %v5089_v20 }
 0x312   : > { %13384 = vmatmul.mubr.bf16.gmra.mrb[16].mxu1 %v4853_v1  ;;  %v16498_v42 = vpop.f32.mrb[160].mxu0  ;;  %v5079_v1 = vrot.slane %v16511_v10, 1 }
 0x313   : > { %18107 = vst [vmem:[#allocation54_spill] sm:$0xff] %v16498_v42  ;;  %13403 = vmatprep.mubr.bf16.mxu1 %v5076_v30  ;;  %v16500_v35 = vpop.f32.mrb[161].mxu0  ;;  %v5078_v30 = vsel %vm2597_vm3, %v5075_v49, %v16509_v8  ;;  %v16530_v42 = vld [vmem:[#allocation3 + $0x38] sm:$0xff] }
 0x314   : > { %18108 = vst [vmem:[#allocation55_spill] sm:$0xff] %v16500_v35  ;;  %v16502_v58 = vpop.f32.mrb[162].mxu0  ;;  %v16521_v34 = vsel %vm2597_vm3, %v16509_v8, %v5079_v1  ;;  %v5083_v49 = vrot.slane %v16530_v42, 1 }
 0x315   : > { %18109 = vst [vmem:[#allocation56_spill] sm:$0xff] %v16502_v58  ;;  %v16504_v28 = vpop.f32.mrb[163].mxu0  ;;  %v16527_v58 = vld [vmem:[#allocation3 + $0x30] sm:$0xff] }
 0x316   : > { %18110 = vst [vmem:[#allocation57_spill] sm:$0xff] %v16504_v28  ;;  %v14607_v28 = vld [vmem:[%s17949_s3 + $0x350] sm:$0xff]   ;;  %v5081_v35 = vrot.slane %v16527_v58, 1 }
 0x318   : > { %v16541_v56 = vsel %vm2597_vm3, %v5081_v35, %v5083_v49 }
 0x31a   : > { %13404 = vmatmul.mubr.bf16.vlgmr.msra.gmra.mrb[0].mxu1 %v5078_v30  ;;  %v16537_v30 = vsel %vm2597_vm3, %v5079_v1, %v5081_v35  ;;  %v5085_v1 = vrot.slane %v16549_v19, 1  ;;  %v18008_v35 = vshll.u32 %v16547_v48, 16 }
 0x31b   : > { %13424 = vmatpush3.bf16.msra.mxu1 %v14605_v33  ;;  %13407 = vmatprep.mubr.bf16.mxu1 %v16521_v34  ;;  %v14608_v33 = vld [vmem:[%s17949_s3 + $0x358] sm:$0xff]  }
 0x31c   : > { %13425 = vmatprep.subr.bf16.mxu1 %v14606_v6  ;;  %v16561_v55 = vsel %vm2597_vm3, %v5083_v49, %v5085_v1  ;;  %v7819_v31 = vrot.slane %v18008_v35, 2  ;;  %v16569_v45 = vsel %vm2597_vm3, %v5085_v1, %v5087_v44  ;;  %v14611_v49 = vld [vmem:[%s17949_s3 + $0x370] sm:$0xff]   ;;  %v16585_v1 = vld [vmem:[#allocation3 + $0x58] sm:$0xff]  ;;  %v14613_v44 = vld [vmem:[%s17949_s3 + $0x380] sm:$0xff]  }
 0x31f   : > { %13426 = vmatpush3.bf16.msra.mxu1 %v14606_v6  ;;  %v14609_v6 = vld [vmem:[%s17949_s3 + $0x360] sm:$0xff]  }
 0x320   : > { %13427 = vmatprep.subr.bf16.mxu1 %v14607_v28 }
 0x322   : > { %13408 = vmatmul.mubr.bf16.gmra.mrb[4].mxu1 %v16537_v30 }
 0x323   : > { %13411 = vmatprep.mubr.bf16.mxu1 %v16541_v56  ;;  %13428 = vmatpush3.bf16.msra.mxu1 %v14607_v28  ;;  %v14610_v28 = vld [vmem:[%s17949_s3 + $0x368] sm:$0xff]  }
 0x324   : > { %13429 = vmatprep.subr.bf16.mxu1 %v14608_v33 }
 0x327   : > { %13430 = vmatpush3.bf16.msra.mxu1 %v14608_v33  ;;  %v16572_v33 = vor.u32 %v7819_v31, %v7818_v13  ;;  %v5305_v31 = vshrl.u32 %v16489_v59, 16  ;;  %v5308_v13 = vshll.u32 %v16489_v59, 16 }
 0x328   : > { %13431 = vmatprep.subr.bf16.mxu1 %v14609_v6 }
 0x329   : > { %18111 = vst [vmem:[#allocation58_spill] sm:$0xff] %v16572_v33  ;;  %v16583_v35 = vsel %vm2828_vm1, %v16193_v57, %v16572_v33  ;;  %v5307_v59 = vrot.slane %v5305_v31, 1  ;;  %v5310_v2 = vrot.slane %v5308_v13, 2  ;;  %v18116_v31 = vld [vmem:[#allocation17_spill] sm:$0xff]  ;;  %v5583_v33 = vrot.slane %v16577_v54, 2 }
 0x32a   : > { %13412 = vmatmul.mubr.bf16.gmra.mrb[8].mxu1 %v16561_v55  ;;  %18112 = vst [vmem:[#allocation59_spill] sm:$0xff] %v16583_v35  ;;  %v16712_v35 = vrot.slane %v16585_v1, 2 }
 0x32b   : > { %13415 = vmatprep.mubr.bf16.mxu1 %v16569_v45  ;;  %13432 = vmatpush3.bf16.msra.mxu1 %v14609_v6  ;;  %v16588_v6 = vrot.slane %v16585_v1, 1  ;;  %v5311_v3 = vor.u32 %v5310_v2, %v5307_v59  ;;  %v14615_v2 = vld [vmem:[%s17949_s3 + $0x390] sm:$0xff]   ;;  %v16636_v59 = vld [vmem:[#allocation3 + $0x60] sm:$0x3] }
 0x32c   : > { %13433 = vmatprep.subr.bf16.mxu1 %v14610_v28  ;;  %v5587_v12 = vrot.slane %v16636_v59, 2 }
 0x32d   : > { %v16601_v57 = vsel %vm2597_vm3, %v5089_v20, %v16588_v6 }
 0x32f   : > { %13434 = vmatpush3.bf16.msra.mxu1 %v14610_v28  ;;  %v18114_v28 = vshrl.u32 %v18113_v23, 16  ;;  %v5094_v23 = vsel %vm2597_vm3, %v16588_v6, %v5093_v41  ;;  %v18119_v41 = vld [vmem:[#allocation11_spill] sm:$0xff] }
 0x330   : > { %13435 = vmatprep.subr.bf16.mxu1 %v14611_v49 }
 0x331   : > { %v5312_v47 = vrot.slane %v18114_v28, 1  ;;  %v18120_v28 = vld [vmem:[#allocation12_spill] sm:$0xff] }
 0x332   : > { %13416 = vmatmul.mubr.bf16.gmra.mrb[12].mxu1 %v16596_v29 }
 0x333   : > { %13419 = vmatprep.mubr.bf16.mxu1 %v16601_v57  ;;  %13436 = vmatpush3.bf16.msra.mxu1 %v14611_v49  ;;  %v5314_v20 = vor.u32 %v5313_v5, %v5312_v47  ;;  %v14614_v49 = vld [vmem:[%s17949_s3 + $0x388] sm:$0xff]   ;;  %v18117_v5 = vld [vmem:[#allocation18_spill] sm:$0xff] }
 0x334   : > { %13437 = vmatprep.subr.bf16.mxu1 %v14612_v18  ;;  %v14616_v47 = vld [vmem:[%s17949_s3 + $0x398] sm:$0xff]  }
 0x335   : > { %v5315_v39 = vsel %vm2828_vm1, %v5311_v3, %v5314_v20  ;;  %v5319_v13 = vsel %vm2828_vm1, %v5314_v20, %v18116_v31  ;;  %v18118_v3 = vld [vmem:[#allocation10_spill] sm:$0xff]  ;;  %v14619_v20 = vld [vmem:[%s17949_s3 + $0x3b0] sm:$0xff]  }
 0x337   : > { %13438 = vmatpush3.bf16.msra.mxu1 %v14612_v18  ;;  %v14617_v18 = vld [vmem:[%s17949_s3 + $0x3a0] sm:$0xff]  }
 0x338   : > { %13459 = vmatprep.subr.bf16.mxu1 %v14613_v44 }
 0x33a   : > { %13420 = vmatmul.mubr.bf16.gmra.mrb[16].mxu1 %v5094_v23  ;;  %v5349_v23 = vshrl.u32 %v16636_v59, 16 }
 0x33b   : > { %13439 = vmatprep.mubr.bf16.mxu1 %v5315_v39  ;;  %v5352_v39 = vshll.u32 %v16636_v59, 16  ;;  %v14631_v59 = vld [vmem:[%s17949_s3 + $0x410] sm:$0xff]  }
 0x342   : > { %13440 = vmatmul.mubr.bf16.vlgmr.msra.gmra.mrb[0].mxu1 %v5319_v13  ;;  %v5351_v13 = vrot.slane %v5349_v23, 1  ;;  %v5569_v23 = vrot.slane %v16491_v25, 2 }
 0x343   : > { %13460 = vmatpush3.bf16.msra.mxu1 %v14613_v44  ;;  %13443 = vmatprep.mubr.bf16.mxu1 %v18117_v5  ;;  %v18121_v44 = vld [vmem:[#allocation15_spill] sm:$0xff] }
 0x344   : > { %13461 = vmatprep.subr.bf16.mxu1 %v14614_v49 }
 0x347   : > { %13462 = vmatpush3.bf16.msra.mxu1 %v14614_v49  ;;  %v14620_v49 = vld [vmem:[%s17949_s3 + $0x3b8] sm:$0xff]  }
 0x348   : > { %13463 = vmatprep.subr.bf16.mxu1 %v14615_v2 }
 0x34a   : > { %13444 = vmatmul.mubr.bf16.gmra.mrb[4].mxu1 %v18118_v3 }
 0x34b   : > { %13447 = vmatprep.mubr.bf16.mxu1 %v18119_v41  ;;  %13464 = vmatpush3.bf16.msra.mxu1 %v14615_v2  ;;  %v5354_v2 = vrot.slane %v5352_v39, 2  ;;  %v5568_v39 = vrot.slane %v5548_v36, 2 }
 0x34c   : > { %13465 = vmatprep.subr.bf16.mxu1 %v14616_v47 }
 0x34d   : > { %v5355_v43 = vor.u32 %v5354_v2, %v5351_v13  ;;  %v14622_v13 = vld [vmem:[%s17949_s3 + $0x3c8] sm:$0xff]   ;;  %v5577_v2 = vrot.slane %v16530_v42, 2 }
 0x34f   : > { %13466 = vmatpush3.bf16.msra.mxu1 %v14616_v47  ;;  %v18122_v47 = vld [vmem:[#allocation16_spill] sm:$0xff] }
 0x350   : > { %13467 = vmatprep.subr.bf16.mxu1 %v14617_v18 }
 0x352   : > { %13448 = vmatmul.mubr.bf16.gmra.mrb[8].mxu1 %v18120_v28 }
 0x353   : > { %13451 = vmatprep.mubr.bf16.mxu1 %v18121_v44  ;;  %13468 = vmatpush3.bf16.msra.mxu1 %v14617_v18  ;;  %v18123_v18 = vld [vmem:[#allocation19_spill] sm:$0xff] }
 0x354   : > { %13469 = vmatprep.subr.bf16.mxu1 %v14618_v46  ;;  %v16651_v11 = vsel %vm2828_vm1, %v18124_v21, %v18123_v18  ;;  %v5356_v4 = vsel %vm2828_vm1, %v18123_v18, %v5355_v43  ;;  %v5570_v21 = vsel %vm3093_vm2, %v5568_v39, %v5569_v23 }
 0x357   : > { %13470 = vmatpush3.bf16.msra.mxu1 %v14618_v46  ;;  %v14621_v46 = vld [vmem:[%s17949_s3 + $0x3c0] sm:$0xff]  }
 0x358   : > { %13471 = vmatprep.subr.bf16.mxu1 %v14619_v20 }
 0x35a   : > { %13452 = vmatmul.mubr.bf16.gmra.mrb[12].mxu1 %v18122_v47 }
 0x35b   : > { %13455 = vmatprep.mubr.bf16.mxu1 %v16651_v11  ;;  %13472 = vmatpush3.bf16.msra.mxu1 %v14619_v20  ;;  %v16662_v20 = vrot.slane %v16506_v26, 2 }
 0x35c   : > { %13473 = vmatprep.subr.bf16.mxu1 %v14620_v49 }
 0x35d   : > { %v5572_v36 = vsel %vm3093_vm2, %v5569_v23, %v16662_v20  ;;  %v16672_v43 = vsel %vm3093_vm2, %v16662_v20, %v5573_v14  ;;  %v14624_v23 = vld [vmem:[%s17949_s3 + $0x3d8] sm:$0xff]  }
 0x35f   : > { %13474 = vmatpush3.bf16.msra.mxu1 %v14620_v49  ;;  %v5575_v49 = vrot.slane %v16527_v58, 2 }
 0x360   : > { %13495 = vmatprep.subr.bf16.mxu1 %v14621_v46 }
 0x361   : > { %v16684_v39 = vsel %vm3093_vm2, %v5573_v14, %v5575_v49  ;;  %v14626_v14 = vld [vmem:[%s17949_s3 + $0x3e8] sm:$0xff]  }
 0x362   : > { %13456 = vmatmul.mubr.bf16.gmra.mrb[16].mxu1 %v5356_v4  ;;  %v14623_v4 = vld [vmem:[%s17949_s3 + $0x3d0] sm:$0xff]  }
 0x363   : > { %13475 = vmatprep.mubr.bf16.mxu1 %v5570_v21  ;;  %v14625_v21 = vld [vmem:[%s17949_s3 + $0x3e0] sm:$0xff]  }
 0x36a   : > { %13476 = vmatmul.mubr.bf16.vlgmr.msra.gmra.mrb[0].mxu1 %v5572_v36  ;;  %v5581_v36 = vrot.slane %v16552_v63, 2 }
 0x36b   : > { %13496 = vmatpush3.bf16.msra.mxu1 %v14621_v46  ;;  %13479 = vmatprep.mubr.bf16.mxu1 %v16672_v43  ;;  %v16688_v46 = vsel %vm3093_vm2, %v5575_v49, %v5577_v2 }
 0x36c   : > { %13497 = vmatprep.subr.bf16.mxu1 %v14622_v13 }
 0x36f   : > { %13498 = vmatpush3.bf16.msra.mxu1 %v14622_v13  ;;  %v5579_v13 = vrot.slane %v16549_v19, 2 }
 0x370   : > { %13499 = vmatprep.subr.bf16.mxu1 %v14623_v4 }
 0x371   : > { %v16700_v49 = vsel %vm3093_vm2, %v5577_v2, %v5579_v13  ;;  %v14628_v2 = vld [vmem:[%s17949_s3 + $0x3f8] sm:$0xff]  }
 0x372   : > { %13480 = vmatmul.mubr.bf16.gmra.mrb[4].mxu1 %v16684_v39 }
 0x373   : > { %13483 = vmatprep.mubr.bf16.mxu1 %v16688_v46  ;;  %13500 = vmatpush3.bf16.msra.mxu1 %v14623_v4  ;;  %v16704_v4 = vsel %vm3093_vm2, %v5579_v13, %v5581_v36  ;;  %v16718_v13 = vsel %vm3093_vm2, %v5581_v36, %v5583_v33  ;;  %v5588_v36 = vsel %vm3093_vm2, %v16712_v35, %v5587_v12  ;;  %v14632_v12 = vld [vmem:[%s17949_s3 + $0x418] sm:$0xff]  }
 0x374   : > { %13501 = vmatprep.subr.bf16.mxu1 %v14624_v23 }
 0x377   : > { %13502 = vmatpush3.bf16.msra.mxu1 %v14624_v23  ;;  %v14627_v23 = vld [vmem:[%s17949_s3 + $0x3f0] sm:$0xff]  }
 0x378   : > { %13503 = vmatprep.subr.bf16.mxu1 %v14625_v21 }
 0x37a   : > { %13484 = vmatmul.mubr.bf16.gmra.mrb[8].mxu1 %v16700_v49 }
 0x37b   : > { %13487 = vmatprep.mubr.bf16.mxu1 %v16704_v4  ;;  %13504 = vmatpush3.bf16.msra.mxu1 %v14625_v21  ;;  %v16723_v21 = vsel %vm3093_vm2, %v5583_v33, %v16712_v35  ;;  %v14630_v33 = vld [vmem:[%s17949_s3 + $0x408] sm:$0xff]  }
 0x37c   : > { %13505 = vmatprep.subr.bf16.mxu1 %v14626_v14 }
 0x37f   : > { %13506 = vmatpush3.bf16.msra.mxu1 %v14626_v14  ;;  %v14629_v14 = vld [vmem:[%s17949_s3 + $0x400] sm:$0xff]  }
 0x380   : > { %13507 = vmatprep.subr.bf16.mxu1 %v14627_v23 }
 0x382   : > { %13488 = vmatmul.mubr.bf16.gmra.mrb[12].mxu1 %v16718_v13 }
 0x383   : > { %13491 = vmatprep.mubr.bf16.mxu1 %v16723_v21  ;;  %13508 = vmatpush3.bf16.msra.mxu1 %v14627_v23  ;;  %v14634_v23 = vld [vmem:[%s17949_s3 + $0x428] sm:$0xff]  }
 0x384   : > { %13509 = vmatprep.subr.bf16.mxu1 %v14628_v2 }
 0x387   : > { %13510 = vmatpush3.bf16.msra.mxu1 %v14628_v2  ;;  %v14635_v2 = vld [vmem:[%s17949_s3 + $0x430] sm:$0xff]  }
 0x388   : > { %13531 = vmatprep.subr.bf16.mxu1 %v14629_v14 }
 0x38a   : > { %13492 = vmatmul.mubr.bf16.gmra.mrb[16].mxu1 %v5588_v36  ;;  %v14637_v36 = vld [vmem:[%s17949_s3 + $0x440] sm:$0xff]  }
 0x38b   : > { %13511 = vmatprep.mubr.bf16.mxu1 %v16491_v25  ;;  %v14633_v25 = vld [vmem:[%s17949_s3 + $0x420] sm:$0xff]  }
 0x392   : > { %13512 = vmatmul.mubr.bf16.vlgmr.msra.gmra.mrb[0].mxu1 %v16506_v26 }
 0x393   : > { %13532 = vmatpush3.bf16.msra.mxu1 %v14629_v14  ;;  %13515 = vmatprep.mubr.bf16.mxu1 %v16511_v10  ;;  %v14636_v14 = vld [vmem:[%s17949_s3 + $0x438] sm:$0xff]  }
 0x394   : > { %13533 = vmatprep.subr.bf16.mxu1 %v14630_v33 }
 0x397   : > { %13534 = vmatpush3.bf16.msra.mxu1 %v14630_v33  ;;  %v16765_v33 = vld [vmem:[#allocation3 + $0x60] sm:$0xff] }
 0x398   : > { %13535 = vmatprep.subr.bf16.mxu1 %v14631_v59 }
 0x39a   : > { %13516 = vmatmul.mubr.bf16.gmra.mrb[4].mxu1 %v16527_v58 }
 0x39b   : > { %13519 = vmatprep.mubr.bf16.mxu1 %v16530_v42  ;;  %13536 = vmatpush3.bf16.msra.mxu1 %v14631_v59  ;;  %v14638_v59 = vld [vmem:[%s17949_s3 + $0x448] sm:$0xff]  }
 0x39c   : > { %13537 = vmatprep.subr.bf16.mxu1 %v14632_v12 }
 0x39f   : > { %13538 = vmatpush3.bf16.msra.mxu1 %v14632_v12  ;;  %v14639_v12 = vld [vmem:[%s17949_s3 + $0x450] sm:$0xff]  }
 0x3a0   : > { %13539 = vmatprep.subr.bf16.mxu1 %v14633_v25 }
 0x3a2   : > { %13520 = vmatmul.mubr.bf16.gmra.mrb[8].mxu1 %v16549_v19 }
 0x3a3   : > { %13523 = vmatprep.mubr.bf16.mxu1 %v16552_v63  ;;  %13540 = vmatpush3.bf16.msra.mxu1 %v14633_v25  ;;  %v6079_v25 = vshll.u32 %v16765_v33, 16 }
 0x3a4   : > { %13541 = vmatprep.subr.bf16.mxu1 %v14634_v23 }
 0x3a7   : > { %13542 = vmatpush3.bf16.msra.mxu1 %v14634_v23  ;;  %v16796_v23 = vld [vmem:[#allocation3 + $0x68] sm:$0x1] }
 0x3a8   : > { %13543 = vmatprep.subr.bf16.mxu1 %v14635_v2 }
 0x3aa   : > { %13524 = vmatmul.mubr.bf16.gmra.mrb[12].mxu1 %v16577_v54 }
 0x3ab   : > { %13527 = vmatprep.mubr.bf16.mxu1 %v16585_v1  ;;  %13544 = vmatpush3.bf16.msra.mxu1 %v14635_v2  ;;  %v6087_v2 = vshll.u32 %v16796_v23, 16 }
 0x3ac   : > { %13545 = vmatprep.subr.bf16.mxu1 %v14636_v14 }
 0x3af   : > { %13546 = vmatpush3.bf16.msra.mxu1 %v14636_v14  ;;  %v6083_v14 = vshrl.u32 %v16765_v33, 16 }
 0x3b0   : > { %13567 = vmatprep.subr.bf16.mxu1 %v14637_v36 }
 0x3b2   : > { %13528 = vmatmul.mubr.bf16.gmra.mrb[16].mxu1 %v16765_v33 }
 0x3b3   : > { %13547 = vmatprep.mubr.bf16.mxu1 %v15569_v53  ;;  %v14640_v53 = vld [vmem:[%s17949_s3 + $0x458] sm:$0xff]  }
 0x3ba   : > { %13548 = vmatmul.mubr.bf16.vlgmr.msra.gmra.mrb[0].mxu1 %v16380_v61  ;;  %v14641_v61 = vld [vmem:[%s17949_s3 + $0x460] sm:$0xff]  }
 0x3bb   : > { %13568 = vmatpush3.bf16.msra.mxu1 %v14637_v36  ;;  %13551 = vmatprep.mubr.bf16.mxu1 %v16404_v52  ;;  %v14642_v52 = vld [vmem:[%s17949_s3 + $0x468] sm:$0xff]   ;;  %v14645_v36 = vld [vmem:[%s17949_s3 + $0x480] sm:$0xff]  }
 0x3bc   : > { %13569 = vmatprep.subr.bf16.mxu1 %v14638_v59 }
 0x3bf   : > { %13570 = vmatpush3.bf16.msra.mxu1 %v14638_v59 }
 0x3c0   : > { %13571 = vmatprep.subr.bf16.mxu1 %v14639_v12 }
 0x3c2   : > { %13552 = vmatmul.mubr.bf16.gmra.mrb[4].mxu1 %v16408_v40  ;;  %v14643_v40 = vld [vmem:[%s17949_s3 + $0x470] sm:$0xff]  }
 0x3c3   : > { %13555 = vmatprep.mubr.bf16.mxu1 %v16434_v9  ;;  %13572 = vmatpush3.bf16.msra.mxu1 %v14639_v12  ;;  %v6081_v9 = vrot.slane %v6079_v25, 1  ;;  %v6089_v12 = vrot.slane %v6087_v2, 1  ;;  %v14652_v2 = vld [vmem:[%s17949_s3 + $0x4b8] sm:$0xff]  }
 0x3c4   : > { %13573 = vmatprep.subr.bf16.mxu1 %v14640_v53 }
 0x3c5   : > { %v6085_v59 = vor.u32 %v6083_v14, %v6081_v9 }
 0x3c7   : > { %13574 = vmatpush3.bf16.msra.mxu1 %v14640_v53  ;;  %v6282_v53 = vld [vmem:[#allocation3 + $0x18] sm:$0xfe] }
 0x3c8   : > { %13575 = vmatprep.subr.bf16.mxu1 %v14641_v61 }
 0x3ca   : > { %13556 = vmatmul.mubr.bf16.gmra.mrb[8].mxu1 %v16438_v0  ;;  %v14644_v0 = vld [vmem:[%s17949_s3 + $0x478] sm:$0xff]  }
 0x3cb   : > { %13559 = vmatprep.mubr.bf16.mxu1 %v16466_v60  ;;  %13576 = vmatpush3.bf16.msra.mxu1 %v14641_v61  ;;  %v6082_v60 = vsel %vm2151_vm0, %v16487_v15, %v6081_v9  ;;  %v6311_v61 = vrot.slane %v6282_v53, 1  ;;  %v6542_v9 = vshrl.u32 %v6282_v53, 16 }
 0x3cc   : > { %13577 = vmatprep.subr.bf16.mxu1 %v14642_v52 }
 0x3cd   : > { %v6313_v15 = vsel %vm2597_vm3, %v6311_v61, %v16509_v8  ;;  %v14648_v8 = vld [vmem:[%s17949_s3 + $0x498] sm:$0xff]   ;;  %v6581_v61 = vrot.slane %v6083_v14, 1 }
 0x3cf   : > { %13578 = vmatpush3.bf16.msra.mxu1 %v14642_v52  ;;  %v14646_v52 = vld [vmem:[%s17949_s3 + $0x488] sm:$0xff]  }
 0x3d0   : > { %13579 = vmatprep.subr.bf16.mxu1 %v14643_v40 }
 0x3d2   : > { %13560 = vmatmul.mubr.bf16.gmra.mrb[12].mxu1 %v16471_v51  ;;  %v6090_v51 = vsel %vm2151_vm0, %v6085_v59, %v6089_v12  ;;  %v6330_v59 = vrot.slane %v16796_v23, 1  ;;  %v14655_v23 = vld [vmem:[%s17949_s3 + $0x4d0] sm:$0xff]  }
 0x3d3   : > { %13563 = vmatprep.mubr.bf16.mxu1 %v6082_v60  ;;  %13580 = vmatpush3.bf16.msra.mxu1 %v14643_v40  ;;  %v14647_v40 = vld [vmem:[%s17949_s3 + $0x490] sm:$0xff]  }
 0x3d4   : > { %13581 = vmatprep.subr.bf16.mxu1 %v14644_v0 }
 0x3d7   : > { %13582 = vmatpush3.bf16.msra.mxu1 %v14644_v0  ;;  %v6545_v0 = vshll.u32 %v6282_v53, 16 }
 0x3d8   : > { %13603 = vmatprep.subr.bf16.mxu1 %v14645_v36 }
 0x3d9   : > { %v6547_v60 = vrot.slane %v6545_v0, 2  ;;  %v14668_v0 = vld [vmem:[%s17949_s3 + $0x538] sm:$0xff]  }
 0x3da   : > { %13564 = vmatmul.mubr.bf16.gmra.mrb[16].mxu1 %v6090_v51  ;;  %v14659_v51 = vld [vmem:[%s17949_s3 + $0x4f0] sm:$0xff]  }
 0x3db   : > { %13583 = vmatprep.mubr.bf16.mxu1 %v6313_v15 }
 0x3e2   : > { %13584 = vmatmul.mubr.bf16.vlgmr.msra.gmra.mrb[0].mxu1 %v16521_v34  ;;  %v14649_v34 = vld [vmem:[%s17949_s3 + $0x4a0] sm:$0xff]  }
 0x3e3   : > { %13604 = vmatpush3.bf16.msra.mxu1 %v14645_v36  ;;  %13587 = vmatprep.mubr.bf16.mxu1 %v16537_v30  ;;  %v14650_v30 = vld [vmem:[%s17949_s3 + $0x4a8] sm:$0xff]   ;;  %v14653_v36 = vld [vmem:[%s17949_s3 + $0x4c0] sm:$0xff]  }
 0x3e4   : > { %13605 = vmatprep.subr.bf16.mxu1 %v14646_v52 }
 0x3e7   : > { %13606 = vmatpush3.bf16.msra.mxu1 %v14646_v52 }
 0x3e8   : > { %13607 = vmatprep.subr.bf16.mxu1 %v14647_v40 }
 0x3ea   : > { %13588 = vmatmul.mubr.bf16.gmra.mrb[4].mxu1 %v16541_v56  ;;  %v14651_v56 = vld [vmem:[%s17949_s3 + $0x4b0] sm:$0xff]  }
 0x3eb   : > { %13591 = vmatprep.mubr.bf16.mxu1 %v16561_v55  ;;  %13608 = vmatpush3.bf16.msra.mxu1 %v14647_v40  ;;  %v6328_v55 = vrot.slane %v16765_v33, 1 }
 0x3ec   : > { %13609 = vmatprep.subr.bf16.mxu1 %v14648_v8 }
 0x3ed   : > { %v6331_v53 = vsel %vm2597_vm3, %v6328_v55, %v6330_v59  ;;  %v18125_v59 = vshll.u32 %v15924_v38, 16 }
 0x3ef   : > { %13610 = vmatpush3.bf16.msra.mxu1 %v14648_v8  ;;  %v14661_v8 = vld [vmem:[%s17949_s3 + $0x500] sm:$0xff]  }
 0x3f0   : > { %13611 = vmatprep.subr.bf16.mxu1 %v14649_v34 }
 0x3f2   : > { %13592 = vmatmul.mubr.bf16.gmra.mrb[8].mxu1 %v16569_v45  ;;  %v6544_v45 = vrot.slane %v6542_v9, 1  ;;  %v14663_v9 = vld [vmem:[%s17949_s3 + $0x510] sm:$0xff]  }
 0x3f3   : > { %13595 = vmatprep.mubr.bf16.mxu1 %v16596_v29  ;;  %13612 = vmatpush3.bf16.msra.mxu1 %v14649_v34  ;;  %v6329_v29 = vsel %vm2597_vm3, %v16588_v6, %v6328_v55 }
 0x3f4   : > { %13613 = vmatprep.subr.bf16.mxu1 %v14650_v30  ;;  %v6548_v12 = vor.u32 %v6547_v60, %v6544_v45  ;;  %v14676_v60 = vld [vmem:[%s17949_s3 + $0x578] sm:$0xff]  }
 0x3f6   : > { %v6552_v6 = vsel %vm2828_vm1, %v6548_v12, %v18116_v31  ;;  %v14656_v31 = vld [vmem:[%s17949_s3 + $0x4d8] sm:$0xff]   ;;  %v7254_v12 = vrot.slane %v18125_v59, 1  ;;  %v14687_v59 = vld [vmem:[%s17949_s3 + $0x5d0] sm:$0xff]  }
 0x3f7   : > { %13614 = vmatpush3.bf16.msra.mxu1 %v14650_v30  ;;  %v6785_v30 = vld [vmem:[#allocation3 + $0x18] sm:$0xfc] }
 0x3f8   : > { %13615 = vmatprep.subr.bf16.mxu1 %v14651_v56 }
 0x3fa   : > { %13596 = vmatmul.mubr.bf16.gmra.mrb[12].mxu1 %v16601_v57  ;;  %v14654_v57 = vld [vmem:[%s17949_s3 + $0x4c8] sm:$0xff]  }
 0x3fb   : > { %13599 = vmatprep.mubr.bf16.mxu1 %v6329_v29  ;;  %13616 = vmatpush3.bf16.msra.mxu1 %v14651_v56  ;;  %v6805_v56 = vrot.slane %v6785_v30, 2  ;;  %v18134_v30 = vshll.u32 %v16102_v22, 16 }
 0x3fc   : > { %13617 = vmatprep.subr.bf16.mxu1 %v14652_v2 }
 0x3ff   : > { %13618 = vmatpush3.bf16.msra.mxu1 %v14652_v2 }
 0x400   : > { %13639 = vmatprep.subr.bf16.mxu1 %v14653_v36 }
 0x402   : > { %13600 = vmatmul.mubr.bf16.gmra.mrb[16].mxu1 %v6331_v53 }
 0x403   : > { %13619 = vmatprep.mubr.bf16.mxu1 %v6552_v6 }
 0x40a   : > { %13620 = vmatmul.mubr.bf16.vlgmr.msra.gmra.mrb[0].mxu1 %v18117_v5  ;;  %v14657_v5 = vld [vmem:[%s17949_s3 + $0x4e0] sm:$0xff]  }
 0x40b   : > { %13640 = vmatpush3.bf16.msra.mxu1 %v14653_v36  ;;  %13623 = vmatprep.mubr.bf16.mxu1 %v18118_v3  ;;  %v14658_v3 = vld [vmem:[%s17949_s3 + $0x4e8] sm:$0xff]  }
 0x40c   : > { %13641 = vmatprep.subr.bf16.mxu1 %v14654_v57 }
 0x40f   : > { %13642 = vmatpush3.bf16.msra.mxu1 %v14654_v57  ;;  %v18127_v57 = vshll.u32 %v15934_v24, 16 }
 0x410   : > { %13643 = vmatprep.subr.bf16.mxu1 %v14655_v23 }
 0x412   : > { %13624 = vmatmul.mubr.bf16.gmra.mrb[4].mxu1 %v18119_v41  ;;  %v6582_v41 = vrot.slane %v6079_v25, 2  ;;  %v14660_v25 = vld [vmem:[%s17949_s3 + $0x4f8] sm:$0xff]  }
 0x413   : > { %13627 = vmatprep.mubr.bf16.mxu1 %v18120_v28  ;;  %13644 = vmatpush3.bf16.msra.mxu1 %v14655_v23  ;;  %v16876_v28 = vld [vmem:[#allocation3 + $0x68] sm:$0x3]  ;;  %v7270_v23 = vrot.slane %v18127_v57, 1 }
 0x414   : > { %13645 = vmatprep.subr.bf16.mxu1 %v14656_v31  ;;  %v6586_v15 = vshrl.u32 %v16876_v28, 16  ;;  %v6583_v52 = vor.u32 %v6582_v41, %v6581_v61  ;;  %v6824_v2 = vrot.slane %v16876_v28, 2  ;;  %v14678_v41 = vld [vmem:[%s17949_s3 + $0x588] sm:$0xff]  }
 0x416   : > { %v6588_v14 = vrot.slane %v6586_v15, 1 }
 0x417   : > { %13646 = vmatpush3.bf16.msra.mxu1 %v14656_v31  ;;  %v18128_v31 = vshrl.u32 %v15924_v38, 16  ;;  %v14679_v38 = vld [vmem:[%s17949_s3 + $0x590] sm:$0xff]  }
 0x418   : > { %13647 = vmatprep.subr.bf16.mxu1 %v14657_v5 }
 0x41a   : > { %13628 = vmatmul.mubr.bf16.gmra.mrb[8].mxu1 %v18121_v44  ;;  %v6589_v44 = vshll.u32 %v16876_v28, 16 }
 0x41b   : > { %13631 = vmatprep.mubr.bf16.mxu1 %v18122_v47  ;;  %13648 = vmatpush3.bf16.msra.mxu1 %v14657_v5  ;;  %v6584_v47 = vsel %vm2828_vm1, %v18123_v18, %v6583_v52  ;;  %v14662_v18 = vld [vmem:[%s17949_s3 + $0x508] sm:$0xff]   ;;  %v7258_v5 = vor.u32 %v18128_v31, %v7254_v12  ;;  %v14689_v31 = vld [vmem:[%s17949_s3 + $0x5e0] sm:$0xff]  }
 0x41c   : > { %13649 = vmatprep.subr.bf16.mxu1 %v14658_v3  ;;  %v6591_v40 = vrot.slane %v6589_v44, 2  ;;  %v14680_v44 = vld [vmem:[%s17949_s3 + $0x598] sm:$0xff]  }
 0x41e   : > { %v6592_v34 = vor.u32 %v6591_v40, %v6588_v14  ;;  %v18132_v14 = vld [vmem:[#allocation8_spill] sm:$0xff]  ;;  %v14681_v40 = vld [vmem:[%s17949_s3 + $0x5a0] sm:$0xff]  }
 0x41f   : > { %13650 = vmatpush3.bf16.msra.mxu1 %v14658_v3  ;;  %v18129_v3 = vshrl.u32 %v15914_v7, 16 }
 0x420   : > { %13651 = vmatprep.subr.bf16.mxu1 %v14659_v51  ;;  %v6593_v55 = vsel %vm2828_vm1, %v6583_v52, %v6592_v34  ;;  %v18131_v52 = vld [vmem:[#allocation7_spill] sm:$0xff] }
 0x422   : > { %13632 = vmatmul.mubr.bf16.gmra.mrb[12].mxu1 %v16651_v11  ;;  %v6807_v11 = vsel %vm3093_vm2, %v6805_v56, %v16662_v20  ;;  %v14664_v20 = vld [vmem:[%s17949_s3 + $0x518] sm:$0xff]   ;;  %v7310_v56 = vrot.slane %v18134_v30, 1 }
 0x423   : > { %13635 = vmatprep.mubr.bf16.mxu1 %v6584_v47  ;;  %13652 = vmatpush3.bf16.msra.mxu1 %v14659_v51 }
 0x424   : > { %13653 = vmatprep.subr.bf16.mxu1 %v14660_v25 }
 0x427   : > { %13654 = vmatpush3.bf16.msra.mxu1 %v14660_v25 }
 0x428   : > { %13675 = vmatprep.subr.bf16.mxu1 %v14661_v8 }
 0x42a   : > { %13636 = vmatmul.mubr.bf16.gmra.mrb[16].mxu1 %v6593_v55  ;;  %v14683_v55 = vld [vmem:[%s17949_s3 + $0x5b0] sm:$0xff]  }
 0x42b   : > { %13655 = vmatprep.mubr.bf16.mxu1 %v6807_v11  ;;  %v18135_v11 = vshrl.u32 %v15932_v32, 16 }
 0x432   : > { %13656 = vmatmul.mubr.bf16.vlgmr.msra.gmra.mrb[0].mxu1 %v16672_v43  ;;  %v14665_v43 = vld [vmem:[%s17949_s3 + $0x520] sm:$0xff]  }
 0x433   : > { %13676 = vmatpush3.bf16.msra.mxu1 %v14661_v8  ;;  %13659 = vmatprep.mubr.bf16.mxu1 %v16684_v39  ;;  %v14666_v39 = vld [vmem:[%s17949_s3 + $0x528] sm:$0xff]  }
 0x434   : > { %13677 = vmatprep.subr.bf16.mxu1 %v14662_v18  ;;  %v14682_v8 = vld [vmem:[%s17949_s3 + $0x5a8] sm:$0xff]  }
 0x437   : > { %13678 = vmatpush3.bf16.msra.mxu1 %v14662_v18 }
 0x438   : > { %13679 = vmatprep.subr.bf16.mxu1 %v14663_v9 }
 0x43a   : > { %13660 = vmatmul.mubr.bf16.gmra.mrb[4].mxu1 %v16688_v46  ;;  %v14667_v46 = vld [vmem:[%s17949_s3 + $0x530] sm:$0xff]  }
 0x43b   : > { %13663 = vmatprep.mubr.bf16.mxu1 %v16700_v49  ;;  %13680 = vmatpush3.bf16.msra.mxu1 %v14663_v9  ;;  %v6822_v49 = vrot.slane %v16765_v33, 2  ;;  %v18136_v9 = vshrl.u32 %v16102_v22, 16 }
 0x43c   : > { %13681 = vmatprep.subr.bf16.mxu1 %v14664_v20 }
 0x43d   : > { %v6825_v29 = vsel %vm3093_vm2, %v6822_v49, %v6824_v2 }
 0x43f   : > { %13682 = vmatpush3.bf16.msra.mxu1 %v14664_v20  ;;  %v7314_v20 = vor.u32 %v18136_v9, %v7310_v56  ;;  %v14981_v9 = vld [vmem:[%s17949_s3 + $0x610] sm:$0xff]  }
 0x440   : > { %13683 = vmatprep.subr.bf16.mxu1 %v14665_v43 }
 0x442   : > { %13664 = vmatmul.mubr.bf16.gmra.mrb[8].mxu1 %v16704_v4  ;;  %v6823_v4 = vsel %vm3093_vm2, %v16712_v35, %v6822_v49  ;;  %v14670_v35 = vld [vmem:[%s17949_s3 + $0x548] sm:$0xff]  }
 0x443   : > { %13667 = vmatprep.mubr.bf16.mxu1 %v16718_v13  ;;  %13684 = vmatpush3.bf16.msra.mxu1 %v14665_v43  ;;  %v14669_v13 = vld [vmem:[%s17949_s3 + $0x540] sm:$0xff]  }
 0x444   : > { %13685 = vmatprep.subr.bf16.mxu1 %v14666_v39 }
 0x447   : > { %13686 = vmatpush3.bf16.msra.mxu1 %v14666_v39  ;;  %v14684_v39 = vld [vmem:[%s17949_s3 + $0x5b8] sm:$0xff]  }
 0x448   : > { %13687 = vmatprep.subr.bf16.mxu1 %v14667_v46 }
 0x44a   : > { %13668 = vmatmul.mubr.bf16.gmra.mrb[12].mxu1 %v16723_v21  ;;  %v14671_v21 = vld [vmem:[%s17949_s3 + $0x550] sm:$0xff]  }
 0x44b   : > { %13671 = vmatprep.mubr.bf16.mxu1 %v6823_v4  ;;  %13688 = vmatpush3.bf16.msra.mxu1 %v14667_v46  ;;  %v18138_v4 = vshrl.u32 %v16547_v48, 16 }
 0x44c   : > { %13689 = vmatprep.subr.bf16.mxu1 %v14668_v0 }
 0x44f   : > { %13690 = vmatpush3.bf16.msra.mxu1 %v14668_v0  ;;  %v14685_v0 = vld [vmem:[%s17949_s3 + $0x5c0] sm:$0xff]  }
 0x450   : > { %13711 = vmatprep.subr.bf16.mxu1 %v14669_v13 }
 0x452   : > { %13672 = vmatmul.mubr.bf16.gmra.mrb[16].mxu1 %v6825_v29  ;;  %v17028_v29 = vld [vmem:[#allocation3 + $0x20] sm:$0xfe] }
 0x453   : > { %13691 = vmatprep.mubr.bf16.mxu1 %v16506_v26  ;;  %v14672_v26 = vld [vmem:[%s17949_s3 + $0x558] sm:$0xff]  }
 0x45a   : > { %13692 = vmatmul.mubr.bf16.vlgmr.msra.gmra.mrb[0].mxu1 %v16511_v10  ;;  %v14673_v10 = vld [vmem:[%s17949_s3 + $0x560] sm:$0xff]  }
 0x45b   : > { %13712 = vmatpush3.bf16.msra.mxu1 %v14669_v13  ;;  %13695 = vmatprep.mubr.bf16.mxu1 %v16527_v58  ;;  %v14674_v58 = vld [vmem:[%s17949_s3 + $0x568] sm:$0xff]  }
 0x45c   : > { %13713 = vmatprep.subr.bf16.mxu1 %v14670_v35 }
 0x45f   : > { %13714 = vmatpush3.bf16.msra.mxu1 %v14670_v35  ;;  %v14971_v35 = vld [vmem:[#allocation3 + $0x28] sm:$0xff] }
 0x460   : > { %13715 = vmatprep.subr.bf16.mxu1 %v14671_v21 }
 0x462   : > { %13696 = vmatmul.mubr.bf16.gmra.mrb[4].mxu1 %v16530_v42  ;;  %v7216_v42 = vld [vmem:[#allocation3 + $0x20] sm:$0xff] }
 0x463   : > { %13699 = vmatprep.mubr.bf16.mxu1 %v16549_v19  ;;  %13716 = vmatpush3.bf16.msra.mxu1 %v14671_v21  ;;  %v14675_v19 = vld [vmem:[%s17949_s3 + $0x570] sm:$0xff]   ;;  %v7247_v45 = vshll.u32 %v7216_v42, 16  ;;  %v7245_v36 = vshrl.u32 %v7216_v42, 16  ;;  %v7549_v21 = vrot.slane %v14971_v35, 1 }
 0x464   : > { %13717 = vmatprep.subr.bf16.mxu1 %v14672_v26 }
 0x467   : > { %13718 = vmatpush3.bf16.msra.mxu1 %v14672_v26  ;;  %v7548_v26 = vrot.slane %v17028_v29, 1 }
 0x468   : > { %13719 = vmatprep.subr.bf16.mxu1 %v14673_v10 }
 0x46a   : > { %13700 = vmatmul.mubr.bf16.gmra.mrb[8].mxu1 %v16552_v63  ;;  %v14677_v63 = vld [vmem:[%s17949_s3 + $0x580] sm:$0xff]  }
 0x46b   : > { %13703 = vmatprep.mubr.bf16.mxu1 %v16577_v54  ;;  %13720 = vmatpush3.bf16.msra.mxu1 %v14673_v10  ;;  %v7249_v54 = vrot.slane %v7247_v45, 1  ;;  %v14973_v45 = vld [vmem:[#allocation3 + $0x38] sm:$0xff] }
 0x46c   : > { %13721 = vmatprep.subr.bf16.mxu1 %v14674_v58 }
 0x46d   : > { %v7250_v53 = vor.u32 %v7249_v54, %v7245_v36  ;;  %v14686_v54 = vld [vmem:[%s17949_s3 + $0x5c8] sm:$0xff]  }
 0x46f   : > { %13722 = vmatpush3.bf16.msra.mxu1 %v14674_v58  ;;  %v7550_v58 = vsel %vm2597_vm3, %v7548_v26, %v7549_v21 }
 0x470   : > { %13723 = vmatprep.subr.bf16.mxu1 %v14675_v19 }
 0x472   : > { %13704 = vmatmul.mubr.bf16.gmra.mrb[12].mxu1 %v16585_v1  ;;  %v7255_v1 = vsel %vm2151_vm0, %v7250_v53, %v7254_v12  ;;  %v14974_v12 = vld [vmem:[#allocation3 + $0x40] sm:$0xff] }
 0x473   : > { %13707 = vmatprep.mubr.bf16.mxu1 %v16765_v33  ;;  %13724 = vmatpush3.bf16.msra.mxu1 %v14675_v19  ;;  %v18126_v33 = vshll.u32 %v15914_v7, 16  ;;  %v18130_v7 = vshrl.u32 %v15934_v24, 16  ;;  %v18133_v24 = vshll.u32 %v15932_v32, 16  ;;  %v14972_v19 = vld [vmem:[#allocation3 + $0x30] sm:$0xff]  ;;  %v7555_v53 = vrot.slane %v14974_v12, 1  ;;  %v14700_v12 = vld [vmem:[%s17951_s5 + $0x18] sm:$0xff]  }
 0x474   : > { %13725 = vmatprep.subr.bf16.mxu1 %v14676_v60  ;;  %v7551_v42 = vrot.slane %v14972_v19, 1 }
 0x475   : > { %v7262_v6 = vrot.slane %v18126_v33, 1  ;;  %v7274_v15 = vor.u32 %v18130_v7, %v7270_v23  ;;  %v7302_v47 = vrot.slane %v18133_v24, 1  ;;  %v14691_v7 = vld [vmem:[%s17949_s3 + $0x5f0] sm:$0xff]  }
 0x477   : > { %13726 = vmatpush3.bf16.msra.mxu1 %v14676_v60  ;;  %v7266_v61 = vor.u32 %v18129_v3, %v7262_v6  ;;  %v7263_v28 = vsel %vm2151_vm0, %v7258_v5, %v7262_v6  ;;  %v7279_v25 = vsel %vm2151_vm0, %v7274_v15, %v18131_v52  ;;  %v7303_v34 = vsel %vm2151_vm0, %v16148_v27, %v7302_v47  ;;  %v17015_v27 = vld [vmem:[#allocation3 + $0x70] sm:$0x1]  ;;  %v14688_v6 = vld [vmem:[%s17949_s3 + $0x5d8] sm:$0xff]   ;;  %v14978_v15 = vld [vmem:[#allocation3 + $0x60] sm:$0xff] }
 0x478   : > { %13747 = vmatprep.subr.bf16.mxu1 %v14677_v63  ;;  %v7306_v18 = vor.u32 %v18135_v11, %v7302_v47  ;;  %v7324_v49 = vshll.u32 %v17015_v27, 16  ;;  %v7553_v60 = vrot.slane %v14973_v45, 1  ;;  %v14976_v5 = vld [vmem:[#allocation3 + $0x50] sm:$0xff]  ;;  %v7565_v52 = vrot.slane %v16547_v48, 1  ;;  %v14693_v45 = vld [vmem:[%s17951_s5 + $0x40] sm:$0xff]  }
 0x479   : > { %v7271_v51 = vsel %vm2151_vm0, %v7266_v61, %v7270_v23  ;;  %v7559_v3 = vrot.slane %v14976_v5, 1  ;;  %v14977_v61 = vld [vmem:[#allocation3 + $0x58] sm:$0xff]  ;;  %12520 = vmatprep.subr.bf16.mxu0 %v14693_v45 }
 0x47a   : > { %13708 = vmatmul.mubr.bf16.gmra.mrb[16].mxu1 %v16547_v48  ;;  %v7311_v46 = vsel %vm2151_vm0, %v7306_v18, %v7310_v56  ;;  %v7326_v2 = vrot.slane %v7324_v49, 1  ;;  %v7554_v36 = vsel %vm2597_vm3, %v7551_v42, %v7553_v60  ;;  %v7556_v57 = vsel %vm2597_vm3, %v7553_v60, %v7555_v53  ;;  %v14979_v56 = vld [vmem:[%s17949_s3 + $0x600] sm:$0xff]   ;;  %v14980_v18 = vld [vmem:[%s17949_s3 + $0x608] sm:$0xff]   ;;  %v14985_v49 = vld [vmem:[%s17949_s3 + $0x630] sm:$0xff]  }
 0x47b   : > { %13727 = vmatprep.mubr.bf16.mxu1 %v7255_v1  ;;  %v14975_v1 = vld [vmem:[#allocation3 + $0x48] sm:$0xff]  ;;  %v14694_v60 = vld [vmem:[%s17951_s5] sm:$0xff]   ;;  %v14708_v5 = vld [vmem:[%s17951_s5 + $0x38] sm:$0xff]  }
 0x47c   : > { %v7557_v33 = vrot.slane %v14975_v1, 1  ;;  %12521 = vmatpush3.bf16.msra.mxu0 %v14694_v60  ;;  %v14702_v1 = vld [vmem:[%s17951_s5 + $0x20] sm:$0xff]  }
 0x47e   : > { %v7558_v23 = vsel %vm2597_vm3, %v7555_v53, %v7557_v33  ;;  %v14701_v53 = vld [vmem:[%s17951_s5 + $0x60] sm:$0xff]  }
 0x482   : > { %13728 = vmatmul.mubr.bf16.vlgmr.msra.gmra.mrb[0].mxu1 %v7263_v28  ;;  %v14690_v28 = vld [vmem:[%s17949_s3 + $0x5e8] sm:$0xff]  }
 0x483   : > { %13748 = vmatpush3.bf16.msra.mxu1 %v14677_v63  ;;  %13731 = vmatprep.mubr.bf16.mxu1 %v7271_v51  ;;  %v7552_v63 = vsel %vm2597_vm3, %v7549_v21, %v7551_v42  ;;  %v7560_v51 = vsel %vm2597_vm3, %v7557_v33, %v7559_v3  ;;  %v18144_v21 = vld [vmem:[#allocation58_spill] sm:$0xff]  ;;  %v14703_v33 = vld [vmem:[%s17951_s5 + $0x68] sm:$0xff]  }
 0x484   : > { %13749 = vmatprep.subr.bf16.mxu1 %v14678_v41 }
 0x487   : > { %13750 = vmatpush3.bf16.msra.mxu1 %v14678_v41  ;;  %v7561_v41 = vrot.slane %v14977_v61, 1 }
 0x488   : > { %13751 = vmatprep.subr.bf16.mxu1 %v14679_v38 }
 0x48a   : > { %13732 = vmatmul.mubr.bf16.gmra.mrb[4].mxu1 %v7279_v25  ;;  %v7779_v25 = vshrl.u32 %v17028_v29, 16 }
 0x48b   : > { %13735 = vmatprep.mubr.bf16.mxu1 %v18132_v14  ;;  %13752 = vmatpush3.bf16.msra.mxu1 %v14679_v38  ;;  %v7562_v38 = vsel %vm2597_vm3, %v7559_v3, %v7561_v41  ;;  %v7782_v14 = vshll.u32 %v17028_v29, 16  ;;  %v14987_v29 = vld [vmem:[#allocation3 + $0x68] sm:$0xff]  ;;  %v14711_v3 = vld [vmem:[%s17951_s5 + $0xc0] sm:$0xff]  }
 0x48c   : > { %13753 = vmatprep.subr.bf16.mxu1 %v14680_v44  ;;  %v8059_v35 = vrot.slane %v14987_v29, 2 }
 0x48f   : > { %13754 = vmatpush3.bf16.msra.mxu1 %v14680_v44  ;;  %v7563_v44 = vrot.slane %v14978_v15, 1 }
 0x490   : > { %13755 = vmatprep.subr.bf16.mxu1 %v14681_v40 }
 0x491   : > { %v7564_v24 = vsel %vm2597_vm3, %v7561_v41, %v7563_v44  ;;  %v7566_v47 = vsel %vm2597_vm3, %v7563_v44, %v7565_v52  ;;  %v18146_v41 = vld [vmem:[#allocation23_spill] sm:$0xff] }
 0x492   : > { %13736 = vmatmul.mubr.bf16.gmra.mrb[8].mxu1 %v16135_v37  ;;  %v18137_v37 = vshll.u32 %v16547_v48, 16  ;;  %v7567_v48 = vrot.slane %v17015_v27, 1  ;;  %v14984_v27 = vld [vmem:[%s17949_s3 + $0x628] sm:$0xff]  }
 0x493   : > { %13739 = vmatprep.mubr.bf16.mxu1 %v7303_v34  ;;  %13756 = vmatpush3.bf16.msra.mxu1 %v14681_v40  ;;  %v14692_v40 = vld [vmem:[%s17949_s3 + $0x5f8] sm:$0xff]   ;;  %v7784_v34 = vrot.slane %v7782_v14, 2 }
 0x494   : > { %13757 = vmatprep.subr.bf16.mxu1 %v14682_v8  ;;  %v7318_v43 = vrot.slane %v18137_v37, 1  ;;  %v7760_v37 = vld [vmem:[#allocation3 + $0x70] sm:$0x3]  ;;  %v18149_v14 = vld [vmem:[#allocation25_spill] sm:$0xff] }
 0x495   : > { %v8061_v19 = vrot.slane %v7760_v37, 2 }
 0x496   : > { %v7319_v32 = vsel %vm2151_vm0, %v7314_v20, %v7318_v43  ;;  %v7322_v13 = vor.u32 %v18138_v4, %v7318_v43  ;;  %v18139_v20 = vld [vmem:[#allocation20_spill] sm:$0xff]  ;;  %v18141_v43 = vld [vmem:[#allocation21_spill] sm:$0xff]  ;;  %v18143_v4 = vld [vmem:[#allocation59_spill] sm:$0xff] }
 0x497   : > { %13758 = vmatpush3.bf16.msra.mxu1 %v14682_v8  ;;  %v7781_v8 = vrot.slane %v7779_v25, 1  ;;  %v8062_v42 = vsel %vm3093_vm2, %v8059_v35, %v8061_v19 }
 0x498   : > { %13759 = vmatprep.subr.bf16.mxu1 %v14683_v55  ;;  %v7327_v10 = vsel %vm2151_vm0, %v7322_v13, %v7326_v2  ;;  %v14986_v13 = vld [vmem:[%s17949_s3 + $0x638] sm:$0xff]  }
 0x499   : > { %v7785_v30 = vor.u32 %v7784_v34, %v7781_v8  ;;  %v18151_v34 = vld [vmem:[#allocation26_spill] sm:$0xff] }
 0x49a   : > { %13740 = vmatmul.mubr.bf16.gmra.mrb[12].mxu1 %v7311_v46  ;;  %v7826_v46 = vshll.u32 %v7760_v37, 16 }
 0x49b   : > { %13743 = vmatprep.mubr.bf16.mxu1 %v7319_v32  ;;  %13760 = vmatpush3.bf16.msra.mxu1 %v14683_v55  ;;  %v7568_v55 = vsel %vm2597_vm3, %v7565_v52, %v7567_v48  ;;  %v7789_v11 = vsel %vm2828_vm1, %v7785_v30, %v15963_v16  ;;  %v18140_v16 = vld [vmem:[#allocation9_spill] sm:$0xff]  ;;  %v18148_v52 = vld [vmem:[#allocation43_spill] sm:$0xff] }
 0x49c   : > { %13761 = vmatprep.subr.bf16.mxu1 %v14684_v39 }
 0x49f   : > { %13762 = vmatpush3.bf16.msra.mxu1 %v14684_v39  ;;  %v7823_v39 = vshrl.u32 %v7760_v37, 16 }
 0x4a0   : > { %13783 = vmatprep.subr.bf16.mxu1 %v14685_v0 }
 0x4a1   : > { %v7825_v32 = vrot.slane %v7823_v39, 1 }
 0x4a2   : > { %13744 = vmatmul.mubr.bf16.gmra.mrb[16].mxu1 %v7327_v10  ;;  %v18145_v10 = vrot.slane %v16102_v22, 2  ;;  %v14695_v22 = vld [vmem:[%s17951_s5 + $0x48] sm:$0xff]  }
 0x4a3   : > { %13763 = vmatprep.mubr.bf16.mxu1 %v7550_v58  ;;  %12522 = vmatprep.subr.bf16.mxu0 %v14695_v22  ;;  %v18161_v22 = vld [vmem:[#allocation50_spill] sm:$0xff] }
 0x4a4   : > { %v8060_v58 = vsel %vm3093_vm2, %v18145_v10, %v8059_v35  ;;  %v18159_v10 = vld [vmem:[#allocation30_spill] sm:$0xff] }
 0x4aa   : > { %13764 = vmatmul.mubr.bf16.vlgmr.msra.gmra.mrb[0].mxu1 %v7552_v63  ;;  %v14697_v63 = vld [vmem:[%s17951_s5 + $0x50] sm:$0xff]  }
 0x4ab   : > { %13784 = vmatpush3.bf16.msra.mxu1 %v14685_v0  ;;  %13767 = vmatprep.mubr.bf16.mxu1 %v7554_v36  ;;  %v7828_v0 = vrot.slane %v7826_v46, 2  ;;  %v14698_v36 = vld [vmem:[%s17951_s5 + $0x10] sm:$0xff]  }
 0x4ac   : > { %13785 = vmatprep.subr.bf16.mxu1 %v14686_v54 }
 0x4ad   : > { %v7829_v2 = vor.u32 %v7828_v0, %v7825_v32  ;;  %v18155_v32 = vld [vmem:[#allocation28_spill] sm:$0xff] }
 0x4af   : > { %13786 = vmatpush3.bf16.msra.mxu1 %v14686_v54  ;;  %v7830_v26 = vsel %vm2828_vm1, %v18144_v21, %v7829_v2  ;;  %v14696_v54 = vld [vmem:[%s17951_s5 + $0x8] sm:$0xff]   ;;  %v18157_v2 = vld [vmem:[#allocation29_spill] sm:$0xff] }
 0x4b0   : > { %13787 = vmatprep.subr.bf16.mxu1 %v14687_v59  ;;  %12523 = vmatpush3.bf16.msra.mxu0 %v14696_v54  ;;  %v18158_v21 = vld [vmem:[#allocation48_spill] sm:$0xff] }
 0x4b1   : > { %12524 = vmatprep.subr.bf16.mxu0 %v14697_v63 }
 0x4b2   : > { %13768 = vmatmul.mubr.bf16.gmra.mrb[4].mxu1 %v7556_v57  ;;  %v14705_v57 = vld [vmem:[%s17951_s5 + $0x70] sm:$0xff]  }
 0x4b3   : > { %13771 = vmatprep.mubr.bf16.mxu1 %v7558_v23  ;;  %13788 = vmatpush3.bf16.msra.mxu1 %v14687_v59  ;;  %v14699_v59 = vld [vmem:[%s17951_s5 + $0x58] sm:$0xff]   ;;  %v14706_v23 = vld [vmem:[%s17951_s5 + $0x30] sm:$0xff]  }
 0x4b4   : > { %13789 = vmatprep.subr.bf16.mxu1 %v14688_v6  ;;  %12525 = vmatpush3.bf16.msra.mxu0 %v14698_v36 }
 0x4b5   : > { %12526 = vmatprep.subr.bf16.mxu0 %v14699_v59 }
 0x4b7   : > { %13790 = vmatpush3.bf16.msra.mxu1 %v14688_v6  ;;  %v14704_v6 = vld [vmem:[%s17951_s5 + $0x28] sm:$0xff]  }
 0x4b8   : > { %13791 = vmatprep.subr.bf16.mxu1 %v14689_v31  ;;  %12527 = vmatpush3.bf16.msra.mxu0 %v14700_v12 }
 0x4b9   : > { %12528 = vmatprep.subr.bf16.mxu0 %v14701_v53 }
 0x4ba   : > { %13772 = vmatmul.mubr.bf16.gmra.mrb[8].mxu1 %v7560_v51 }
 0x4bb   : > { %13775 = vmatprep.mubr.bf16.mxu1 %v7562_v38  ;;  %13792 = vmatpush3.bf16.msra.mxu1 %v14689_v31  ;;  %v14707_v31 = vld [vmem:[%s17951_s5 + $0x78] sm:$0xff]   ;;  %v17162_v38 = vld [vmem:[%s17950_s4] ss:$0 sm:$0xff] }
 0x4bc   : > { %13793 = vmatprep.subr.bf16.mxu1 %v14690_v28  ;;  %12529 = vmatpush3.bf16.msra.mxu0 %v14702_v1 }
 0x4bd   : > { %12530 = vmatprep.subr.bf16.mxu0 %v14703_v33  ;;  %v18162_v33 = vld [vmem:[#allocation31_spill] sm:$0xff] }
 0x4bf   : > { %13794 = vmatpush3.bf16.msra.mxu1 %v14690_v28 }
 0x4c0   : > { %13795 = vmatprep.subr.bf16.mxu1 %v14691_v7  ;;  %12531 = vmatpush3.bf16.msra.mxu0 %v14704_v6 }
 0x4c1   : > { %12532 = vmatprep.subr.bf16.mxu0 %v14705_v57 }
 0x4c2   : > { %13776 = vmatmul.mubr.bf16.gmra.mrb[12].mxu1 %v7564_v24 }
 0x4c3   : > { %13779 = vmatprep.mubr.bf16.mxu1 %v7566_v47  ;;  %13796 = vmatpush3.bf16.msra.mxu1 %v14691_v7  ;;  %v18147_v7 = vld [vmem:[#allocation24_spill] sm:$0xff] }
 0x4c4   : > { %13797 = vmatprep.subr.bf16.mxu1 %v14692_v40  ;;  %12533 = vmatpush3.bf16.msra.mxu0 %v14706_v23  ;;  %v18150_v47 = vld [vmem:[#allocation44_spill] sm:$0xff] }
 0x4c5   : > { %12534 = vmatprep.subr.bf16.mxu0 %v14707_v31 }
 0x4c7   : > { %13798 = vmatpush3.bf16.msra.mxu1 %v14692_v40 }
 0x4c8   : > { %13915 = vmatprep.subr.bf16.mxu1 %v14979_v56  ;;  %12535 = vmatpush3.bf16.msra.mxu0 %v14708_v5  ;;  %v18163_v5 = vld [vmem:[#allocation32_spill] sm:$0xff] }
 0x4c9   : > { %12542 = vmatprep.subr.bf16.mxu0 %v14711_v3 }
 0x4ca   : > { %13780 = vmatmul.mubr.bf16.gmra.mrb[16].mxu1 %v7568_v55 }
 0x4cb   : > { %13799 = vmatprep.mubr.bf16.mxu1 %v7789_v11 }
 0x4d2   : > { %13800 = vmatmul.mubr.bf16.vlgmr.msra.gmra.mrb[0].mxu1 %v15971_v50  ;;  %v14982_v50 = vld [vmem:[%s17949_s3 + $0x618] sm:$0xff]  }
 0x4d3   : > { %13803 = vmatprep.mubr.bf16.mxu1 %v15975_v17  ;;  %13923 = vmatpush3.bf16.msra.mxu1 %v14979_v56  ;;  %v14983_v17 = vld [vmem:[%s17949_s3 + $0x620] sm:$0xff]   ;;  %v18152_v56 = vld [vmem:[#allocation45_spill] sm:$0xff] }
 0x4d4   : > { %13916 = vmatprep.subr.bf16.mxu1 %v14980_v18 }
 0x4d7   : > { %13924 = vmatpush3.bf16.msra.mxu1 %v14980_v18  ;;  %v18153_v18 = vld [vmem:[#allocation46_spill] sm:$0xff] }
 0x4d8   : > { %13917 = vmatprep.subr.bf16.mxu1 %v14981_v9 }
 0x4da   : > { %13804 = vmatmul.mubr.bf16.gmra.mrb[4].mxu1 %v18139_v20 }
 0x4db   : > { %13807 = vmatprep.mubr.bf16.mxu1 %v18140_v16  ;;  %13925 = vmatpush3.bf16.msra.mxu1 %v14981_v9 }
 0x4dc   : > { %13918 = vmatprep.subr.bf16.mxu1 %v14982_v50 }
 0x4df   : > { %13926 = vmatpush3.bf16.msra.mxu1 %v14982_v50 }
 0x4e0   : > { %13919 = vmatprep.subr.bf16.mxu1 %v14983_v17 }
 0x4e2   : > { %13808 = vmatmul.mubr.bf16.gmra.mrb[8].mxu1 %v15722_v62  ;;  %v18142_v62 = vld [vmem:[#allocation22_spill] sm:$0xff] }
 0x4e3   : > { %13811 = vmatprep.mubr.bf16.mxu1 %v18141_v43  ;;  %13927 = vmatpush3.bf16.msra.mxu1 %v14983_v17 }
 0x4e4   : > { %13920 = vmatprep.subr.bf16.mxu1 %v14984_v27 }
 0x4e7   : > { %13928 = vmatpush3.bf16.msra.mxu1 %v14984_v27  ;;  %v18154_v27 = vld [vmem:[#allocation27_spill] sm:$0xff] }
 0x4e8   : > { %13921 = vmatprep.subr.bf16.mxu1 %v14985_v49 }
 0x4ea   : > { %13812 = vmatmul.mubr.bf16.gmra.mrb[12].mxu1 %v18142_v62 }
 0x4eb   : > { %13815 = vmatprep.mubr.bf16.mxu1 %v18143_v4  ;;  %13929 = vmatpush3.bf16.msra.mxu1 %v14985_v49  ;;  %v18156_v4 = vld [vmem:[#allocation47_spill] sm:$0xff] }
 0x4ec   : > { %13922 = vmatprep.subr.bf16.mxu1 %v14986_v13 }
 0x4ef   : > { %13930 = vmatpush3.bf16.msra.mxu1 %v14986_v13 }
 0x4f2   : > { %13816 = vmatmul.mubr.bf16.gmra.mrb[16].mxu1 %v7830_v26 }
 0x4f3   : > { %13851 = vmatprep.mubr.bf16.mxu1 %v8060_v58 }
 0x4fe   : > { %13852 = vmatmul.mubr.bf16.vlgmr.msra.gmra.mrb[16].mxu1 %v8062_v42  ;;  %v18160_v42 = vld [vmem:[#allocation49_spill] sm:$0xff] }
 0x5a5   : > { %v13801_v61 = vpop.f32.mrb[0].mxu1 }
 0x5a6   : > { %v13931_v28 = vadd.f32 %v13801_v61, %v18146_v41  ;;  %v7923_v51 = vpop.f32.mrb[1].mxu1 }
 0x5a7   : > { %v13933_v15 = vadd.f32 %v7923_v51, %v18147_v7  ;;  %v13802_v44 = vpop.f32.mrb[2].mxu1  ;;  %v18164_v51 = vld [vmem:[#allocation14_spill] sm:$0xff] }
 0x5a8   : > { %v13932_v25 = vadd.f32 %v13931_v28, %v18148_v52  ;;  %v13935_v40 = vadd.f32 %v13802_v44, %v18149_v14  ;;  %v7926_v24 = vpop.f32.mrb[3].mxu1  ;;  %v18165_v52 = vld [vmem:[#allocation51_spill] sm:$0xff] }
 0x5a9   : > { %v13934_v8 = vadd.f32 %v13933_v15, %v18150_v47  ;;  %v13937_v48 = vadd.f32 %v7926_v24, %v18151_v34  ;;  %v18166_v24 = vld [vmem:[#allocation33_spill] sm:$0xff] }
 0x5aa   : > { %v8263_v30 = vadd.f32 %v13932_v25, %v17162_v38  ;;  %v13936_v55 = vadd.f32 %v13935_v40, %v18152_v56 }
 0x5ab   : > { %v8261_v11 = vadd.f32 %v13934_v8, %v17162_v38  ;;  %v13938_v9 = vadd.f32 %v13937_v48, %v18153_v18 }
 0x5ac   : > { %v8283_v20 = vmax.f32 %v8263_v30, 0.0  ;;  %v8264_v16 = vadd.f32 %v13936_v55, %v17162_v38  ;;  %v18167_v30 = vld [vmem:[#allocation34_spill] sm:$0xff] }
 0x5ad   : > { %v8281_v50 = vmax.f32 %v8261_v11, 0.0  ;;  %v8262_v17 = vadd.f32 %v13938_v9, %v17162_v38  ;;  %v13805_v37 = vpop.f32.mrb[4].mxu1  ;;  %v18168_v11 = vld [vmem:[#allocation52_spill] sm:$0xff]  ;;  %v14756_v9 = vld [vmem:[%s17951_s5 + $0x198] sm:$0xff]  }
 0x5ae   : > { %8303 = vst [vmem:[#allocation4 + $0x10] sm:$0xff] %v8283_v20  ;;  %v8284_v43 = vmax.f32 %v8264_v16, 0.0  ;;  %v13939_v39 = vadd.f32 %v13805_v37, %v18154_v27  ;;  %v7939_v46 = vpop.f32.mrb[5].mxu1  ;;  %v8335_v20 = vld [vmem:[#allocation5] sm:$0x1] }
 0x5af   : > { %8301 = vst [vmem:[#allocation4] sm:$0xff] %v8281_v50  ;;  %v8282_v49 = vmax.f32 %v8262_v17, 0.0  ;;  %v13941_v0 = vadd.f32 %v7939_v46, %v18155_v32  ;;  %v13806_v62 = vpop.f32.mrb[6].mxu1  ;;  %v18171_v17 = vld [vmem:[#allocation53_spill] sm:$0xff]  ;;  %v8347_v32 = vld [vmem:[#allocation5 + $0x4] sm:$0x1] }
 0x5b0   : > { %8304 = vst [vmem:[#allocation4 + $0x18] sm:$0xff] %v8284_v43  ;;  %v13940_v13 = vadd.f32 %v13939_v39, %v18156_v4  ;;  %v13943_v29 = vadd.f32 %v13806_v62, %v18157_v2  ;;  %v7942_v35 = vpop.f32.mrb[7].mxu1  ;;  %v18172_v39 = vld [vmem:[#allocation35_spill] sm:$0xff] }
 0x5b1   : > { %8302 = vst [vmem:[#allocation4 + $0x8] sm:$0xff] %v8282_v49  ;;  %v13942_v26 = vadd.f32 %v13941_v0, %v18158_v21  ;;  %v13945_v58 = vadd.f32 %v7942_v35, %v18159_v10 }
 0x5b2   : > { %v8267_v19 = vadd.f32 %v13940_v13, %v17162_v38  ;;  %v13944_v45 = vadd.f32 %v13943_v29, %v18160_v42  ;;  %v18173_v13 = vld [vmem:[#allocation36_spill] sm:$0xff]  ;;  %v8353_v42 = vld [vmem:[#allocation5 + $0x8] sm:$0x1] }
 0x5b3   : > { %v8265_v60 = vadd.f32 %v13942_v26, %v17162_v38  ;;  %v13946_v54 = vadd.f32 %v13945_v58, %v18161_v22  ;;  %v18174_v26 = vld [vmem:[#allocation54_spill] sm:$0xff] }
 0x5b4   : > { %v8287_v63 = vmax.f32 %v8267_v19, 0.0  ;;  %v8268_v36 = vadd.f32 %v13944_v45, %v17162_v38 }
 0x5b5   : > { %v8285_v59 = vmax.f32 %v8265_v60, 0.0  ;;  %v8266_v12 = vadd.f32 %v13946_v54, %v17162_v38  ;;  %v13809_v53 = vpop.f32.mrb[8].mxu1  ;;  %v18175_v60 = vld [vmem:[#allocation55_spill] sm:$0xff]  ;;  %v18176_v54 = vld [vmem:[#allocation37_spill] sm:$0xff] }
 0x5b6   : > { %8307 = vst [vmem:[#allocation4 + $0x30] sm:$0xff] %v8287_v63  ;;  %v8288_v1 = vmax.f32 %v8268_v36, 0.0  ;;  %v13947_v6 = vadd.f32 %v13809_v53, %v18162_v33  ;;  %v7955_v57 = vpop.f32.mrb[9].mxu1  ;;  %v18177_v33 = vld [vmem:[#allocation38_spill] sm:$0xff] }
 0x5b7   : > { %v8326_v23 = vld [vmem:[#allocation4 + $0x10] ss:$2 sm:$0x1f]  ;;  %v8328_v31 = vld [vmem:[#allocation4 + $0x11] ss:$2 sm:$0x1f]  ;;  %v13949_v3 = vadd.f32 %v7955_v57, %v18163_v5 }
 0x5b8   : > { %8305 = vst [vmem:[#allocation4 + $0x20] sm:$0xff] %v8285_v59  ;;  %v8329_v61 = vmax.f32 %v8326_v23, %v8328_v31  ;;  %v8321_v41 = vld [vmem:[#allocation4] ss:$2 sm:$0x1f]  ;;  %8308 = vst [vmem:[#allocation4 + $0x38] sm:$0xff] %v8288_v1  ;;  %v13948_v7 = vadd.f32 %v13947_v6, %v18164_v51  ;;  %v8286_v44 = vmax.f32 %v8266_v12, 0.0 }
 0x5b9   : > { %v8323_v28 = vld [vmem:[#allocation4 + $0x1] ss:$2 sm:$0x1f]  ;;  %v13950_v25 = vadd.f32 %v13949_v3, %v18165_v52  ;;  %v13810_v14 = vpop.f32.mrb[10].mxu1  ;;  %v18178_v5 = vld [vmem:[#allocation56_spill] sm:$0xff] }
 0x5ba   : > { %v8324_v15 = vmax.f32 %v8321_v41, %v8323_v28  ;;  %v8271_v40 = vadd.f32 %v13948_v7, %v17162_v38  ;;  %v13951_v47 = vadd.f32 %v13810_v14, %v18166_v24  ;;  %v7958_v8 = vpop.f32.mrb[11].mxu1  ;;  %8306 = vst [vmem:[#allocation4 + $0x28] sm:$0xff] %v8286_v44  ;;  %v8359_v41 = vld [vmem:[#allocation5 + $0xc] sm:$0x1]  ;;  %v8365_v28 = vld [vmem:[#allocation5 + $0x10] sm:$0x1] }
 0x5bb   : > { %v8269_v48 = vadd.f32 %v13950_v25, %v17162_v38  ;;  %v13953_v56 = vadd.f32 %v7958_v8, %v18167_v30  ;;  %v18179_v7 = vld [vmem:[#allocation57_spill] sm:$0xff] }
 0x5bc   : > { %v8330_v34 = vmax.f32 %v8324_v15, %v8329_v61  ;;  %v8291_v55 = vmax.f32 %v8271_v40, 0.0  ;;  %v13952_v18 = vadd.f32 %v13951_v47, %v18168_v11  ;;  %v8398_v11 = vld [vmem:[#allocation5 + $0x1c] sm:$0x1] }
 0x5bd   : > { %v8289_v50 = vmax.f32 %v8269_v48, 0.0  ;;  %v13954_v37 = vadd.f32 %v13953_v56, %v18171_v17  ;;  %v13813_v43 = vpop.f32.mrb[12].mxu1 }
 0x5be   : > { %v8331_v16 = vpack.c.bf16 %v8330_v34, %v8330_v34  ;;  %8311 = vst [vmem:[#allocation4 + $0x50] sm:$0xff] %v8291_v55  ;;  %v8272_v27 = vadd.f32 %v13952_v18, %v17162_v38  ;;  %v13955_v46 = vadd.f32 %v13813_v43, %v18172_v39  ;;  %v7971_v49 = vpop.f32.mrb[13].mxu1  ;;  %v8380_v34 = vld [vmem:[#allocation5 + $0x14] sm:$0x1]  ;;  %v8392_v55 = vld [vmem:[#allocation5 + $0x18] sm:$0x1] }
 0x5bf   : > { %v8374_v0 = vld [vmem:[#allocation4 + $0x30] ss:$2 sm:$0x1f]  ;;  %v8376_v62 = vld [vmem:[#allocation4 + $0x31] ss:$2 sm:$0x1f]  ;;  %v8270_v4 = vadd.f32 %v13954_v37, %v17162_v38  ;;  %v13957_v2 = vadd.f32 %v7971_v49, %v18173_v13 }
 0x5c0   : > { %8309 = vst [vmem:[#allocation4 + $0x40] sm:$0xff] %v8289_v50  ;;  %v8336_v29 = vsel %vm17197_vm6, %v8331_v16, %v8335_v20  ;;  %v8377_v35 = vmax.f32 %v8374_v0, %v8376_v62  ;;  %v8292_v21 = vmax.f32 %v8272_v27, 0.0  ;;  %v13956_v10 = vadd.f32 %v13955_v46, %v18174_v26  ;;  %v13814_v58 = vpop.f32.mrb[14].mxu1  ;;  %v8404_v13 = vld [vmem:[#allocation5 + $0x20] sm:$0x1] }
 0x5c1   : > { %8337 = vst [vmem:[#allocation5] sm:$0x1] %v8336_v29  ;;  %v8342_v19 = vshrl.u32 %v8331_v16, 16  ;;  %v8290_v45 = vmax.f32 %v8270_v4, 0.0  ;;  %v13958_v22 = vadd.f32 %v13957_v2, %v18175_v60  ;;  %v13959_v63 = vadd.f32 %v13814_v58, %v18176_v54  ;;  %v7974_v36 = vpop.f32.mrb[15].mxu1  ;;  %v14712_v4 = vld [vmem:[%s17951_s5 + $0x80] sm:$0xff]  }
 0x5c2   : > { %v11724_v59 = vrot.slane %v8331_v16, 9  ;;  %v8369_v12 = vld [vmem:[#allocation4 + $0x20] ss:$2 sm:$0x1f]  ;;  %8312 = vst [vmem:[#allocation4 + $0x58] sm:$0xff] %v8292_v21  ;;  %v8275_v1 = vadd.f32 %v13956_v10, %v17162_v38  ;;  %v13961_v6 = vadd.f32 %v7974_v36, %v18177_v33  ;;  %v11726_v52 = vrot.slane %v8331_v16, 10 }
 0x5c3   : > { %v8371_v53 = vld [vmem:[#allocation4 + $0x21] ss:$2 sm:$0x1f]  ;;  %v8348_v57 = vsel %vm17197_vm6, %v8342_v19, %v8347_v32  ;;  %8310 = vst [vmem:[#allocation4 + $0x48] sm:$0xff] %v8290_v45  ;;  %v8273_v31 = vadd.f32 %v13958_v22, %v17162_v38  ;;  %v13960_v3 = vadd.f32 %v13959_v63, %v18178_v5  ;;  %v11725_v44 = vrot.slane %v8342_v19, 9  ;;  %v14715_v29 = vld [vmem:[%s17951_s5 + $0xc8] sm:$0xff]  }
 0x5c4   : > { %v8372_v23 = vmax.f32 %v8369_v12, %v8371_v53  ;;  %8349 = vst [vmem:[#allocation5 + $0x4] sm:$0x1] %v8348_v57  ;;  %v8354_v61 = vsel %vm17197_vm6, %v11724_v59, %v8353_v42  ;;  %v8295_v51 = vmax.f32 %v8275_v1, 0.0  ;;  %v13962_v15 = vadd.f32 %v13961_v6, %v18179_v7  ;;  %v8410_v32 = vld [vmem:[#allocation5 + $0x24] sm:$0x1]  ;;  %v14716_v60 = vld [vmem:[%s17951_s5 + $0x88] sm:$0xff]  }
 0x5c5   : > { %8355 = vst [vmem:[#allocation5 + $0x8] sm:$0x1] %v8354_v61  ;;  %v8293_v14 = vmax.f32 %v8273_v31, 0.0  ;;  %v8276_v40 = vadd.f32 %v13960_v3, %v17162_v38  ;;  %v8360_v47 = vsel %vm17197_vm6, %v11725_v44, %v8359_v41  ;;  %v8366_v8 = vsel %vm17197_vm6, %v11726_v52, %v8365_v28  ;;  %v14717_v22 = vld [vmem:[%s17951_s5 + $0xd0] sm:$0xff]   ;;  %v8425_v63 = vld [vmem:[#allocation5 + $0x28] sm:$0x1] }
 0x5c6   : > { %v8378_v25 = vmax.f32 %v8372_v23, %v8377_v35  ;;  %8315 = vst [vmem:[#allocation4 + $0x70] sm:$0xff] %v8295_v51  ;;  %v8274_v24 = vadd.f32 %v13962_v15, %v17162_v38  ;;  %8361 = vst [vmem:[#allocation5 + $0xc] sm:$0x1] %v8360_v47  ;;  %v18180_v59 = vld [vmem:[#allocation39_spill] sm:$0xff]  ;;  %v18181_v6 = vld [vmem:[#allocation40_spill] sm:$0xff] }
 0x5c7   : > { %8313 = vst [vmem:[#allocation4 + $0x60] sm:$0xff] %v8293_v14  ;;  %v8296_v30 = vmax.f32 %v8276_v40, 0.0  ;;  %8367 = vst [vmem:[#allocation5 + $0x10] sm:$0x1] %v8366_v8  ;;  %v8437_v33 = vld [vmem:[#allocation5 + $0x2c] sm:$0x1] }
 0x5c8   : > { %v8379_v48 = vpack.c.bf16 %v8378_v25, %v8378_v25  ;;  %v8294_v56 = vmax.f32 %v8274_v24, 0.0  ;;  %v14718_v31 = vld [vmem:[%s17951_s5 + $0x90] sm:$0xff]   ;;  %v14719_v51 = vld [vmem:[%s17951_s5 + $0xd8] sm:$0xff]   ;;  %v14721_v8 = vld [vmem:[%s17951_s5 + $0xe0] sm:$0xff]  }
 0x5c9   : > { %v8419_v18 = vld [vmem:[#allocation4 + $0x50] ss:$2 sm:$0x1f]  ;;  %v8421_v20 = vld [vmem:[#allocation4 + $0x51] ss:$2 sm:$0x1f] }
 0x5ca   : > { %8316 = vst [vmem:[#allocation4 + $0x78] sm:$0xff] %v8296_v30  ;;  %v8381_v16 = vsel %vm17197_vm6, %v8379_v48, %v8380_v34  ;;  %v8422_v50 = vmax.f32 %v8419_v18, %v8421_v20  ;;  %v8414_v17 = vld [vmem:[#allocation4 + $0x40] ss:$2 sm:$0x1f]  ;;  %8314 = vst [vmem:[#allocation4 + $0x68] sm:$0xff] %v8294_v56  ;;  %v8387_v39 = vshrl.u32 %v8379_v48, 16 }
 0x5cb   : > { %v8416_v37 = vld [vmem:[#allocation4 + $0x41] ss:$2 sm:$0x1f]  ;;  %8382 = vst [vmem:[#allocation5 + $0x14] sm:$0x1] %v8381_v16  ;;  %v11729_v46 = vrot.slane %v8379_v48, 9 }
 0x5cc   : > { %v8417_v43 = vmax.f32 %v8414_v17, %v8416_v37  ;;  %v8548_v27 = vld [vmem:[#allocation5] sm:$0xff]  ;;  %v11731_v49 = vrot.slane %v8379_v48, 10  ;;  %v8393_v35 = vsel %vm17197_vm6, %v8387_v39, %v8392_v55  ;;  %v11730_v26 = vrot.slane %v8387_v39, 9  ;;  %v14723_v48 = vld [vmem:[%s17951_s5 + $0xe8] sm:$0xff]   ;;  %v14725_v56 = vld [vmem:[%s17951_s5 + $0xf0] sm:$0xff]  }
 0x5cd   : > { %v11748_v0 = vcombine.low %v8548_v27, %v8548_v27  ;;  %v11749_v62 = vcombine.high %v8548_v27, %v8548_v27  ;;  %v8399_v21 = vsel %vm17197_vm6, %v11729_v46, %v8398_v11  ;;  %v17238_v10 = vld [vmem:[#allocation5 + $0x8] sm:$0xff]  ;;  %8394 = vst [vmem:[#allocation5 + $0x18] sm:$0x1] %v8393_v35  ;;  %v18182_v61 = vld [vmem:[#allocation41_spill] sm:$0xff]  ;;  %v14724_v30 = vld [vmem:[%s17951_s5 + $0xa8] sm:$0xff]  }
 0x5ce   : > { %v8423_v2 = vmax.f32 %v8417_v43, %v8422_v50  ;;  %8400 = vst [vmem:[#allocation5 + $0x1c] sm:$0x1] %v8399_v21  ;;  %v8411_v58 = vsel %vm17197_vm6, %v11731_v49, %v8410_v32  ;;  %v11751_v42 = vcombine.high %v17238_v10, %v17238_v10  ;;  %v8405_v45 = vsel %vm17197_vm6, %v11730_v26, %v8404_v13  ;;  %v18183_v15 = vld [vmem:[#allocation42_spill] sm:$0xff]  ;;  %v14726_v55 = vld [vmem:[%s17951_s5 + $0xb0] sm:$0xff]   ;;  %v14733_v46 = vld [vmem:[%s17951_s5 + $0x148] sm:$0xff]  }
 0x5cf   : > { %10288 = vmatprep.mubr.bf16.mxu0 %v11749_v62  ;;  %8412 = vst [vmem:[#allocation5 + $0x24] sm:$0x1] %v8411_v58  ;;  %8406 = vst [vmem:[#allocation5 + $0x20] sm:$0x1] %v8405_v45  ;;  %v14720_v24 = vld [vmem:[%s17951_s5 + $0x98] sm:$0xff]   ;;  %v14729_v16 = vld [vmem:[%s17951_s5 + $0x140] sm:$0xff]   ;;  %v11750_v39 = vcombine.low %v17238_v10, %v17238_v10 }
 0x5d0   : > { %v17242_v19 = vpack.c.bf16 %v8423_v2, %v8423_v2  ;;  %10289 = vmatmul.mubr.bf16.vlgmr.msra.gmra.mrb[164].mxu0 %v11748_v0  ;;  %v14727_v11 = vld [vmem:[%s17951_s5 + $0xf8] sm:$0xff]   ;;  %v14730_v27 = vld [vmem:[%s17951_s5 + $0x100] sm:$0xff]   ;;  %v14734_v62 = vld [vmem:[%s17951_s5 + $0x108] sm:$0xff]  }
 0x5d1   : > { %12543 = vmatpush3.bf16.msra.mxu0 %v14712_v4  ;;  %10328 = vmatprep.mubr.bf16.mxu0 %v11751_v42  ;;  %v13853_v54 = vpop.f32.mrb[16].mxu1  ;;  %v14728_v18 = vld [vmem:[%s17951_s5 + $0xb8] sm:$0xff]   ;;  %v8464_v20 = vld [vmem:[#allocation4 + $0x70] ss:$2 sm:$0x1f] }
 0x5d2   : > { %12544 = vmatprep.subr.bf16.mxu0 %v14715_v29  ;;  %v8432_v36 = vshrl.u32 %v17242_v19, 16  ;;  %v13963_v12 = vadd.f32 %v13853_v54, %v18180_v59  ;;  %v8219_v53 = vpop.f32.mrb[17].mxu1  ;;  %v8426_v1 = vsel %vm17197_vm6, %v17242_v19, %v8425_v63  ;;  %v8466_v50 = vld [vmem:[#allocation4 + $0x71] ss:$2 sm:$0x1f]  ;;  %v11734_v4 = vrot.slane %v17242_v19, 9 }
 0x5d3   : > { %v13964_v57 = vadd.f32 %v8219_v53, %v18181_v6  ;;  %v13854_v23 = vpop.f32.mrb[18].mxu1  ;;  %8427 = vst [vmem:[#allocation5 + $0x28] sm:$0x1] %v8426_v1  ;;  %v8459_v17 = vld [vmem:[#allocation4 + $0x60] ss:$2 sm:$0x1f]  ;;  %v8467_v49 = vmax.f32 %v8464_v20, %v8466_v50 }
 0x5d4   : > { %v8438_v5 = vsel %vm17197_vm6, %v8432_v36, %v8437_v33  ;;  %v8279_v3 = vadd.f32 %v13963_v12, %v17162_v38  ;;  %v13965_v41 = vadd.f32 %v13854_v23, %v18182_v61  ;;  %v8222_v28 = vpop.f32.mrb[19].mxu1  ;;  %v8461_v37 = vld [vmem:[#allocation4 + $0x61] ss:$2 sm:$0x1f]  ;;  %v17306_v43 = vld [vmem:[#allocation5 + $0x10] sm:$0xff]  ;;  %v11735_v2 = vrot.slane %v8432_v36, 9 }
 0x5d5   : > { %12545 = vmatpush3.bf16.msra.mxu0 %v14716_v60  ;;  %8439 = vst [vmem:[#allocation5 + $0x2c] sm:$0x1] %v8438_v5  ;;  %v8277_v7 = vadd.f32 %v13964_v57, %v17162_v38  ;;  %v13966_v44 = vadd.f32 %v8222_v28, %v18183_v15  ;;  %v8462_v32 = vmax.f32 %v8459_v17, %v8461_v37  ;;  %v8443_v13 = vld [vmem:[#allocation5 + $0x30] sm:$0x1]  ;;  %v8449_v29 = vld [vmem:[#allocation5 + $0x34] sm:$0x1] }
 0x5d6   : > { %12546 = vmatprep.subr.bf16.mxu0 %v14717_v22  ;;  %v8299_v52 = vmax.f32 %v8279_v3, 0.0  ;;  %v8280_v25 = vadd.f32 %v13965_v41, %v17162_v38  ;;  %v11753_v0 = vcombine.high %v17306_v43, %v17306_v43  ;;  %v14735_v35 = vld [vmem:[%s17951_s5 + $0x150] sm:$0xff]   ;;  %v8444_v26 = vsel %vm17197_vm6, %v11734_v4, %v8443_v13  ;;  %v14737_v22 = vld [vmem:[%s17951_s5 + $0x158] sm:$0xff]   ;;  %v14739_v63 = vld [vmem:[%s17951_s5 + $0x160] sm:$0xff]  }
 0x5d7   : > { %v8297_v14 = vmax.f32 %v8277_v7, 0.0  ;;  %v8278_v40 = vadd.f32 %v13966_v44, %v17162_v38  ;;  %v14722_v38 = vld [vmem:[%s17951_s5 + $0xa0] sm:$0xff]   ;;  %v8468_v21 = vmax.f32 %v8462_v32, %v8467_v49  ;;  %v8450_v10 = vsel %vm17197_vm6, %v11735_v2, %v8449_v29  ;;  %8445 = vst [vmem:[#allocation5 + $0x30] sm:$0x1] %v8444_v26  ;;  %v8455_v42 = vld [vmem:[#allocation5 + $0x38] sm:$0x1] }
 0x5d8   : > { %8319 = vst [vmem:[#allocation4 + $0x90] sm:$0xff] %v8299_v52  ;;  %v8300_v47 = vmax.f32 %v8280_v25, 0.0  ;;  %v11736_v58 = vrot.slane %v17242_v19, 10  ;;  %8451 = vst [vmem:[#allocation5 + $0x34] sm:$0x1] %v8450_v10  ;;  %v14736_v45 = vld [vmem:[%s17951_s5 + $0x110] sm:$0xff]   ;;  %v11752_v37 = vcombine.low %v17306_v43, %v17306_v43 }
 0x5d9   : > { %12547 = vmatpush3.bf16.msra.mxu0 %v14718_v31  ;;  %8317 = vst [vmem:[#allocation4 + $0x80] sm:$0xff] %v8297_v14  ;;  %v8298_v34 = vmax.f32 %v8278_v40, 0.0  ;;  %v8469_v54 = vpack.c.bf16 %v8468_v21, %v8468_v21  ;;  %v14738_v19 = vld [vmem:[%s17951_s5 + $0x118] sm:$0xff]   ;;  %v8470_v36 = vld [vmem:[#allocation5 + $0x3c] sm:$0x1]  ;;  %v14740_v3 = vld [vmem:[%s17951_s5 + $0x120] sm:$0xff]  }
 0x5da   : > { %12548 = vmatprep.subr.bf16.mxu0 %v14719_v51  ;;  %8320 = vst [vmem:[#allocation4 + $0x98] sm:$0xff] %v8300_v47  ;;  %v8456_v60 = vsel %vm17197_vm6, %v11736_v58, %v8455_v42  ;;  %v8482_v57 = vld [vmem:[#allocation5 + $0x40] sm:$0x1]  ;;  %v8488_v23 = vld [vmem:[#allocation5 + $0x44] sm:$0x1]  ;;  %v14741_v15 = vld [vmem:[%s17951_s5 + $0x168] sm:$0xff]  }
 0x5db   : > { %8318 = vst [vmem:[#allocation4 + $0x88] sm:$0xff] %v8298_v34  ;;  %8457 = vst [vmem:[#allocation5 + $0x38] sm:$0x1] %v8456_v60  ;;  %v8471_v59 = vsel %vm17197_vm6, %v8469_v54, %v8470_v36  ;;  %v8477_v12 = vshrl.u32 %v8469_v54, 16  ;;  %v11739_v53 = vrot.slane %v8469_v54, 9  ;;  %v11741_v1 = vrot.slane %v8469_v54, 10 }
 0x5dc   : > { %8472 = vst [vmem:[#allocation5 + $0x3c] sm:$0x1] %v8471_v59  ;;  %v8500_v31 = vld [vmem:[#allocation5 + $0x4c] sm:$0x1]  ;;  %v8494_v44 = vld [vmem:[#allocation5 + $0x48] sm:$0x1] }
 0x5dd   : > { %12549 = vmatpush3.bf16.msra.mxu0 %v14720_v24  ;;  %v8483_v61 = vsel %vm17197_vm6, %v8477_v12, %v8482_v57  ;;  %v8489_v41 = vsel %vm17197_vm6, %v11739_v53, %v8488_v23  ;;  %v11740_v28 = vrot.slane %v8477_v12, 9  ;;  %v8501_v51 = vsel %vm17197_vm6, %v11741_v1, %v8500_v31  ;;  %v14742_v40 = vld [vmem:[%s17951_s5 + $0x128] sm:$0xff]   ;;  %v14743_v24 = vld [vmem:[%s17951_s5 + $0x170] sm:$0xff]   ;;  %v14745_v34 = vld [vmem:[%s17951_s5 + $0x178] sm:$0xff]  }
 0x5de   : > { %12550 = vmatprep.subr.bf16.mxu0 %v14721_v8  ;;  %8484 = vst [vmem:[#allocation5 + $0x40] sm:$0x1] %v8483_v61  ;;  %8490 = vst [vmem:[#allocation5 + $0x44] sm:$0x1] %v8489_v41  ;;  %v14744_v8 = vld [vmem:[%s17951_s5 + $0x130] sm:$0xff]   ;;  %v14752_v13 = vld [vmem:[%s17951_s5 + $0x188] sm:$0xff]  }
 0x5df   : > { %8502 = vst [vmem:[#allocation5 + $0x4c] sm:$0x1] %v8501_v51  ;;  %v8495_v52 = vsel %vm17197_vm6, %v11740_v28, %v8494_v44  ;;  %v8545_v49 = vld [vmem:[#allocation5 + $0x60] sm:$0x1]  ;;  %v8539_v43 = vld [vmem:[#allocation5 + $0x5c] sm:$0x1] }
 0x5e0   : > { %8496 = vst [vmem:[#allocation5 + $0x48] sm:$0x1] %v8495_v52  ;;  %v14753_v29 = vld [vmem:[%s17951_s5 + $0x1d0] sm:$0xff]   ;;  %v14755_v21 = vld [vmem:[%s17951_s5 + $0x1d8] sm:$0xff]   ;;  %v14757_v26 = vld [vmem:[%s17951_s5 + $0x1e0] sm:$0xff]  }
 0x5e1   : > { %12551 = vmatpush3.bf16.msra.mxu0 %v14722_v38  ;;  %v8509_v33 = vld [vmem:[#allocation4 + $0x90] ss:$2 sm:$0x1f]  ;;  %v8511_v6 = vld [vmem:[#allocation4 + $0x91] ss:$2 sm:$0x1f] }
 0x5e2   : > { %12552 = vmatprep.subr.bf16.mxu0 %v14723_v48  ;;  %v8504_v5 = vld [vmem:[#allocation4 + $0x80] ss:$2 sm:$0x1f]  ;;  %v8506_v7 = vld [vmem:[#allocation4 + $0x81] ss:$2 sm:$0x1f]  ;;  %v8512_v25 = vmax.f32 %v8509_v33, %v8511_v6 }
 0x5e3   : > { %v8507_v14 = vmax.f32 %v8504_v5, %v8506_v7  ;;  %v14746_v48 = vld [vmem:[%s17951_s5 + $0x138] sm:$0xff]   ;;  %v14758_v10 = vld [vmem:[%s17951_s5 + $0x1a0] sm:$0xff]   ;;  %v14759_v58 = vld [vmem:[%s17951_s5 + $0x1e8] sm:$0xff]  }
 0x5e4   : > { %v14760_v42 = vld [vmem:[%s17951_s5 + $0x1a8] sm:$0xff]   ;;  %v14762_v60 = vld [vmem:[%s17951_s5 + $0x1b0] sm:$0xff]   ;;  %v14764_v54 = vld [vmem:[%s17951_s5 + $0x1b8] sm:$0xff]  }
 0x5e5   : > { %12553 = vmatpush3.bf16.msra.mxu0 %v14724_v30  ;;  %v8513_v47 = vmax.f32 %v8507_v14, %v8512_v25  ;;  %v14747_v30 = vld [vmem:[%s17951_s5 + $0x1c0] sm:$0xff]   ;;  %v14769_v12 = vld [vmem:[%s17951_s5 + $0x248] sm:$0xff]   ;;  %v14771_v33 = vld [vmem:[%s17951_s5 + $0x250] sm:$0xff]  }
 0x5e6   : > { %12554 = vmatprep.subr.bf16.mxu0 %v14725_v56  ;;  %v17380_v56 = vld [vmem:[#allocation5 + $0x18] sm:$0xff]  ;;  %v14766_v36 = vld [vmem:[%s17951_s5 + $0x200] sm:$0xff]   ;;  %v14770_v1 = vld [vmem:[%s17951_s5 + $0x208] sm:$0xff]  }
 0x5e7   : > { %v8514_v38 = vpack.c.bf16 %v8513_v47, %v8513_v47  ;;  %v11754_v59 = vcombine.low %v17380_v56, %v17380_v56  ;;  %v14772_v6 = vld [vmem:[%s17951_s5 + $0x210] sm:$0xff]   ;;  %v14773_v57 = vld [vmem:[%s17951_s5 + $0x258] sm:$0xff]   ;;  %v14775_v31 = vld [vmem:[%s17951_s5 + $0x260] sm:$0xff]  }
 0x5e8   : > { %v14774_v23 = vld [vmem:[%s17951_s5 + $0x218] sm:$0xff]   ;;  %v14776_v5 = vld [vmem:[%s17951_s5 + $0x220] sm:$0xff]   ;;  %v14778_v61 = vld [vmem:[%s17951_s5 + $0x228] sm:$0xff]  }
 0x5e9   : > { %12555 = vmatpush3.bf16.msra.mxu0 %v14726_v55  ;;  %v8515_v55 = vld [vmem:[#allocation5 + $0x50] sm:$0x1]  ;;  %v11744_v50 = vrot.slane %v8514_v38, 9  ;;  %v11746_v17 = vrot.slane %v8514_v38, 10  ;;  %v14779_v41 = vld [vmem:[%s17951_s5 + $0x270] sm:$0xff]   ;;  %v14781_v51 = vld [vmem:[%s17951_s5 + $0x278] sm:$0xff]  }
 0x5ea   : > { %12556 = vmatprep.subr.bf16.mxu0 %v14727_v11  ;;  %v14748_v11 = vld [vmem:[%s17951_s5 + $0x180] sm:$0xff]   ;;  %v8516_v20 = vsel %vm17197_vm6, %v8514_v38, %v8515_v55  ;;  %v14780_v28 = vld [vmem:[%s17951_s5 + $0x230] sm:$0xff]   ;;  %v14782_v7 = vld [vmem:[%s17951_s5 + $0x238] sm:$0xff]  }
 0x5eb   : > { %8517 = vst [vmem:[#allocation5 + $0x50] sm:$0x1] %v8516_v20  ;;  %v8546_v4 = vsel %vm17197_vm6, %v11746_v17, %v8545_v49  ;;  %v8553_v44 = vld [vmem:[#allocation5 + $0x28] sm:$0xff]  ;;  %v14787_v14 = vld [vmem:[%s17951_s5 + $0x2c8] sm:$0xff]   ;;  %v14789_v47 = vld [vmem:[%s17951_s5 + $0x2d0] sm:$0xff]  }
 0x5ec   : > { %8547 = vst [vmem:[#allocation5 + $0x60] sm:$0x1] %v8546_v4  ;;  %v14784_v52 = vld [vmem:[%s17951_s5 + $0x280] sm:$0xff]   ;;  %v14796_v55 = vld [vmem:[%s17951_s5 + $0x2a8] sm:$0xff]   ;;  %v14799_v20 = vld [vmem:[%s17951_s5 + $0x2f8] sm:$0xff]  }
 0x5ed   : > { %12557 = vmatpush3.bf16.msra.mxu0 %v14728_v18  ;;  %v14751_v18 = vld [vmem:[%s17951_s5 + $0x1c8] sm:$0xff]   ;;  %v14810_v4 = vld [vmem:[%s17951_s5 + $0x318] sm:$0xff]  }
 0x5ee   : > { %12564 = vmatprep.subr.bf16.mxu0 %v14729_v16  ;;  %v8522_v16 = vshrl.u32 %v8514_v38, 16  ;;  %v14792_v38 = vld [vmem:[%s17951_s5 + $0x298] sm:$0xff]   ;;  %v8554_v17 = vld [vmem:[#allocation5 + $0x30] sm:$0xff] }
 0x5ef   : > { %v14806_v49 = vld [vmem:[%s17951_s5 + $0x308] sm:$0xff]  }
 0x5f0   : > { %10329 = vmatmul.mubr.bf16.vlgmr.msra.gmra.mrb[168].mxu0 %v11750_v39  ;;  %v8527_v39 = vld [vmem:[#allocation5 + $0x54] sm:$0x1] }
 0x5f1   : > { %12565 = vmatpush3.bf16.msra.mxu0 %v14730_v27  ;;  %10368 = vmatprep.mubr.bf16.mxu0 %v11753_v0  ;;  %v11755_v27 = vcombine.high %v17380_v56, %v17380_v56  ;;  %v8528_v32 = vsel %vm17197_vm6, %v8522_v16, %v8527_v39  ;;  %v14795_v56 = vld [vmem:[%s17951_s5 + $0x2e8] sm:$0xff]  }
 0x5f2   : > { %12566 = vmatprep.subr.bf16.mxu0 %v14733_v46  ;;  %v8533_v46 = vld [vmem:[#allocation5 + $0x58] sm:$0x1]  ;;  %8529 = vst [vmem:[#allocation5 + $0x54] sm:$0x1] %v8528_v32  ;;  %v14805_v39 = vld [vmem:[%s17951_s5 + $0x348] sm:$0xff]  }
 0x5f3   : > { %v8534_v0 = vsel %vm17197_vm6, %v11744_v50, %v8533_v46  ;;  %v14801_v50 = vld [vmem:[%s17951_s5 + $0x340] sm:$0xff]   ;;  %v11761_v46 = vcombine.high %v8554_v17, %v8554_v17  ;;  %v14807_v32 = vld [vmem:[%s17951_s5 + $0x350] sm:$0xff]  }
 0x5f4   : > { %8535 = vst [vmem:[#allocation5 + $0x58] sm:$0x1] %v8534_v0  ;;  %v14808_v0 = vld [vmem:[%s17951_s5 + $0x310] sm:$0xff]  }
 0x5f5   : > { %12567 = vmatpush3.bf16.msra.mxu0 %v14734_v62  ;;  %v11745_v62 = vrot.slane %v8522_v16, 9  ;;  %v14800_v16 = vld [vmem:[%s17951_s5 + $0x2b8] sm:$0xff]  }
 0x5f6   : > { %12568 = vmatprep.subr.bf16.mxu0 %v14735_v35  ;;  %v14754_v35 = vld [vmem:[%s17951_s5 + $0x190] sm:$0xff]  }
 0x5f7   : > { %v8540_v2 = vsel %vm17197_vm6, %v11745_v62, %v8539_v43  ;;  %v14809_v62 = vld [vmem:[%s17951_s5 + $0x358] sm:$0xff]   ;;  %v14811_v43 = vld [vmem:[%s17951_s5 + $0x360] sm:$0xff]  }
 0x5f8   : > { %8541 = vst [vmem:[#allocation5 + $0x5c] sm:$0x1] %v8540_v2  ;;  %v14813_v2 = vld [vmem:[%s17951_s5 + $0x368] sm:$0xff]  }
 0x5f9   : > { %12569 = vmatpush3.bf16.msra.mxu0 %v14736_v45  ;;  %v14761_v45 = vld [vmem:[%s17951_s5 + $0x1f0] sm:$0xff]  }
 0x5fa   : > { %12570 = vmatprep.subr.bf16.mxu0 %v14737_v22  ;;  %v14763_v22 = vld [vmem:[%s17951_s5 + $0x1f8] sm:$0xff]  }
 0x5fd   : > { %12571 = vmatpush3.bf16.msra.mxu0 %v14738_v19  ;;  %v14765_v19 = vld [vmem:[%s17951_s5 + $0x240] sm:$0xff]  }
 0x5fe   : > { %12572 = vmatprep.subr.bf16.mxu0 %v14739_v63  ;;  %v8552_v63 = vld [vmem:[#allocation5 + $0x20] sm:$0xff] }
 0x5ff   : > { %v11757_v53 = vcombine.high %v8552_v63, %v8552_v63  ;;  %v11756_v25 = vcombine.low %v8552_v63, %v8552_v63  ;;  %v14826_v63 = vld [vmem:[%s17951_s5 + $0x390] sm:$0xff]  }
 0x601   : > { %12573 = vmatpush3.bf16.msra.mxu0 %v14740_v3  ;;  %v14777_v3 = vld [vmem:[%s17951_s5 + $0x268] sm:$0xff]  }
 0x602   : > { %12574 = vmatprep.subr.bf16.mxu0 %v14741_v15  ;;  %v14783_v15 = vld [vmem:[%s17951_s5 + $0x2c0] sm:$0xff]  }
 0x605   : > { %12575 = vmatpush3.bf16.msra.mxu0 %v14742_v40  ;;  %v11759_v40 = vcombine.high %v8553_v44, %v8553_v44 }
 0x606   : > { %12576 = vmatprep.subr.bf16.mxu0 %v14743_v24  ;;  %v14788_v24 = vld [vmem:[%s17951_s5 + $0x288] sm:$0xff]  }
 0x609   : > { %12577 = vmatpush3.bf16.msra.mxu0 %v14744_v8  ;;  %v14790_v8 = vld [vmem:[%s17951_s5 + $0x290] sm:$0xff]  }
 0x60a   : > { %12578 = vmatprep.subr.bf16.mxu0 %v14745_v34  ;;  %v14791_v34 = vld [vmem:[%s17951_s5 + $0x2d8] sm:$0xff]  }
 0x60d   : > { %12579 = vmatpush3.bf16.msra.mxu0 %v14746_v48  ;;  %v14793_v48 = vld [vmem:[%s17951_s5 + $0x2e0] sm:$0xff]  }
 0x60e   : > { %12586 = vmatprep.subr.bf16.mxu0 %v14747_v30  ;;  %v14794_v30 = vld [vmem:[%s17951_s5 + $0x2a0] sm:$0xff]  }
 0x610   : > { %10369 = vmatmul.mubr.bf16.vlgmr.msra.gmra.mrb[172].mxu0 %v11752_v37  ;;  %v14802_v37 = vld [vmem:[%s17951_s5 + $0x300] sm:$0xff]  }
 0x611   : > { %12587 = vmatpush3.bf16.msra.mxu0 %v14748_v11  ;;  %10408 = vmatprep.mubr.bf16.mxu0 %v11755_v27  ;;  %v14797_v11 = vld [vmem:[%s17951_s5 + $0x2f0] sm:$0xff]   ;;  %v11758_v27 = vcombine.low %v8553_v44, %v8553_v44 }
 0x612   : > { %12588 = vmatprep.subr.bf16.mxu0 %v14751_v18  ;;  %v14798_v18 = vld [vmem:[%s17951_s5 + $0x2b0] sm:$0xff]  }
 0x615   : > { %12589 = vmatpush3.bf16.msra.mxu0 %v14752_v13  ;;  %v14812_v13 = vld [vmem:[%s17951_s5 + $0x320] sm:$0xff]  }
 0x616   : > { %12590 = vmatprep.subr.bf16.mxu0 %v14753_v29  ;;  %v14814_v29 = vld [vmem:[%s17951_s5 + $0x328] sm:$0xff]  }
 0x619   : > { %12591 = vmatpush3.bf16.msra.mxu0 %v14754_v35  ;;  %v14815_v35 = vld [vmem:[%s17951_s5 + $0x370] sm:$0xff]  }
 0x61a   : > { %12592 = vmatprep.subr.bf16.mxu0 %v14755_v21  ;;  %v14816_v21 = vld [vmem:[%s17951_s5 + $0x330] sm:$0xff]  }
 0x61d   : > { %12593 = vmatpush3.bf16.msra.mxu0 %v14756_v9  ;;  %v14817_v9 = vld [vmem:[%s17951_s5 + $0x378] sm:$0xff]  }
 0x61e   : > { %12594 = vmatprep.subr.bf16.mxu0 %v14757_v26  ;;  %v14818_v26 = vld [vmem:[%s17951_s5 + $0x338] sm:$0xff]  }
 0x621   : > { %12595 = vmatpush3.bf16.msra.mxu0 %v14758_v10  ;;  %v14819_v10 = vld [vmem:[%s17951_s5 + $0x3c0] sm:$0xff]  }
 0x622   : > { %12596 = vmatprep.subr.bf16.mxu0 %v14759_v58  ;;  %v8555_v58 = vld [vmem:[#allocation5 + $0x38] sm:$0xff] }
 0x623   : > { %v11762_v44 = vcombine.low %v8555_v58, %v8555_v58 }
 0x625   : > { %12597 = vmatpush3.bf16.msra.mxu0 %v14760_v42  ;;  %v14820_v42 = vld [vmem:[%s17951_s5 + $0x380] sm:$0xff]  }
 0x626   : > { %12598 = vmatprep.subr.bf16.mxu0 %v14761_v45  ;;  %v11760_v45 = vcombine.low %v8554_v17, %v8554_v17  ;;  %v14852_v17 = vld [vmem:[%s17951_s5 + $0x430] sm:$0xff]  }
 0x629   : > { %12599 = vmatpush3.bf16.msra.mxu0 %v14762_v60  ;;  %v14823_v60 = vld [vmem:[%s17951_s5 + $0x3c8] sm:$0xff]  }
 0x62a   : > { %12600 = vmatprep.subr.bf16.mxu0 %v14763_v22  ;;  %v11763_v22 = vcombine.high %v8555_v58, %v8555_v58  ;;  %v14868_v58 = vld [vmem:[%s17951_s5 + $0x4a8] sm:$0xff]  }
 0x62d   : > { %12601 = vmatpush3.bf16.msra.mxu0 %v14764_v54  ;;  %v14824_v54 = vld [vmem:[%s17951_s5 + $0x388] sm:$0xff]  }
 0x62e   : > { %12608 = vmatprep.subr.bf16.mxu0 %v14765_v19  ;;  %v14825_v19 = vld [vmem:[%s17951_s5 + $0x3d0] sm:$0xff]  }
 0x630   : > { %10409 = vmatmul.mubr.bf16.vlgmr.msra.gmra.mrb[176].mxu0 %v11754_v59  ;;  %v14828_v59 = vld [vmem:[%s17951_s5 + $0x398] sm:$0xff]  }
 0x631   : > { %12609 = vmatpush3.bf16.msra.mxu0 %v14766_v36  ;;  %10448 = vmatprep.mubr.bf16.mxu0 %v11757_v53  ;;  %v14827_v36 = vld [vmem:[%s17951_s5 + $0x3d8] sm:$0xff]   ;;  %v14830_v53 = vld [vmem:[%s17951_s5 + $0x3a0] sm:$0xff]  }
 0x632   : > { %12610 = vmatprep.subr.bf16.mxu0 %v14769_v12  ;;  %v14829_v12 = vld [vmem:[%s17951_s5 + $0x3e0] sm:$0xff]  }
 0x635   : > { %12611 = vmatpush3.bf16.msra.mxu0 %v14770_v1  ;;  %v14831_v1 = vld [vmem:[%s17951_s5 + $0x3e8] sm:$0xff]  }
 0x636   : > { %12612 = vmatprep.subr.bf16.mxu0 %v14771_v33  ;;  %v14832_v33 = vld [vmem:[%s17951_s5 + $0x3a8] sm:$0xff]  }
 0x639   : > { %12613 = vmatpush3.bf16.msra.mxu0 %v14772_v6  ;;  %v14833_v6 = vld [vmem:[%s17951_s5 + $0x3f0] sm:$0xff]  }
 0x63a   : > { %12614 = vmatprep.subr.bf16.mxu0 %v14773_v57 }
 0x63d   : > { %12615 = vmatpush3.bf16.msra.mxu0 %v14774_v23 }
 0x63e   : > { %12616 = vmatprep.subr.bf16.mxu0 %v14775_v31 }
 0x641   : > { %12617 = vmatpush3.bf16.msra.mxu0 %v14776_v5 }
 0x642   : > { %12618 = vmatprep.subr.bf16.mxu0 %v14777_v3  ;;  %v14834_v3 = vld [vmem:[%s17951_s5 + $0x3b0] sm:$0xff]  }
 0x645   : > { %12619 = vmatpush3.bf16.msra.mxu0 %v14778_v61 }
 0x646   : > { %12620 = vmatprep.subr.bf16.mxu0 %v14779_v41  ;;  %v14835_v41 = vld [vmem:[%s17951_s5 + $0x3f8] sm:$0xff]  }
 0x649   : > { %12621 = vmatpush3.bf16.msra.mxu0 %v14780_v28  ;;  %v14836_v28 = vld [vmem:[%s17951_s5 + $0x3b8] sm:$0xff]  }
 0x64a   : > { %12622 = vmatprep.subr.bf16.mxu0 %v14781_v51  ;;  %v14837_v51 = vld [vmem:[%s17951_s5 + $0x440] sm:$0xff]  }
 0x64d   : > { %12623 = vmatpush3.bf16.msra.mxu0 %v14782_v7  ;;  %v8556_v7 = vld [vmem:[#allocation5 + $0x40] sm:$0xff] }
 0x64e   : > { %12630 = vmatprep.subr.bf16.mxu0 %v14783_v15  ;;  %v14838_v15 = vld [vmem:[%s17951_s5 + $0x400] sm:$0xff]  }
 0x650   : > { %10449 = vmatmul.mubr.bf16.vlgmr.msra.gmra.mrb[180].mxu0 %v11756_v25  ;;  %v11765_v25 = vcombine.high %v8556_v7, %v8556_v7 }
 0x651   : > { %12631 = vmatpush3.bf16.msra.mxu0 %v14784_v52  ;;  %10488 = vmatprep.mubr.bf16.mxu0 %v11759_v40  ;;  %v14841_v52 = vld [vmem:[%s17951_s5 + $0x448] sm:$0xff]   ;;  %v14843_v40 = vld [vmem:[%s17951_s5 + $0x450] sm:$0xff]  }
 0x652   : > { %12632 = vmatprep.subr.bf16.mxu0 %v14787_v14  ;;  %v14842_v14 = vld [vmem:[%s17951_s5 + $0x408] sm:$0xff]  }
 0x655   : > { %12633 = vmatpush3.bf16.msra.mxu0 %v14788_v24  ;;  %v14844_v24 = vld [vmem:[%s17951_s5 + $0x410] sm:$0xff]  }
 0x656   : > { %12634 = vmatprep.subr.bf16.mxu0 %v14789_v47  ;;  %v14845_v47 = vld [vmem:[%s17951_s5 + $0x458] sm:$0xff]  }
 0x659   : > { %12635 = vmatpush3.bf16.msra.mxu0 %v14790_v8  ;;  %v14846_v8 = vld [vmem:[%s17951_s5 + $0x418] sm:$0xff]  }
 0x65a   : > { %12636 = vmatprep.subr.bf16.mxu0 %v14791_v34  ;;  %v14847_v34 = vld [vmem:[%s17951_s5 + $0x460] sm:$0xff]  }
 0x65d   : > { %12637 = vmatpush3.bf16.msra.mxu0 %v14792_v38  ;;  %v14848_v38 = vld [vmem:[%s17951_s5 + $0x420] sm:$0xff]  }
 0x65e   : > { %12638 = vmatprep.subr.bf16.mxu0 %v14793_v48  ;;  %v14849_v48 = vld [vmem:[%s17951_s5 + $0x468] sm:$0xff]  }
 0x661   : > { %12639 = vmatpush3.bf16.msra.mxu0 %v14794_v30  ;;  %v14850_v30 = vld [vmem:[%s17951_s5 + $0x428] sm:$0xff]  }
 0x662   : > { %12640 = vmatprep.subr.bf16.mxu0 %v14795_v56  ;;  %v11747_v56 = vld [vmem:[%s17952_s6] ss:$0 sm:$0xff] }
 0x665   : > { %12641 = vmatpush3.bf16.msra.mxu0 %v14796_v55  ;;  %v14851_v55 = vld [vmem:[%s17951_s5 + $0x470] sm:$0xff]  }
 0x666   : > { %12642 = vmatprep.subr.bf16.mxu0 %v14797_v11 }
 0x669   : > { %12643 = vmatpush3.bf16.msra.mxu0 %v14798_v18 }
 0x66a   : > { %12644 = vmatprep.subr.bf16.mxu0 %v14799_v20 }
 0x66d   : > { %12645 = vmatpush3.bf16.msra.mxu0 %v14800_v16 }
 0x66e   : > { %12652 = vmatprep.subr.bf16.mxu0 %v14801_v50 }
 0x670   : > { %10489 = vmatmul.mubr.bf16.vlgmr.msra.gmra.mrb[184].mxu0 %v11758_v27  ;;  %v14853_v27 = vld [vmem:[%s17951_s5 + $0x478] sm:$0xff]  }
 0x671   : > { %12653 = vmatpush3.bf16.msra.mxu0 %v14802_v37  ;;  %10528 = vmatprep.mubr.bf16.mxu0 %v11761_v46  ;;  %v14854_v46 = vld [vmem:[%s17951_s5 + $0x438] sm:$0xff]  }
 0x672   : > { %12654 = vmatprep.subr.bf16.mxu0 %v14805_v39 }
 0x675   : > { %12655 = vmatpush3.bf16.msra.mxu0 %v14806_v49  ;;  %v14855_v49 = vld [vmem:[%s17951_s5 + $0x4c0] sm:$0xff]  }
 0x676   : > { %12656 = vmatprep.subr.bf16.mxu0 %v14807_v32  ;;  %v8557_v32 = vld [vmem:[#allocation5 + $0x48] sm:$0xff] }
 0x679   : > { %12657 = vmatpush3.bf16.msra.mxu0 %v14808_v0  ;;  %v14856_v0 = vld [vmem:[%s17951_s5 + $0x480] sm:$0xff]  }
 0x67a   : > { %12658 = vmatprep.subr.bf16.mxu0 %v14809_v62  ;;  %v11764_v62 = vcombine.low %v8556_v7, %v8556_v7  ;;  %v14885_v7 = vld [vmem:[%s17951_s5 + $0x568] sm:$0xff]  }
 0x67d   : > { %12659 = vmatpush3.bf16.msra.mxu0 %v14810_v4  ;;  %v14859_v4 = vld [vmem:[%s17951_s5 + $0x4c8] sm:$0xff]  }
 0x67e   : > { %12660 = vmatprep.subr.bf16.mxu0 %v14811_v43  ;;  %v11767_v43 = vcombine.high %v8557_v32, %v8557_v32 }
 0x681   : > { %12661 = vmatpush3.bf16.msra.mxu0 %v14812_v13  ;;  %v14860_v13 = vld [vmem:[%s17951_s5 + $0x488] sm:$0xff]  }
 0x682   : > { %12662 = vmatprep.subr.bf16.mxu0 %v14813_v2  ;;  %v14861_v2 = vld [vmem:[%s17951_s5 + $0x4d0] sm:$0xff]  }
 0x685   : > { %12663 = vmatpush3.bf16.msra.mxu0 %v14814_v29  ;;  %v14862_v29 = vld [vmem:[%s17951_s5 + $0x490] sm:$0xff]  }
 0x686   : > { %12664 = vmatprep.subr.bf16.mxu0 %v14815_v35  ;;  %v14863_v35 = vld [vmem:[%s17951_s5 + $0x4d8] sm:$0xff]  }
 0x689   : > { %12665 = vmatpush3.bf16.msra.mxu0 %v14816_v21  ;;  %v14864_v21 = vld [vmem:[%s17951_s5 + $0x498] sm:$0xff]  }
 0x68a   : > { %12666 = vmatprep.subr.bf16.mxu0 %v14817_v9  ;;  %v14865_v9 = vld [vmem:[%s17951_s5 + $0x4e0] sm:$0xff]  }
 0x68d   : > { %12667 = vmatpush3.bf16.msra.mxu0 %v14818_v26  ;;  %v14866_v26 = vld [vmem:[%s17951_s5 + $0x4a0] sm:$0xff]  }
 0x68e   : > { %12674 = vmatprep.subr.bf16.mxu0 %v14819_v10  ;;  %v14867_v10 = vld [vmem:[%s17951_s5 + $0x4e8] sm:$0xff]  }
 0x690   : > { %10529 = vmatmul.mubr.bf16.vlgmr.msra.gmra.mrb[188].mxu0 %v11760_v45 }
 0x691   : > { %12675 = vmatpush3.bf16.msra.mxu0 %v14820_v42  ;;  %10568 = vmatprep.mubr.bf16.mxu0 %v11763_v22  ;;  %v14869_v42 = vld [vmem:[%s17951_s5 + $0x4f0] sm:$0xff]  }
 0x692   : > { %12676 = vmatprep.subr.bf16.mxu0 %v14823_v60 }
 0x695   : > { %12677 = vmatpush3.bf16.msra.mxu0 %v14824_v54 }
 0x696   : > { %12678 = vmatprep.subr.bf16.mxu0 %v14825_v19  ;;  %v14870_v19 = vld [vmem:[%s17951_s5 + $0x4b0] sm:$0xff]  }
 0x699   : > { %12679 = vmatpush3.bf16.msra.mxu0 %v14826_v63 }
 0x69a   : > { %12680 = vmatprep.subr.bf16.mxu0 %v14827_v36  ;;  %v14871_v36 = vld [vmem:[%s17951_s5 + $0x4f8] sm:$0xff]  }
 0x69d   : > { %12681 = vmatpush3.bf16.msra.mxu0 %v14828_v59 }
 0x69e   : > { %12682 = vmatprep.subr.bf16.mxu0 %v14829_v12  ;;  %v14872_v12 = vld [vmem:[%s17951_s5 + $0x4b8] sm:$0xff]  }
 0x6a1   : > { %12683 = vmatpush3.bf16.msra.mxu0 %v14830_v53  ;;  %v14873_v53 = vld [vmem:[%s17951_s5 + $0x540] sm:$0xff]  }
 0x6a2   : > { %12684 = vmatprep.subr.bf16.mxu0 %v14831_v1  ;;  %v8558_v1 = vld [vmem:[#allocation5 + $0x50] sm:$0xff] }
 0x6a3   : > { %v12536_v57 = vpop.f32.mrb[164].mxu0 }
 0x6a4   : > { %v12537_v23 = vpop.f32.mrb[165].mxu0 }
 0x6a5   : > { %v12538_v31 = vadd.f32 %v12537_v23, %v12536_v57  ;;  %12685 = vmatpush3.bf16.msra.mxu0 %v14832_v33  ;;  %v12539_v5 = vpop.f32.mrb[166].mxu0  ;;  %v14874_v33 = vld [vmem:[%s17951_s5 + $0x500] sm:$0xff]   ;;  %v14877_v57 = vld [vmem:[%s17951_s5 + $0x548] sm:$0xff]   ;;  %v11769_v23 = vcombine.high %v8558_v1, %v8558_v1 }
 0x6a6   : > { %v12540_v61 = vpop.f32.mrb[167].mxu0  ;;  %12686 = vmatprep.subr.bf16.mxu0 %v14833_v6  ;;  %v11766_v6 = vcombine.low %v8557_v32, %v8557_v32  ;;  %v14879_v5 = vld [vmem:[%s17951_s5 + $0x550] sm:$0xff]  }
 0x6a7   : > { %v10291_v20 = vadd.f32 %v12538_v31, %v11747_v56  ;;  %v14878_v31 = vld [vmem:[%s17951_s5 + $0x508] sm:$0xff]   ;;  %v14881_v61 = vld [vmem:[%s17951_s5 + $0x558] sm:$0xff]   ;;  %v14892_v56 = vld [vmem:[%s17951_s5 + $0x580] sm:$0xff]  }
 0x6a8   : > { %v14905_v32 = vld [vmem:[%s17951_s5 + $0x5f0] sm:$0xff]  }
 0x6a9   : > { %12687 = vmatpush3.bf16.msra.mxu0 %v14834_v3  ;;  %v14880_v3 = vld [vmem:[%s17951_s5 + $0x510] sm:$0xff]  }
 0x6aa   : > { %12688 = vmatprep.subr.bf16.mxu0 %v14835_v41  ;;  %v14882_v41 = vld [vmem:[%s17951_s5 + $0x518] sm:$0xff]  }
 0x6ad   : > { %12689 = vmatpush3.bf16.msra.mxu0 %v14836_v28  ;;  %v14883_v28 = vld [vmem:[%s17951_s5 + $0x560] sm:$0xff]  }
 0x6ae   : > { %12696 = vmatprep.subr.bf16.mxu0 %v14837_v51  ;;  %v14884_v51 = vld [vmem:[%s17951_s5 + $0x520] sm:$0xff]  }
 0x6b0   : > { %10569 = vmatmul.mubr.bf16.vlgmr.msra.gmra.mrb[192].mxu0 %v11762_v44  ;;  %v14887_v44 = vld [vmem:[%s17951_s5 + $0x570] sm:$0xff]  }
 0x6b1   : > { %12697 = vmatpush3.bf16.msra.mxu0 %v14838_v15  ;;  %10608 = vmatprep.mubr.bf16.mxu0 %v11765_v25  ;;  %v14886_v15 = vld [vmem:[%s17951_s5 + $0x528] sm:$0xff]  }
 0x6b2   : > { %12698 = vmatprep.subr.bf16.mxu0 %v14841_v52 }
 0x6b5   : > { %12699 = vmatpush3.bf16.msra.mxu0 %v14842_v14 }
 0x6b6   : > { %12700 = vmatprep.subr.bf16.mxu0 %v14843_v40 }
 0x6b9   : > { %12701 = vmatpush3.bf16.msra.mxu0 %v14844_v24  ;;  %v14888_v24 = vld [vmem:[%s17951_s5 + $0x530] sm:$0xff]  }
 0x6ba   : > { %12702 = vmatprep.subr.bf16.mxu0 %v14845_v47 }
 0x6bd   : > { %12703 = vmatpush3.bf16.msra.mxu0 %v14846_v8  ;;  %v14889_v8 = vld [vmem:[%s17951_s5 + $0x578] sm:$0xff]  }
 0x6be   : > { %12704 = vmatprep.subr.bf16.mxu0 %v14847_v34 }
 0x6c1   : > { %12705 = vmatpush3.bf16.msra.mxu0 %v14848_v38  ;;  %v14890_v38 = vld [vmem:[%s17951_s5 + $0x538] sm:$0xff]  }
 0x6c2   : > { %12706 = vmatprep.subr.bf16.mxu0 %v14849_v48  ;;  %v14891_v48 = vld [vmem:[%s17951_s5 + $0x5c0] sm:$0xff]  }
 0x6c3   : > { %v12558_v11 = vpop.f32.mrb[168].mxu0 }
 0x6c4   : > { %v12559_v18 = vpop.f32.mrb[169].mxu0 }
 0x6c5   : > { %v12560_v16 = vadd.f32 %v12559_v18, %v12558_v11  ;;  %v12561_v50 = vpop.f32.mrb[170].mxu0  ;;  %12707 = vmatpush3.bf16.msra.mxu0 %v14850_v30  ;;  %v8559_v30 = vld [vmem:[#allocation5 + $0x58] sm:$0xff]  ;;  %v14895_v11 = vld [vmem:[%s17951_s5 + $0x5c8] sm:$0xff]  }
 0x6c6   : > { %v12562_v37 = vpop.f32.mrb[171].mxu0  ;;  %12708 = vmatprep.subr.bf16.mxu0 %v14851_v55  ;;  %v11768_v55 = vcombine.low %v8558_v1, %v8558_v1  ;;  %v11771_v18 = vcombine.high %v8559_v30, %v8559_v30  ;;  %v14898_v50 = vld [vmem:[%s17951_s5 + $0x590] sm:$0xff]   ;;  %v14916_v1 = vld [vmem:[%s17951_s5 + $0x638] sm:$0xff]  }
 0x6c7   : > { %v10331_v39 = vadd.f32 %v12560_v16, %v10291_v20  ;;  %v14896_v20 = vld [vmem:[%s17951_s5 + $0x588] sm:$0xff]   ;;  %v14897_v16 = vld [vmem:[%s17951_s5 + $0x5d0] sm:$0xff]   ;;  %v14900_v37 = vld [vmem:[%s17951_s5 + $0x598] sm:$0xff]  }
 0x6c9   : > { %12709 = vmatpush3.bf16.msra.mxu0 %v14852_v17  ;;  %v14899_v17 = vld [vmem:[%s17951_s5 + $0x5d8] sm:$0xff]  }
 0x6ca   : > { %12710 = vmatprep.subr.bf16.mxu0 %v14853_v27  ;;  %v14901_v27 = vld [vmem:[%s17951_s5 + $0x5e0] sm:$0xff]  }
 0x6cd   : > { %12711 = vmatpush3.bf16.msra.mxu0 %v14854_v46  ;;  %v14903_v46 = vld [vmem:[%s17951_s5 + $0x5e8] sm:$0xff]  }
 0x6ce   : > { %12718 = vmatprep.subr.bf16.mxu0 %v14855_v49  ;;  %v14904_v49 = vld [vmem:[%s17951_s5 + $0x5a8] sm:$0xff]  }
 0x6d0   : > { %10609 = vmatmul.mubr.bf16.vlgmr.msra.gmra.mrb[196].mxu0 %v11764_v62 }
 0x6d1   : > { %12719 = vmatpush3.bf16.msra.mxu0 %v14856_v0  ;;  %10648 = vmatprep.mubr.bf16.mxu0 %v11767_v43 }
 0x6d2   : > { %12720 = vmatprep.subr.bf16.mxu0 %v14859_v4 }
 0x6d5   : > { %12721 = vmatpush3.bf16.msra.mxu0 %v14860_v13  ;;  %v14906_v13 = vld [vmem:[%s17951_s5 + $0x5b0] sm:$0xff]  }
 0x6d6   : > { %12722 = vmatprep.subr.bf16.mxu0 %v14861_v2 }
 0x6d9   : > { %12723 = vmatpush3.bf16.msra.mxu0 %v14862_v29  ;;  %v14907_v29 = vld [vmem:[%s17951_s5 + $0x5f8] sm:$0xff]  }
 0x6da   : > { %12724 = vmatprep.subr.bf16.mxu0 %v14863_v35 }
 0x6dd   : > { %12725 = vmatpush3.bf16.msra.mxu0 %v14864_v21  ;;  %v14908_v21 = vld [vmem:[%s17951_s5 + $0x5b8] sm:$0xff]  }
 0x6de   : > { %12726 = vmatprep.subr.bf16.mxu0 %v14865_v9  ;;  %v14909_v9 = vld [vmem:[%s17951_s5 + $0x600] sm:$0xff]  }
 0x6e1   : > { %12727 = vmatpush3.bf16.msra.mxu0 %v14866_v26  ;;  %v11770_v26 = vcombine.low %v8559_v30, %v8559_v30 }
 0x6e2   : > { %12728 = vmatprep.subr.bf16.mxu0 %v14867_v10  ;;  %v14996_v10 = vmov 0.0  }
 0x6e3   : > { %v12580_v45 = vpop.f32.mrb[172].mxu0 }
 0x6e4   : > { %v12581_v60 = vpop.f32.mrb[173].mxu0 }
 0x6e5   : > { %v12582_v22 = vadd.f32 %v12581_v60, %v12580_v45  ;;  %v12583_v54 = vpop.f32.mrb[174].mxu0  ;;  %12729 = vmatpush3.bf16.msra.mxu0 %v14868_v58  ;;  %v14910_v58 = vld [vmem:[%s17951_s5 + $0x608] sm:$0xff]   ;;  %v14912_v45 = vld [vmem:[%s17951_s5 + $0x618] sm:$0xff]   ;;  %v14913_v60 = vld [vmem:[%s17951_s5 + $0x620] sm:$0xff]  }
 0x6e6   : > { %v12584_v63 = vpop.f32.mrb[175].mxu0  ;;  %12730 = vmatprep.subr.bf16.mxu0 %v14869_v42  ;;  %v14911_v42 = vld [vmem:[%s17951_s5 + $0x610] sm:$0xff]  }
 0x6e7   : > { %v10371_v59 = vadd.f32 %v12582_v22, %v10331_v39  ;;  %v14902_v39 = vld [vmem:[%s17951_s5 + $0x5a0] sm:$0xff]   ;;  %v14914_v22 = vld [vmem:[%s17951_s5 + $0x628] sm:$0xff]  }
 0x6e9   : > { %12731 = vmatpush3.bf16.msra.mxu0 %v14870_v19 }
 0x6ea   : > { %12732 = vmatprep.subr.bf16.mxu0 %v14871_v36 }
 0x6ed   : > { %12733 = vmatpush3.bf16.msra.mxu0 %v14872_v12 }
 0x6ee   : > { %12740 = vmatprep.subr.bf16.mxu0 %v14873_v53 }
 0x6f0   : > { %10649 = vmatmul.mubr.bf16.vlgmr.msra.gmra.mrb[200].mxu0 %v11766_v6 }
 0x6f1   : > { %12741 = vmatpush3.bf16.msra.mxu0 %v14874_v33  ;;  %10688 = vmatprep.mubr.bf16.mxu0 %v11769_v23  ;;  %v14917_v33 = vld [vmem:[#allocation5 + $0x60] ss:$0 sps:$4 sm:$0xff]  }
 0x6f2   : > { %12742 = vmatprep.subr.bf16.mxu0 %v14877_v57 }
 0x6f5   : > { %12743 = vmatpush3.bf16.msra.mxu0 %v14878_v31 }
 0x6f6   : > { %12744 = vmatprep.subr.bf16.mxu0 %v14879_v5 }
 0x6f9   : > { %12745 = vmatpush3.bf16.msra.mxu0 %v14880_v3 }
 0x6fa   : > { %12746 = vmatprep.subr.bf16.mxu0 %v14881_v61 }
 0x6fd   : > { %12747 = vmatpush3.bf16.msra.mxu0 %v14882_v41 }
 0x6fe   : > { %12748 = vmatprep.subr.bf16.mxu0 %v14883_v28 }
 0x701   : > { %12749 = vmatpush3.bf16.msra.mxu0 %v14884_v51 }
 0x702   : > { %12750 = vmatprep.subr.bf16.mxu0 %v14885_v7 }
 0x703   : > { %v12602_v52 = vpop.f32.mrb[176].mxu0 }
 0x704   : > { %v12603_v25 = vpop.f32.mrb[177].mxu0 }
 0x705   : > { %v12604_v14 = vadd.f32 %v12603_v25, %v12602_v52  ;;  %v12605_v40 = vpop.f32.mrb[178].mxu0  ;;  %12751 = vmatpush3.bf16.msra.mxu0 %v14886_v15  ;;  %v14918_v15 = vld [vmem:[%s17953_s7] sm:$0xff]   ;;  %v14919_v52 = vld [vmem:[%s17953_s7 + $0x8] sm:$0xff]   ;;  %v14920_v25 = vld [vmem:[%s17953_s7 + $0x10] sm:$0xff]  }
 0x706   : > { %v12606_v47 = vpop.f32.mrb[179].mxu0  ;;  %12752 = vmatprep.subr.bf16.mxu0 %v14887_v44  ;;  %v14922_v40 = vld [vmem:[%s17953_s7 + $0x20] sm:$0xff]  }
 0x707   : > { %v10411_v34 = vadd.f32 %v12604_v14, %v10371_v59  ;;  %v14915_v59 = vld [vmem:[%s17951_s5 + $0x630] sm:$0xff]   ;;  %v14921_v14 = vld [vmem:[%s17953_s7 + $0x18] sm:$0xff]  }
 0x709   : > { %12753 = vmatpush3.bf16.msra.mxu0 %v14888_v24  ;;  %v14923_v24 = vld [vmem:[%s17953_s7 + $0x28] sm:$0xff]  }
 0x70a   : > { %12754 = vmatprep.subr.bf16.mxu0 %v14889_v8 }
 0x70d   : > { %12755 = vmatpush3.bf16.msra.mxu0 %v14890_v38 }
 0x70e   : > { %12762 = vmatprep.subr.bf16.mxu0 %v14891_v48 }
 0x710   : > { %10689 = vmatmul.mubr.bf16.vlgmr.msra.gmra.mrb[204].mxu0 %v11768_v55  ;;  %v14925_v55 = vld [vmem:[%s17953_s7 + $0x38] sm:$0xff]  }
 0x711   : > { %12763 = vmatpush3.bf16.msra.mxu0 %v14892_v56  ;;  %10728 = vmatprep.mubr.bf16.mxu0 %v11771_v18  ;;  %v14924_v56 = vld [vmem:[%s17953_s7 + $0x30] sm:$0xff]  }
 0x712   : > { %12764 = vmatprep.subr.bf16.mxu0 %v14895_v11 }
 0x715   : > { %12765 = vmatpush3.bf16.msra.mxu0 %v14896_v20 }
 0x716   : > { %12766 = vmatprep.subr.bf16.mxu0 %v14897_v16 }
 0x719   : > { %12767 = vmatpush3.bf16.msra.mxu0 %v14898_v50 }
 0x71a   : > { %12768 = vmatprep.subr.bf16.mxu0 %v14899_v17 }
 0x71d   : > { %12769 = vmatpush3.bf16.msra.mxu0 %v14900_v37 }
 0x71e   : > { %12770 = vmatprep.subr.bf16.mxu0 %v14901_v27 }
 0x721   : > { %12771 = vmatpush3.bf16.msra.mxu0 %v14902_v39 }
 0x722   : > { %12772 = vmatprep.subr.bf16.mxu0 %v14903_v46 }
 0x723   : > { %v12624_v0 = vpop.f32.mrb[180].mxu0 }
 0x724   : > { %v12625_v62 = vpop.f32.mrb[181].mxu0 }
 0x725   : > { %v12626_v4 = vadd.f32 %v12625_v62, %v12624_v0  ;;  %v12627_v43 = vpop.f32.mrb[182].mxu0  ;;  %12773 = vmatpush3.bf16.msra.mxu0 %v14904_v49 }
 0x726   : > { %v12628_v2 = vpop.f32.mrb[183].mxu0  ;;  %12774 = vmatprep.subr.bf16.mxu0 %v14905_v32 }
 0x727   : > { %v10451_v35 = vadd.f32 %v12626_v4, %v10411_v34 }
 0x729   : > { %12775 = vmatpush3.bf16.msra.mxu0 %v14906_v13 }
 0x72a   : > { %12776 = vmatprep.subr.bf16.mxu0 %v14907_v29 }
 0x72d   : > { %12777 = vmatpush3.bf16.msra.mxu0 %v14908_v21 }
 0x72e   : > { %13855 = vmatprep.subr.bf16.mxu0 %v14996_v10 }
 0x730   : > { %10729 = vmatmul.mubr.bf16.vlgmr.msra.gmra.mrb[208].mxu0 %v11770_v26 }
 0x731   : > { %13856 = vmatpush3.bf16.msra.mxu0 %v14909_v9  ;;  %13871 = vmatprep.mubr.msk.bf16.mxu0 %vm14997_vm7, %v14996_v10 }
 0x732   : > { %13857 = vmatprep.subr.bf16.mxu0 %v14996_v10 }
 0x735   : > { %13858 = vmatpush3.bf16.msra.mxu0 %v14910_v58 }
 0x736   : > { %13859 = vmatprep.subr.bf16.mxu0 %v14996_v10 }
 0x739   : > { %13860 = vmatpush3.bf16.msra.mxu0 %v14911_v42  ;;  %v14926_v42 = vld [vmem:[%s17955_s9] sm:$0xff]  }
 0x73a   : > { %13861 = vmatprep.subr.bf16.mxu0 %v14996_v10 }
 0x73d   : > { %13862 = vmatpush3.bf16.msra.mxu0 %v14912_v45 }
 0x73e   : > { %13863 = vmatprep.subr.bf16.mxu0 %v14996_v10 }
 0x741   : > { %13864 = vmatpush3.bf16.msra.mxu0 %v14913_v60  ;;  %v14927_v60 = vld [vmem:[%s17955_s9 + $0x8] sm:$0xff]  }
 0x742   : > { %13865 = vmatprep.subr.bf16.mxu0 %v14996_v10 }
 0x743   : > { %v12646_v54 = vpop.f32.mrb[184].mxu0 }
 0x744   : > { %v12647_v19 = vpop.f32.mrb[185].mxu0 }
 0x745   : > { %v12648_v63 = vadd.f32 %v12647_v19, %v12646_v54  ;;  %v12649_v36 = vpop.f32.mrb[186].mxu0  ;;  %13866 = vmatpush3.bf16.msra.mxu0 %v14914_v22  ;;  %v14928_v22 = vld [vmem:[%s17955_s9 + $0x10] sm:$0xff]   ;;  %v14929_v54 = vld [vmem:[%s17955_s9 + $0x18] sm:$0xff]   ;;  %v14930_v19 = vld [vmem:[%s17955_s9 + $0x20] sm:$0xff]  }
 0x746   : > { %v12650_v12 = vpop.f32.mrb[187].mxu0  ;;  %13867 = vmatprep.subr.bf16.mxu0 %v14996_v10  ;;  %v14932_v36 = vld [vmem:[%s17955_s9 + $0x30] sm:$0xff]  }
 0x747   : > { %v10491_v53 = vadd.f32 %v12648_v63, %v10451_v35  ;;  %v14931_v63 = vld [vmem:[%s17955_s9 + $0x28] sm:$0xff]   ;;  %v11973_v12 = vld [vmem:[%s17954_s8] ss:$0 sm:$0xff] }
 0x749   : > { %13868 = vmatpush3.bf16.msra.mxu0 %v14915_v59  ;;  %v14933_v59 = vld [vmem:[%s17955_s9 + $0x38] sm:$0xff]  }
 0x74a   : > { %13869 = vmatprep.subr.bf16.mxu0 %v14996_v10 }
 0x74d   : > { %13870 = vmatpush3.bf16.msra.mxu0 %v14916_v1 }
 0x74e   : > { %13875 = vmatprep.subr.bf16.mxu0 %v14996_v10 }
 0x750   : > { %13872 = vmatmul.mubr.bf16.vlgmr.msra.gmra.mrb[212].mxu0 %v14917_v33 }
 0x751   : > { %13891 = vmatprep.mubr.msk.bf16.mxu0 %vm14997_vm7, %v14996_v10  ;;  %13876 = vmatpush3.bf16.msra.mxu0 %v14918_v15 }
 0x752   : > { %13877 = vmatprep.subr.bf16.mxu0 %v14996_v10 }
 0x755   : > { %13878 = vmatpush3.bf16.msra.mxu0 %v14919_v52 }
 0x756   : > { %13879 = vmatprep.subr.bf16.mxu0 %v14996_v10 }
 0x759   : > { %13880 = vmatpush3.bf16.msra.mxu0 %v14920_v25 }
 0x75a   : > { %13881 = vmatprep.subr.bf16.mxu0 %v14996_v10 }
 0x75d   : > { %13882 = vmatpush3.bf16.msra.mxu0 %v14921_v14 }
 0x75e   : > { %13883 = vmatprep.subr.bf16.mxu0 %v14996_v10 }
 0x761   : > { %13884 = vmatpush3.bf16.msra.mxu0 %v14922_v40 }
 0x762   : > { %13885 = vmatprep.subr.bf16.mxu0 %v14996_v10 }
 0x763   : > { %v12668_v6 = vpop.f32.mrb[188].mxu0 }
 0x764   : > { %v12669_v57 = vpop.f32.mrb[189].mxu0 }
 0x765   : > { %v12670_v23 = vadd.f32 %v12669_v57, %v12668_v6  ;;  %v12671_v31 = vpop.f32.mrb[190].mxu0  ;;  %13886 = vmatpush3.bf16.msra.mxu0 %v14923_v24 }
 0x766   : > { %v12672_v5 = vpop.f32.mrb[191].mxu0  ;;  %13887 = vmatprep.subr.bf16.mxu0 %v14996_v10 }
 0x767   : > { %v10531_v3 = vadd.f32 %v12670_v23, %v10491_v53 }
 0x769   : > { %13888 = vmatpush3.bf16.msra.mxu0 %v14924_v56 }
 0x76a   : > { %13889 = vmatprep.subr.bf16.mxu0 %v14996_v10 }
 0x76d   : > { %13890 = vmatpush3.bf16.msra.mxu0 %v14925_v55 }
 0x76e   : > { %13895 = vmatprep.subr.bf16.mxu0 %v14996_v10 }
 0x783   : > { %v12690_v61 = vpop.f32.mrb[192].mxu0 }
 0x784   : > { %v12691_v41 = vpop.f32.mrb[193].mxu0 }
 0x785   : > { %v12692_v28 = vadd.f32 %v12691_v41, %v12690_v61  ;;  %v12693_v51 = vpop.f32.mrb[194].mxu0 }
 0x786   : > { %v12694_v7 = vpop.f32.mrb[195].mxu0 }
 0x787   : > { %v10571_v44 = vadd.f32 %v12692_v28, %v10531_v3 }
 0x7a3   : > { %v12712_v47 = vpop.f32.mrb[196].mxu0 }
 0x7a4   : > { %v12713_v8 = vpop.f32.mrb[197].mxu0 }
 0x7a5   : > { %v12714_v34 = vadd.f32 %v12713_v8, %v12712_v47  ;;  %v12715_v38 = vpop.f32.mrb[198].mxu0 }
 0x7a6   : > { %v12716_v48 = vpop.f32.mrb[199].mxu0 }
 0x7a7   : > { %v10611_v30 = vadd.f32 %v12714_v34, %v10571_v44 }
 0x7c3   : > { %v12734_v11 = vpop.f32.mrb[200].mxu0 }
 0x7c4   : > { %v12735_v18 = vpop.f32.mrb[201].mxu0 }
 0x7c5   : > { %v12736_v20 = vadd.f32 %v12735_v18, %v12734_v11  ;;  %v12737_v16 = vpop.f32.mrb[202].mxu0 }
 0x7c6   : > { %v12738_v50 = vpop.f32.mrb[203].mxu0 }
 0x7c7   : > { %v10651_v17 = vadd.f32 %v12736_v20, %v10611_v30 }
 0x7e3   : > { %v12756_v37 = vpop.f32.mrb[204].mxu0 }
 0x7e4   : > { %v12757_v27 = vpop.f32.mrb[205].mxu0 }
 0x7e5   : > { %v12758_v39 = vadd.f32 %v12757_v27, %v12756_v37  ;;  %v12759_v46 = vpop.f32.mrb[206].mxu0 }
 0x7e6   : > { %v12760_v49 = vpop.f32.mrb[207].mxu0 }
 0x7e7   : > { %v10691_v32 = vadd.f32 %v12758_v39, %v10651_v17 }
 0x803   : > { %v12778_v0 = vpop.f32.mrb[208].mxu0 }
 0x804   : > { %v12779_v62 = vpop.f32.mrb[209].mxu0 }
 0x805   : > { %v12780_v4 = vadd.f32 %v12779_v62, %v12778_v0  ;;  %v12781_v43 = vpop.f32.mrb[210].mxu0 }
 0x806   : > { %v12782_v13 = vpop.f32.mrb[211].mxu0 }
 0x807   : > { %v10731_v2 = vadd.f32 %v12780_v4, %v10691_v32 }
 0x823   : > { %v10770_v29 = vpop.f32.mrb[212].mxu0 }
 0x824   : > { %v10771_v35 = vadd.f32 %v10770_v29, %v10731_v2  ;;  %v13873_v21 = vpop.f32.mrb[213].mxu0 }
 0x825   : > { %v10773_v9 = vpop.f32.mrb[214].mxu0 }
 0x826   : > { %v10776_v26 = vmax.f32 %v10771_v35, 0.0  ;;  %v13874_v58 = vpop.f32.mrb[215].mxu0 }
 0x828   : > { %v10777_v45 = vpack.c.bf16 %v10776_v26, %v10776_v26 }
 0x82a   : > { %13892 = vmatmul.mubr.bf16.vlgmr.msra.gmra.mrb[216].mxu0 %v10777_v45 }
 0x82b   : > { %13896 = vmatpush3.bf16.msra.mxu0 %v14926_v42  ;;  %13911 = vmatprep.mubr.msk.bf16.mxu0 %vm14997_vm7, %v14996_v10 }
 0x82c   : > { %13897 = vmatprep.subr.bf16.mxu0 %v14996_v10 }
 0x82f   : > { %13898 = vmatpush3.bf16.msra.mxu0 %v14927_v60 }
 0x830   : > { %13899 = vmatprep.subr.bf16.mxu0 %v14996_v10 }
 0x833   : > { %13900 = vmatpush3.bf16.msra.mxu0 %v14928_v22 }
 0x834   : > { %13901 = vmatprep.subr.bf16.mxu0 %v14996_v10 }
 0x837   : > { %13902 = vmatpush3.bf16.msra.mxu0 %v14929_v54 }
 0x838   : > { %13903 = vmatprep.subr.bf16.mxu0 %v14996_v10 }
 0x83b   : > { %13904 = vmatpush3.bf16.msra.mxu0 %v14930_v19 }
 0x83c   : > { %13905 = vmatprep.subr.bf16.mxu0 %v14996_v10 }
 0x83f   : > { %13906 = vmatpush3.bf16.msra.mxu0 %v14931_v63 }
 0x840   : > { %13907 = vmatprep.subr.bf16.mxu0 %v14996_v10 }
 0x843   : > { %13908 = vmatpush3.bf16.msra.mxu0 %v14932_v36 }
 0x844   : > { %13909 = vmatprep.subr.bf16.mxu0 %v14996_v10  ;;  %v11982_v10 = vld [vmem:[%s17956_s10] ss:$0 sm:$0xff] }
 0x847   : > { %13910 = vmatpush3.bf16.msra.mxu0 %v14933_v59 }
 0x8fd   : > { %v10883_v53 = vpop.f32.mrb[216].mxu0 }
 0x8fe   : > { %v10884_v1 = vadd.f32 %v11973_v12, %v10883_v53  ;;  %v13893_v33 = vpop.f32.mrb[217].mxu0 }
 0x8ff   : > { %v10886_v6 = vpop.f32.mrb[218].mxu0 }
 0x900   : > { %v10889_v57 = vmax.f32 %v10884_v1, 0.0  ;;  %v13894_v23 = vpop.f32.mrb[219].mxu0 }
 0x902   : > { %v10890_v31 = vpack.c.bf16 %v10889_v57, %v10889_v57 }
 0x904   : > { %13912 = vmatmul.mubr.bf16.vlgmr.msra.gmra.mrb[220].mxu0 %v10890_v31 }
 0x9d7   : > { %v10996_v5 = vpop.f32.mrb[220].mxu0 }
 0x9d8   : > { %v10997_v3 = vadd.f32 %v11982_v10, %v10996_v5  ;;  %v13913_v61 = vpop.f32.mrb[221].mxu0 }
 0x9d9   : > { %v10999_v41 = vpop.f32.mrb[222].mxu0 }
 0x9da   : > { %11002 = vst [vmem:[%s386_s28] sm:$0xff] %v10997_v3  ;;  %v13914_v28 = vpop.f32.mrb[223].mxu0 }
 0x9db PF: > { %s21_s17 = sadd.s32 1, %s14994_s17  }
 0x9dc   : > { %p18_p5 = scmp.ge.s32.totalorder %s21_s17, 4  }
 0x9de   :  { %20 = sbr.rel (!%p18_p5) target bundleno = 1 (0x1), region = 248 }

</bundles_post_ra>
